<compile_context>
chip_gen: v7x
topology: tpu7x:2x2x1
jax: 0.10.0
libtpu: 0.0.40
codegen_flags: <defaults>
</compile_context>

<pallas_src>
import jax
import jax.numpy as jnp
import numpy as np
from jax import lax
from jax.experimental import pallas as pl
from jax.experimental.pallas import tpu as pltpu

EPS = 1e-5  # PyTorch BatchNorm2d default eps


def _round_up(a, b):
    return (a + b - 1) // b * b


def _pick_tm(m):
    """M tile (multiple of 8): bound zero-row padding waste and keep >= 2
    grid steps when m allows (v7x megacore sharding of the parallel axis)."""
    best = 8
    for tm in (8, 16, 32, 64, 128, 256, 512):
        if _round_up(m, tm) - m <= max(8, m // 16):
            best = tm
    while best > 8 and _round_up(m, best) < 2 * best:
        best //= 2
    return best


# ----------------------------------------------------------------------------
# Layer 1 kernel: phase-major matmul (K = 9, unpadded) + pool max + bias + ReLU
# ----------------------------------------------------------------------------
def _phase_matmul_kernel(p_ref, w_ref, b_ref, o_ref):
    # p_ref: (4, tm, K)  bf16 pool-phase-major im2col patches (K = 9, unpadded)
    # w_ref: (K, Coutp)  bf16 conv weight with BN scale folded in
    # b_ref: (1, Coutp)  f32 folded BatchNorm bias = beta - mean * scale
    # o_ref: (tm, Coutp) bf16 pooled rows (lane-dense: Coutp % 128 == 0)
    z = jnp.dot(p_ref[0], w_ref[...], preferred_element_type=jnp.float32)
    for ph in range(1, 4):  # max over the 4 positions of each 2x2 pool window
        z = jnp.maximum(
            z, jnp.dot(p_ref[ph], w_ref[...], preferred_element_type=jnp.float32))
    o_ref[...] = jnp.maximum(z + b_ref[...], 0.0).astype(o_ref.dtype)


# ----------------------------------------------------------------------------
# Layers 2-4 kernel: fused conv(3x3, pad=1, stride=1) + BN + ReLU + 2x2 maxpool
# The 3x3 gather is done in-kernel from the 4 (row, col) parity planes of the
# halo-padded activation, so every tap of every pool phase is a stride-1 slice.
# ----------------------------------------------------------------------------
def _make_fused_layer_kernel(hq, wq, coutp):
    q = hq * wq

    def kernel(x_ref, w_ref, b_ref, o_ref):
        # x_ref: (2, 2, hq+1, wq+1, Cin) bf16 parity planes of padded input
        # w_ref: (9, Cin, Coutp) bf16 BN-scaled weight; b_ref: (1, Coutp) f32
        # o_ref: (hq, wq, Coutp) bf16 pooled output for one image
        planes = [[x_ref[0, 0], x_ref[0, 1]],
                  [x_ref[1, 0], x_ref[1, 1]]]
        # 16 distinct shifted taps T[a][b][io*wq+jo, :] = xp[2*io + a, 2*jo + b, :]
        taps = []
        for a in range(4):
            row = []
            for b in range(4):
                t = planes[a % 2][b % 2][a // 2:a // 2 + hq,
                                         b // 2:b // 2 + wq, :]
                row.append(t.reshape(q, t.shape[-1]))
            taps.append(row)
        # Pool phase (pi, pj): conv output at (2*io+pi, 2*jo+pj) needs the
        # padded-input sample at (2*io + pi+dy, 2*jo + pj+dx) for tap (dy, dx).
        z = None
        for pi in range(2):
            for pj in range(2):
                acc = jnp.zeros((q, coutp), jnp.float32)
                for dy in range(3):
                    for dx in range(3):
                        acc = acc + jnp.dot(taps[pi + dy][pj + dx],
                                            w_ref[dy * 3 + dx],
                                            preferred_element_type=jnp.float32)
                z = acc if z is None else jnp.maximum(z, acc)
        y = jnp.maximum(z + b_ref[...], 0.0)       # f32 epilogue (v5e-safe)
        o_ref[...] = y.reshape(hq, wq, coutp).astype(o_ref.dtype)

    return kernel


# ----------------------------------------------------------------------------
# Glue
# ----------------------------------------------------------------------------
def _im2col_pool_phases(x, stride):
    """x: (N, H, W, 1). 3x3 conv, pad=1, given stride.  Returns phase-major
    patches (4, N*Q, 9) where Q = (Ho//2)*(Wo//2); only used for layer 1."""
    n, h, w, cin = x.shape
    ho = (h + 2 - 3) // stride + 1
    wo = (w + 2 - 3) // stride + 1
    assert ho % 2 == 0 and wo % 2 == 0, "odd conv output not supported"
    hp, wp = ho // 2, wo // 2
    xp = jnp.pad(x, ((0, 0), (1, 1), (1, 1), (0, 0)))
    cols = []
    for dy in range(3):
        for dx in range(3):
            cols.append(xp[:, dy:dy + stride * (ho - 1) + 1:stride,
                           dx:dx + stride * (wo - 1) + 1:stride, :])
    patches = jnp.concatenate(cols, axis=-1)            # (N, Ho, Wo, 9*Cin)
    phases = []
    for i in range(2):
        for j in range(2):
            phases.append(
                patches[:, i::2, j::2, :].reshape(1, n * hp * wp, 9 * cin))
    return jnp.concatenate(phases, axis=0), (hp, wp)     # (4, N*Q, 9*Cin)


def _layer1(x, weight, gamma, beta, mean, var):
    """Conv2d(1->32, 3x3, pad=1, stride=2) -> BN -> ReLU -> MaxPool2d(2)."""
    n = x.shape[0]
    cout = weight.shape[0]
    coutp = _round_up(cout, 128)                         # lane-dense output

    patches, (hp, wp) = _im2col_pool_phases(x, stride=2)
    m_rows, k = patches.shape[1], patches.shape[2]       # k == 9 (no K padding)

    tm = _pick_tm(m_rows)
    m_pad = _round_up(m_rows, tm)
    patches = jnp.pad(patches, ((0, 0), (0, m_pad - m_rows), (0, 0)))

    inv = gamma / jnp.sqrt(var + EPS)
    w_mat = jnp.transpose(weight, (2, 3, 1, 0)).reshape(k, cout) * inv[None, :]
    w_mat = jnp.pad(w_mat, ((0, 0), (0, coutp - cout))).astype(jnp.bfloat16)
    bias = jnp.pad((beta - mean * inv).reshape(1, cout),
                   ((0, 0), (0, coutp - cout))).astype(jnp.float32)

    out = pl.pallas_call(
        _phase_matmul_kernel,
        out_shape=jax.ShapeDtypeStruct((m_pad, coutp), jnp.bfloat16),
        grid_spec=pltpu.PrefetchScalarGridSpec(
            num_scalar_prefetch=0,
            grid=(m_pad // tm,),
            in_specs=[
                pl.BlockSpec((4, tm, k), lambda m: (0, m, 0)),
                pl.BlockSpec((k, coutp), lambda m: (0, 0)),
                pl.BlockSpec((1, coutp), lambda m: (0, 0)),
            ],
            out_specs=pl.BlockSpec((tm, coutp), lambda m: (m, 0)),
        ),
        compiler_params=pltpu.CompilerParams(
            dimension_semantics=("parallel",)),
    )(patches, w_mat, bias)

    # Channels beyond `cout` are zeros; the next layer slices them off.
    return out[:m_rows].reshape(n, hp, wp, coutp)


def _conv_layer_fused(x, weight, gamma, beta, mean, var):
    """Conv2d(3x3, pad=1, stride=1) -> BN(eval) -> ReLU -> MaxPool2d(2), fused.
    x: (N, H, W, C_stored) bf16 where C_stored >= true Cin (extra lanes zero)."""
    n, h, w_sp = x.shape[0], x.shape[1], x.shape[2]
    cout, cin = weight.shape[0], weight.shape[1]
    assert h % 2 == 0 and w_sp % 2 == 0, "odd conv output not supported"
    hq, wq = h // 2, w_sp // 2
    coutp = _round_up(cout, 128)                          # lane-dense output

    # Halo pad (+1 ring of zeros) and split into the 4 (row, col) parity
    # planes: same total bytes as the activation, no im2col amplification.
    xp = jnp.pad(x[..., :cin], ((0, 0), (1, 1), (1, 1), (0, 0)))
    planes = jnp.stack(
        [jnp.stack([xp[:, i::2, j::2, :] for j in range(2)], axis=1)
         for i in range(2)], axis=1).astype(jnp.bfloat16)
    # planes: (N, 2, 2, hq+1, wq+1, Cin)
    hh, wh = hq + 1, wq + 1

    inv = gamma / jnp.sqrt(var + EPS)
    w_mat = jnp.transpose(weight, (2, 3, 1, 0)).reshape(9, cin, cout) * inv
    w_mat = jnp.pad(w_mat, ((0, 0), (0, 0), (0, coutp - cout))).astype(jnp.bfloat16)
    bias = jnp.pad((beta - mean * inv).reshape(1, cout),
                   ((0, 0), (0, coutp - cout))).astype(jnp.float32)

    kernel = _make_fused_layer_kernel(hq, wq, coutp)
    out = pl.pallas_call(
        kernel,
        out_shape=jax.ShapeDtypeStruct((n, hq, wq, coutp), jnp.bfloat16),
        grid_spec=pltpu.PrefetchScalarGridSpec(
            num_scalar_prefetch=0,
            grid=(n,),   # >= 2 steps at batch >= 2 -> both v7x cores get work
            in_specs=[
                pl.BlockSpec((None, 2, 2, hh, wh, cin),
                             lambda b: (b, 0, 0, 0, 0, 0)),
                pl.BlockSpec((9, cin, coutp), lambda b: (0, 0, 0)),
                pl.BlockSpec((1, coutp), lambda b: (0, 0)),
            ],
            out_specs=pl.BlockSpec((None, hq, wq, coutp),
                                   lambda b: (b, 0, 0, 0)),
        ),
        compiler_params=pltpu.CompilerParams(
            dimension_semantics=("parallel",)),
    )(planes, w_mat, bias)
    return out   # (N, hq, wq, Coutp); true channels are the first `cout`


@jax.jit
def embedding_net_forward(x_nchw, params):
    """PyTorch-equivalent forward.
    x_nchw: (N, 1, H, W) float32 -> (N, 256, H/32, W/32) float32."""
    x = jnp.transpose(x_nchw, (0, 2, 3, 1)).astype(jnp.bfloat16)   # NCHW->NHWC
    x = _layer1(x, *params[0])                                     # stride-2 layer
    for p in params[1:]:
        x = _conv_layer_fused(x, *p)                               # stride-1 layers
    return jnp.transpose(x.astype(jnp.float32), (0, 3, 1, 2))      # NHWC->NCHW


# ----------------------------------------------------------------------------
# Pure-JAX f32 reference (lax.conv / reduce_window) for a sanity check
# ----------------------------------------------------------------------------
@jax.jit
def reference_forward(x_nchw, params):
    x = jnp.transpose(x_nchw, (0, 2, 3, 1))
    strides = (2, 1, 1, 1)
    for (w, gamma, beta, mean, var), s in zip(params, strides):
        wh = jnp.transpose(w, (2, 3, 1, 0))  # OIHW -> HWIO
        y = lax.conv_general_dilated(
            x, wh, (s, s), ((1, 1), (1, 1)),
            dimension_numbers=("NHWC", "HWIO", "NHWC"),
            precision=lax.Precision.HIGHEST)
        inv = gamma / jnp.sqrt(var + EPS)
        y = jnp.maximum(y * inv + (beta - mean * inv), 0.0)
        y = lax.reduce_window(y, -jnp.inf, lax.max,
                              (1, 2, 2, 1), (1, 2, 2, 1), "VALID")
        x = y
    return jnp.transpose(x, (0, 3, 1, 2))


def init_params(key):
    """Deterministic synthetic parameters matching the module's shapes."""
    cfg = [(1, 32), (32, 64), (64, 128), (128, 256)]
    params = []
    for cin, cout in cfg:
        key, k1, k2, k3, k4, k5 = jax.random.split(key, 6)
        w = jax.random.normal(k1, (cout, cin, 3, 3), jnp.float32) * (2.0 / (cin * 9)) ** 0.5
        gamma = 1.0 + 0.1 * jax.random.normal(k2, (cout,), jnp.float32)
        beta = 0.1 * jax.random.normal(k3, (cout,), jnp.float32)
        mean = 0.1 * jax.random.normal(k4, (cout,), jnp.float32)
        var = jax.random.uniform(k5, (cout,), jnp.float32, minval=0.5, maxval=1.5)
        params.append((w, gamma, beta, mean, var))
    return params


if __name__ == "__main__":
    # Input: batch=2, 1 channel, 64x64 (divisible by 32: the 4 layers halve
    # spatially 5 times in total).  Output: (2, 256, 2, 2).
    x = jax.random.normal(jax.random.PRNGKey(0), (2, 1, 64, 64), jnp.float32)
    params = init_params(jax.random.PRNGKey(1))

    y = jax.block_until_ready(embedding_net_forward(x, params))
    assert y.shape == (2, 256, 2, 2), y.shape

    # Tolerance is loose on purpose: the kernel deliberately uses bf16 matmul
    # inputs / bf16 inter-layer activations with f32 accumulation.
    y_ref = jax.block_until_ready(reference_forward(x, params))
    np.testing.assert_allclose(np.asarray(y), np.asarray(y_ref),
                               rtol=5e-2, atol=5e-2)

    print("KERNEL_OK")
</pallas_src>

<mosaic_0001>
module attributes {stable_mosaic.version = 11 : i64} {
  func.func @_phase_matmul_kernel(%arg0: i32, %arg1: memref<4x256x9xbf16, #tpu.memory_space<vmem>>, %arg2: memref<9x128xbf16, #tpu.memory_space<vmem>>, %arg3: memref<1x128xf32, #tpu.memory_space<vmem>>, %arg4: memref<256x128xbf16, #tpu.memory_space<vmem>>) attributes {dimension_semantics = [#tpu.dimension_semantics<parallel>], iteration_bounds = array<i64: 2>, scalar_prefetch = 0 : i64, scratch_operands = 0 : i64, tpu.core_type = #tpu.core_type<tc>, window_params = [{transform_indices = @transform_0, window_bounds = array<i64: 4, 256, 9>}, {pipeline_mode = #tpu.pipeline_mode<synchronous>, transform_indices = @transform_1, window_bounds = array<i64: 9, 128>}, {pipeline_mode = #tpu.pipeline_mode<synchronous>, transform_indices = @transform_2, window_bounds = array<i64: 1, 128>}, {transform_indices = @transform_3, window_bounds = array<i64: 256, 128>}]} {
    %c0 = arith.constant 0 : index
    %c0_0 = arith.constant 0 : index
    %c0_1 = arith.constant 0 : index
    %0 = vector.load %arg1[%c0, %c0_0, %c0_1] : memref<4x256x9xbf16, #tpu.memory_space<vmem>>, vector<1x256x9xbf16>
    %1 = vector.shape_cast %0 : vector<1x256x9xbf16> to vector<256x9xbf16>
    %c0_2 = arith.constant 0 : index
    %c0_3 = arith.constant 0 : index
    %2 = vector.load %arg2[%c0_2, %c0_3] : memref<9x128xbf16, #tpu.memory_space<vmem>>, vector<9x128xbf16>
    %cst = arith.constant dense<0.000000e+00> : vector<256x128xf32>
    %3 = tpu.matmul %1, %2, %cst {dimension_numbers = #tpu.dot_dimension_numbers<[1], [0], [0], [1], [0, 0, 1, 1], [], []>} : vector<256x9xbf16>, vector<9x128xbf16>, vector<256x128xf32> -> vector<256x128xf32>
    %c1 = arith.constant 1 : index
    %c0_4 = arith.constant 0 : index
    %c0_5 = arith.constant 0 : index
    %4 = vector.load %arg1[%c1, %c0_4, %c0_5] : memref<4x256x9xbf16, #tpu.memory_space<vmem>>, vector<1x256x9xbf16>
    %5 = vector.shape_cast %4 : vector<1x256x9xbf16> to vector<256x9xbf16>
    %c0_6 = arith.constant 0 : index
    %c0_7 = arith.constant 0 : index
    %6 = vector.load %arg2[%c0_6, %c0_7] : memref<9x128xbf16, #tpu.memory_space<vmem>>, vector<9x128xbf16>
    %cst_8 = arith.constant dense<0.000000e+00> : vector<256x128xf32>
    %7 = tpu.matmul %5, %6, %cst_8 {dimension_numbers = #tpu.dot_dimension_numbers<[1], [0], [0], [1], [0, 0, 1, 1], [], []>} : vector<256x9xbf16>, vector<9x128xbf16>, vector<256x128xf32> -> vector<256x128xf32>
    %8 = arith.maximumf %3, %7 : vector<256x128xf32>
    %c2 = arith.constant 2 : index
    %c0_9 = arith.constant 0 : index
    %c0_10 = arith.constant 0 : index
    %9 = vector.load %arg1[%c2, %c0_9, %c0_10] : memref<4x256x9xbf16, #tpu.memory_space<vmem>>, vector<1x256x9xbf16>
    %10 = vector.shape_cast %9 : vector<1x256x9xbf16> to vector<256x9xbf16>
    %c0_11 = arith.constant 0 : index
    %c0_12 = arith.constant 0 : index
    %11 = vector.load %arg2[%c0_11, %c0_12] : memref<9x128xbf16, #tpu.memory_space<vmem>>, vector<9x128xbf16>
    %cst_13 = arith.constant dense<0.000000e+00> : vector<256x128xf32>
    %12 = tpu.matmul %10, %11, %cst_13 {dimension_numbers = #tpu.dot_dimension_numbers<[1], [0], [0], [1], [0, 0, 1, 1], [], []>} : vector<256x9xbf16>, vector<9x128xbf16>, vector<256x128xf32> -> vector<256x128xf32>
    %13 = arith.maximumf %8, %12 : vector<256x128xf32>
    %c3 = arith.constant 3 : index
    %c0_14 = arith.constant 0 : index
    %c0_15 = arith.constant 0 : index
    %14 = vector.load %arg1[%c3, %c0_14, %c0_15] : memref<4x256x9xbf16, #tpu.memory_space<vmem>>, vector<1x256x9xbf16>
    %15 = vector.shape_cast %14 : vector<1x256x9xbf16> to vector<256x9xbf16>
    %c0_16 = arith.constant 0 : index
    %c0_17 = arith.constant 0 : index
    %16 = vector.load %arg2[%c0_16, %c0_17] : memref<9x128xbf16, #tpu.memory_space<vmem>>, vector<9x128xbf16>
    %cst_18 = arith.constant dense<0.000000e+00> : vector<256x128xf32>
    %17 = tpu.matmul %15, %16, %cst_18 {dimension_numbers = #tpu.dot_dimension_numbers<[1], [0], [0], [1], [0, 0, 1, 1], [], []>} : vector<256x9xbf16>, vector<9x128xbf16>, vector<256x128xf32> -> vector<256x128xf32>
    %18 = arith.maximumf %13, %17 : vector<256x128xf32>
    %c0_19 = arith.constant 0 : index
    %c0_20 = arith.constant 0 : index
    %19 = vector.load %arg3[%c0_19, %c0_20] : memref<1x128xf32, #tpu.memory_space<vmem>>, vector<1x128xf32>
    %20 = vector.broadcast %19 : vector<1x128xf32> to vector<256x128xf32>
    %21 = arith.addf %18, %20 : vector<256x128xf32>
    %cst_21 = arith.constant 0.000000e+00 : f32
    %22 = vector.broadcast %cst_21 : f32 to vector<256x128xf32>
    %23 = arith.maximumf %21, %22 : vector<256x128xf32>
    %24 = arith.truncf %23 : vector<256x128xf32> to vector<256x128xbf16>
    %c0_22 = arith.constant 0 : index
    %c0_23 = arith.constant 0 : index
    %25 = vector.load %arg4[%c0_22, %c0_23] : memref<256x128xbf16, #tpu.memory_space<vmem>>, vector<256x128xbf16>
    tpu.vector_store %arg4[%c0_22, %c0_23], %24 {strides = array<i32>} : memref<256x128xbf16, #tpu.memory_space<vmem>>, vector<256x128xbf16>,
    return
  }
  func.func @transform_0(%arg0: i32) -> (i32, i32, i32) {
    %c0_i32 = arith.constant 0 : i32
    %c0_i32_0 = arith.constant 0 : i32
    %c0_i32_1 = arith.constant 0 : i32
    return %c0_i32, %arg0, %c0_i32_0 : i32, i32, i32
  }
  func.func @transform_1(%arg0: i32) -> (i32, i32) {
    %c0_i32 = arith.constant 0 : i32
    %c0_i32_0 = arith.constant 0 : i32
    %c0_i32_1 = arith.constant 0 : i32
    return %c0_i32, %c0_i32_0 : i32, i32
  }
  func.func @transform_2(%arg0: i32) -> (i32, i32) {
    %c0_i32 = arith.constant 0 : i32
    %c0_i32_0 = arith.constant 0 : i32
    %c0_i32_1 = arith.constant 0 : i32
    return %c0_i32, %c0_i32_0 : i32, i32
  }
  func.func @transform_3(%arg0: i32) -> (i32, i32) {
    %c0_i32 = arith.constant 0 : i32
    %c0_i32_0 = arith.constant 0 : i32
    return %arg0, %c0_i32 : i32, i32
  }
}

module attributes {stable_mosaic.version = 11 : i64} {
  func.func @kernel(%arg0: i32, %arg1: memref<1x2x2x9x9x32xbf16, #tpu.memory_space<vmem>>, %arg2: memref<9x32x128xbf16, #tpu.memory_space<vmem>>, %arg3: memref<1x128xf32, #tpu.memory_space<vmem>>, %arg4: memref<1x8x8x128xbf16, #tpu.memory_space<vmem>>) attributes {dimension_semantics = [#tpu.dimension_semantics<parallel>], iteration_bounds = array<i64: 2>, scalar_prefetch = 0 : i64, scratch_operands = 0 : i64, tpu.core_type = #tpu.core_type<tc>, window_params = [{transform_indices = @transform_0, window_bounds = array<i64: 1, 2, 2, 9, 9, 32>}, {pipeline_mode = #tpu.pipeline_mode<synchronous>, transform_indices = @transform_1, window_bounds = array<i64: 9, 32, 128>}, {pipeline_mode = #tpu.pipeline_mode<synchronous>, transform_indices = @transform_2, window_bounds = array<i64: 1, 128>}, {transform_indices = @transform_3, window_bounds = array<i64: 1, 8, 8, 128>}]} {
    %c0 = arith.constant 0 : index
    %c0_0 = arith.constant 0 : index
    %c0_1 = arith.constant 0 : index
    %c0_2 = arith.constant 0 : index
    %c0_3 = arith.constant 0 : index
    %c0_4 = arith.constant 0 : index
    %0 = vector.load %arg1[%c0, %c0_0, %c0_1, %c0_2, %c0_3, %c0_4] : memref<1x2x2x9x9x32xbf16, #tpu.memory_space<vmem>>, vector<1x1x1x9x9x32xbf16>
    %1 = vector.shape_cast %0 : vector<1x1x1x9x9x32xbf16> to vector<9x9x32xbf16>
    %c0_5 = arith.constant 0 : index
    %c0_6 = arith.constant 0 : index
    %c1 = arith.constant 1 : index
    %c0_7 = arith.constant 0 : index
    %c0_8 = arith.constant 0 : index
    %c0_9 = arith.constant 0 : index
    %2 = vector.load %arg1[%c0_5, %c0_6, %c1, %c0_7, %c0_8, %c0_9] : memref<1x2x2x9x9x32xbf16, #tpu.memory_space<vmem>>, vector<1x1x1x9x9x32xbf16>
    %3 = vector.shape_cast %2 : vector<1x1x1x9x9x32xbf16> to vector<9x9x32xbf16>
    %c0_10 = arith.constant 0 : index
    %c1_11 = arith.constant 1 : index
    %c0_12 = arith.constant 0 : index
    %c0_13 = arith.constant 0 : index
    %c0_14 = arith.constant 0 : index
    %c0_15 = arith.constant 0 : index
    %4 = vector.load %arg1[%c0_10, %c1_11, %c0_12, %c0_13, %c0_14, %c0_15] : memref<1x2x2x9x9x32xbf16, #tpu.memory_space<vmem>>, vector<1x1x1x9x9x32xbf16>
    %5 = vector.shape_cast %4 : vector<1x1x1x9x9x32xbf16> to vector<9x9x32xbf16>
    %c0_16 = arith.constant 0 : index
    %c1_17 = arith.constant 1 : index
    %c1_18 = arith.constant 1 : index
    %c0_19 = arith.constant 0 : index
    %c0_20 = arith.constant 0 : index
    %c0_21 = arith.constant 0 : index
    %6 = vector.load %arg1[%c0_16, %c1_17, %c1_18, %c0_19, %c0_20, %c0_21] : memref<1x2x2x9x9x32xbf16, #tpu.memory_space<vmem>>, vector<1x1x1x9x9x32xbf16>
    %7 = vector.shape_cast %6 : vector<1x1x1x9x9x32xbf16> to vector<9x9x32xbf16>
    %8 = vector.extract_strided_slice %1 {offsets = [0, 0, 0], sizes = [8, 8, 32], strides = [1, 1, 1]} : vector<9x9x32xbf16> to vector<8x8x32xbf16>
    %9 = vector.shape_cast %8 : vector<8x8x32xbf16> to vector<64x32xbf16>
    %10 = vector.extract_strided_slice %3 {offsets = [0, 0, 0], sizes = [8, 8, 32], strides = [1, 1, 1]} : vector<9x9x32xbf16> to vector<8x8x32xbf16>
    %11 = vector.shape_cast %10 : vector<8x8x32xbf16> to vector<64x32xbf16>
    %12 = vector.extract_strided_slice %1 {offsets = [0, 1, 0], sizes = [8, 8, 32], strides = [1, 1, 1]} : vector<9x9x32xbf16> to vector<8x8x32xbf16>
    %13 = vector.shape_cast %12 : vector<8x8x32xbf16> to vector<64x32xbf16>
    %14 = vector.extract_strided_slice %3 {offsets = [0, 1, 0], sizes = [8, 8, 32], strides = [1, 1, 1]} : vector<9x9x32xbf16> to vector<8x8x32xbf16>
    %15 = vector.shape_cast %14 : vector<8x8x32xbf16> to vector<64x32xbf16>
    %16 = vector.extract_strided_slice %5 {offsets = [0, 0, 0], sizes = [8, 8, 32], strides = [1, 1, 1]} : vector<9x9x32xbf16> to vector<8x8x32xbf16>
    %17 = vector.shape_cast %16 : vector<8x8x32xbf16> to vector<64x32xbf16>
    %18 = vector.extract_strided_slice %7 {offsets = [0, 0, 0], sizes = [8, 8, 32], strides = [1, 1, 1]} : vector<9x9x32xbf16> to vector<8x8x32xbf16>
    %19 = vector.shape_cast %18 : vector<8x8x32xbf16> to vector<64x32xbf16>
    %20 = vector.extract_strided_slice %5 {offsets = [0, 1, 0], sizes = [8, 8, 32], strides = [1, 1, 1]} : vector<9x9x32xbf16> to vector<8x8x32xbf16>
    %21 = vector.shape_cast %20 : vector<8x8x32xbf16> to vector<64x32xbf16>
    %22 = vector.extract_strided_slice %7 {offsets = [0, 1, 0], sizes = [8, 8, 32], strides = [1, 1, 1]} : vector<9x9x32xbf16> to vector<8x8x32xbf16>
    %23 = vector.shape_cast %22 : vector<8x8x32xbf16> to vector<64x32xbf16>
    %24 = vector.extract_strided_slice %1 {offsets = [1, 0, 0], sizes = [8, 8, 32], strides = [1, 1, 1]} : vector<9x9x32xbf16> to vector<8x8x32xbf16>
    %25 = vector.shape_cast %24 : vector<8x8x32xbf16> to vector<64x32xbf16>
    %26 = vector.extract_strided_slice %3 {offsets = [1, 0, 0], sizes = [8, 8, 32], strides = [1, 1, 1]} : vector<9x9x32xbf16> to vector<8x8x32xbf16>
    %27 = vector.shape_cast %26 : vector<8x8x32xbf16> to vector<64x32xbf16>
    %28 = vector.extract_strided_slice %1 {offsets = [1, 1, 0], sizes = [8, 8, 32], strides = [1, 1, 1]} : vector<9x9x32xbf16> to vector<8x8x32xbf16>
    %29 = vector.shape_cast %28 : vector<8x8x32xbf16> to vector<64x32xbf16>
    %30 = vector.extract_strided_slice %3 {offsets = [1, 1, 0], sizes = [8, 8, 32], strides = [1, 1, 1]} : vector<9x9x32xbf16> to vector<8x8x32xbf16>
    %31 = vector.shape_cast %30 : vector<8x8x32xbf16> to vector<64x32xbf16>
    %32 = vector.extract_strided_slice %5 {offsets = [1, 0, 0], sizes = [8, 8, 32], strides = [1, 1, 1]} : vector<9x9x32xbf16> to vector<8x8x32xbf16>
    %33 = vector.shape_cast %32 : vector<8x8x32xbf16> to vector<64x32xbf16>
    %34 = vector.extract_strided_slice %7 {offsets = [1, 0, 0], sizes = [8, 8, 32], strides = [1, 1, 1]} : vector<9x9x32xbf16> to vector<8x8x32xbf16>
    %35 = vector.shape_cast %34 : vector<8x8x32xbf16> to vector<64x32xbf16>
    %36 = vector.extract_strided_slice %5 {offsets = [1, 1, 0], sizes = [8, 8, 32], strides = [1, 1, 1]} : vector<9x9x32xbf16> to vector<8x8x32xbf16>
    %37 = vector.shape_cast %36 : vector<8x8x32xbf16> to vector<64x32xbf16>
    %38 = vector.extract_strided_slice %7 {offsets = [1, 1, 0], sizes = [8, 8, 32], strides = [1, 1, 1]} : vector<9x9x32xbf16> to vector<8x8x32xbf16>
    %39 = vector.shape_cast %38 : vector<8x8x32xbf16> to vector<64x32xbf16>
    %cst = arith.constant 0.000000e+00 : f32
    %40 = vector.broadcast %cst : f32 to vector<64x128xf32>
    %c0_22 = arith.constant 0 : index
    %c0_23 = arith.constant 0 : index
    %c0_24 = arith.constant 0 : index
    %41 = vector.load %arg2[%c0_22, %c0_23, %c0_24] : memref<9x32x128xbf16, #tpu.memory_space<vmem>>, vector<1x32x128xbf16>
    %42 = vector.shape_cast %41 : vector<1x32x128xbf16> to vector<32x128xbf16>
    %cst_25 = arith.constant dense<0.000000e+00> : vector<64x128xf32>
    %43 = tpu.matmul %9, %42, %cst_25 {dimension_numbers = #tpu.dot_dimension_numbers<[1], [0], [0], [1], [0, 0, 1, 1], [], []>} : vector<64x32xbf16>, vector<32x128xbf16>, vector<64x128xf32> -> vector<64x128xf32>
    %44 = arith.addf %40, %43 : vector<64x128xf32>
    %c1_26 = arith.constant 1 : index
    %c0_27 = arith.constant 0 : index
    %c0_28 = arith.constant 0 : index
    %45 = vector.load %arg2[%c1_26, %c0_27, %c0_28] : memref<9x32x128xbf16, #tpu.memory_space<vmem>>, vector<1x32x128xbf16>
    %46 = vector.shape_cast %45 : vector<1x32x128xbf16> to vector<32x128xbf16>
    %cst_29 = arith.constant dense<0.000000e+00> : vector<64x128xf32>
    %47 = tpu.matmul %11, %46, %cst_29 {dimension_numbers = #tpu.dot_dimension_numbers<[1], [0], [0], [1], [0, 0, 1, 1], [], []>} : vector<64x32xbf16>, vector<32x128xbf16>, vector<64x128xf32> -> vector<64x128xf32>
    %48 = arith.addf %44, %47 : vector<64x128xf32>
    %c2 = arith.constant 2 : index
    %c0_30 = arith.constant 0 : index
    %c0_31 = arith.constant 0 : index
    %49 = vector.load %arg2[%c2, %c0_30, %c0_31] : memref<9x32x128xbf16, #tpu.memory_space<vmem>>, vector<1x32x128xbf16>
    %50 = vector.shape_cast %49 : vector<1x32x128xbf16> to vector<32x128xbf16>
    %cst_32 = arith.constant dense<0.000000e+00> : vector<64x128xf32>
    %51 = tpu.matmul %13, %50, %cst_32 {dimension_numbers = #tpu.dot_dimension_numbers<[1], [0], [0], [1], [0, 0, 1, 1], [], []>} : vector<64x32xbf16>, vector<32x128xbf16>, vector<64x128xf32> -> vector<64x128xf32>
    %52 = arith.addf %48, %51 : vector<64x128xf32>
    %c3 = arith.constant 3 : index
    %c0_33 = arith.constant 0 : index
    %c0_34 = arith.constant 0 : index
    %53 = vector.load %arg2[%c3, %c0_33, %c0_34] : memref<9x32x128xbf16, #tpu.memory_space<vmem>>, vector<1x32x128xbf16>
    %54 = vector.shape_cast %53 : vector<1x32x128xbf16> to vector<32x128xbf16>
    %cst_35 = arith.constant dense<0.000000e+00> : vector<64x128xf32>
    %55 = tpu.matmul %17, %54, %cst_35 {dimension_numbers = #tpu.dot_dimension_numbers<[1], [0], [0], [1], [0, 0, 1, 1], [], []>} : vector<64x32xbf16>, vector<32x128xbf16>, vector<64x128xf32> -> vector<64x128xf32>
    %56 = arith.addf %52, %55 : vector<64x128xf32>
    %c4 = arith.constant 4 : index
    %c0_36 = arith.constant 0 : index
    %c0_37 = arith.constant 0 : index
    %57 = vector.load %arg2[%c4, %c0_36, %c0_37] : memref<9x32x128xbf16, #tpu.memory_space<vmem>>, vector<1x32x128xbf16>
    %58 = vector.shape_cast %57 : vector<1x32x128xbf16> to vector<32x128xbf16>
    %cst_38 = arith.constant dense<0.000000e+00> : vector<64x128xf32>
    %59 = tpu.matmul %19, %58, %cst_38 {dimension_numbers = #tpu.dot_dimension_numbers<[1], [0], [0], [1], [0, 0, 1, 1], [], []>} : vector<64x32xbf16>, vector<32x128xbf16>, vector<64x128xf32> -> vector<64x128xf32>
    %60 = arith.addf %56, %59 : vector<64x128xf32>
    %c5 = arith.constant 5 : index
    %c0_39 = arith.constant 0 : index
    %c0_40 = arith.constant 0 : index
    %61 = vector.load %arg2[%c5, %c0_39, %c0_40] : memref<9x32x128xbf16, #tpu.memory_space<vmem>>, vector<1x32x128xbf16>
    %62 = vector.shape_cast %61 : vector<1x32x128xbf16> to vector<32x128xbf16>
    %cst_41 = arith.constant dense<0.000000e+00> : vector<64x128xf32>
    %63 = tpu.matmul %21, %62, %cst_41 {dimension_numbers = #tpu.dot_dimension_numbers<[1], [0], [0], [1], [0, 0, 1, 1], [], []>} : vector<64x32xbf16>, vector<32x128xbf16>, vector<64x128xf32> -> vector<64x128xf32>
    %64 = arith.addf %60, %63 : vector<64x128xf32>
    %c6 = arith.constant 6 : index
    %c0_42 = arith.constant 0 : index
    %c0_43 = arith.constant 0 : index
    %65 = vector.load %arg2[%c6, %c0_42, %c0_43] : memref<9x32x128xbf16, #tpu.memory_space<vmem>>, vector<1x32x128xbf16>
    %66 = vector.shape_cast %65 : vector<1x32x128xbf16> to vector<32x128xbf16>
    %cst_44 = arith.constant dense<0.000000e+00> : vector<64x128xf32>
    %67 = tpu.matmul %25, %66, %cst_44 {dimension_numbers = #tpu.dot_dimension_numbers<[1], [0], [0], [1], [0, 0, 1, 1], [], []>} : vector<64x32xbf16>, vector<32x128xbf16>, vector<64x128xf32> -> vector<64x128xf32>
    %68 = arith.addf %64, %67 : vector<64x128xf32>
    %c7 = arith.constant 7 : index
    %c0_45 = arith.constant 0 : index
    %c0_46 = arith.constant 0 : index
    %69 = vector.load %arg2[%c7, %c0_45, %c0_46] : memref<9x32x128xbf16, #tpu.memory_space<vmem>>, vector<1x32x128xbf16>
    %70 = vector.shape_cast %69 : vector<1x32x128xbf16> to vector<32x128xbf16>
    %cst_47 = arith.constant dense<0.000000e+00> : vector<64x128xf32>
    %71 = tpu.matmul %27, %70, %cst_47 {dimension_numbers = #tpu.dot_dimension_numbers<[1], [0], [0], [1], [0, 0, 1, 1], [], []>} : vector<64x32xbf16>, vector<32x128xbf16>, vector<64x128xf32> -> vector<64x128xf32>
    %72 = arith.addf %68, %71 : vector<64x128xf32>
    %c8 = arith.constant 8 : index
    %c0_48 = arith.constant 0 : index
    %c0_49 = arith.constant 0 : index
    %73 = vector.load %arg2[%c8, %c0_48, %c0_49] : memref<9x32x128xbf16, #tpu.memory_space<vmem>>, vector<1x32x128xbf16>
    %74 = vector.shape_cast %73 : vector<1x32x128xbf16> to vector<32x128xbf16>
    %cst_50 = arith.constant dense<0.000000e+00> : vector<64x128xf32>
    %75 = tpu.matmul %29, %74, %cst_50 {dimension_numbers = #tpu.dot_dimension_numbers<[1], [0], [0], [1], [0, 0, 1, 1], [], []>} : vector<64x32xbf16>, vector<32x128xbf16>, vector<64x128xf32> -> vector<64x128xf32>
    %76 = arith.addf %72, %75 : vector<64x128xf32>
    %cst_51 = arith.constant 0.000000e+00 : f32
    %77 = vector.broadcast %cst_51 : f32 to vector<64x128xf32>
    %c0_52 = arith.constant 0 : index
    %c0_53 = arith.constant 0 : index
    %c0_54 = arith.constant 0 : index
    %78 = vector.load %arg2[%c0_52, %c0_53, %c0_54] : memref<9x32x128xbf16, #tpu.memory_space<vmem>>, vector<1x32x128xbf16>
    %79 = vector.shape_cast %78 : vector<1x32x128xbf16> to vector<32x128xbf16>
    %cst_55 = arith.constant dense<0.000000e+00> : vector<64x128xf32>
    %80 = tpu.matmul %11, %79, %cst_55 {dimension_numbers = #tpu.dot_dimension_numbers<[1], [0], [0], [1], [0, 0, 1, 1], [], []>} : vector<64x32xbf16>, vector<32x128xbf16>, vector<64x128xf32> -> vector<64x128xf32>
    %81 = arith.addf %77, %80 : vector<64x128xf32>
    %c1_56 = arith.constant 1 : index
    %c0_57 = arith.constant 0 : index
    %c0_58 = arith.constant 0 : index
    %82 = vector.load %arg2[%c1_56, %c0_57, %c0_58] : memref<9x32x128xbf16, #tpu.memory_space<vmem>>, vector<1x32x128xbf16>
    %83 = vector.shape_cast %82 : vector<1x32x128xbf16> to vector<32x128xbf16>
    %cst_59 = arith.constant dense<0.000000e+00> : vector<64x128xf32>
    %84 = tpu.matmul %13, %83, %cst_59 {dimension_numbers = #tpu.dot_dimension_numbers<[1], [0], [0], [1], [0, 0, 1, 1], [], []>} : vector<64x32xbf16>, vector<32x128xbf16>, vector<64x128xf32> -> vector<64x128xf32>
    %85 = arith.addf %81, %84 : vector<64x128xf32>
    %c2_60 = arith.constant 2 : index
    %c0_61 = arith.constant 0 : index
    %c0_62 = arith.constant 0 : index
    %86 = vector.load %arg2[%c2_60, %c0_61, %c0_62] : memref<9x32x128xbf16, #tpu.memory_space<vmem>>, vector<1x32x128xbf16>
    %87 = vector.shape_cast %86 : vector<1x32x128xbf16> to vector<32x128xbf16>
    %cst_63 = arith.constant dense<0.000000e+00> : vector<64x128xf32>
    %88 = tpu.matmul %15, %87, %cst_63 {dimension_numbers = #tpu.dot_dimension_numbers<[1], [0], [0], [1], [0, 0, 1, 1], [], []>} : vector<64x32xbf16>, vector<32x128xbf16>, vector<64x128xf32> -> vector<64x128xf32>
    %89 = arith.addf %85, %88 : vector<64x128xf32>
    %c3_64 = arith.constant 3 : index
    %c0_65 = arith.constant 0 : index
    %c0_66 = arith.constant 0 : index
    %90 = vector.load %arg2[%c3_64, %c0_65, %c0_66] : memref<9x32x128xbf16, #tpu.memory_space<vmem>>, vector<1x32x128xbf16>
    %91 = vector.shape_cast %90 : vector<1x32x128xbf16> to vector<32x128xbf16>
    %cst_67 = arith.constant dense<0.000000e+00> : vector<64x128xf32>
    %92 = tpu.matmul %19, %91, %cst_67 {dimension_numbers = #tpu.dot_dimension_numbers<[1], [0], [0], [1], [0, 0, 1, 1], [], []>} : vector<64x32xbf16>, vector<32x128xbf16>, vector<64x128xf32> -> vector<64x128xf32>
    %93 = arith.addf %89, %92 : vector<64x128xf32>
    %c4_68 = arith.constant 4 : index
    %c0_69 = arith.constant 0 : index
    %c0_70 = arith.constant 0 : index
    %94 = vector.load %arg2[%c4_68, %c0_69, %c0_70] : memref<9x32x128xbf16, #tpu.memory_space<vmem>>, vector<1x32x128xbf16>
    %95 = vector.shape_cast %94 : vector<1x32x128xbf16> to vector<32x128xbf16>
    %cst_71 = arith.constant dense<0.000000e+00> : vector<64x128xf32>
    %96 = tpu.matmul %21, %95, %cst_71 {dimension_numbers = #tpu.dot_dimension_numbers<[1], [0], [0], [1], [0, 0, 1, 1], [], []>} : vector<64x32xbf16>, vector<32x128xbf16>, vector<64x128xf32> -> vector<64x128xf32>
    %97 = arith.addf %93, %96 : vector<64x128xf32>
    %c5_72 = arith.constant 5 : index
    %c0_73 = arith.constant 0 : index
    %c0_74 = arith.constant 0 : index
    %98 = vector.load %arg2[%c5_72, %c0_73, %c0_74] : memref<9x32x128xbf16, #tpu.memory_space<vmem>>, vector<1x32x128xbf16>
    %99 = vector.shape_cast %98 : vector<1x32x128xbf16> to vector<32x128xbf16>
    %cst_75 = arith.constant dense<0.000000e+00> : vector<64x128xf32>
    %100 = tpu.matmul %23, %99, %cst_75 {dimension_numbers = #tpu.dot_dimension_numbers<[1], [0], [0], [1], [0, 0, 1, 1], [], []>} : vector<64x32xbf16>, vector<32x128xbf16>, vector<64x128xf32> -> vector<64x128xf32>
    %101 = arith.addf %97, %100 : vector<64x128xf32>
    %c6_76 = arith.constant 6 : index
    %c0_77 = arith.constant 0 : index
    %c0_78 = arith.constant 0 : index
    %102 = vector.load %arg2[%c6_76, %c0_77, %c0_78] : memref<9x32x128xbf16, #tpu.memory_space<vmem>>, vector<1x32x128xbf16>
    %103 = vector.shape_cast %102 : vector<1x32x128xbf16> to vector<32x128xbf16>
    %cst_79 = arith.constant dense<0.000000e+00> : vector<64x128xf32>
    %104 = tpu.matmul %27, %103, %cst_79 {dimension_numbers = #tpu.dot_dimension_numbers<[1], [0], [0], [1], [0, 0, 1, 1], [], []>} : vector<64x32xbf16>, vector<32x128xbf16>, vector<64x128xf32> -> vector<64x128xf32>
    %105 = arith.addf %101, %104 : vector<64x128xf32>
    %c7_80 = arith.constant 7 : index
    %c0_81 = arith.constant 0 : index
    %c0_82 = arith.constant 0 : index
    %106 = vector.load %arg2[%c7_80, %c0_81, %c0_82] : memref<9x32x128xbf16, #tpu.memory_space<vmem>>, vector<1x32x128xbf16>
    %107 = vector.shape_cast %106 : vector<1x32x128xbf16> to vector<32x128xbf16>
    %cst_83 = arith.constant dense<0.000000e+00> : vector<64x128xf32>
    %108 = tpu.matmul %29, %107, %cst_83 {dimension_numbers = #tpu.dot_dimension_numbers<[1], [0], [0], [1], [0, 0, 1, 1], [], []>} : vector<64x32xbf16>, vector<32x128xbf16>, vector<64x128xf32> -> vector<64x128xf32>
    %109 = arith.addf %105, %108 : vector<64x128xf32>
    %c8_84 = arith.constant 8 : index
    %c0_85 = arith.constant 0 : index
    %c0_86 = arith.constant 0 : index
    %110 = vector.load %arg2[%c8_84, %c0_85, %c0_86] : memref<9x32x128xbf16, #tpu.memory_space<vmem>>, vector<1x32x128xbf16>
    %111 = vector.shape_cast %110 : vector<1x32x128xbf16> to vector<32x128xbf16>
    %cst_87 = arith.constant dense<0.000000e+00> : vector<64x128xf32>
    %112 = tpu.matmul %31, %111, %cst_87 {dimension_numbers = #tpu.dot_dimension_numbers<[1], [0], [0], [1], [0, 0, 1, 1], [], []>} : vector<64x32xbf16>, vector<32x128xbf16>, vector<64x128xf32> -> vector<64x128xf32>
    %113 = arith.addf %109, %112 : vector<64x128xf32>
    %114 = arith.maximumf %76, %113 : vector<64x128xf32>
    %cst_88 = arith.constant 0.000000e+00 : f32
    %115 = vector.broadcast %cst_88 : f32 to vector<64x128xf32>
    %c0_89 = arith.constant 0 : index
    %c0_90 = arith.constant 0 : index
    %c0_91 = arith.constant 0 : index
    %116 = vector.load %arg2[%c0_89, %c0_90, %c0_91] : memref<9x32x128xbf16, #tpu.memory_space<vmem>>, vector<1x32x128xbf16>
    %117 = vector.shape_cast %116 : vector<1x32x128xbf16> to vector<32x128xbf16>
    %cst_92 = arith.constant dense<0.000000e+00> : vector<64x128xf32>
    %118 = tpu.matmul %17, %117, %cst_92 {dimension_numbers = #tpu.dot_dimension_numbers<[1], [0], [0], [1], [0, 0, 1, 1], [], []>} : vector<64x32xbf16>, vector<32x128xbf16>, vector<64x128xf32> -> vector<64x128xf32>
    %119 = arith.addf %115, %118 : vector<64x128xf32>
    %c1_93 = arith.constant 1 : index
    %c0_94 = arith.constant 0 : index
    %c0_95 = arith.constant 0 : index
    %120 = vector.load %arg2[%c1_93, %c0_94, %c0_95] : memref<9x32x128xbf16, #tpu.memory_space<vmem>>, vector<1x32x128xbf16>
    %121 = vector.shape_cast %120 : vector<1x32x128xbf16> to vector<32x128xbf16>
    %cst_96 = arith.constant dense<0.000000e+00> : vector<64x128xf32>
    %122 = tpu.matmul %19, %121, %cst_96 {dimension_numbers = #tpu.dot_dimension_numbers<[1], [0], [0], [1], [0, 0, 1, 1], [], []>} : vector<64x32xbf16>, vector<32x128xbf16>, vector<64x128xf32> -> vector<64x128xf32>
    %123 = arith.addf %119, %122 : vector<64x128xf32>
    %c2_97 = arith.constant 2 : index
    %c0_98 = arith.constant 0 : index
    %c0_99 = arith.constant 0 : index
    %124 = vector.load %arg2[%c2_97, %c0_98, %c0_99] : memref<9x32x128xbf16, #tpu.memory_space<vmem>>, vector<1x32x128xbf16>
    %125 = vector.shape_cast %124 : vector<1x32x128xbf16> to vector<32x128xbf16>
    %cst_100 = arith.constant dense<0.000000e+00> : vector<64x128xf32>
    %126 = tpu.matmul %21, %125, %cst_100 {dimension_numbers = #tpu.dot_dimension_numbers<[1], [0], [0], [1], [0, 0, 1, 1], [], []>} : vector<64x32xbf16>, vector<32x128xbf16>, vector<64x128xf32> -> vector<64x128xf32>
    %127 = arith.addf %123, %126 : vector<64x128xf32>
    %c3_101 = arith.constant 3 : index
    %c0_102 = arith.constant 0 : index
    %c0_103 = arith.constant 0 : index
    %128 = vector.load %arg2[%c3_101, %c0_102, %c0_103] : memref<9x32x128xbf16, #tpu.memory_space<vmem>>, vector<1x32x128xbf16>
    %129 = vector.shape_cast %128 : vector<1x32x128xbf16> to vector<32x128xbf16>
    %cst_104 = arith.constant dense<0.000000e+00> : vector<64x128xf32>
    %130 = tpu.matmul %25, %129, %cst_104 {dimension_numbers = #tpu.dot_dimension_numbers<[1], [0], [0], [1], [0, 0, 1, 1], [], []>} : vector<64x32xbf16>, vector<32x128xbf16>, vector<64x128xf32> -> vector<64x128xf32>
    %131 = arith.addf %127, %130 : vector<64x128xf32>
    %c4_105 = arith.constant 4 : index
    %c0_106 = arith.constant 0 : index
    %c0_107 = arith.constant 0 : index
    %132 = vector.load %arg2[%c4_105, %c0_106, %c0_107] : memref<9x32x128xbf16, #tpu.memory_space<vmem>>, vector<1x32x128xbf16>
    %133 = vector.shape_cast %132 : vector<1x32x128xbf16> to vector<32x128xbf16>
    %cst_108 = arith.constant dense<0.000000e+00> : vector<64x128xf32>
    %134 = tpu.matmul %27, %133, %cst_108 {dimension_numbers = #tpu.dot_dimension_numbers<[1], [0], [0], [1], [0, 0, 1, 1], [], []>} : vector<64x32xbf16>, vector<32x128xbf16>, vector<64x128xf32> -> vector<64x128xf32>
    %135 = arith.addf %131, %134 : vector<64x128xf32>
    %c5_109 = arith.constant 5 : index
    %c0_110 = arith.constant 0 : index
    %c0_111 = arith.constant 0 : index
    %136 = vector.load %arg2[%c5_109, %c0_110, %c0_111] : memref<9x32x128xbf16, #tpu.memory_space<vmem>>, vector<1x32x128xbf16>
    %137 = vector.shape_cast %136 : vector<1x32x128xbf16> to vector<32x128xbf16>
    %cst_112 = arith.constant dense<0.000000e+00> : vector<64x128xf32>
    %138 = tpu.matmul %29, %137, %cst_112 {dimension_numbers = #tpu.dot_dimension_numbers<[1], [0], [0], [1], [0, 0, 1, 1], [], []>} : vector<64x32xbf16>, vector<32x128xbf16>, vector<64x128xf32> -> vector<64x128xf32>
    %139 = arith.addf %135, %138 : vector<64x128xf32>
    %c6_113 = arith.constant 6 : index
    %c0_114 = arith.constant 0 : index
    %c0_115 = arith.constant 0 : index
    %140 = vector.load %arg2[%c6_113, %c0_114, %c0_115] : memref<9x32x128xbf16, #tpu.memory_space<vmem>>, vector<1x32x128xbf16>
    %141 = vector.shape_cast %140 : vector<1x32x128xbf16> to vector<32x128xbf16>
    %cst_116 = arith.constant dense<0.000000e+00> : vector<64x128xf32>
    %142 = tpu.matmul %33, %141, %cst_116 {dimension_numbers = #tpu.dot_dimension_numbers<[1], [0], [0], [1], [0, 0, 1, 1], [], []>} : vector<64x32xbf16>, vector<32x128xbf16>, vector<64x128xf32> -> vector<64x128xf32>
    %143 = arith.addf %139, %142 : vector<64x128xf32>
    %c7_117 = arith.constant 7 : index
    %c0_118 = arith.constant 0 : index
    %c0_119 = arith.constant 0 : index
    %144 = vector.load %arg2[%c7_117, %c0_118, %c0_119] : memref<9x32x128xbf16, #tpu.memory_space<vmem>>, vector<1x32x128xbf16>
    %145 = vector.shape_cast %144 : vector<1x32x128xbf16> to vector<32x128xbf16>
    %cst_120 = arith.constant dense<0.000000e+00> : vector<64x128xf32>
    %146 = tpu.matmul %35, %145, %cst_120 {dimension_numbers = #tpu.dot_dimension_numbers<[1], [0], [0], [1], [0, 0, 1, 1], [], []>} : vector<64x32xbf16>, vector<32x128xbf16>, vector<64x128xf32> -> vector<64x128xf32>
    %147 = arith.addf %143, %146 : vector<64x128xf32>
    %c8_121 = arith.constant 8 : index
    %c0_122 = arith.constant 0 : index
    %c0_123 = arith.constant 0 : index
    %148 = vector.load %arg2[%c8_121, %c0_122, %c0_123] : memref<9x32x128xbf16, #tpu.memory_space<vmem>>, vector<1x32x128xbf16>
    %149 = vector.shape_cast %148 : vector<1x32x128xbf16> to vector<32x128xbf16>
    %cst_124 = arith.constant dense<0.000000e+00> : vector<64x128xf32>
    %150 = tpu.matmul %37, %149, %cst_124 {dimension_numbers = #tpu.dot_dimension_numbers<[1], [0], [0], [1], [0, 0, 1, 1], [], []>} : vector<64x32xbf16>, vector<32x128xbf16>, vector<64x128xf32> -> vector<64x128xf32>
    %151 = arith.addf %147, %150 : vector<64x128xf32>
    %152 = arith.maximumf %114, %151 : vector<64x128xf32>
    %cst_125 = arith.constant 0.000000e+00 : f32
    %153 = vector.broadcast %cst_125 : f32 to vector<64x128xf32>
    %c0_126 = arith.constant 0 : index
    %c0_127 = arith.constant 0 : index
    %c0_128 = arith.constant 0 : index
    %154 = vector.load %arg2[%c0_126, %c0_127, %c0_128] : memref<9x32x128xbf16, #tpu.memory_space<vmem>>, vector<1x32x128xbf16>
    %155 = vector.shape_cast %154 : vector<1x32x128xbf16> to vector<32x128xbf16>
    %cst_129 = arith.constant dense<0.000000e+00> : vector<64x128xf32>
    %156 = tpu.matmul %19, %155, %cst_129 {dimension_numbers = #tpu.dot_dimension_numbers<[1], [0], [0], [1], [0, 0, 1, 1], [], []>} : vector<64x32xbf16>, vector<32x128xbf16>, vector<64x128xf32> -> vector<64x128xf32>
    %157 = arith.addf %153, %156 : vector<64x128xf32>
    %c1_130 = arith.constant 1 : index
    %c0_131 = arith.constant 0 : index
    %c0_132 = arith.constant 0 : index
    %158 = vector.load %arg2[%c1_130, %c0_131, %c0_132] : memref<9x32x128xbf16, #tpu.memory_space<vmem>>, vector<1x32x128xbf16>
    %159 = vector.shape_cast %158 : vector<1x32x128xbf16> to vector<32x128xbf16>
    %cst_133 = arith.constant dense<0.000000e+00> : vector<64x128xf32>
    %160 = tpu.matmul %21, %159, %cst_133 {dimension_numbers = #tpu.dot_dimension_numbers<[1], [0], [0], [1], [0, 0, 1, 1], [], []>} : vector<64x32xbf16>, vector<32x128xbf16>, vector<64x128xf32> -> vector<64x128xf32>
    %161 = arith.addf %157, %160 : vector<64x128xf32>
    %c2_134 = arith.constant 2 : index
    %c0_135 = arith.constant 0 : index
    %c0_136 = arith.constant 0 : index
    %162 = vector.load %arg2[%c2_134, %c0_135, %c0_136] : memref<9x32x128xbf16, #tpu.memory_space<vmem>>, vector<1x32x128xbf16>
    %163 = vector.shape_cast %162 : vector<1x32x128xbf16> to vector<32x128xbf16>
    %cst_137 = arith.constant dense<0.000000e+00> : vector<64x128xf32>
    %164 = tpu.matmul %23, %163, %cst_137 {dimension_numbers = #tpu.dot_dimension_numbers<[1], [0], [0], [1], [0, 0, 1, 1], [], []>} : vector<64x32xbf16>, vector<32x128xbf16>, vector<64x128xf32> -> vector<64x128xf32>
    %165 = arith.addf %161, %164 : vector<64x128xf32>
    %c3_138 = arith.constant 3 : index
    %c0_139 = arith.constant 0 : index
    %c0_140 = arith.constant 0 : index
    %166 = vector.load %arg2[%c3_138, %c0_139, %c0_140] : memref<9x32x128xbf16, #tpu.memory_space<vmem>>, vector<1x32x128xbf16>
    %167 = vector.shape_cast %166 : vector<1x32x128xbf16> to vector<32x128xbf16>
    %cst_141 = arith.constant dense<0.000000e+00> : vector<64x128xf32>
    %168 = tpu.matmul %27, %167, %cst_141 {dimension_numbers = #tpu.dot_dimension_numbers<[1], [0], [0], [1], [0, 0, 1, 1], [], []>} : vector<64x32xbf16>, vector<32x128xbf16>, vector<64x128xf32> -> vector<64x128xf32>
    %169 = arith.addf %165, %168 : vector<64x128xf32>
    %c4_142 = arith.constant 4 : index
    %c0_143 = arith.constant 0 : index
    %c0_144 = arith.constant 0 : index
    %170 = vector.load %arg2[%c4_142, %c0_143, %c0_144] : memref<9x32x128xbf16, #tpu.memory_space<vmem>>, vector<1x32x128xbf16>
    %171 = vector.shape_cast %170 : vector<1x32x128xbf16> to vector<32x128xbf16>
    %cst_145 = arith.constant dense<0.000000e+00> : vector<64x128xf32>
    %172 = tpu.matmul %29, %171, %cst_145 {dimension_numbers = #tpu.dot_dimension_numbers<[1], [0], [0], [1], [0, 0, 1, 1], [], []>} : vector<64x32xbf16>, vector<32x128xbf16>, vector<64x128xf32> -> vector<64x128xf32>
    %173 = arith.addf %169, %172 : vector<64x128xf32>
    %c5_146 = arith.constant 5 : index
    %c0_147 = arith.constant 0 : index
    %c0_148 = arith.constant 0 : index
    %174 = vector.load %arg2[%c5_146, %c0_147, %c0_148] : memref<9x32x128xbf16, #tpu.memory_space<vmem>>, vector<1x32x128xbf16>
    %175 = vector.shape_cast %174 : vector<1x32x128xbf16> to vector<32x128xbf16>
    %cst_149 = arith.constant dense<0.000000e+00> : vector<64x128xf32>
    %176 = tpu.matmul %31, %175, %cst_149 {dimension_numbers = #tpu.dot_dimension_numbers<[1], [0], [0], [1], [0, 0, 1, 1], [], []>} : vector<64x32xbf16>, vector<32x128xbf16>, vector<64x128xf32> -> vector<64x128xf32>
    %177 = arith.addf %173, %176 : vector<64x128xf32>
    %c6_150 = arith.constant 6 : index
    %c0_151 = arith.constant 0 : index
    %c0_152 = arith.constant 0 : index
    %178 = vector.load %arg2[%c6_150, %c0_151, %c0_152] : memref<9x32x128xbf16, #tpu.memory_space<vmem>>, vector<1x32x128xbf16>
    %179 = vector.shape_cast %178 : vector<1x32x128xbf16> to vector<32x128xbf16>
    %cst_153 = arith.constant dense<0.000000e+00> : vector<64x128xf32>
    %180 = tpu.matmul %35, %179, %cst_153 {dimension_numbers = #tpu.dot_dimension_numbers<[1], [0], [0], [1], [0, 0, 1, 1], [], []>} : vector<64x32xbf16>, vector<32x128xbf16>, vector<64x128xf32> -> vector<64x128xf32>
    %181 = arith.addf %177, %180 : vector<64x128xf32>
    %c7_154 = arith.constant 7 : index
    %c0_155 = arith.constant 0 : index
    %c0_156 = arith.constant 0 : index
    %182 = vector.load %arg2[%c7_154, %c0_155, %c0_156] : memref<9x32x128xbf16, #tpu.memory_space<vmem>>, vector<1x32x128xbf16>
    %183 = vector.shape_cast %182 : vector<1x32x128xbf16> to vector<32x128xbf16>
    %cst_157 = arith.constant dense<0.000000e+00> : vector<64x128xf32>
    %184 = tpu.matmul %37, %183, %cst_157 {dimension_numbers = #tpu.dot_dimension_numbers<[1], [0], [0], [1], [0, 0, 1, 1], [], []>} : vector<64x32xbf16>, vector<32x128xbf16>, vector<64x128xf32> -> vector<64x128xf32>
    %185 = arith.addf %181, %184 : vector<64x128xf32>
    %c8_158 = arith.constant 8 : index
    %c0_159 = arith.constant 0 : index
    %c0_160 = arith.constant 0 : index
    %186 = vector.load %arg2[%c8_158, %c0_159, %c0_160] : memref<9x32x128xbf16, #tpu.memory_space<vmem>>, vector<1x32x128xbf16>
    %187 = vector.shape_cast %186 : vector<1x32x128xbf16> to vector<32x128xbf16>
    %cst_161 = arith.constant dense<0.000000e+00> : vector<64x128xf32>
    %188 = tpu.matmul %39, %187, %cst_161 {dimension_numbers = #tpu.dot_dimension_numbers<[1], [0], [0], [1], [0, 0, 1, 1], [], []>} : vector<64x32xbf16>, vector<32x128xbf16>, vector<64x128xf32> -> vector<64x128xf32>
    %189 = arith.addf %185, %188 : vector<64x128xf32>
    %190 = arith.maximumf %152, %189 : vector<64x128xf32>
    %c0_162 = arith.constant 0 : index
    %c0_163 = arith.constant 0 : index
    %191 = vector.load %arg3[%c0_162, %c0_163] : memref<1x128xf32, #tpu.memory_space<vmem>>, vector<1x128xf32>
    %192 = vector.broadcast %191 : vector<1x128xf32> to vector<64x128xf32>
    %193 = arith.addf %190, %192 : vector<64x128xf32>
    %cst_164 = arith.constant 0.000000e+00 : f32
    %194 = vector.broadcast %cst_164 : f32 to vector<64x128xf32>
    %195 = arith.maximumf %193, %194 : vector<64x128xf32>
    %196 = vector.shape_cast %195 : vector<64x128xf32> to vector<8x8x128xf32>
    %197 = arith.truncf %196 : vector<8x8x128xf32> to vector<8x8x128xbf16>
    %c0_165 = arith.constant 0 : index
    %c0_166 = arith.constant 0 : index
    %c0_167 = arith.constant 0 : index
    %c0_168 = arith.constant 0 : index
    %198 = vector.load %arg4[%c0_165, %c0_166, %c0_167, %c0_168] : memref<1x8x8x128xbf16, #tpu.memory_space<vmem>>, vector<1x8x8x128xbf16>
    %199 = vector.shape_cast %198 : vector<1x8x8x128xbf16> to vector<8x8x128xbf16>
    %200 = vector.shape_cast %197 : vector<8x8x128xbf16> to vector<1x8x8x128xbf16>
    tpu.vector_store %arg4[%c0_165, %c0_166, %c0_167, %c0_168], %200 {strides = array<i32>} : memref<1x8x8x128xbf16, #tpu.memory_space<vmem>>, vector<1x8x8x128xbf16>,
    return
  }
  func.func @transform_0(%arg0: i32) -> (i32, i32, i32, i32, i32, i32) {
    %c0_i32 = arith.constant 0 : i32
    %c0_i32_0 = arith.constant 0 : i32
    %c0_i32_1 = arith.constant 0 : i32
    %c0_i32_2 = arith.constant 0 : i32
    %c0_i32_3 = arith.constant 0 : i32
    %c0_i32_4 = arith.constant 0 : i32
    return %arg0, %c0_i32, %c0_i32_0, %c0_i32_1, %c0_i32_2, %c0_i32_3 : i32, i32, i32, i32, i32, i32
  }
  func.func @transform_1(%arg0: i32) -> (i32, i32, i32) {
    %c0_i32 = arith.constant 0 : i32
    %c0_i32_0 = arith.constant 0 : i32
    %c0_i32_1 = arith.constant 0 : i32
    %c0_i32_2 = arith.constant 0 : i32
    return %c0_i32, %c0_i32_0, %c0_i32_1 : i32, i32, i32
  }
  func.func @transform_2(%arg0: i32) -> (i32, i32) {
    %c0_i32 = arith.constant 0 : i32
    %c0_i32_0 = arith.constant 0 : i32
    %c0_i32_1 = arith.constant 0 : i32
    return %c0_i32, %c0_i32_0 : i32, i32
  }
  func.func @transform_3(%arg0: i32) -> (i32, i32, i32, i32) {
    %c0_i32 = arith.constant 0 : i32
    %c0_i32_0 = arith.constant 0 : i32
    %c0_i32_1 = arith.constant 0 : i32
    %c0_i32_2 = arith.constant 0 : i32
    return %arg0, %c0_i32, %c0_i32_0, %c0_i32_1 : i32, i32, i32, i32
  }
}

module attributes {stable_mosaic.version = 11 : i64} {
  func.func @kernel(%arg0: i32, %arg1: memref<1x2x2x5x5x64xbf16, #tpu.memory_space<vmem>>, %arg2: memref<9x64x128xbf16, #tpu.memory_space<vmem>>, %arg3: memref<1x128xf32, #tpu.memory_space<vmem>>, %arg4: memref<1x4x4x128xbf16, #tpu.memory_space<vmem>>) attributes {dimension_semantics = [#tpu.dimension_semantics<parallel>], iteration_bounds = array<i64: 2>, scalar_prefetch = 0 : i64, scratch_operands = 0 : i64, tpu.core_type = #tpu.core_type<tc>, window_params = [{transform_indices = @transform_0, window_bounds = array<i64: 1, 2, 2, 5, 5, 64>}, {pipeline_mode = #tpu.pipeline_mode<synchronous>, transform_indices = @transform_1, window_bounds = array<i64: 9, 64, 128>}, {pipeline_mode = #tpu.pipeline_mode<synchronous>, transform_indices = @transform_2, window_bounds = array<i64: 1, 128>}, {transform_indices = @transform_3, window_bounds = array<i64: 1, 4, 4, 128>}]} {
    %c0 = arith.constant 0 : index
    %c0_0 = arith.constant 0 : index
    %c0_1 = arith.constant 0 : index
    %c0_2 = arith.constant 0 : index
    %c0_3 = arith.constant 0 : index
    %c0_4 = arith.constant 0 : index
    %0 = vector.load %arg1[%c0, %c0_0, %c0_1, %c0_2, %c0_3, %c0_4] : memref<1x2x2x5x5x64xbf16, #tpu.memory_space<vmem>>, vector<1x1x1x5x5x64xbf16>
    %1 = vector.shape_cast %0 : vector<1x1x1x5x5x64xbf16> to vector<5x5x64xbf16>
    %c0_5 = arith.constant 0 : index
    %c0_6 = arith.constant 0 : index
    %c1 = arith.constant 1 : index
    %c0_7 = arith.constant 0 : index
    %c0_8 = arith.constant 0 : index
    %c0_9 = arith.constant 0 : index
    %2 = vector.load %arg1[%c0_5, %c0_6, %c1, %c0_7, %c0_8, %c0_9] : memref<1x2x2x5x5x64xbf16, #tpu.memory_space<vmem>>, vector<1x1x1x5x5x64xbf16>
    %3 = vector.shape_cast %2 : vector<1x1x1x5x5x64xbf16> to vector<5x5x64xbf16>
    %c0_10 = arith.constant 0 : index
    %c1_11 = arith.constant 1 : index
    %c0_12 = arith.constant 0 : index
    %c0_13 = arith.constant 0 : index
    %c0_14 = arith.constant 0 : index
    %c0_15 = arith.constant 0 : index
    %4 = vector.load %arg1[%c0_10, %c1_11, %c0_12, %c0_13, %c0_14, %c0_15] : memref<1x2x2x5x5x64xbf16, #tpu.memory_space<vmem>>, vector<1x1x1x5x5x64xbf16>
    %5 = vector.shape_cast %4 : vector<1x1x1x5x5x64xbf16> to vector<5x5x64xbf16>
    %c0_16 = arith.constant 0 : index
    %c1_17 = arith.constant 1 : index
    %c1_18 = arith.constant 1 : index
    %c0_19 = arith.constant 0 : index
    %c0_20 = arith.constant 0 : index
    %c0_21 = arith.constant 0 : index
    %6 = vector.load %arg1[%c0_16, %c1_17, %c1_18, %c0_19, %c0_20, %c0_21] : memref<1x2x2x5x5x64xbf16, #tpu.memory_space<vmem>>, vector<1x1x1x5x5x64xbf16>
    %7 = vector.shape_cast %6 : vector<1x1x1x5x5x64xbf16> to vector<5x5x64xbf16>
    %8 = vector.extract_strided_slice %1 {offsets = [0, 0, 0], sizes = [4, 4, 64], strides = [1, 1, 1]} : vector<5x5x64xbf16> to vector<4x4x64xbf16>
    %9 = vector.shape_cast %8 : vector<4x4x64xbf16> to vector<16x64xbf16>
    %10 = vector.extract_strided_slice %3 {offsets = [0, 0, 0], sizes = [4, 4, 64], strides = [1, 1, 1]} : vector<5x5x64xbf16> to vector<4x4x64xbf16>
    %11 = vector.shape_cast %10 : vector<4x4x64xbf16> to vector<16x64xbf16>
    %12 = vector.extract_strided_slice %1 {offsets = [0, 1, 0], sizes = [4, 4, 64], strides = [1, 1, 1]} : vector<5x5x64xbf16> to vector<4x4x64xbf16>
    %13 = vector.shape_cast %12 : vector<4x4x64xbf16> to vector<16x64xbf16>
    %14 = vector.extract_strided_slice %3 {offsets = [0, 1, 0], sizes = [4, 4, 64], strides = [1, 1, 1]} : vector<5x5x64xbf16> to vector<4x4x64xbf16>
    %15 = vector.shape_cast %14 : vector<4x4x64xbf16> to vector<16x64xbf16>
    %16 = vector.extract_strided_slice %5 {offsets = [0, 0, 0], sizes = [4, 4, 64], strides = [1, 1, 1]} : vector<5x5x64xbf16> to vector<4x4x64xbf16>
    %17 = vector.shape_cast %16 : vector<4x4x64xbf16> to vector<16x64xbf16>
    %18 = vector.extract_strided_slice %7 {offsets = [0, 0, 0], sizes = [4, 4, 64], strides = [1, 1, 1]} : vector<5x5x64xbf16> to vector<4x4x64xbf16>
    %19 = vector.shape_cast %18 : vector<4x4x64xbf16> to vector<16x64xbf16>
    %20 = vector.extract_strided_slice %5 {offsets = [0, 1, 0], sizes = [4, 4, 64], strides = [1, 1, 1]} : vector<5x5x64xbf16> to vector<4x4x64xbf16>
    %21 = vector.shape_cast %20 : vector<4x4x64xbf16> to vector<16x64xbf16>
    %22 = vector.extract_strided_slice %7 {offsets = [0, 1, 0], sizes = [4, 4, 64], strides = [1, 1, 1]} : vector<5x5x64xbf16> to vector<4x4x64xbf16>
    %23 = vector.shape_cast %22 : vector<4x4x64xbf16> to vector<16x64xbf16>
    %24 = vector.extract_strided_slice %1 {offsets = [1, 0, 0], sizes = [4, 4, 64], strides = [1, 1, 1]} : vector<5x5x64xbf16> to vector<4x4x64xbf16>
    %25 = vector.shape_cast %24 : vector<4x4x64xbf16> to vector<16x64xbf16>
    %26 = vector.extract_strided_slice %3 {offsets = [1, 0, 0], sizes = [4, 4, 64], strides = [1, 1, 1]} : vector<5x5x64xbf16> to vector<4x4x64xbf16>
    %27 = vector.shape_cast %26 : vector<4x4x64xbf16> to vector<16x64xbf16>
    %28 = vector.extract_strided_slice %1 {offsets = [1, 1, 0], sizes = [4, 4, 64], strides = [1, 1, 1]} : vector<5x5x64xbf16> to vector<4x4x64xbf16>
    %29 = vector.shape_cast %28 : vector<4x4x64xbf16> to vector<16x64xbf16>
    %30 = vector.extract_strided_slice %3 {offsets = [1, 1, 0], sizes = [4, 4, 64], strides = [1, 1, 1]} : vector<5x5x64xbf16> to vector<4x4x64xbf16>
    %31 = vector.shape_cast %30 : vector<4x4x64xbf16> to vector<16x64xbf16>
    %32 = vector.extract_strided_slice %5 {offsets = [1, 0, 0], sizes = [4, 4, 64], strides = [1, 1, 1]} : vector<5x5x64xbf16> to vector<4x4x64xbf16>
    %33 = vector.shape_cast %32 : vector<4x4x64xbf16> to vector<16x64xbf16>
    %34 = vector.extract_strided_slice %7 {offsets = [1, 0, 0], sizes = [4, 4, 64], strides = [1, 1, 1]} : vector<5x5x64xbf16> to vector<4x4x64xbf16>
    %35 = vector.shape_cast %34 : vector<4x4x64xbf16> to vector<16x64xbf16>
    %36 = vector.extract_strided_slice %5 {offsets = [1, 1, 0], sizes = [4, 4, 64], strides = [1, 1, 1]} : vector<5x5x64xbf16> to vector<4x4x64xbf16>
    %37 = vector.shape_cast %36 : vector<4x4x64xbf16> to vector<16x64xbf16>
    %38 = vector.extract_strided_slice %7 {offsets = [1, 1, 0], sizes = [4, 4, 64], strides = [1, 1, 1]} : vector<5x5x64xbf16> to vector<4x4x64xbf16>
    %39 = vector.shape_cast %38 : vector<4x4x64xbf16> to vector<16x64xbf16>
    %cst = arith.constant 0.000000e+00 : f32
    %40 = vector.broadcast %cst : f32 to vector<16x128xf32>
    %c0_22 = arith.constant 0 : index
    %c0_23 = arith.constant 0 : index
    %c0_24 = arith.constant 0 : index
    %41 = vector.load %arg2[%c0_22, %c0_23, %c0_24] : memref<9x64x128xbf16, #tpu.memory_space<vmem>>, vector<1x64x128xbf16>
    %42 = vector.shape_cast %41 : vector<1x64x128xbf16> to vector<64x128xbf16>
    %cst_25 = arith.constant dense<0.000000e+00> : vector<16x128xf32>
    %43 = tpu.matmul %9, %42, %cst_25 {dimension_numbers = #tpu.dot_dimension_numbers<[1], [0], [0], [1], [0, 0, 1, 1], [], []>} : vector<16x64xbf16>, vector<64x128xbf16>, vector<16x128xf32> -> vector<16x128xf32>
    %44 = arith.addf %40, %43 : vector<16x128xf32>
    %c1_26 = arith.constant 1 : index
    %c0_27 = arith.constant 0 : index
    %c0_28 = arith.constant 0 : index
    %45 = vector.load %arg2[%c1_26, %c0_27, %c0_28] : memref<9x64x128xbf16, #tpu.memory_space<vmem>>, vector<1x64x128xbf16>
    %46 = vector.shape_cast %45 : vector<1x64x128xbf16> to vector<64x128xbf16>
    %cst_29 = arith.constant dense<0.000000e+00> : vector<16x128xf32>
    %47 = tpu.matmul %11, %46, %cst_29 {dimension_numbers = #tpu.dot_dimension_numbers<[1], [0], [0], [1], [0, 0, 1, 1], [], []>} : vector<16x64xbf16>, vector<64x128xbf16>, vector<16x128xf32> -> vector<16x128xf32>
    %48 = arith.addf %44, %47 : vector<16x128xf32>
    %c2 = arith.constant 2 : index
    %c0_30 = arith.constant 0 : index
    %c0_31 = arith.constant 0 : index
    %49 = vector.load %arg2[%c2, %c0_30, %c0_31] : memref<9x64x128xbf16, #tpu.memory_space<vmem>>, vector<1x64x128xbf16>
    %50 = vector.shape_cast %49 : vector<1x64x128xbf16> to vector<64x128xbf16>
    %cst_32 = arith.constant dense<0.000000e+00> : vector<16x128xf32>
    %51 = tpu.matmul %13, %50, %cst_32 {dimension_numbers = #tpu.dot_dimension_numbers<[1], [0], [0], [1], [0, 0, 1, 1], [], []>} : vector<16x64xbf16>, vector<64x128xbf16>, vector<16x128xf32> -> vector<16x128xf32>
    %52 = arith.addf %48, %51 : vector<16x128xf32>
    %c3 = arith.constant 3 : index
    %c0_33 = arith.constant 0 : index
    %c0_34 = arith.constant 0 : index
    %53 = vector.load %arg2[%c3, %c0_33, %c0_34] : memref<9x64x128xbf16, #tpu.memory_space<vmem>>, vector<1x64x128xbf16>
    %54 = vector.shape_cast %53 : vector<1x64x128xbf16> to vector<64x128xbf16>
    %cst_35 = arith.constant dense<0.000000e+00> : vector<16x128xf32>
    %55 = tpu.matmul %17, %54, %cst_35 {dimension_numbers = #tpu.dot_dimension_numbers<[1], [0], [0], [1], [0, 0, 1, 1], [], []>} : vector<16x64xbf16>, vector<64x128xbf16>, vector<16x128xf32> -> vector<16x128xf32>
    %56 = arith.addf %52, %55 : vector<16x128xf32>
    %c4 = arith.constant 4 : index
    %c0_36 = arith.constant 0 : index
    %c0_37 = arith.constant 0 : index
    %57 = vector.load %arg2[%c4, %c0_36, %c0_37] : memref<9x64x128xbf16, #tpu.memory_space<vmem>>, vector<1x64x128xbf16>
    %58 = vector.shape_cast %57 : vector<1x64x128xbf16> to vector<64x128xbf16>
    %cst_38 = arith.constant dense<0.000000e+00> : vector<16x128xf32>
    %59 = tpu.matmul %19, %58, %cst_38 {dimension_numbers = #tpu.dot_dimension_numbers<[1], [0], [0], [1], [0, 0, 1, 1], [], []>} : vector<16x64xbf16>, vector<64x128xbf16>, vector<16x128xf32> -> vector<16x128xf32>
    %60 = arith.addf %56, %59 : vector<16x128xf32>
    %c5 = arith.constant 5 : index
    %c0_39 = arith.constant 0 : index
    %c0_40 = arith.constant 0 : index
    %61 = vector.load %arg2[%c5, %c0_39, %c0_40] : memref<9x64x128xbf16, #tpu.memory_space<vmem>>, vector<1x64x128xbf16>
    %62 = vector.shape_cast %61 : vector<1x64x128xbf16> to vector<64x128xbf16>
    %cst_41 = arith.constant dense<0.000000e+00> : vector<16x128xf32>
    %63 = tpu.matmul %21, %62, %cst_41 {dimension_numbers = #tpu.dot_dimension_numbers<[1], [0], [0], [1], [0, 0, 1, 1], [], []>} : vector<16x64xbf16>, vector<64x128xbf16>, vector<16x128xf32> -> vector<16x128xf32>
    %64 = arith.addf %60, %63 : vector<16x128xf32>
    %c6 = arith.constant 6 : index
    %c0_42 = arith.constant 0 : index
    %c0_43 = arith.constant 0 : index
    %65 = vector.load %arg2[%c6, %c0_42, %c0_43] : memref<9x64x128xbf16, #tpu.memory_space<vmem>>, vector<1x64x128xbf16>
    %66 = vector.shape_cast %65 : vector<1x64x128xbf16> to vector<64x128xbf16>
    %cst_44 = arith.constant dense<0.000000e+00> : vector<16x128xf32>
    %67 = tpu.matmul %25, %66, %cst_44 {dimension_numbers = #tpu.dot_dimension_numbers<[1], [0], [0], [1], [0, 0, 1, 1], [], []>} : vector<16x64xbf16>, vector<64x128xbf16>, vector<16x128xf32> -> vector<16x128xf32>
    %68 = arith.addf %64, %67 : vector<16x128xf32>
    %c7 = arith.constant 7 : index
    %c0_45 = arith.constant 0 : index
    %c0_46 = arith.constant 0 : index
    %69 = vector.load %arg2[%c7, %c0_45, %c0_46] : memref<9x64x128xbf16, #tpu.memory_space<vmem>>, vector<1x64x128xbf16>
    %70 = vector.shape_cast %69 : vector<1x64x128xbf16> to vector<64x128xbf16>
    %cst_47 = arith.constant dense<0.000000e+00> : vector<16x128xf32>
    %71 = tpu.matmul %27, %70, %cst_47 {dimension_numbers = #tpu.dot_dimension_numbers<[1], [0], [0], [1], [0, 0, 1, 1], [], []>} : vector<16x64xbf16>, vector<64x128xbf16>, vector<16x128xf32> -> vector<16x128xf32>
    %72 = arith.addf %68, %71 : vector<16x128xf32>
    %c8 = arith.constant 8 : index
    %c0_48 = arith.constant 0 : index
    %c0_49 = arith.constant 0 : index
    %73 = vector.load %arg2[%c8, %c0_48, %c0_49] : memref<9x64x128xbf16, #tpu.memory_space<vmem>>, vector<1x64x128xbf16>
    %74 = vector.shape_cast %73 : vector<1x64x128xbf16> to vector<64x128xbf16>
    %cst_50 = arith.constant dense<0.000000e+00> : vector<16x128xf32>
    %75 = tpu.matmul %29, %74, %cst_50 {dimension_numbers = #tpu.dot_dimension_numbers<[1], [0], [0], [1], [0, 0, 1, 1], [], []>} : vector<16x64xbf16>, vector<64x128xbf16>, vector<16x128xf32> -> vector<16x128xf32>
    %76 = arith.addf %72, %75 : vector<16x128xf32>
    %cst_51 = arith.constant 0.000000e+00 : f32
    %77 = vector.broadcast %cst_51 : f32 to vector<16x128xf32>
    %c0_52 = arith.constant 0 : index
    %c0_53 = arith.constant 0 : index
    %c0_54 = arith.constant 0 : index
    %78 = vector.load %arg2[%c0_52, %c0_53, %c0_54] : memref<9x64x128xbf16, #tpu.memory_space<vmem>>, vector<1x64x128xbf16>
    %79 = vector.shape_cast %78 : vector<1x64x128xbf16> to vector<64x128xbf16>
    %cst_55 = arith.constant dense<0.000000e+00> : vector<16x128xf32>
    %80 = tpu.matmul %11, %79, %cst_55 {dimension_numbers = #tpu.dot_dimension_numbers<[1], [0], [0], [1], [0, 0, 1, 1], [], []>} : vector<16x64xbf16>, vector<64x128xbf16>, vector<16x128xf32> -> vector<16x128xf32>
    %81 = arith.addf %77, %80 : vector<16x128xf32>
    %c1_56 = arith.constant 1 : index
    %c0_57 = arith.constant 0 : index
    %c0_58 = arith.constant 0 : index
    %82 = vector.load %arg2[%c1_56, %c0_57, %c0_58] : memref<9x64x128xbf16, #tpu.memory_space<vmem>>, vector<1x64x128xbf16>
    %83 = vector.shape_cast %82 : vector<1x64x128xbf16> to vector<64x128xbf16>
    %cst_59 = arith.constant dense<0.000000e+00> : vector<16x128xf32>
    %84 = tpu.matmul %13, %83, %cst_59 {dimension_numbers = #tpu.dot_dimension_numbers<[1], [0], [0], [1], [0, 0, 1, 1], [], []>} : vector<16x64xbf16>, vector<64x128xbf16>, vector<16x128xf32> -> vector<16x128xf32>
    %85 = arith.addf %81, %84 : vector<16x128xf32>
    %c2_60 = arith.constant 2 : index
    %c0_61 = arith.constant 0 : index
    %c0_62 = arith.constant 0 : index
    %86 = vector.load %arg2[%c2_60, %c0_61, %c0_62] : memref<9x64x128xbf16, #tpu.memory_space<vmem>>, vector<1x64x128xbf16>
    %87 = vector.shape_cast %86 : vector<1x64x128xbf16> to vector<64x128xbf16>
    %cst_63 = arith.constant dense<0.000000e+00> : vector<16x128xf32>
    %88 = tpu.matmul %15, %87, %cst_63 {dimension_numbers = #tpu.dot_dimension_numbers<[1], [0], [0], [1], [0, 0, 1, 1], [], []>} : vector<16x64xbf16>, vector<64x128xbf16>, vector<16x128xf32> -> vector<16x128xf32>
    %89 = arith.addf %85, %88 : vector<16x128xf32>
    %c3_64 = arith.constant 3 : index
    %c0_65 = arith.constant 0 : index
    %c0_66 = arith.constant 0 : index
    %90 = vector.load %arg2[%c3_64, %c0_65, %c0_66] : memref<9x64x128xbf16, #tpu.memory_space<vmem>>, vector<1x64x128xbf16>
    %91 = vector.shape_cast %90 : vector<1x64x128xbf16> to vector<64x128xbf16>
    %cst_67 = arith.constant dense<0.000000e+00> : vector<16x128xf32>
    %92 = tpu.matmul %19, %91, %cst_67 {dimension_numbers = #tpu.dot_dimension_numbers<[1], [0], [0], [1], [0, 0, 1, 1], [], []>} : vector<16x64xbf16>, vector<64x128xbf16>, vector<16x128xf32> -> vector<16x128xf32>
    %93 = arith.addf %89, %92 : vector<16x128xf32>
    %c4_68 = arith.constant 4 : index
    %c0_69 = arith.constant 0 : index
    %c0_70 = arith.constant 0 : index
    %94 = vector.load %arg2[%c4_68, %c0_69, %c0_70] : memref<9x64x128xbf16, #tpu.memory_space<vmem>>, vector<1x64x128xbf16>
    %95 = vector.shape_cast %94 : vector<1x64x128xbf16> to vector<64x128xbf16>
    %cst_71 = arith.constant dense<0.000000e+00> : vector<16x128xf32>
    %96 = tpu.matmul %21, %95, %cst_71 {dimension_numbers = #tpu.dot_dimension_numbers<[1], [0], [0], [1], [0, 0, 1, 1], [], []>} : vector<16x64xbf16>, vector<64x128xbf16>, vector<16x128xf32> -> vector<16x128xf32>
    %97 = arith.addf %93, %96 : vector<16x128xf32>
    %c5_72 = arith.constant 5 : index
    %c0_73 = arith.constant 0 : index
    %c0_74 = arith.constant 0 : index
    %98 = vector.load %arg2[%c5_72, %c0_73, %c0_74] : memref<9x64x128xbf16, #tpu.memory_space<vmem>>, vector<1x64x128xbf16>
    %99 = vector.shape_cast %98 : vector<1x64x128xbf16> to vector<64x128xbf16>
    %cst_75 = arith.constant dense<0.000000e+00> : vector<16x128xf32>
    %100 = tpu.matmul %23, %99, %cst_75 {dimension_numbers = #tpu.dot_dimension_numbers<[1], [0], [0], [1], [0, 0, 1, 1], [], []>} : vector<16x64xbf16>, vector<64x128xbf16>, vector<16x128xf32> -> vector<16x128xf32>
    %101 = arith.addf %97, %100 : vector<16x128xf32>
    %c6_76 = arith.constant 6 : index
    %c0_77 = arith.constant 0 : index
    %c0_78 = arith.constant 0 : index
    %102 = vector.load %arg2[%c6_76, %c0_77, %c0_78] : memref<9x64x128xbf16, #tpu.memory_space<vmem>>, vector<1x64x128xbf16>
    %103 = vector.shape_cast %102 : vector<1x64x128xbf16> to vector<64x128xbf16>
    %cst_79 = arith.constant dense<0.000000e+00> : vector<16x128xf32>
    %104 = tpu.matmul %27, %103, %cst_79 {dimension_numbers = #tpu.dot_dimension_numbers<[1], [0], [0], [1], [0, 0, 1, 1], [], []>} : vector<16x64xbf16>, vector<64x128xbf16>, vector<16x128xf32> -> vector<16x128xf32>
    %105 = arith.addf %101, %104 : vector<16x128xf32>
    %c7_80 = arith.constant 7 : index
    %c0_81 = arith.constant 0 : index
    %c0_82 = arith.constant 0 : index
    %106 = vector.load %arg2[%c7_80, %c0_81, %c0_82] : memref<9x64x128xbf16, #tpu.memory_space<vmem>>, vector<1x64x128xbf16>
    %107 = vector.shape_cast %106 : vector<1x64x128xbf16> to vector<64x128xbf16>
    %cst_83 = arith.constant dense<0.000000e+00> : vector<16x128xf32>
    %108 = tpu.matmul %29, %107, %cst_83 {dimension_numbers = #tpu.dot_dimension_numbers<[1], [0], [0], [1], [0, 0, 1, 1], [], []>} : vector<16x64xbf16>, vector<64x128xbf16>, vector<16x128xf32> -> vector<16x128xf32>
    %109 = arith.addf %105, %108 : vector<16x128xf32>
    %c8_84 = arith.constant 8 : index
    %c0_85 = arith.constant 0 : index
    %c0_86 = arith.constant 0 : index
    %110 = vector.load %arg2[%c8_84, %c0_85, %c0_86] : memref<9x64x128xbf16, #tpu.memory_space<vmem>>, vector<1x64x128xbf16>
    %111 = vector.shape_cast %110 : vector<1x64x128xbf16> to vector<64x128xbf16>
    %cst_87 = arith.constant dense<0.000000e+00> : vector<16x128xf32>
    %112 = tpu.matmul %31, %111, %cst_87 {dimension_numbers = #tpu.dot_dimension_numbers<[1], [0], [0], [1], [0, 0, 1, 1], [], []>} : vector<16x64xbf16>, vector<64x128xbf16>, vector<16x128xf32> -> vector<16x128xf32>
    %113 = arith.addf %109, %112 : vector<16x128xf32>
    %114 = arith.maximumf %76, %113 : vector<16x128xf32>
    %cst_88 = arith.constant 0.000000e+00 : f32
    %115 = vector.broadcast %cst_88 : f32 to vector<16x128xf32>
    %c0_89 = arith.constant 0 : index
    %c0_90 = arith.constant 0 : index
    %c0_91 = arith.constant 0 : index
    %116 = vector.load %arg2[%c0_89, %c0_90, %c0_91] : memref<9x64x128xbf16, #tpu.memory_space<vmem>>, vector<1x64x128xbf16>
    %117 = vector.shape_cast %116 : vector<1x64x128xbf16> to vector<64x128xbf16>
    %cst_92 = arith.constant dense<0.000000e+00> : vector<16x128xf32>
    %118 = tpu.matmul %17, %117, %cst_92 {dimension_numbers = #tpu.dot_dimension_numbers<[1], [0], [0], [1], [0, 0, 1, 1], [], []>} : vector<16x64xbf16>, vector<64x128xbf16>, vector<16x128xf32> -> vector<16x128xf32>
    %119 = arith.addf %115, %118 : vector<16x128xf32>
    %c1_93 = arith.constant 1 : index
    %c0_94 = arith.constant 0 : index
    %c0_95 = arith.constant 0 : index
    %120 = vector.load %arg2[%c1_93, %c0_94, %c0_95] : memref<9x64x128xbf16, #tpu.memory_space<vmem>>, vector<1x64x128xbf16>
    %121 = vector.shape_cast %120 : vector<1x64x128xbf16> to vector<64x128xbf16>
    %cst_96 = arith.constant dense<0.000000e+00> : vector<16x128xf32>
    %122 = tpu.matmul %19, %121, %cst_96 {dimension_numbers = #tpu.dot_dimension_numbers<[1], [0], [0], [1], [0, 0, 1, 1], [], []>} : vector<16x64xbf16>, vector<64x128xbf16>, vector<16x128xf32> -> vector<16x128xf32>
    %123 = arith.addf %119, %122 : vector<16x128xf32>
    %c2_97 = arith.constant 2 : index
    %c0_98 = arith.constant 0 : index
    %c0_99 = arith.constant 0 : index
    %124 = vector.load %arg2[%c2_97, %c0_98, %c0_99] : memref<9x64x128xbf16, #tpu.memory_space<vmem>>, vector<1x64x128xbf16>
    %125 = vector.shape_cast %124 : vector<1x64x128xbf16> to vector<64x128xbf16>
    %cst_100 = arith.constant dense<0.000000e+00> : vector<16x128xf32>
    %126 = tpu.matmul %21, %125, %cst_100 {dimension_numbers = #tpu.dot_dimension_numbers<[1], [0], [0], [1], [0, 0, 1, 1], [], []>} : vector<16x64xbf16>, vector<64x128xbf16>, vector<16x128xf32> -> vector<16x128xf32>
    %127 = arith.addf %123, %126 : vector<16x128xf32>
    %c3_101 = arith.constant 3 : index
    %c0_102 = arith.constant 0 : index
    %c0_103 = arith.constant 0 : index
    %128 = vector.load %arg2[%c3_101, %c0_102, %c0_103] : memref<9x64x128xbf16, #tpu.memory_space<vmem>>, vector<1x64x128xbf16>
    %129 = vector.shape_cast %128 : vector<1x64x128xbf16> to vector<64x128xbf16>
    %cst_104 = arith.constant dense<0.000000e+00> : vector<16x128xf32>
    %130 = tpu.matmul %25, %129, %cst_104 {dimension_numbers = #tpu.dot_dimension_numbers<[1], [0], [0], [1], [0, 0, 1, 1], [], []>} : vector<16x64xbf16>, vector<64x128xbf16>, vector<16x128xf32> -> vector<16x128xf32>
    %131 = arith.addf %127, %130 : vector<16x128xf32>
    %c4_105 = arith.constant 4 : index
    %c0_106 = arith.constant 0 : index
    %c0_107 = arith.constant 0 : index
    %132 = vector.load %arg2[%c4_105, %c0_106, %c0_107] : memref<9x64x128xbf16, #tpu.memory_space<vmem>>, vector<1x64x128xbf16>
    %133 = vector.shape_cast %132 : vector<1x64x128xbf16> to vector<64x128xbf16>
    %cst_108 = arith.constant dense<0.000000e+00> : vector<16x128xf32>
    %134 = tpu.matmul %27, %133, %cst_108 {dimension_numbers = #tpu.dot_dimension_numbers<[1], [0], [0], [1], [0, 0, 1, 1], [], []>} : vector<16x64xbf16>, vector<64x128xbf16>, vector<16x128xf32> -> vector<16x128xf32>
    %135 = arith.addf %131, %134 : vector<16x128xf32>
    %c5_109 = arith.constant 5 : index
    %c0_110 = arith.constant 0 : index
    %c0_111 = arith.constant 0 : index
    %136 = vector.load %arg2[%c5_109, %c0_110, %c0_111] : memref<9x64x128xbf16, #tpu.memory_space<vmem>>, vector<1x64x128xbf16>
    %137 = vector.shape_cast %136 : vector<1x64x128xbf16> to vector<64x128xbf16>
    %cst_112 = arith.constant dense<0.000000e+00> : vector<16x128xf32>
    %138 = tpu.matmul %29, %137, %cst_112 {dimension_numbers = #tpu.dot_dimension_numbers<[1], [0], [0], [1], [0, 0, 1, 1], [], []>} : vector<16x64xbf16>, vector<64x128xbf16>, vector<16x128xf32> -> vector<16x128xf32>
    %139 = arith.addf %135, %138 : vector<16x128xf32>
    %c6_113 = arith.constant 6 : index
    %c0_114 = arith.constant 0 : index
    %c0_115 = arith.constant 0 : index
    %140 = vector.load %arg2[%c6_113, %c0_114, %c0_115] : memref<9x64x128xbf16, #tpu.memory_space<vmem>>, vector<1x64x128xbf16>
    %141 = vector.shape_cast %140 : vector<1x64x128xbf16> to vector<64x128xbf16>
    %cst_116 = arith.constant dense<0.000000e+00> : vector<16x128xf32>
    %142 = tpu.matmul %33, %141, %cst_116 {dimension_numbers = #tpu.dot_dimension_numbers<[1], [0], [0], [1], [0, 0, 1, 1], [], []>} : vector<16x64xbf16>, vector<64x128xbf16>, vector<16x128xf32> -> vector<16x128xf32>
    %143 = arith.addf %139, %142 : vector<16x128xf32>
    %c7_117 = arith.constant 7 : index
    %c0_118 = arith.constant 0 : index
    %c0_119 = arith.constant 0 : index
    %144 = vector.load %arg2[%c7_117, %c0_118, %c0_119] : memref<9x64x128xbf16, #tpu.memory_space<vmem>>, vector<1x64x128xbf16>
    %145 = vector.shape_cast %144 : vector<1x64x128xbf16> to vector<64x128xbf16>
    %cst_120 = arith.constant dense<0.000000e+00> : vector<16x128xf32>
    %146 = tpu.matmul %35, %145, %cst_120 {dimension_numbers = #tpu.dot_dimension_numbers<[1], [0], [0], [1], [0, 0, 1, 1], [], []>} : vector<16x64xbf16>, vector<64x128xbf16>, vector<16x128xf32> -> vector<16x128xf32>
    %147 = arith.addf %143, %146 : vector<16x128xf32>
    %c8_121 = arith.constant 8 : index
    %c0_122 = arith.constant 0 : index
    %c0_123 = arith.constant 0 : index
    %148 = vector.load %arg2[%c8_121, %c0_122, %c0_123] : memref<9x64x128xbf16, #tpu.memory_space<vmem>>, vector<1x64x128xbf16>
    %149 = vector.shape_cast %148 : vector<1x64x128xbf16> to vector<64x128xbf16>
    %cst_124 = arith.constant dense<0.000000e+00> : vector<16x128xf32>
    %150 = tpu.matmul %37, %149, %cst_124 {dimension_numbers = #tpu.dot_dimension_numbers<[1], [0], [0], [1], [0, 0, 1, 1], [], []>} : vector<16x64xbf16>, vector<64x128xbf16>, vector<16x128xf32> -> vector<16x128xf32>
    %151 = arith.addf %147, %150 : vector<16x128xf32>
    %152 = arith.maximumf %114, %151 : vector<16x128xf32>
    %cst_125 = arith.constant 0.000000e+00 : f32
    %153 = vector.broadcast %cst_125 : f32 to vector<16x128xf32>
    %c0_126 = arith.constant 0 : index
    %c0_127 = arith.constant 0 : index
    %c0_128 = arith.constant 0 : index
    %154 = vector.load %arg2[%c0_126, %c0_127, %c0_128] : memref<9x64x128xbf16, #tpu.memory_space<vmem>>, vector<1x64x128xbf16>
    %155 = vector.shape_cast %154 : vector<1x64x128xbf16> to vector<64x128xbf16>
    %cst_129 = arith.constant dense<0.000000e+00> : vector<16x128xf32>
    %156 = tpu.matmul %19, %155, %cst_129 {dimension_numbers = #tpu.dot_dimension_numbers<[1], [0], [0], [1], [0, 0, 1, 1], [], []>} : vector<16x64xbf16>, vector<64x128xbf16>, vector<16x128xf32> -> vector<16x128xf32>
    %157 = arith.addf %153, %156 : vector<16x128xf32>
    %c1_130 = arith.constant 1 : index
    %c0_131 = arith.constant 0 : index
    %c0_132 = arith.constant 0 : index
    %158 = vector.load %arg2[%c1_130, %c0_131, %c0_132] : memref<9x64x128xbf16, #tpu.memory_space<vmem>>, vector<1x64x128xbf16>
    %159 = vector.shape_cast %158 : vector<1x64x128xbf16> to vector<64x128xbf16>
    %cst_133 = arith.constant dense<0.000000e+00> : vector<16x128xf32>
    %160 = tpu.matmul %21, %159, %cst_133 {dimension_numbers = #tpu.dot_dimension_numbers<[1], [0], [0], [1], [0, 0, 1, 1], [], []>} : vector<16x64xbf16>, vector<64x128xbf16>, vector<16x128xf32> -> vector<16x128xf32>
    %161 = arith.addf %157, %160 : vector<16x128xf32>
    %c2_134 = arith.constant 2 : index
    %c0_135 = arith.constant 0 : index
    %c0_136 = arith.constant 0 : index
    %162 = vector.load %arg2[%c2_134, %c0_135, %c0_136] : memref<9x64x128xbf16, #tpu.memory_space<vmem>>, vector<1x64x128xbf16>
    %163 = vector.shape_cast %162 : vector<1x64x128xbf16> to vector<64x128xbf16>
    %cst_137 = arith.constant dense<0.000000e+00> : vector<16x128xf32>
    %164 = tpu.matmul %23, %163, %cst_137 {dimension_numbers = #tpu.dot_dimension_numbers<[1], [0], [0], [1], [0, 0, 1, 1], [], []>} : vector<16x64xbf16>, vector<64x128xbf16>, vector<16x128xf32> -> vector<16x128xf32>
    %165 = arith.addf %161, %164 : vector<16x128xf32>
    %c3_138 = arith.constant 3 : index
    %c0_139 = arith.constant 0 : index
    %c0_140 = arith.constant 0 : index
    %166 = vector.load %arg2[%c3_138, %c0_139, %c0_140] : memref<9x64x128xbf16, #tpu.memory_space<vmem>>, vector<1x64x128xbf16>
    %167 = vector.shape_cast %166 : vector<1x64x128xbf16> to vector<64x128xbf16>
    %cst_141 = arith.constant dense<0.000000e+00> : vector<16x128xf32>
    %168 = tpu.matmul %27, %167, %cst_141 {dimension_numbers = #tpu.dot_dimension_numbers<[1], [0], [0], [1], [0, 0, 1, 1], [], []>} : vector<16x64xbf16>, vector<64x128xbf16>, vector<16x128xf32> -> vector<16x128xf32>
    %169 = arith.addf %165, %168 : vector<16x128xf32>
    %c4_142 = arith.constant 4 : index
    %c0_143 = arith.constant 0 : index
    %c0_144 = arith.constant 0 : index
    %170 = vector.load %arg2[%c4_142, %c0_143, %c0_144] : memref<9x64x128xbf16, #tpu.memory_space<vmem>>, vector<1x64x128xbf16>
    %171 = vector.shape_cast %170 : vector<1x64x128xbf16> to vector<64x128xbf16>
    %cst_145 = arith.constant dense<0.000000e+00> : vector<16x128xf32>
    %172 = tpu.matmul %29, %171, %cst_145 {dimension_numbers = #tpu.dot_dimension_numbers<[1], [0], [0], [1], [0, 0, 1, 1], [], []>} : vector<16x64xbf16>, vector<64x128xbf16>, vector<16x128xf32> -> vector<16x128xf32>
    %173 = arith.addf %169, %172 : vector<16x128xf32>
    %c5_146 = arith.constant 5 : index
    %c0_147 = arith.constant 0 : index
    %c0_148 = arith.constant 0 : index
    %174 = vector.load %arg2[%c5_146, %c0_147, %c0_148] : memref<9x64x128xbf16, #tpu.memory_space<vmem>>, vector<1x64x128xbf16>
    %175 = vector.shape_cast %174 : vector<1x64x128xbf16> to vector<64x128xbf16>
    %cst_149 = arith.constant dense<0.000000e+00> : vector<16x128xf32>
    %176 = tpu.matmul %31, %175, %cst_149 {dimension_numbers = #tpu.dot_dimension_numbers<[1], [0], [0], [1], [0, 0, 1, 1], [], []>} : vector<16x64xbf16>, vector<64x128xbf16>, vector<16x128xf32> -> vector<16x128xf32>
    %177 = arith.addf %173, %176 : vector<16x128xf32>
    %c6_150 = arith.constant 6 : index
    %c0_151 = arith.constant 0 : index
    %c0_152 = arith.constant 0 : index
    %178 = vector.load %arg2[%c6_150, %c0_151, %c0_152] : memref<9x64x128xbf16, #tpu.memory_space<vmem>>, vector<1x64x128xbf16>
    %179 = vector.shape_cast %178 : vector<1x64x128xbf16> to vector<64x128xbf16>
    %cst_153 = arith.constant dense<0.000000e+00> : vector<16x128xf32>
    %180 = tpu.matmul %35, %179, %cst_153 {dimension_numbers = #tpu.dot_dimension_numbers<[1], [0], [0], [1], [0, 0, 1, 1], [], []>} : vector<16x64xbf16>, vector<64x128xbf16>, vector<16x128xf32> -> vector<16x128xf32>
    %181 = arith.addf %177, %180 : vector<16x128xf32>
    %c7_154 = arith.constant 7 : index
    %c0_155 = arith.constant 0 : index
    %c0_156 = arith.constant 0 : index
    %182 = vector.load %arg2[%c7_154, %c0_155, %c0_156] : memref<9x64x128xbf16, #tpu.memory_space<vmem>>, vector<1x64x128xbf16>
    %183 = vector.shape_cast %182 : vector<1x64x128xbf16> to vector<64x128xbf16>
    %cst_157 = arith.constant dense<0.000000e+00> : vector<16x128xf32>
    %184 = tpu.matmul %37, %183, %cst_157 {dimension_numbers = #tpu.dot_dimension_numbers<[1], [0], [0], [1], [0, 0, 1, 1], [], []>} : vector<16x64xbf16>, vector<64x128xbf16>, vector<16x128xf32> -> vector<16x128xf32>
    %185 = arith.addf %181, %184 : vector<16x128xf32>
    %c8_158 = arith.constant 8 : index
    %c0_159 = arith.constant 0 : index
    %c0_160 = arith.constant 0 : index
    %186 = vector.load %arg2[%c8_158, %c0_159, %c0_160] : memref<9x64x128xbf16, #tpu.memory_space<vmem>>, vector<1x64x128xbf16>
    %187 = vector.shape_cast %186 : vector<1x64x128xbf16> to vector<64x128xbf16>
    %cst_161 = arith.constant dense<0.000000e+00> : vector<16x128xf32>
    %188 = tpu.matmul %39, %187, %cst_161 {dimension_numbers = #tpu.dot_dimension_numbers<[1], [0], [0], [1], [0, 0, 1, 1], [], []>} : vector<16x64xbf16>, vector<64x128xbf16>, vector<16x128xf32> -> vector<16x128xf32>
    %189 = arith.addf %185, %188 : vector<16x128xf32>
    %190 = arith.maximumf %152, %189 : vector<16x128xf32>
    %c0_162 = arith.constant 0 : index
    %c0_163 = arith.constant 0 : index
    %191 = vector.load %arg3[%c0_162, %c0_163] : memref<1x128xf32, #tpu.memory_space<vmem>>, vector<1x128xf32>
    %192 = vector.broadcast %191 : vector<1x128xf32> to vector<16x128xf32>
    %193 = arith.addf %190, %192 : vector<16x128xf32>
    %cst_164 = arith.constant 0.000000e+00 : f32
    %194 = vector.broadcast %cst_164 : f32 to vector<16x128xf32>
    %195 = arith.maximumf %193, %194 : vector<16x128xf32>
    %196 = vector.shape_cast %195 : vector<16x128xf32> to vector<4x4x128xf32>
    %197 = arith.truncf %196 : vector<4x4x128xf32> to vector<4x4x128xbf16>
    %c0_165 = arith.constant 0 : index
    %c0_166 = arith.constant 0 : index
    %c0_167 = arith.constant 0 : index
    %c0_168 = arith.constant 0 : index
    %198 = vector.load %arg4[%c0_165, %c0_166, %c0_167, %c0_168] : memref<1x4x4x128xbf16, #tpu.memory_space<vmem>>, vector<1x4x4x128xbf16>
    %199 = vector.shape_cast %198 : vector<1x4x4x128xbf16> to vector<4x4x128xbf16>
    %200 = vector.shape_cast %197 : vector<4x4x128xbf16> to vector<1x4x4x128xbf16>
    tpu.vector_store %arg4[%c0_165, %c0_166, %c0_167, %c0_168], %200 {strides = array<i32>} : memref<1x4x4x128xbf16, #tpu.memory_space<vmem>>, vector<1x4x4x128xbf16>,
    return
  }
  func.func @transform_0(%arg0: i32) -> (i32, i32, i32, i32, i32, i32) {
    %c0_i32 = arith.constant 0 : i32
    %c0_i32_0 = arith.constant 0 : i32
    %c0_i32_1 = arith.constant 0 : i32
    %c0_i32_2 = arith.constant 0 : i32
    %c0_i32_3 = arith.constant 0 : i32
    %c0_i32_4 = arith.constant 0 : i32
    return %arg0, %c0_i32, %c0_i32_0, %c0_i32_1, %c0_i32_2, %c0_i32_3 : i32, i32, i32, i32, i32, i32
  }
  func.func @transform_1(%arg0: i32) -> (i32, i32, i32) {
    %c0_i32 = arith.constant 0 : i32
    %c0_i32_0 = arith.constant 0 : i32
    %c0_i32_1 = arith.constant 0 : i32
    %c0_i32_2 = arith.constant 0 : i32
    return %c0_i32, %c0_i32_0, %c0_i32_1 : i32, i32, i32
  }
  func.func @transform_2(%arg0: i32) -> (i32, i32) {
    %c0_i32 = arith.constant 0 : i32
    %c0_i32_0 = arith.constant 0 : i32
    %c0_i32_1 = arith.constant 0 : i32
    return %c0_i32, %c0_i32_0 : i32, i32
  }
  func.func @transform_3(%arg0: i32) -> (i32, i32, i32, i32) {
    %c0_i32 = arith.constant 0 : i32
    %c0_i32_0 = arith.constant 0 : i32
    %c0_i32_1 = arith.constant 0 : i32
    %c0_i32_2 = arith.constant 0 : i32
    return %arg0, %c0_i32, %c0_i32_0, %c0_i32_1 : i32, i32, i32, i32
  }
}

module attributes {stable_mosaic.version = 11 : i64} {
  func.func @kernel(%arg0: i32, %arg1: memref<1x2x2x3x3x128xbf16, #tpu.memory_space<vmem>>, %arg2: memref<9x128x256xbf16, #tpu.memory_space<vmem>>, %arg3: memref<1x256xf32, #tpu.memory_space<vmem>>, %arg4: memref<1x2x2x256xbf16, #tpu.memory_space<vmem>>) attributes {dimension_semantics = [#tpu.dimension_semantics<parallel>], iteration_bounds = array<i64: 2>, scalar_prefetch = 0 : i64, scratch_operands = 0 : i64, tpu.core_type = #tpu.core_type<tc>, window_params = [{transform_indices = @transform_0, window_bounds = array<i64: 1, 2, 2, 3, 3, 128>}, {pipeline_mode = #tpu.pipeline_mode<synchronous>, transform_indices = @transform_1, window_bounds = array<i64: 9, 128, 256>}, {pipeline_mode = #tpu.pipeline_mode<synchronous>, transform_indices = @transform_2, window_bounds = array<i64: 1, 256>}, {transform_indices = @transform_3, window_bounds = array<i64: 1, 2, 2, 256>}]} {
    %c0 = arith.constant 0 : index
    %c0_0 = arith.constant 0 : index
    %c0_1 = arith.constant 0 : index
    %c0_2 = arith.constant 0 : index
    %c0_3 = arith.constant 0 : index
    %c0_4 = arith.constant 0 : index
    %0 = vector.load %arg1[%c0, %c0_0, %c0_1, %c0_2, %c0_3, %c0_4] : memref<1x2x2x3x3x128xbf16, #tpu.memory_space<vmem>>, vector<1x1x1x3x3x128xbf16>
    %1 = vector.shape_cast %0 : vector<1x1x1x3x3x128xbf16> to vector<3x3x128xbf16>
    %c0_5 = arith.constant 0 : index
    %c0_6 = arith.constant 0 : index
    %c1 = arith.constant 1 : index
    %c0_7 = arith.constant 0 : index
    %c0_8 = arith.constant 0 : index
    %c0_9 = arith.constant 0 : index
    %2 = vector.load %arg1[%c0_5, %c0_6, %c1, %c0_7, %c0_8, %c0_9] : memref<1x2x2x3x3x128xbf16, #tpu.memory_space<vmem>>, vector<1x1x1x3x3x128xbf16>
    %3 = vector.shape_cast %2 : vector<1x1x1x3x3x128xbf16> to vector<3x3x128xbf16>
    %c0_10 = arith.constant 0 : index
    %c1_11 = arith.constant 1 : index
    %c0_12 = arith.constant 0 : index
    %c0_13 = arith.constant 0 : index
    %c0_14 = arith.constant 0 : index
    %c0_15 = arith.constant 0 : index
    %4 = vector.load %arg1[%c0_10, %c1_11, %c0_12, %c0_13, %c0_14, %c0_15] : memref<1x2x2x3x3x128xbf16, #tpu.memory_space<vmem>>, vector<1x1x1x3x3x128xbf16>
    %5 = vector.shape_cast %4 : vector<1x1x1x3x3x128xbf16> to vector<3x3x128xbf16>
    %c0_16 = arith.constant 0 : index
    %c1_17 = arith.constant 1 : index
    %c1_18 = arith.constant 1 : index
    %c0_19 = arith.constant 0 : index
    %c0_20 = arith.constant 0 : index
    %c0_21 = arith.constant 0 : index
    %6 = vector.load %arg1[%c0_16, %c1_17, %c1_18, %c0_19, %c0_20, %c0_21] : memref<1x2x2x3x3x128xbf16, #tpu.memory_space<vmem>>, vector<1x1x1x3x3x128xbf16>
    %7 = vector.shape_cast %6 : vector<1x1x1x3x3x128xbf16> to vector<3x3x128xbf16>
    %8 = vector.extract_strided_slice %1 {offsets = [0, 0, 0], sizes = [2, 2, 128], strides = [1, 1, 1]} : vector<3x3x128xbf16> to vector<2x2x128xbf16>
    %9 = vector.shape_cast %8 : vector<2x2x128xbf16> to vector<4x128xbf16>
    %10 = vector.extract_strided_slice %3 {offsets = [0, 0, 0], sizes = [2, 2, 128], strides = [1, 1, 1]} : vector<3x3x128xbf16> to vector<2x2x128xbf16>
    %11 = vector.shape_cast %10 : vector<2x2x128xbf16> to vector<4x128xbf16>
    %12 = vector.extract_strided_slice %1 {offsets = [0, 1, 0], sizes = [2, 2, 128], strides = [1, 1, 1]} : vector<3x3x128xbf16> to vector<2x2x128xbf16>
    %13 = vector.shape_cast %12 : vector<2x2x128xbf16> to vector<4x128xbf16>
    %14 = vector.extract_strided_slice %3 {offsets = [0, 1, 0], sizes = [2, 2, 128], strides = [1, 1, 1]} : vector<3x3x128xbf16> to vector<2x2x128xbf16>
    %15 = vector.shape_cast %14 : vector<2x2x128xbf16> to vector<4x128xbf16>
    %16 = vector.extract_strided_slice %5 {offsets = [0, 0, 0], sizes = [2, 2, 128], strides = [1, 1, 1]} : vector<3x3x128xbf16> to vector<2x2x128xbf16>
    %17 = vector.shape_cast %16 : vector<2x2x128xbf16> to vector<4x128xbf16>
    %18 = vector.extract_strided_slice %7 {offsets = [0, 0, 0], sizes = [2, 2, 128], strides = [1, 1, 1]} : vector<3x3x128xbf16> to vector<2x2x128xbf16>
    %19 = vector.shape_cast %18 : vector<2x2x128xbf16> to vector<4x128xbf16>
    %20 = vector.extract_strided_slice %5 {offsets = [0, 1, 0], sizes = [2, 2, 128], strides = [1, 1, 1]} : vector<3x3x128xbf16> to vector<2x2x128xbf16>
    %21 = vector.shape_cast %20 : vector<2x2x128xbf16> to vector<4x128xbf16>
    %22 = vector.extract_strided_slice %7 {offsets = [0, 1, 0], sizes = [2, 2, 128], strides = [1, 1, 1]} : vector<3x3x128xbf16> to vector<2x2x128xbf16>
    %23 = vector.shape_cast %22 : vector<2x2x128xbf16> to vector<4x128xbf16>
    %24 = vector.extract_strided_slice %1 {offsets = [1, 0, 0], sizes = [2, 2, 128], strides = [1, 1, 1]} : vector<3x3x128xbf16> to vector<2x2x128xbf16>
    %25 = vector.shape_cast %24 : vector<2x2x128xbf16> to vector<4x128xbf16>
    %26 = vector.extract_strided_slice %3 {offsets = [1, 0, 0], sizes = [2, 2, 128], strides = [1, 1, 1]} : vector<3x3x128xbf16> to vector<2x2x128xbf16>
    %27 = vector.shape_cast %26 : vector<2x2x128xbf16> to vector<4x128xbf16>
    %28 = vector.extract_strided_slice %1 {offsets = [1, 1, 0], sizes = [2, 2, 128], strides = [1, 1, 1]} : vector<3x3x128xbf16> to vector<2x2x128xbf16>
    %29 = vector.shape_cast %28 : vector<2x2x128xbf16> to vector<4x128xbf16>
    %30 = vector.extract_strided_slice %3 {offsets = [1, 1, 0], sizes = [2, 2, 128], strides = [1, 1, 1]} : vector<3x3x128xbf16> to vector<2x2x128xbf16>
    %31 = vector.shape_cast %30 : vector<2x2x128xbf16> to vector<4x128xbf16>
    %32 = vector.extract_strided_slice %5 {offsets = [1, 0, 0], sizes = [2, 2, 128], strides = [1, 1, 1]} : vector<3x3x128xbf16> to vector<2x2x128xbf16>
    %33 = vector.shape_cast %32 : vector<2x2x128xbf16> to vector<4x128xbf16>
    %34 = vector.extract_strided_slice %7 {offsets = [1, 0, 0], sizes = [2, 2, 128], strides = [1, 1, 1]} : vector<3x3x128xbf16> to vector<2x2x128xbf16>
    %35 = vector.shape_cast %34 : vector<2x2x128xbf16> to vector<4x128xbf16>
    %36 = vector.extract_strided_slice %5 {offsets = [1, 1, 0], sizes = [2, 2, 128], strides = [1, 1, 1]} : vector<3x3x128xbf16> to vector<2x2x128xbf16>
    %37 = vector.shape_cast %36 : vector<2x2x128xbf16> to vector<4x128xbf16>
    %38 = vector.extract_strided_slice %7 {offsets = [1, 1, 0], sizes = [2, 2, 128], strides = [1, 1, 1]} : vector<3x3x128xbf16> to vector<2x2x128xbf16>
    %39 = vector.shape_cast %38 : vector<2x2x128xbf16> to vector<4x128xbf16>
    %cst = arith.constant 0.000000e+00 : f32
    %40 = vector.broadcast %cst : f32 to vector<4x256xf32>
    %c0_22 = arith.constant 0 : index
    %c0_23 = arith.constant 0 : index
    %c0_24 = arith.constant 0 : index
    %41 = vector.load %arg2[%c0_22, %c0_23, %c0_24] : memref<9x128x256xbf16, #tpu.memory_space<vmem>>, vector<1x128x256xbf16>
    %42 = vector.shape_cast %41 : vector<1x128x256xbf16> to vector<128x256xbf16>
    %cst_25 = arith.constant dense<0.000000e+00> : vector<4x256xf32>
    %43 = tpu.matmul %9, %42, %cst_25 {dimension_numbers = #tpu.dot_dimension_numbers<[1], [0], [0], [1], [0, 0, 1, 1], [], []>} : vector<4x128xbf16>, vector<128x256xbf16>, vector<4x256xf32> -> vector<4x256xf32>
    %44 = arith.addf %40, %43 : vector<4x256xf32>
    %c1_26 = arith.constant 1 : index
    %c0_27 = arith.constant 0 : index
    %c0_28 = arith.constant 0 : index
    %45 = vector.load %arg2[%c1_26, %c0_27, %c0_28] : memref<9x128x256xbf16, #tpu.memory_space<vmem>>, vector<1x128x256xbf16>
    %46 = vector.shape_cast %45 : vector<1x128x256xbf16> to vector<128x256xbf16>
    %cst_29 = arith.constant dense<0.000000e+00> : vector<4x256xf32>
    %47 = tpu.matmul %11, %46, %cst_29 {dimension_numbers = #tpu.dot_dimension_numbers<[1], [0], [0], [1], [0, 0, 1, 1], [], []>} : vector<4x128xbf16>, vector<128x256xbf16>, vector<4x256xf32> -> vector<4x256xf32>
    %48 = arith.addf %44, %47 : vector<4x256xf32>
    %c2 = arith.constant 2 : index
    %c0_30 = arith.constant 0 : index
    %c0_31 = arith.constant 0 : index
    %49 = vector.load %arg2[%c2, %c0_30, %c0_31] : memref<9x128x256xbf16, #tpu.memory_space<vmem>>, vector<1x128x256xbf16>
    %50 = vector.shape_cast %49 : vector<1x128x256xbf16> to vector<128x256xbf16>
    %cst_32 = arith.constant dense<0.000000e+00> : vector<4x256xf32>
    %51 = tpu.matmul %13, %50, %cst_32 {dimension_numbers = #tpu.dot_dimension_numbers<[1], [0], [0], [1], [0, 0, 1, 1], [], []>} : vector<4x128xbf16>, vector<128x256xbf16>, vector<4x256xf32> -> vector<4x256xf32>
    %52 = arith.addf %48, %51 : vector<4x256xf32>
    %c3 = arith.constant 3 : index
    %c0_33 = arith.constant 0 : index
    %c0_34 = arith.constant 0 : index
    %53 = vector.load %arg2[%c3, %c0_33, %c0_34] : memref<9x128x256xbf16, #tpu.memory_space<vmem>>, vector<1x128x256xbf16>
    %54 = vector.shape_cast %53 : vector<1x128x256xbf16> to vector<128x256xbf16>
    %cst_35 = arith.constant dense<0.000000e+00> : vector<4x256xf32>
    %55 = tpu.matmul %17, %54, %cst_35 {dimension_numbers = #tpu.dot_dimension_numbers<[1], [0], [0], [1], [0, 0, 1, 1], [], []>} : vector<4x128xbf16>, vector<128x256xbf16>, vector<4x256xf32> -> vector<4x256xf32>
    %56 = arith.addf %52, %55 : vector<4x256xf32>
    %c4 = arith.constant 4 : index
    %c0_36 = arith.constant 0 : index
    %c0_37 = arith.constant 0 : index
    %57 = vector.load %arg2[%c4, %c0_36, %c0_37] : memref<9x128x256xbf16, #tpu.memory_space<vmem>>, vector<1x128x256xbf16>
    %58 = vector.shape_cast %57 : vector<1x128x256xbf16> to vector<128x256xbf16>
    %cst_38 = arith.constant dense<0.000000e+00> : vector<4x256xf32>
    %59 = tpu.matmul %19, %58, %cst_38 {dimension_numbers = #tpu.dot_dimension_numbers<[1], [0], [0], [1], [0, 0, 1, 1], [], []>} : vector<4x128xbf16>, vector<128x256xbf16>, vector<4x256xf32> -> vector<4x256xf32>
    %60 = arith.addf %56, %59 : vector<4x256xf32>
    %c5 = arith.constant 5 : index
    %c0_39 = arith.constant 0 : index
    %c0_40 = arith.constant 0 : index
    %61 = vector.load %arg2[%c5, %c0_39, %c0_40] : memref<9x128x256xbf16, #tpu.memory_space<vmem>>, vector<1x128x256xbf16>
    %62 = vector.shape_cast %61 : vector<1x128x256xbf16> to vector<128x256xbf16>
    %cst_41 = arith.constant dense<0.000000e+00> : vector<4x256xf32>
    %63 = tpu.matmul %21, %62, %cst_41 {dimension_numbers = #tpu.dot_dimension_numbers<[1], [0], [0], [1], [0, 0, 1, 1], [], []>} : vector<4x128xbf16>, vector<128x256xbf16>, vector<4x256xf32> -> vector<4x256xf32>
    %64 = arith.addf %60, %63 : vector<4x256xf32>
    %c6 = arith.constant 6 : index
    %c0_42 = arith.constant 0 : index
    %c0_43 = arith.constant 0 : index
    %65 = vector.load %arg2[%c6, %c0_42, %c0_43] : memref<9x128x256xbf16, #tpu.memory_space<vmem>>, vector<1x128x256xbf16>
    %66 = vector.shape_cast %65 : vector<1x128x256xbf16> to vector<128x256xbf16>
    %cst_44 = arith.constant dense<0.000000e+00> : vector<4x256xf32>
    %67 = tpu.matmul %25, %66, %cst_44 {dimension_numbers = #tpu.dot_dimension_numbers<[1], [0], [0], [1], [0, 0, 1, 1], [], []>} : vector<4x128xbf16>, vector<128x256xbf16>, vector<4x256xf32> -> vector<4x256xf32>
    %68 = arith.addf %64, %67 : vector<4x256xf32>
    %c7 = arith.constant 7 : index
    %c0_45 = arith.constant 0 : index
    %c0_46 = arith.constant 0 : index
    %69 = vector.load %arg2[%c7, %c0_45, %c0_46] : memref<9x128x256xbf16, #tpu.memory_space<vmem>>, vector<1x128x256xbf16>
    %70 = vector.shape_cast %69 : vector<1x128x256xbf16> to vector<128x256xbf16>
    %cst_47 = arith.constant dense<0.000000e+00> : vector<4x256xf32>
    %71 = tpu.matmul %27, %70, %cst_47 {dimension_numbers = #tpu.dot_dimension_numbers<[1], [0], [0], [1], [0, 0, 1, 1], [], []>} : vector<4x128xbf16>, vector<128x256xbf16>, vector<4x256xf32> -> vector<4x256xf32>
    %72 = arith.addf %68, %71 : vector<4x256xf32>
    %c8 = arith.constant 8 : index
    %c0_48 = arith.constant 0 : index
    %c0_49 = arith.constant 0 : index
    %73 = vector.load %arg2[%c8, %c0_48, %c0_49] : memref<9x128x256xbf16, #tpu.memory_space<vmem>>, vector<1x128x256xbf16>
    %74 = vector.shape_cast %73 : vector<1x128x256xbf16> to vector<128x256xbf16>
    %cst_50 = arith.constant dense<0.000000e+00> : vector<4x256xf32>
    %75 = tpu.matmul %29, %74, %cst_50 {dimension_numbers = #tpu.dot_dimension_numbers<[1], [0], [0], [1], [0, 0, 1, 1], [], []>} : vector<4x128xbf16>, vector<128x256xbf16>, vector<4x256xf32> -> vector<4x256xf32>
    %76 = arith.addf %72, %75 : vector<4x256xf32>
    %cst_51 = arith.constant 0.000000e+00 : f32
    %77 = vector.broadcast %cst_51 : f32 to vector<4x256xf32>
    %c0_52 = arith.constant 0 : index
    %c0_53 = arith.constant 0 : index
    %c0_54 = arith.constant 0 : index
    %78 = vector.load %arg2[%c0_52, %c0_53, %c0_54] : memref<9x128x256xbf16, #tpu.memory_space<vmem>>, vector<1x128x256xbf16>
    %79 = vector.shape_cast %78 : vector<1x128x256xbf16> to vector<128x256xbf16>
    %cst_55 = arith.constant dense<0.000000e+00> : vector<4x256xf32>
    %80 = tpu.matmul %11, %79, %cst_55 {dimension_numbers = #tpu.dot_dimension_numbers<[1], [0], [0], [1], [0, 0, 1, 1], [], []>} : vector<4x128xbf16>, vector<128x256xbf16>, vector<4x256xf32> -> vector<4x256xf32>
    %81 = arith.addf %77, %80 : vector<4x256xf32>
    %c1_56 = arith.constant 1 : index
    %c0_57 = arith.constant 0 : index
    %c0_58 = arith.constant 0 : index
    %82 = vector.load %arg2[%c1_56, %c0_57, %c0_58] : memref<9x128x256xbf16, #tpu.memory_space<vmem>>, vector<1x128x256xbf16>
    %83 = vector.shape_cast %82 : vector<1x128x256xbf16> to vector<128x256xbf16>
    %cst_59 = arith.constant dense<0.000000e+00> : vector<4x256xf32>
    %84 = tpu.matmul %13, %83, %cst_59 {dimension_numbers = #tpu.dot_dimension_numbers<[1], [0], [0], [1], [0, 0, 1, 1], [], []>} : vector<4x128xbf16>, vector<128x256xbf16>, vector<4x256xf32> -> vector<4x256xf32>
    %85 = arith.addf %81, %84 : vector<4x256xf32>
    %c2_60 = arith.constant 2 : index
    %c0_61 = arith.constant 0 : index
    %c0_62 = arith.constant 0 : index
    %86 = vector.load %arg2[%c2_60, %c0_61, %c0_62] : memref<9x128x256xbf16, #tpu.memory_space<vmem>>, vector<1x128x256xbf16>
    %87 = vector.shape_cast %86 : vector<1x128x256xbf16> to vector<128x256xbf16>
    %cst_63 = arith.constant dense<0.000000e+00> : vector<4x256xf32>
    %88 = tpu.matmul %15, %87, %cst_63 {dimension_numbers = #tpu.dot_dimension_numbers<[1], [0], [0], [1], [0, 0, 1, 1], [], []>} : vector<4x128xbf16>, vector<128x256xbf16>, vector<4x256xf32> -> vector<4x256xf32>
    %89 = arith.addf %85, %88 : vector<4x256xf32>
    %c3_64 = arith.constant 3 : index
    %c0_65 = arith.constant 0 : index
    %c0_66 = arith.constant 0 : index
    %90 = vector.load %arg2[%c3_64, %c0_65, %c0_66] : memref<9x128x256xbf16, #tpu.memory_space<vmem>>, vector<1x128x256xbf16>
    %91 = vector.shape_cast %90 : vector<1x128x256xbf16> to vector<128x256xbf16>
    %cst_67 = arith.constant dense<0.000000e+00> : vector<4x256xf32>
    %92 = tpu.matmul %19, %91, %cst_67 {dimension_numbers = #tpu.dot_dimension_numbers<[1], [0], [0], [1], [0, 0, 1, 1], [], []>} : vector<4x128xbf16>, vector<128x256xbf16>, vector<4x256xf32> -> vector<4x256xf32>
    %93 = arith.addf %89, %92 : vector<4x256xf32>
    %c4_68 = arith.constant 4 : index
    %c0_69 = arith.constant 0 : index
    %c0_70 = arith.constant 0 : index
    %94 = vector.load %arg2[%c4_68, %c0_69, %c0_70] : memref<9x128x256xbf16, #tpu.memory_space<vmem>>, vector<1x128x256xbf16>
    %95 = vector.shape_cast %94 : vector<1x128x256xbf16> to vector<128x256xbf16>
    %cst_71 = arith.constant dense<0.000000e+00> : vector<4x256xf32>
    %96 = tpu.matmul %21, %95, %cst_71 {dimension_numbers = #tpu.dot_dimension_numbers<[1], [0], [0], [1], [0, 0, 1, 1], [], []>} : vector<4x128xbf16>, vector<128x256xbf16>, vector<4x256xf32> -> vector<4x256xf32>
    %97 = arith.addf %93, %96 : vector<4x256xf32>
    %c5_72 = arith.constant 5 : index
    %c0_73 = arith.constant 0 : index
    %c0_74 = arith.constant 0 : index
    %98 = vector.load %arg2[%c5_72, %c0_73, %c0_74] : memref<9x128x256xbf16, #tpu.memory_space<vmem>>, vector<1x128x256xbf16>
    %99 = vector.shape_cast %98 : vector<1x128x256xbf16> to vector<128x256xbf16>
    %cst_75 = arith.constant dense<0.000000e+00> : vector<4x256xf32>
    %100 = tpu.matmul %23, %99, %cst_75 {dimension_numbers = #tpu.dot_dimension_numbers<[1], [0], [0], [1], [0, 0, 1, 1], [], []>} : vector<4x128xbf16>, vector<128x256xbf16>, vector<4x256xf32> -> vector<4x256xf32>
    %101 = arith.addf %97, %100 : vector<4x256xf32>
    %c6_76 = arith.constant 6 : index
    %c0_77 = arith.constant 0 : index
    %c0_78 = arith.constant 0 : index
    %102 = vector.load %arg2[%c6_76, %c0_77, %c0_78] : memref<9x128x256xbf16, #tpu.memory_space<vmem>>, vector<1x128x256xbf16>
    %103 = vector.shape_cast %102 : vector<1x128x256xbf16> to vector<128x256xbf16>
    %cst_79 = arith.constant dense<0.000000e+00> : vector<4x256xf32>
    %104 = tpu.matmul %27, %103, %cst_79 {dimension_numbers = #tpu.dot_dimension_numbers<[1], [0], [0], [1], [0, 0, 1, 1], [], []>} : vector<4x128xbf16>, vector<128x256xbf16>, vector<4x256xf32> -> vector<4x256xf32>
    %105 = arith.addf %101, %104 : vector<4x256xf32>
    %c7_80 = arith.constant 7 : index
    %c0_81 = arith.constant 0 : index
    %c0_82 = arith.constant 0 : index
    %106 = vector.load %arg2[%c7_80, %c0_81, %c0_82] : memref<9x128x256xbf16, #tpu.memory_space<vmem>>, vector<1x128x256xbf16>
    %107 = vector.shape_cast %106 : vector<1x128x256xbf16> to vector<128x256xbf16>
    %cst_83 = arith.constant dense<0.000000e+00> : vector<4x256xf32>
    %108 = tpu.matmul %29, %107, %cst_83 {dimension_numbers = #tpu.dot_dimension_numbers<[1], [0], [0], [1], [0, 0, 1, 1], [], []>} : vector<4x128xbf16>, vector<128x256xbf16>, vector<4x256xf32> -> vector<4x256xf32>
    %109 = arith.addf %105, %108 : vector<4x256xf32>
    %c8_84 = arith.constant 8 : index
    %c0_85 = arith.constant 0 : index
    %c0_86 = arith.constant 0 : index
    %110 = vector.load %arg2[%c8_84, %c0_85, %c0_86] : memref<9x128x256xbf16, #tpu.memory_space<vmem>>, vector<1x128x256xbf16>
    %111 = vector.shape_cast %110 : vector<1x128x256xbf16> to vector<128x256xbf16>
    %cst_87 = arith.constant dense<0.000000e+00> : vector<4x256xf32>
    %112 = tpu.matmul %31, %111, %cst_87 {dimension_numbers = #tpu.dot_dimension_numbers<[1], [0], [0], [1], [0, 0, 1, 1], [], []>} : vector<4x128xbf16>, vector<128x256xbf16>, vector<4x256xf32> -> vector<4x256xf32>
    %113 = arith.addf %109, %112 : vector<4x256xf32>
    %114 = arith.maximumf %76, %113 : vector<4x256xf32>
    %cst_88 = arith.constant 0.000000e+00 : f32
    %115 = vector.broadcast %cst_88 : f32 to vector<4x256xf32>
    %c0_89 = arith.constant 0 : index
    %c0_90 = arith.constant 0 : index
    %c0_91 = arith.constant 0 : index
    %116 = vector.load %arg2[%c0_89, %c0_90, %c0_91] : memref<9x128x256xbf16, #tpu.memory_space<vmem>>, vector<1x128x256xbf16>
    %117 = vector.shape_cast %116 : vector<1x128x256xbf16> to vector<128x256xbf16>
    %cst_92 = arith.constant dense<0.000000e+00> : vector<4x256xf32>
    %118 = tpu.matmul %17, %117, %cst_92 {dimension_numbers = #tpu.dot_dimension_numbers<[1], [0], [0], [1], [0, 0, 1, 1], [], []>} : vector<4x128xbf16>, vector<128x256xbf16>, vector<4x256xf32> -> vector<4x256xf32>
    %119 = arith.addf %115, %118 : vector<4x256xf32>
    %c1_93 = arith.constant 1 : index
    %c0_94 = arith.constant 0 : index
    %c0_95 = arith.constant 0 : index
    %120 = vector.load %arg2[%c1_93, %c0_94, %c0_95] : memref<9x128x256xbf16, #tpu.memory_space<vmem>>, vector<1x128x256xbf16>
    %121 = vector.shape_cast %120 : vector<1x128x256xbf16> to vector<128x256xbf16>
    %cst_96 = arith.constant dense<0.000000e+00> : vector<4x256xf32>
    %122 = tpu.matmul %19, %121, %cst_96 {dimension_numbers = #tpu.dot_dimension_numbers<[1], [0], [0], [1], [0, 0, 1, 1], [], []>} : vector<4x128xbf16>, vector<128x256xbf16>, vector<4x256xf32> -> vector<4x256xf32>
    %123 = arith.addf %119, %122 : vector<4x256xf32>
    %c2_97 = arith.constant 2 : index
    %c0_98 = arith.constant 0 : index
    %c0_99 = arith.constant 0 : index
    %124 = vector.load %arg2[%c2_97, %c0_98, %c0_99] : memref<9x128x256xbf16, #tpu.memory_space<vmem>>, vector<1x128x256xbf16>
    %125 = vector.shape_cast %124 : vector<1x128x256xbf16> to vector<128x256xbf16>
    %cst_100 = arith.constant dense<0.000000e+00> : vector<4x256xf32>
    %126 = tpu.matmul %21, %125, %cst_100 {dimension_numbers = #tpu.dot_dimension_numbers<[1], [0], [0], [1], [0, 0, 1, 1], [], []>} : vector<4x128xbf16>, vector<128x256xbf16>, vector<4x256xf32> -> vector<4x256xf32>
    %127 = arith.addf %123, %126 : vector<4x256xf32>
    %c3_101 = arith.constant 3 : index
    %c0_102 = arith.constant 0 : index
    %c0_103 = arith.constant 0 : index
    %128 = vector.load %arg2[%c3_101, %c0_102, %c0_103] : memref<9x128x256xbf16, #tpu.memory_space<vmem>>, vector<1x128x256xbf16>
    %129 = vector.shape_cast %128 : vector<1x128x256xbf16> to vector<128x256xbf16>
    %cst_104 = arith.constant dense<0.000000e+00> : vector<4x256xf32>
    %130 = tpu.matmul %25, %129, %cst_104 {dimension_numbers = #tpu.dot_dimension_numbers<[1], [0], [0], [1], [0, 0, 1, 1], [], []>} : vector<4x128xbf16>, vector<128x256xbf16>, vector<4x256xf32> -> vector<4x256xf32>
    %131 = arith.addf %127, %130 : vector<4x256xf32>
    %c4_105 = arith.constant 4 : index
    %c0_106 = arith.constant 0 : index
    %c0_107 = arith.constant 0 : index
    %132 = vector.load %arg2[%c4_105, %c0_106, %c0_107] : memref<9x128x256xbf16, #tpu.memory_space<vmem>>, vector<1x128x256xbf16>
    %133 = vector.shape_cast %132 : vector<1x128x256xbf16> to vector<128x256xbf16>
    %cst_108 = arith.constant dense<0.000000e+00> : vector<4x256xf32>
    %134 = tpu.matmul %27, %133, %cst_108 {dimension_numbers = #tpu.dot_dimension_numbers<[1], [0], [0], [1], [0, 0, 1, 1], [], []>} : vector<4x128xbf16>, vector<128x256xbf16>, vector<4x256xf32> -> vector<4x256xf32>
    %135 = arith.addf %131, %134 : vector<4x256xf32>
    %c5_109 = arith.constant 5 : index
    %c0_110 = arith.constant 0 : index
    %c0_111 = arith.constant 0 : index
    %136 = vector.load %arg2[%c5_109, %c0_110, %c0_111] : memref<9x128x256xbf16, #tpu.memory_space<vmem>>, vector<1x128x256xbf16>
    %137 = vector.shape_cast %136 : vector<1x128x256xbf16> to vector<128x256xbf16>
    %cst_112 = arith.constant dense<0.000000e+00> : vector<4x256xf32>
    %138 = tpu.matmul %29, %137, %cst_112 {dimension_numbers = #tpu.dot_dimension_numbers<[1], [0], [0], [1], [0, 0, 1, 1], [], []>} : vector<4x128xbf16>, vector<128x256xbf16>, vector<4x256xf32> -> vector<4x256xf32>
    %139 = arith.addf %135, %138 : vector<4x256xf32>
    %c6_113 = arith.constant 6 : index
    %c0_114 = arith.constant 0 : index
    %c0_115 = arith.constant 0 : index
    %140 = vector.load %arg2[%c6_113, %c0_114, %c0_115] : memref<9x128x256xbf16, #tpu.memory_space<vmem>>, vector<1x128x256xbf16>
    %141 = vector.shape_cast %140 : vector<1x128x256xbf16> to vector<128x256xbf16>
    %cst_116 = arith.constant dense<0.000000e+00> : vector<4x256xf32>
    %142 = tpu.matmul %33, %141, %cst_116 {dimension_numbers = #tpu.dot_dimension_numbers<[1], [0], [0], [1], [0, 0, 1, 1], [], []>} : vector<4x128xbf16>, vector<128x256xbf16>, vector<4x256xf32> -> vector<4x256xf32>
    %143 = arith.addf %139, %142 : vector<4x256xf32>
    %c7_117 = arith.constant 7 : index
    %c0_118 = arith.constant 0 : index
    %c0_119 = arith.constant 0 : index
    %144 = vector.load %arg2[%c7_117, %c0_118, %c0_119] : memref<9x128x256xbf16, #tpu.memory_space<vmem>>, vector<1x128x256xbf16>
    %145 = vector.shape_cast %144 : vector<1x128x256xbf16> to vector<128x256xbf16>
    %cst_120 = arith.constant dense<0.000000e+00> : vector<4x256xf32>
    %146 = tpu.matmul %35, %145, %cst_120 {dimension_numbers = #tpu.dot_dimension_numbers<[1], [0], [0], [1], [0, 0, 1, 1], [], []>} : vector<4x128xbf16>, vector<128x256xbf16>, vector<4x256xf32> -> vector<4x256xf32>
    %147 = arith.addf %143, %146 : vector<4x256xf32>
    %c8_121 = arith.constant 8 : index
    %c0_122 = arith.constant 0 : index
    %c0_123 = arith.constant 0 : index
    %148 = vector.load %arg2[%c8_121, %c0_122, %c0_123] : memref<9x128x256xbf16, #tpu.memory_space<vmem>>, vector<1x128x256xbf16>
    %149 = vector.shape_cast %148 : vector<1x128x256xbf16> to vector<128x256xbf16>
    %cst_124 = arith.constant dense<0.000000e+00> : vector<4x256xf32>
    %150 = tpu.matmul %37, %149, %cst_124 {dimension_numbers = #tpu.dot_dimension_numbers<[1], [0], [0], [1], [0, 0, 1, 1], [], []>} : vector<4x128xbf16>, vector<128x256xbf16>, vector<4x256xf32> -> vector<4x256xf32>
    %151 = arith.addf %147, %150 : vector<4x256xf32>
    %152 = arith.maximumf %114, %151 : vector<4x256xf32>
    %cst_125 = arith.constant 0.000000e+00 : f32
    %153 = vector.broadcast %cst_125 : f32 to vector<4x256xf32>
    %c0_126 = arith.constant 0 : index
    %c0_127 = arith.constant 0 : index
    %c0_128 = arith.constant 0 : index
    %154 = vector.load %arg2[%c0_126, %c0_127, %c0_128] : memref<9x128x256xbf16, #tpu.memory_space<vmem>>, vector<1x128x256xbf16>
    %155 = vector.shape_cast %154 : vector<1x128x256xbf16> to vector<128x256xbf16>
    %cst_129 = arith.constant dense<0.000000e+00> : vector<4x256xf32>
    %156 = tpu.matmul %19, %155, %cst_129 {dimension_numbers = #tpu.dot_dimension_numbers<[1], [0], [0], [1], [0, 0, 1, 1], [], []>} : vector<4x128xbf16>, vector<128x256xbf16>, vector<4x256xf32> -> vector<4x256xf32>
    %157 = arith.addf %153, %156 : vector<4x256xf32>
    %c1_130 = arith.constant 1 : index
    %c0_131 = arith.constant 0 : index
    %c0_132 = arith.constant 0 : index
    %158 = vector.load %arg2[%c1_130, %c0_131, %c0_132] : memref<9x128x256xbf16, #tpu.memory_space<vmem>>, vector<1x128x256xbf16>
    %159 = vector.shape_cast %158 : vector<1x128x256xbf16> to vector<128x256xbf16>
    %cst_133 = arith.constant dense<0.000000e+00> : vector<4x256xf32>
    %160 = tpu.matmul %21, %159, %cst_133 {dimension_numbers = #tpu.dot_dimension_numbers<[1], [0], [0], [1], [0, 0, 1, 1], [], []>} : vector<4x128xbf16>, vector<128x256xbf16>, vector<4x256xf32> -> vector<4x256xf32>
    %161 = arith.addf %157, %160 : vector<4x256xf32>
    %c2_134 = arith.constant 2 : index
    %c0_135 = arith.constant 0 : index
    %c0_136 = arith.constant 0 : index
    %162 = vector.load %arg2[%c2_134, %c0_135, %c0_136] : memref<9x128x256xbf16, #tpu.memory_space<vmem>>, vector<1x128x256xbf16>
    %163 = vector.shape_cast %162 : vector<1x128x256xbf16> to vector<128x256xbf16>
    %cst_137 = arith.constant dense<0.000000e+00> : vector<4x256xf32>
    %164 = tpu.matmul %23, %163, %cst_137 {dimension_numbers = #tpu.dot_dimension_numbers<[1], [0], [0], [1], [0, 0, 1, 1], [], []>} : vector<4x128xbf16>, vector<128x256xbf16>, vector<4x256xf32> -> vector<4x256xf32>
    %165 = arith.addf %161, %164 : vector<4x256xf32>
    %c3_138 = arith.constant 3 : index
    %c0_139 = arith.constant 0 : index
    %c0_140 = arith.constant 0 : index
    %166 = vector.load %arg2[%c3_138, %c0_139, %c0_140] : memref<9x128x256xbf16, #tpu.memory_space<vmem>>, vector<1x128x256xbf16>
    %167 = vector.shape_cast %166 : vector<1x128x256xbf16> to vector<128x256xbf16>
    %cst_141 = arith.constant dense<0.000000e+00> : vector<4x256xf32>
    %168 = tpu.matmul %27, %167, %cst_141 {dimension_numbers = #tpu.dot_dimension_numbers<[1], [0], [0], [1], [0, 0, 1, 1], [], []>} : vector<4x128xbf16>, vector<128x256xbf16>, vector<4x256xf32> -> vector<4x256xf32>
    %169 = arith.addf %165, %168 : vector<4x256xf32>
    %c4_142 = arith.constant 4 : index
    %c0_143 = arith.constant 0 : index
    %c0_144 = arith.constant 0 : index
    %170 = vector.load %arg2[%c4_142, %c0_143, %c0_144] : memref<9x128x256xbf16, #tpu.memory_space<vmem>>, vector<1x128x256xbf16>
    %171 = vector.shape_cast %170 : vector<1x128x256xbf16> to vector<128x256xbf16>
    %cst_145 = arith.constant dense<0.000000e+00> : vector<4x256xf32>
    %172 = tpu.matmul %29, %171, %cst_145 {dimension_numbers = #tpu.dot_dimension_numbers<[1], [0], [0], [1], [0, 0, 1, 1], [], []>} : vector<4x128xbf16>, vector<128x256xbf16>, vector<4x256xf32> -> vector<4x256xf32>
    %173 = arith.addf %169, %172 : vector<4x256xf32>
    %c5_146 = arith.constant 5 : index
    %c0_147 = arith.constant 0 : index
    %c0_148 = arith.constant 0 : index
    %174 = vector.load %arg2[%c5_146, %c0_147, %c0_148] : memref<9x128x256xbf16, #tpu.memory_space<vmem>>, vector<1x128x256xbf16>
    %175 = vector.shape_cast %174 : vector<1x128x256xbf16> to vector<128x256xbf16>
    %cst_149 = arith.constant dense<0.000000e+00> : vector<4x256xf32>
    %176 = tpu.matmul %31, %175, %cst_149 {dimension_numbers = #tpu.dot_dimension_numbers<[1], [0], [0], [1], [0, 0, 1, 1], [], []>} : vector<4x128xbf16>, vector<128x256xbf16>, vector<4x256xf32> -> vector<4x256xf32>
    %177 = arith.addf %173, %176 : vector<4x256xf32>
    %c6_150 = arith.constant 6 : index
    %c0_151 = arith.constant 0 : index
    %c0_152 = arith.constant 0 : index
    %178 = vector.load %arg2[%c6_150, %c0_151, %c0_152] : memref<9x128x256xbf16, #tpu.memory_space<vmem>>, vector<1x128x256xbf16>
    %179 = vector.shape_cast %178 : vector<1x128x256xbf16> to vector<128x256xbf16>
    %cst_153 = arith.constant dense<0.000000e+00> : vector<4x256xf32>
    %180 = tpu.matmul %35, %179, %cst_153 {dimension_numbers = #tpu.dot_dimension_numbers<[1], [0], [0], [1], [0, 0, 1, 1], [], []>} : vector<4x128xbf16>, vector<128x256xbf16>, vector<4x256xf32> -> vector<4x256xf32>
    %181 = arith.addf %177, %180 : vector<4x256xf32>
    %c7_154 = arith.constant 7 : index
    %c0_155 = arith.constant 0 : index
    %c0_156 = arith.constant 0 : index
    %182 = vector.load %arg2[%c7_154, %c0_155, %c0_156] : memref<9x128x256xbf16, #tpu.memory_space<vmem>>, vector<1x128x256xbf16>
    %183 = vector.shape_cast %182 : vector<1x128x256xbf16> to vector<128x256xbf16>
    %cst_157 = arith.constant dense<0.000000e+00> : vector<4x256xf32>
    %184 = tpu.matmul %37, %183, %cst_157 {dimension_numbers = #tpu.dot_dimension_numbers<[1], [0], [0], [1], [0, 0, 1, 1], [], []>} : vector<4x128xbf16>, vector<128x256xbf16>, vector<4x256xf32> -> vector<4x256xf32>
    %185 = arith.addf %181, %184 : vector<4x256xf32>
    %c8_158 = arith.constant 8 : index
    %c0_159 = arith.constant 0 : index
    %c0_160 = arith.constant 0 : index
    %186 = vector.load %arg2[%c8_158, %c0_159, %c0_160] : memref<9x128x256xbf16, #tpu.memory_space<vmem>>, vector<1x128x256xbf16>
    %187 = vector.shape_cast %186 : vector<1x128x256xbf16> to vector<128x256xbf16>
    %cst_161 = arith.constant dense<0.000000e+00> : vector<4x256xf32>
    %188 = tpu.matmul %39, %187, %cst_161 {dimension_numbers = #tpu.dot_dimension_numbers<[1], [0], [0], [1], [0, 0, 1, 1], [], []>} : vector<4x128xbf16>, vector<128x256xbf16>, vector<4x256xf32> -> vector<4x256xf32>
    %189 = arith.addf %185, %188 : vector<4x256xf32>
    %190 = arith.maximumf %152, %189 : vector<4x256xf32>
    %c0_162 = arith.constant 0 : index
    %c0_163 = arith.constant 0 : index
    %191 = vector.load %arg3[%c0_162, %c0_163] : memref<1x256xf32, #tpu.memory_space<vmem>>, vector<1x256xf32>
    %192 = vector.broadcast %191 : vector<1x256xf32> to vector<4x256xf32>
    %193 = arith.addf %190, %192 : vector<4x256xf32>
    %cst_164 = arith.constant 0.000000e+00 : f32
    %194 = vector.broadcast %cst_164 : f32 to vector<4x256xf32>
    %195 = arith.maximumf %193, %194 : vector<4x256xf32>
    %196 = vector.shape_cast %195 : vector<4x256xf32> to vector<2x2x256xf32>
    %197 = arith.truncf %196 : vector<2x2x256xf32> to vector<2x2x256xbf16>
    %c0_165 = arith.constant 0 : index
    %c0_166 = arith.constant 0 : index
    %c0_167 = arith.constant 0 : index
    %c0_168 = arith.constant 0 : index
    %198 = vector.load %arg4[%c0_165, %c0_166, %c0_167, %c0_168] : memref<1x2x2x256xbf16, #tpu.memory_space<vmem>>, vector<1x2x2x256xbf16>
    %199 = vector.shape_cast %198 : vector<1x2x2x256xbf16> to vector<2x2x256xbf16>
    %200 = vector.shape_cast %197 : vector<2x2x256xbf16> to vector<1x2x2x256xbf16>
    tpu.vector_store %arg4[%c0_165, %c0_166, %c0_167, %c0_168], %200 {strides = array<i32>} : memref<1x2x2x256xbf16, #tpu.memory_space<vmem>>, vector<1x2x2x256xbf16>,
    return
  }
  func.func @transform_0(%arg0: i32) -> (i32, i32, i32, i32, i32, i32) {
    %c0_i32 = arith.constant 0 : i32
    %c0_i32_0 = arith.constant 0 : i32
    %c0_i32_1 = arith.constant 0 : i32
    %c0_i32_2 = arith.constant 0 : i32
    %c0_i32_3 = arith.constant 0 : i32
    %c0_i32_4 = arith.constant 0 : i32
    return %arg0, %c0_i32, %c0_i32_0, %c0_i32_1, %c0_i32_2, %c0_i32_3 : i32, i32, i32, i32, i32, i32
  }
  func.func @transform_1(%arg0: i32) -> (i32, i32, i32) {
    %c0_i32 = arith.constant 0 : i32
    %c0_i32_0 = arith.constant 0 : i32
    %c0_i32_1 = arith.constant 0 : i32
    %c0_i32_2 = arith.constant 0 : i32
    return %c0_i32, %c0_i32_0, %c0_i32_1 : i32, i32, i32
  }
  func.func @transform_2(%arg0: i32) -> (i32, i32) {
    %c0_i32 = arith.constant 0 : i32
    %c0_i32_0 = arith.constant 0 : i32
    %c0_i32_1 = arith.constant 0 : i32
    return %c0_i32, %c0_i32_0 : i32, i32
  }
  func.func @transform_3(%arg0: i32) -> (i32, i32, i32, i32) {
    %c0_i32 = arith.constant 0 : i32
    %c0_i32_0 = arith.constant 0 : i32
    %c0_i32_1 = arith.constant 0 : i32
    %c0_i32_2 = arith.constant 0 : i32
    return %arg0, %c0_i32, %c0_i32_0, %c0_i32_1 : i32, i32, i32, i32
  }
}

</mosaic_0001>

<bundles_post_ra>
// kernel: embedding_net_forward.4
= control target key start
LH: loop header
LB: loop body
LE: loop exit
PB: predicated region body
PF: predicated region fallthrough
CT: control target
= control target key end

     0   :  { %s3153_s12 = smov 0   ;;  %s3155_s13 = smov 0   ;;  %s3813_s0 = inlined_call_operand.vmem [shape: bf16[4,512,9], index: 0, kind: input, shape index: {}]   ;;  %s3814_s1 = inlined_call_operand.vmem [shape: bf16[9,128], index: 1, kind: input, shape index: {}]   ;;  %s3815_s2 = inlined_call_operand.vmem [shape: f32[1,128], index: 2, kind: input, shape index: {}]   ;;  %s3816_s3 = inlined_call_operand.vmem [shape: bf16[512,128], index: 3, kind: output, shape index: {}]  }
   0x1   :  { %s3157_s14 = smov 0  }
   0x2 LB: > { %s2415_s15 = sadd.s32 4294967295, %s3130_s14   ;;  %s3170_s16 = sadd.s32 1, %s3130_s14   ;;  %s3130_s14 = sphi %s3157_s14, %s3902_s14   ;;  %s3126_s13 = sphi %s3155_s13, %s3901_s13   ;;  %s3122_s12 = sphi %s3153_s12, %s3900_s12  }
   0x3   : > { %s17_s17 = ssub.s32 %s3130_s14, %s3170_s16  ;;  %s20_s18 = sadd.s32 1, %s3126_s13 }
   0x4   : > { %p18_p0 = scmp.eq.s32.totalorder %s17_s17, 0  ;;  %p27_p1 = scmp.ne.s32.totalorder %s3126_s13, %s3122_s12 }
   0x5   : > { %p28_p2 = scmp.eq.s32.totalorder %s3130_s14, 0  ;;  %p2418_p4 = scmp.ge.s32.totalorder %s3130_s14, 2 }
   0x6   : > { %s3179_s19 = scalar_select %p18_p0, %s3126_s13, %s20_s18  }
   0x7   : > { %p29_p3 = por %p28_p2, %p27_p1  ;;  %127 = sbr.rel (%p2418_p4) target bundleno = 50 (0x32), region = 24 }
   0xe   : > { %130 = sbr.rel (!%p29_p3) target bundleno = 50 (0x32), region = 28  ;;  %s132_s20 = sand.u32 (%p29_p3), 1, %s3126_s13  }
   0xf   : > { %s2686_s21 = sshll.u32 (%p29_p3), %s3130_s14, 7  ;;  %s2419_s22 = sshll.u32 (%p29_p3), %s132_s20, 9 }
  0x10   : > { %s3187_s25 = scalar_lea.vmem (%p29_p3), %s3813_s0, %s2686_s21  ;;  %s3192_s26 = scalar_lea.vmem (%p29_p3), [#allocation2], %s2419_s22 }
  0x11   : > { %v153_v0 = vld [vmem:[%s3187_s25] sm:$0xff] (%p29_p3)   ;;  %v157_v1 = vld [vmem:[%s3187_s25 + $0x8] sm:$0xff] (%p29_p3)   ;;  %v161_v2 = vld [vmem:[%s3187_s25 + $0x10] sm:$0xff] (%p29_p3)  }
  0x12   : > { %154 = vst [vmem:[%s3192_s26] sm:$0xff] (%p29_p3), %v153_v0   ;;  %158 = vst [vmem:[%s3192_s26 + $0x8] sm:$0xff] (%p29_p3), %v157_v1   ;;  %v165_v3 = vld [vmem:[%s3187_s25 + $0x18] sm:$0xff] (%p29_p3)   ;;  %v169_v4 = vld [vmem:[%s3187_s25 + $0x20] sm:$0xff] (%p29_p3)  }
  0x13   : > { %162 = vst [vmem:[%s3192_s26 + $0x10] sm:$0xff] (%p29_p3), %v161_v2   ;;  %v173_v5 = vld [vmem:[%s3187_s25 + $0x28] sm:$0xff] (%p29_p3)   ;;  %166 = vst [vmem:[%s3192_s26 + $0x18] sm:$0xff] (%p29_p3), %v165_v3   ;;  %v177_v6 = vld [vmem:[%s3187_s25 + $0x30] sm:$0xff] (%p29_p3)  }
  0x14   : > { %170 = vst [vmem:[%s3192_s26 + $0x20] sm:$0xff] (%p29_p3), %v169_v4   ;;  %174 = vst [vmem:[%s3192_s26 + $0x28] sm:$0xff] (%p29_p3), %v173_v5   ;;  %v181_v7 = vld [vmem:[%s3187_s25 + $0x38] sm:$0xff] (%p29_p3)   ;;  %v185_v8 = vld [vmem:[%s3187_s25 + $0x40] sm:$0xff] (%p29_p3)  }
  0x15   : > { %178 = vst [vmem:[%s3192_s26 + $0x30] sm:$0xff] %v177_v6   ;;  %182 = vst [vmem:[%s3192_s26 + $0x38] sm:$0xff] %v181_v7   ;;  %v189_v9 = vld [vmem:[%s3187_s25 + $0x48] sm:$0xff]   ;;  %v193_v10 = vld [vmem:[%s3187_s25 + $0x50] sm:$0xff]  }
  0x16   : > { %186 = vst [vmem:[%s3192_s26 + $0x40] sm:$0xff] %v185_v8   ;;  %v197_v11 = vld [vmem:[%s3187_s25 + $0x58] sm:$0xff]   ;;  %190 = vst [vmem:[%s3192_s26 + $0x48] sm:$0xff] %v189_v9   ;;  %v201_v12 = vld [vmem:[%s3187_s25 + $0x60] sm:$0xff]  }
  0x17   : > { %194 = vst [vmem:[%s3192_s26 + $0x50] sm:$0xff] %v193_v10   ;;  %198 = vst [vmem:[%s3192_s26 + $0x58] sm:$0xff] %v197_v11   ;;  %v205_v13 = vld [vmem:[%s3187_s25 + $0x68] sm:$0xff]   ;;  %v209_v14 = vld [vmem:[%s3187_s25 + $0x70] sm:$0xff]  }
  0x18   : > { %202 = vst [vmem:[%s3192_s26 + $0x60] sm:$0xff] %v201_v12   ;;  %206 = vst [vmem:[%s3192_s26 + $0x68] sm:$0xff] %v205_v13   ;;  %v213_v15 = vld [vmem:[%s3187_s25 + $0x78] sm:$0xff]   ;;  %v217_v16 = vld [vmem:[%s3187_s25 + $0x100] sm:$0xff]  }
  0x19   : > { %210 = vst [vmem:[%s3192_s26 + $0x70] sm:$0xff] %v209_v14   ;;  %v221_v17 = vld [vmem:[%s3187_s25 + $0x108] sm:$0xff]   ;;  %214 = vst [vmem:[%s3192_s26 + $0x78] sm:$0xff] %v213_v15   ;;  %v225_v18 = vld [vmem:[%s3187_s25 + $0x110] sm:$0xff]  }
  0x1a   : > { %218 = vst [vmem:[%s3192_s26 + $0x80] sm:$0xff] %v217_v16   ;;  %222 = vst [vmem:[%s3192_s26 + $0x88] sm:$0xff] %v221_v17   ;;  %v229_v19 = vld [vmem:[%s3187_s25 + $0x118] sm:$0xff]   ;;  %v233_v20 = vld [vmem:[%s3187_s25 + $0x120] sm:$0xff]  }
  0x1b   : > { %226 = vst [vmem:[%s3192_s26 + $0x90] sm:$0xff] %v225_v18   ;;  %230 = vst [vmem:[%s3192_s26 + $0x98] sm:$0xff] %v229_v19   ;;  %v237_v21 = vld [vmem:[%s3187_s25 + $0x128] sm:$0xff]   ;;  %v241_v22 = vld [vmem:[%s3187_s25 + $0x130] sm:$0xff]  }
  0x1c   : > { %234 = vst [vmem:[%s3192_s26 + $0xa0] sm:$0xff] %v233_v20   ;;  %v245_v23 = vld [vmem:[%s3187_s25 + $0x138] sm:$0xff]   ;;  %238 = vst [vmem:[%s3192_s26 + $0xa8] sm:$0xff] %v237_v21   ;;  %v249_v24 = vld [vmem:[%s3187_s25 + $0x140] sm:$0xff]  }
  0x1d   : > { %242 = vst [vmem:[%s3192_s26 + $0xb0] sm:$0xff] %v241_v22   ;;  %246 = vst [vmem:[%s3192_s26 + $0xb8] sm:$0xff] %v245_v23   ;;  %v253_v25 = vld [vmem:[%s3187_s25 + $0x148] sm:$0xff]   ;;  %v257_v26 = vld [vmem:[%s3187_s25 + $0x150] sm:$0xff]  }
  0x1e   : > { %250 = vst [vmem:[%s3192_s26 + $0xc0] sm:$0xff] %v249_v24   ;;  %254 = vst [vmem:[%s3192_s26 + $0xc8] sm:$0xff] %v253_v25   ;;  %v261_v27 = vld [vmem:[%s3187_s25 + $0x158] sm:$0xff]   ;;  %v265_v28 = vld [vmem:[%s3187_s25 + $0x160] sm:$0xff]  }
  0x1f   : > { %258 = vst [vmem:[%s3192_s26 + $0xd0] sm:$0xff] %v257_v26   ;;  %v269_v29 = vld [vmem:[%s3187_s25 + $0x168] sm:$0xff]   ;;  %262 = vst [vmem:[%s3192_s26 + $0xd8] sm:$0xff] %v261_v27   ;;  %v273_v30 = vld [vmem:[%s3187_s25 + $0x170] sm:$0xff]  }
  0x20   : > { %266 = vst [vmem:[%s3192_s26 + $0xe0] sm:$0xff] %v265_v28   ;;  %270 = vst [vmem:[%s3192_s26 + $0xe8] sm:$0xff] %v269_v29   ;;  %v277_v31 = vld [vmem:[%s3187_s25 + $0x178] sm:$0xff]   ;;  %v281_v32 = vld [vmem:[%s3187_s25 + $0x200] sm:$0xff]  }
  0x21   : > { %274 = vst [vmem:[%s3192_s26 + $0xf0] sm:$0xff] %v273_v30   ;;  %278 = vst [vmem:[%s3192_s26 + $0xf8] sm:$0xff] %v277_v31   ;;  %v285_v33 = vld [vmem:[%s3187_s25 + $0x208] sm:$0xff]   ;;  %v289_v34 = vld [vmem:[%s3187_s25 + $0x210] sm:$0xff]  }
  0x22   : > { %282 = vst [vmem:[%s3192_s26 + $0x100] sm:$0xff] %v281_v32   ;;  %v293_v35 = vld [vmem:[%s3187_s25 + $0x218] sm:$0xff]   ;;  %286 = vst [vmem:[%s3192_s26 + $0x108] sm:$0xff] %v285_v33   ;;  %v297_v36 = vld [vmem:[%s3187_s25 + $0x220] sm:$0xff]  }
  0x23   : > { %290 = vst [vmem:[%s3192_s26 + $0x110] sm:$0xff] %v289_v34   ;;  %294 = vst [vmem:[%s3192_s26 + $0x118] sm:$0xff] %v293_v35   ;;  %v301_v37 = vld [vmem:[%s3187_s25 + $0x228] sm:$0xff]   ;;  %v305_v38 = vld [vmem:[%s3187_s25 + $0x230] sm:$0xff]  }
  0x24   : > { %298 = vst [vmem:[%s3192_s26 + $0x120] sm:$0xff] %v297_v36   ;;  %302 = vst [vmem:[%s3192_s26 + $0x128] sm:$0xff] %v301_v37   ;;  %v309_v39 = vld [vmem:[%s3187_s25 + $0x238] sm:$0xff]   ;;  %v313_v40 = vld [vmem:[%s3187_s25 + $0x240] sm:$0xff]  }
  0x25   : > { %306 = vst [vmem:[%s3192_s26 + $0x130] sm:$0xff] %v305_v38   ;;  %v317_v41 = vld [vmem:[%s3187_s25 + $0x248] sm:$0xff]   ;;  %310 = vst [vmem:[%s3192_s26 + $0x138] sm:$0xff] %v309_v39   ;;  %v321_v42 = vld [vmem:[%s3187_s25 + $0x250] sm:$0xff]  }
  0x26   : > { %314 = vst [vmem:[%s3192_s26 + $0x140] sm:$0xff] %v313_v40   ;;  %318 = vst [vmem:[%s3192_s26 + $0x148] sm:$0xff] %v317_v41   ;;  %v325_v43 = vld [vmem:[%s3187_s25 + $0x258] sm:$0xff]   ;;  %v329_v44 = vld [vmem:[%s3187_s25 + $0x260] sm:$0xff]  }
  0x27   : > { %322 = vst [vmem:[%s3192_s26 + $0x150] sm:$0xff] %v321_v42   ;;  %326 = vst [vmem:[%s3192_s26 + $0x158] sm:$0xff] %v325_v43   ;;  %v333_v45 = vld [vmem:[%s3187_s25 + $0x268] sm:$0xff]   ;;  %v337_v46 = vld [vmem:[%s3187_s25 + $0x270] sm:$0xff]  }
  0x28   : > { %330 = vst [vmem:[%s3192_s26 + $0x160] sm:$0xff] %v329_v44   ;;  %v341_v47 = vld [vmem:[%s3187_s25 + $0x278] sm:$0xff]   ;;  %334 = vst [vmem:[%s3192_s26 + $0x168] sm:$0xff] %v333_v45   ;;  %v345_v48 = vld [vmem:[%s3187_s25 + $0x300] sm:$0xff]  }
  0x29   : > { %338 = vst [vmem:[%s3192_s26 + $0x170] sm:$0xff] %v337_v46   ;;  %342 = vst [vmem:[%s3192_s26 + $0x178] sm:$0xff] %v341_v47   ;;  %v349_v49 = vld [vmem:[%s3187_s25 + $0x308] sm:$0xff]   ;;  %v353_v50 = vld [vmem:[%s3187_s25 + $0x310] sm:$0xff]  }
  0x2a   : > { %346 = vst [vmem:[%s3192_s26 + $0x180] sm:$0xff] %v345_v48   ;;  %350 = vst [vmem:[%s3192_s26 + $0x188] sm:$0xff] %v349_v49   ;;  %v357_v51 = vld [vmem:[%s3187_s25 + $0x318] sm:$0xff]   ;;  %v361_v52 = vld [vmem:[%s3187_s25 + $0x320] sm:$0xff]  }
  0x2b   : > { %354 = vst [vmem:[%s3192_s26 + $0x190] sm:$0xff] %v353_v50   ;;  %v365_v53 = vld [vmem:[%s3187_s25 + $0x328] sm:$0xff]   ;;  %358 = vst [vmem:[%s3192_s26 + $0x198] sm:$0xff] %v357_v51   ;;  %v369_v54 = vld [vmem:[%s3187_s25 + $0x330] sm:$0xff]  }
  0x2c   : > { %362 = vst [vmem:[%s3192_s26 + $0x1a0] sm:$0xff] %v361_v52   ;;  %366 = vst [vmem:[%s3192_s26 + $0x1a8] sm:$0xff] %v365_v53   ;;  %v373_v55 = vld [vmem:[%s3187_s25 + $0x338] sm:$0xff]   ;;  %v377_v56 = vld [vmem:[%s3187_s25 + $0x340] sm:$0xff]  }
  0x2d   : > { %370 = vst [vmem:[%s3192_s26 + $0x1b0] sm:$0xff] %v369_v54   ;;  %374 = vst [vmem:[%s3192_s26 + $0x1b8] sm:$0xff] %v373_v55   ;;  %v381_v57 = vld [vmem:[%s3187_s25 + $0x348] sm:$0xff]   ;;  %v385_v58 = vld [vmem:[%s3187_s25 + $0x350] sm:$0xff]  }
  0x2e   : > { %378 = vst [vmem:[%s3192_s26 + $0x1c0] sm:$0xff] %v377_v56   ;;  %v389_v59 = vld [vmem:[%s3187_s25 + $0x358] sm:$0xff]   ;;  %382 = vst [vmem:[%s3192_s26 + $0x1c8] sm:$0xff] %v381_v57   ;;  %v393_v60 = vld [vmem:[%s3187_s25 + $0x360] sm:$0xff]  }
  0x2f   : > { %386 = vst [vmem:[%s3192_s26 + $0x1d0] sm:$0xff] %v385_v58   ;;  %390 = vst [vmem:[%s3192_s26 + $0x1d8] sm:$0xff] %v389_v59   ;;  %v397_v61 = vld [vmem:[%s3187_s25 + $0x368] sm:$0xff]   ;;  %v401_v62 = vld [vmem:[%s3187_s25 + $0x370] sm:$0xff]  }
  0x30   : > { %394 = vst [vmem:[%s3192_s26 + $0x1e0] sm:$0xff] %v393_v60   ;;  %398 = vst [vmem:[%s3192_s26 + $0x1e8] sm:$0xff] %v397_v61   ;;  %v405_v63 = vld [vmem:[%s3187_s25 + $0x378] sm:$0xff]  }
  0x31   : > { %402 = vst [vmem:[%s3192_s26 + $0x1f0] sm:$0xff] %v401_v62   ;;  %406 = vst [vmem:[%s3192_s26 + $0x1f8] sm:$0xff] %v405_v63  }
  0x32 PF: > { %p2422_p5 = scmp.ge.s32.totalorder %s3130_s14, 1  ;;  %p686_p6 = scmp.lt.s32.totalorder %s3130_s14, 3 }
  0x34   : > { %p687_p7 = pnand %p2422_p5, %p686_p6 }
  0x36   : > { %690 = sbr.rel (%p687_p7) target bundleno = 416 (0x1a0), region = 69 }
  0x3d   : > { %v3043_v0 = vld [vmem:[%s3814_s1] sm:$0x1f]   ;;  %vm892_vm0 = vcmask 1043456   ;;  %vm893_vm1 = vcmask 1044480   ;;  %s693_s29 = sand.u32 1, %s3122_s12   ;;  %v3132_v1 = vmov 65535  }
  0x3e   : > { %v894_v2 = vsel %vm892_vm0, 4294967295, %v3132_v1  ;;  %s2423_s30 = sshll.u32 %s693_s29, 9  ;;  %vm843_vm2 = vcmask 72704   ;;  %s2424_s5 = sshll.u32 %s2415_s15, 5 }
  0x3f   : > { %v895_v3 = vsel %vm893_vm1, %v894_v2, 0  ;;  %s3325_s4 = scalar_lea.vmem [#allocation2], %s2423_s30  ;;  %p718_p8 = scmp.lt.s32.totalorder %s2424_s5, 63 }
  0x40   : > { %v897_v4 = vand.u32 %v3043_v0, %v895_v3  ;;  %v3044_v5 = vld [vmem:[%s3325_s4] sm:$0xff]   ;;  %v3046_v7 = vld [vmem:[%s3325_s4 + $0x8] sm:$0xff]   ;;  %v3048_v9 = vld [vmem:[%s3325_s4 + $0x10] sm:$0xff]  }
  0x41   : > { %v3045_v6 = vld [vmem:[%s3325_s4 + $0x80] sm:$0xff]   ;;  %v3047_v8 = vld [vmem:[%s3325_s4 + $0x88] sm:$0xff]   ;;  %2884 = vmatprep.mubr.msk.bf16.mxu0 %vm843_vm2, %v3044_v5  ;;  %v3049_v10 = vld [vmem:[%s3325_s4 + $0x90] sm:$0xff]   ;;  %s3904_s5 = smov (!%p718_p8, %s2424_s5), 63 }
  0x42   : > { %2882 = vmatprep.subr.bf16.mxu0 %v897_v4  ;;  %2916 = vmatprep.subr.bf16.mxu1 %v897_v4  ;;  %v3050_v11 = vld [vmem:[%s3325_s4 + $0x18] sm:$0xff]   ;;  %v3052_v13 = vld [vmem:[%s3325_s4 + $0x20] sm:$0xff]   ;;  %v3054_v15 = vld [vmem:[%s3325_s4 + $0x28] sm:$0xff]   ;;  %s2425_s8 = sshll.u32 %s3904_s5, 2 }
  0x43   : > { %2883 = vmatpush3.bf16.msra.mxu0 %v897_v4  ;;  %2917 = vmatpush3.bf16.msra.mxu1 %v897_v4  ;;  %v3051_v12 = vld [vmem:[%s3325_s4 + $0x98] sm:$0xff]   ;;  %v3053_v14 = vld [vmem:[%s3325_s4 + $0xa0] sm:$0xff]   ;;  %v3055_v16 = vld [vmem:[%s3325_s4 + $0xa8] sm:$0xff]   ;;  %s3676_s11 = scalar_lea.vmem %s3816_s3, %s2425_s8 }
  0x44   : > { %2918 = vmatprep.mubr.msk.bf16.mxu1 %vm843_vm2, %v3045_v6  ;;  %2950 = vmatprep.subr.bf16.mxu0 %v897_v4  ;;  %v3056_v17 = vld [vmem:[%s3325_s4 + $0x30] sm:$0xff]   ;;  %v3058_v19 = vld [vmem:[%s3325_s4 + $0x38] sm:$0xff]   ;;  %v3060_v21 = vld [vmem:[%s3325_s4 + $0x40] sm:$0xff]  }
  0x45   : > { %2984 = vmatprep.subr.bf16.mxu1 %v897_v4  ;;  %v3057_v18 = vld [vmem:[%s3325_s4 + $0xb0] sm:$0xff]   ;;  %v3059_v20 = vld [vmem:[%s3325_s4 + $0xb8] sm:$0xff]   ;;  %v3061_v22 = vld [vmem:[%s3325_s4 + $0xc0] sm:$0xff]  }
  0x46   : > { %2885 = vmatmul.mubr.msk.bf16.vlgmr.msra.gmra.mrb[0].mxu0 %vm843_vm2, %v3046_v7  ;;  %2919 = vmatmul.mubr.msk.bf16.vlgmr.msra.gmra.mrb[0].mxu1 %vm843_vm2, %v3047_v8  ;;  %v3062_v23 = vld [vmem:[%s3325_s4 + $0x48] sm:$0xff]   ;;  %v3064_v25 = vld [vmem:[%s3325_s4 + $0x50] sm:$0xff]   ;;  %v3066_v27 = vld [vmem:[%s3325_s4 + $0x58] sm:$0xff]  }
  0x47   : > { %2951 = vmatpush3.bf16.msra.mxu0 %v897_v4  ;;  %2985 = vmatpush3.bf16.msra.mxu1 %v897_v4  ;;  %v3063_v24 = vld [vmem:[%s3325_s4 + $0xc8] sm:$0xff]   ;;  %v3065_v26 = vld [vmem:[%s3325_s4 + $0xd0] sm:$0xff]   ;;  %v3067_v28 = vld [vmem:[%s3325_s4 + $0xd8] sm:$0xff]  }
  0x48   : > { %2888 = vmatprep.mubr.msk.bf16.mxu0 %vm843_vm2, %v3048_v9  ;;  %2922 = vmatprep.mubr.msk.bf16.mxu1 %vm843_vm2, %v3049_v10  ;;  %v3068_v29 = vld [vmem:[%s3325_s4 + $0x60] sm:$0xff]   ;;  %v3070_v31 = vld [vmem:[%s3325_s4 + $0x68] sm:$0xff]   ;;  %v3072_v33 = vld [vmem:[%s3325_s4 + $0x70] sm:$0xff]  }
  0x49   : > { %v3069_v30 = vld [vmem:[%s3325_s4 + $0xe0] sm:$0xff]   ;;  %v3071_v32 = vld [vmem:[%s3325_s4 + $0xe8] sm:$0xff]   ;;  %v3073_v34 = vld [vmem:[%s3325_s4 + $0xf0] sm:$0xff]  }
  0x4a   : > { %v3074_v35 = vld [vmem:[%s3325_s4 + $0x78] sm:$0xff]   ;;  %v3076_v37 = vld [vmem:[%s3325_s4 + $0x100] sm:$0xff]   ;;  %v3078_v39 = vld [vmem:[%s3325_s4 + $0x108] sm:$0xff]  }
  0x4b   : > { %v3075_v36 = vld [vmem:[%s3325_s4 + $0xf8] sm:$0xff]   ;;  %v3077_v38 = vld [vmem:[%s3325_s4 + $0x180] sm:$0xff]   ;;  %v3079_v40 = vld [vmem:[%s3325_s4 + $0x188] sm:$0xff]  }
  0x4c   : > { %v3080_v41 = vld [vmem:[%s3325_s4 + $0x110] sm:$0xff]   ;;  %v3082_v43 = vld [vmem:[%s3325_s4 + $0x118] sm:$0xff]   ;;  %v3084_v45 = vld [vmem:[%s3325_s4 + $0x120] sm:$0xff]  }
  0x4d   : > { %v3081_v42 = vld [vmem:[%s3325_s4 + $0x190] sm:$0xff]   ;;  %v3083_v44 = vld [vmem:[%s3325_s4 + $0x198] sm:$0xff]   ;;  %v3085_v46 = vld [vmem:[%s3325_s4 + $0x1a0] sm:$0xff]  }
  0x4e   : > { %2889 = vmatmul.mubr.msk.bf16.gmra.mrb[4].mxu0 %vm843_vm2, %v3050_v11  ;;  %2923 = vmatmul.mubr.msk.bf16.gmra.mrb[4].mxu1 %vm843_vm2, %v3051_v12  ;;  %v3086_v47 = vld [vmem:[%s3325_s4 + $0x128] sm:$0xff]   ;;  %v3088_v49 = vld [vmem:[%s3325_s4 + $0x130] sm:$0xff]   ;;  %v3090_v51 = vld [vmem:[%s3325_s4 + $0x138] sm:$0xff]  }
  0x4f   : > { %2892 = vmatprep.mubr.msk.bf16.mxu0 %vm843_vm2, %v3052_v13  ;;  %2926 = vmatprep.mubr.msk.bf16.mxu1 %vm843_vm2, %v3053_v14  ;;  %v3087_v48 = vld [vmem:[%s3325_s4 + $0x1a8] sm:$0xff]   ;;  %v3089_v50 = vld [vmem:[%s3325_s4 + $0x1b0] sm:$0xff]   ;;  %v3091_v52 = vld [vmem:[%s3325_s4 + $0x1b8] sm:$0xff]  }
  0x50   : > { %v3092_v53 = vld [vmem:[%s3325_s4 + $0x140] sm:$0xff]   ;;  %v3094_v55 = vld [vmem:[%s3325_s4 + $0x148] sm:$0xff]   ;;  %v3096_v57 = vld [vmem:[%s3325_s4 + $0x150] sm:$0xff]  }
  0x51   : > { %v3093_v54 = vld [vmem:[%s3325_s4 + $0x1c0] sm:$0xff]   ;;  %v3095_v56 = vld [vmem:[%s3325_s4 + $0x1c8] sm:$0xff]   ;;  %v3097_v58 = vld [vmem:[%s3325_s4 + $0x1d0] sm:$0xff]  }
  0x52   : > { %v3098_v59 = vld [vmem:[%s3325_s4 + $0x158] sm:$0xff]   ;;  %v3100_v61 = vld [vmem:[%s3325_s4 + $0x160] sm:$0xff]   ;;  %v3102_v63 = vld [vmem:[%s3325_s4 + $0x168] sm:$0xff]  }
  0x53   : > { %v3099_v60 = vld [vmem:[%s3325_s4 + $0x1d8] sm:$0xff]   ;;  %v3101_v62 = vld [vmem:[%s3325_s4 + $0x1e0] sm:$0xff]   ;;  %v3103_v0 = vld [vmem:[%s3325_s4 + $0x1e8] sm:$0xff]  }
  0x54   : > { %v3104_v1 = vld [vmem:[%s3325_s4 + $0x170] sm:$0xff]   ;;  %v3106_v3 = vld [vmem:[%s3325_s4 + $0x178] sm:$0xff]  }
  0x55   : > { %v3105_v2 = vld [vmem:[%s3325_s4 + $0x1f0] sm:$0xff]   ;;  %v3107_v4 = vld [vmem:[%s3325_s4 + $0x1f8] sm:$0xff]  }
  0x56   : > { %2893 = vmatmul.mubr.msk.bf16.gmra.mrb[8].mxu0 %vm843_vm2, %v3054_v15  ;;  %2927 = vmatmul.mubr.msk.bf16.gmra.mrb[8].mxu1 %vm843_vm2, %v3055_v16 }
  0x57   : > { %2896 = vmatprep.mubr.msk.bf16.mxu0 %vm843_vm2, %v3056_v17  ;;  %2930 = vmatprep.mubr.msk.bf16.mxu1 %vm843_vm2, %v3057_v18 }
  0x5e   : > { %2897 = vmatmul.mubr.msk.bf16.gmra.mrb[12].mxu0 %vm843_vm2, %v3058_v19  ;;  %2931 = vmatmul.mubr.msk.bf16.gmra.mrb[12].mxu1 %vm843_vm2, %v3059_v20 }
  0x5f   : > { %2900 = vmatprep.mubr.msk.bf16.mxu0 %vm843_vm2, %v3060_v21  ;;  %2934 = vmatprep.mubr.msk.bf16.mxu1 %vm843_vm2, %v3061_v22 }
  0x66   : > { %2901 = vmatmul.mubr.msk.bf16.gmra.mrb[16].mxu0 %vm843_vm2, %v3062_v23  ;;  %2935 = vmatmul.mubr.msk.bf16.gmra.mrb[16].mxu1 %vm843_vm2, %v3063_v24 }
  0x67   : > { %2904 = vmatprep.mubr.msk.bf16.mxu0 %vm843_vm2, %v3064_v25  ;;  %2938 = vmatprep.mubr.msk.bf16.mxu1 %vm843_vm2, %v3065_v26 }
  0x6e   : > { %2905 = vmatmul.mubr.msk.bf16.gmra.mrb[20].mxu0 %vm843_vm2, %v3066_v27  ;;  %2939 = vmatmul.mubr.msk.bf16.gmra.mrb[20].mxu1 %vm843_vm2, %v3067_v28 }
  0x6f   : > { %2908 = vmatprep.mubr.msk.bf16.mxu0 %vm843_vm2, %v3068_v29  ;;  %2942 = vmatprep.mubr.msk.bf16.mxu1 %vm843_vm2, %v3069_v30 }
  0x76   : > { %2909 = vmatmul.mubr.msk.bf16.gmra.mrb[24].mxu0 %vm843_vm2, %v3070_v31  ;;  %2943 = vmatmul.mubr.msk.bf16.gmra.mrb[24].mxu1 %vm843_vm2, %v3071_v32 }
  0x77   : > { %2912 = vmatprep.mubr.msk.bf16.mxu0 %vm843_vm2, %v3072_v33  ;;  %2946 = vmatprep.mubr.msk.bf16.mxu1 %vm843_vm2, %v3073_v34 }
  0x7e   : > { %2913 = vmatmul.mubr.msk.bf16.gmra.mrb[28].mxu0 %vm843_vm2, %v3074_v35  ;;  %2947 = vmatmul.mubr.msk.bf16.gmra.mrb[28].mxu1 %vm843_vm2, %v3075_v36 }
  0x7f   : > { %2952 = vmatprep.mubr.msk.bf16.mxu0 %vm843_vm2, %v3076_v37  ;;  %2986 = vmatprep.mubr.msk.bf16.mxu1 %vm843_vm2, %v3077_v38 }
  0x86   : > { %2953 = vmatmul.mubr.msk.bf16.vlgmr.msra.gmra.mrb[32].mxu0 %vm843_vm2, %v3078_v39  ;;  %2987 = vmatmul.mubr.msk.bf16.vlgmr.msra.gmra.mrb[32].mxu1 %vm843_vm2, %v3079_v40 }
  0x87   : > { %2956 = vmatprep.mubr.msk.bf16.mxu0 %vm843_vm2, %v3080_v41  ;;  %2990 = vmatprep.mubr.msk.bf16.mxu1 %vm843_vm2, %v3081_v42 }
  0x8e   : > { %2957 = vmatmul.mubr.msk.bf16.gmra.mrb[36].mxu0 %vm843_vm2, %v3082_v43  ;;  %2991 = vmatmul.mubr.msk.bf16.gmra.mrb[36].mxu1 %vm843_vm2, %v3083_v44 }
  0x8f   : > { %2960 = vmatprep.mubr.msk.bf16.mxu0 %vm843_vm2, %v3084_v45  ;;  %2994 = vmatprep.mubr.msk.bf16.mxu1 %vm843_vm2, %v3085_v46 }
  0x96   : > { %2961 = vmatmul.mubr.msk.bf16.gmra.mrb[40].mxu0 %vm843_vm2, %v3086_v47  ;;  %2995 = vmatmul.mubr.msk.bf16.gmra.mrb[40].mxu1 %vm843_vm2, %v3087_v48 }
  0x97   : > { %2964 = vmatprep.mubr.msk.bf16.mxu0 %vm843_vm2, %v3088_v49  ;;  %2998 = vmatprep.mubr.msk.bf16.mxu1 %vm843_vm2, %v3089_v50 }
  0x9e   : > { %2965 = vmatmul.mubr.msk.bf16.gmra.mrb[44].mxu0 %vm843_vm2, %v3090_v51  ;;  %2999 = vmatmul.mubr.msk.bf16.gmra.mrb[44].mxu1 %vm843_vm2, %v3091_v52 }
  0x9f   : > { %2968 = vmatprep.mubr.msk.bf16.mxu0 %vm843_vm2, %v3092_v53  ;;  %3002 = vmatprep.mubr.msk.bf16.mxu1 %vm843_vm2, %v3093_v54 }
  0xa6   : > { %2969 = vmatmul.mubr.msk.bf16.gmra.mrb[48].mxu0 %vm843_vm2, %v3094_v55  ;;  %3003 = vmatmul.mubr.msk.bf16.gmra.mrb[48].mxu1 %vm843_vm2, %v3095_v56 }
  0xa7   : > { %2972 = vmatprep.mubr.msk.bf16.mxu0 %vm843_vm2, %v3096_v57  ;;  %3006 = vmatprep.mubr.msk.bf16.mxu1 %vm843_vm2, %v3097_v58 }
  0xae   : > { %2973 = vmatmul.mubr.msk.bf16.gmra.mrb[52].mxu0 %vm843_vm2, %v3098_v59  ;;  %3007 = vmatmul.mubr.msk.bf16.gmra.mrb[52].mxu1 %vm843_vm2, %v3099_v60 }
  0xaf   : > { %2976 = vmatprep.mubr.msk.bf16.mxu0 %vm843_vm2, %v3100_v61  ;;  %3010 = vmatprep.mubr.msk.bf16.mxu1 %vm843_vm2, %v3101_v62  ;;  %v3655_v61 = vld [vmem:[%s3815_s2] ss:$0 sm:$0xff] }
  0xb6   : > { %2977 = vmatmul.mubr.msk.bf16.gmra.mrb[56].mxu0 %vm843_vm2, %v3102_v63  ;;  %3011 = vmatmul.mubr.msk.bf16.gmra.mrb[56].mxu1 %vm843_vm2, %v3103_v0 }
  0xb7   : > { %2980 = vmatprep.mubr.msk.bf16.mxu0 %vm843_vm2, %v3104_v1  ;;  %3014 = vmatprep.mubr.msk.bf16.mxu1 %vm843_vm2, %v3105_v2 }
  0xbe   : > { %2981 = vmatmul.mubr.msk.bf16.gmra.mrb[60].mxu0 %vm843_vm2, %v3106_v3  ;;  %3015 = vmatmul.mubr.msk.bf16.gmra.mrb[60].mxu1 %vm843_vm2, %v3107_v4 }
 0x119   : > { %v3455_v5 = vpop.f32.mrb[0].mxu0  ;;  %v3457_v6 = vpop.f32.mrb[0].mxu1 }
 0x11a   : > { %v3461_v8 = vpop.f32.mrb[1].mxu0  ;;  %v3463_v9 = vpop.f32.mrb[1].mxu1  ;;  %v3851_v3 = vmax.f32 %v3455_v5, %v3457_v6 }
 0x11b   : > { %v3467_v11 = vpop.f32.mrb[2].mxu0  ;;  %v3469_v12 = vpop.f32.mrb[2].mxu1 }
 0x11c   : > { %v3473_v14 = vpop.f32.mrb[3].mxu0  ;;  %v3475_v15 = vpop.f32.mrb[3].mxu1 }
 0x121   : > { %v3479_v17 = vpop.f32.mrb[4].mxu0  ;;  %v3481_v18 = vpop.f32.mrb[4].mxu1 }
 0x122   : > { %v3485_v20 = vpop.f32.mrb[5].mxu0  ;;  %v3487_v21 = vpop.f32.mrb[5].mxu1 }
 0x123   : > { %v3491_v23 = vpop.f32.mrb[6].mxu0  ;;  %v3493_v24 = vpop.f32.mrb[6].mxu1 }
 0x124   : > { %v3497_v26 = vpop.f32.mrb[7].mxu0  ;;  %v3499_v27 = vpop.f32.mrb[7].mxu1 }
 0x129   : > { %v3503_v29 = vpop.f32.mrb[8].mxu0  ;;  %v3505_v30 = vpop.f32.mrb[8].mxu1 }
 0x12a   : > { %v3509_v32 = vpop.f32.mrb[9].mxu0  ;;  %v3511_v33 = vpop.f32.mrb[9].mxu1 }
 0x12b   : > { %v3515_v35 = vpop.f32.mrb[10].mxu0  ;;  %v3517_v36 = vpop.f32.mrb[10].mxu1 }
 0x12c   : > { %v3521_v38 = vpop.f32.mrb[11].mxu0  ;;  %v3523_v39 = vpop.f32.mrb[11].mxu1 }
 0x131   : > { %v3527_v41 = vpop.f32.mrb[12].mxu0  ;;  %v3529_v42 = vpop.f32.mrb[12].mxu1 }
 0x132   : > { %v3533_v44 = vpop.f32.mrb[13].mxu0  ;;  %v3535_v45 = vpop.f32.mrb[13].mxu1 }
 0x133   : > { %v3539_v47 = vpop.f32.mrb[14].mxu0  ;;  %v3541_v48 = vpop.f32.mrb[14].mxu1 }
 0x134   : > { %v3545_v50 = vpop.f32.mrb[15].mxu0  ;;  %v3547_v51 = vpop.f32.mrb[15].mxu1 }
 0x139   : > { %v3551_v53 = vpop.f32.mrb[16].mxu0  ;;  %v3553_v54 = vpop.f32.mrb[16].mxu1 }
 0x13a   : > { %v3557_v56 = vpop.f32.mrb[17].mxu0  ;;  %v3559_v57 = vpop.f32.mrb[17].mxu1 }
 0x13b   : > { %v3563_v59 = vpop.f32.mrb[18].mxu0  ;;  %v3565_v60 = vpop.f32.mrb[18].mxu1 }
 0x13c   : > { %v3569_v62 = vpop.f32.mrb[19].mxu0  ;;  %v3571_v63 = vpop.f32.mrb[19].mxu1 }
 0x141   : > { %v3575_v1 = vpop.f32.mrb[20].mxu0  ;;  %v3577_v2 = vpop.f32.mrb[20].mxu1 }
 0x142   : > { %v3581_v4 = vpop.f32.mrb[21].mxu0  ;;  %v3583_v58 = vpop.f32.mrb[21].mxu1 }
 0x143   : > { %v3587_v55 = vpop.f32.mrb[22].mxu0  ;;  %v3589_v52 = vpop.f32.mrb[22].mxu1 }
 0x144   : > { %v3593_v49 = vpop.f32.mrb[23].mxu0  ;;  %v3595_v46 = vpop.f32.mrb[23].mxu1 }
 0x145   : > { %3834 = vst [vmem:[#allocation3_spill] sm:$0xff] %v3595_v46 }
 0x149   : > { %v3599_v43 = vpop.f32.mrb[24].mxu0  ;;  %v3601_v40 = vpop.f32.mrb[24].mxu1 }
 0x14a   : > { %3835 = vst [vmem:[#allocation4_spill] sm:$0xff] %v3599_v43  ;;  %3836 = vst [vmem:[#allocation5_spill] sm:$0xff] %v3601_v40  ;;  %v3605_v37 = vpop.f32.mrb[25].mxu0  ;;  %v3607_v34 = vpop.f32.mrb[25].mxu1 }
 0x14b   : > { %3837 = vst [vmem:[#allocation6_spill] sm:$0xff] %v3605_v37  ;;  %3838 = vst [vmem:[#allocation7_spill] sm:$0xff] %v3607_v34  ;;  %v3611_v31 = vpop.f32.mrb[26].mxu0  ;;  %v3613_v28 = vpop.f32.mrb[26].mxu1  ;;  %v3853_v34 = vmax.f32 %v3467_v11, %v3469_v12 }
 0x14c   : > { %3839 = vst [vmem:[#allocation8_spill] sm:$0xff] %v3611_v31  ;;  %3840 = vst [vmem:[#allocation9_spill] sm:$0xff] %v3613_v28  ;;  %v3617_v25 = vpop.f32.mrb[27].mxu0  ;;  %v3619_v22 = vpop.f32.mrb[27].mxu1 }
 0x14d   : > { %3841 = vst [vmem:[#allocation10_spill] sm:$0xff] %v3617_v25  ;;  %3842 = vst [vmem:[#allocation11_spill] sm:$0xff] %v3619_v22 }
 0x151   : > { %v3623_v19 = vpop.f32.mrb[28].mxu0  ;;  %v3625_v16 = vpop.f32.mrb[28].mxu1 }
 0x152   : > { %3843 = vst [vmem:[#allocation12_spill] sm:$0xff] %v3623_v19  ;;  %3844 = vst [vmem:[#allocation13_spill] sm:$0xff] %v3625_v16  ;;  %v3629_v13 = vpop.f32.mrb[29].mxu0  ;;  %v3631_v10 = vpop.f32.mrb[29].mxu1 }
 0x153   : > { %3845 = vst [vmem:[#allocation14_spill] sm:$0xff] %v3629_v13  ;;  %3846 = vst [vmem:[#allocation15_spill] sm:$0xff] %v3631_v10  ;;  %v3635_v7 = vpop.f32.mrb[30].mxu0  ;;  %v3637_v28 = vpop.f32.mrb[30].mxu1 }
 0x154   : > { %3847 = vst [vmem:[#allocation16_spill] sm:$0xff] %v3635_v7  ;;  %3848 = vst [vmem:[#allocation17_spill] sm:$0xff] %v3637_v28  ;;  %v3641_v22 = vpop.f32.mrb[31].mxu0  ;;  %v3643_v25 = vpop.f32.mrb[31].mxu1  ;;  %v3852_v28 = vmax.f32 %v3461_v8, %v3463_v9 }
 0x155   : > { %3849 = vst [vmem:[#allocation18_spill] sm:$0xff] %v3641_v22  ;;  %3850 = vst [vmem:[#allocation19_spill] sm:$0xff] %v3643_v25 }
 0x159   : > { %v2954_v16 = vpop.f32.mrb[32].mxu0  ;;  %v2988_v19 = vpop.f32.mrb[32].mxu1 }
 0x15a   : > { %v1738_v10 = vmax.f32 %v3851_v3, %v2954_v16  ;;  %v1609_v13 = vpop.f32.mrb[33].mxu0  ;;  %v1963_v31 = vpop.f32.mrb[33].mxu1  ;;  %v3854_v3 = vmax.f32 %v3473_v14, %v3475_v15 }
 0x15b   : > { %v1736_v0 = vmax.f32 %v3852_v28, %v1609_v13  ;;  %v2955_v25 = vpop.f32.mrb[34].mxu0  ;;  %v2989_v22 = vpop.f32.mrb[34].mxu1  ;;  %v3855_v28 = vmax.f32 %v3479_v17, %v3481_v18  ;;  %v3857_v18 = vmax.f32 %v3491_v23, %v3493_v24 }
 0x15c   : > { %v2092_v7 = vmax.f32 %v1738_v10, %v2988_v19  ;;  %v1739_v37 = vmax.f32 %v3853_v34, %v2955_v25  ;;  %v1612_v5 = vpop.f32.mrb[35].mxu0  ;;  %v1966_v6 = vpop.f32.mrb[35].mxu1  ;;  %v3856_v34 = vmax.f32 %v3485_v20, %v3487_v21 }
 0x15d   : > { %v2090_v16 = vmax.f32 %v1736_v0, %v1963_v31  ;;  %v1737_v40 = vmax.f32 %v3854_v3, %v1612_v5 }
 0x15e   : > { %v2131_v43 = vadd.f32 %v3655_v61, %v2092_v7  ;;  %v2093_v46 = vmax.f32 %v1739_v37, %v2989_v22 }
 0x15f   : > { %v2129_v8 = vadd.f32 %v3655_v61, %v2090_v16  ;;  %v2091_v9 = vmax.f32 %v1737_v40, %v1966_v6 }
 0x160   : > { %v2132_v10 = vadd.f32 %v3655_v61, %v2093_v46  ;;  %v2163_v19 = vmax.f32 %v2131_v43, 0.0 }
 0x161   : > { %v2130_v11 = vadd.f32 %v3655_v61, %v2091_v9  ;;  %v2958_v12 = vpop.f32.mrb[36].mxu0  ;;  %v2992_v13 = vpop.f32.mrb[36].mxu1  ;;  %v2161_v7 = vmax.f32 %v2129_v8, 0.0  ;;  %v3858_v8 = vmax.f32 %v3497_v26, %v3499_v27  ;;  %v3859_v26 = vmax.f32 %v3503_v29, %v3505_v30 }
 0x162   : > { %v2164_v25 = vmax.f32 %v2132_v10, 0.0  ;;  %v1742_v14 = vmax.f32 %v3855_v28, %v2958_v12  ;;  %v1625_v15 = vpop.f32.mrb[37].mxu0  ;;  %v1979_v31 = vpop.f32.mrb[37].mxu1 }
 0x163   : > { %v2162_v22 = vmax.f32 %v2130_v11, 0.0  ;;  %v1740_v37 = vmax.f32 %v3856_v34, %v1625_v15  ;;  %v2959_v40 = vpop.f32.mrb[38].mxu0  ;;  %v2993_v43 = vpop.f32.mrb[38].mxu1 }
 0x164   : > { %v2727_v46 = vpack.c.bf16 %v2164_v25, %v2163_v19  ;;  %v2096_v17 = vmax.f32 %v1742_v14, %v2992_v13  ;;  %v1743_v0 = vmax.f32 %v3857_v18, %v2959_v40  ;;  %v1628_v5 = vpop.f32.mrb[39].mxu0  ;;  %v1982_v6 = vpop.f32.mrb[39].mxu1 }
 0x165   : > { %v2722_v16 = vpack.c.bf16 %v2162_v22, %v2161_v7  ;;  %v2094_v3 = vmax.f32 %v1740_v37, %v1979_v31  ;;  %v1741_v9 = vmax.f32 %v3858_v8, %v1628_v5  ;;  %v3860_v7 = vmax.f32 %v3509_v32, %v3511_v33 }
 0x166   : > { %2799 = vst [vmem:[%s3676_s11 + $0x8] sm:$0xff] %v2727_v46   ;;  %v2135_v20 = vadd.f32 %v3655_v61, %v2096_v17  ;;  %v2097_v21 = vmax.f32 %v1743_v0, %v2993_v43  ;;  %v3861_v46 = vmax.f32 %v3515_v35, %v3517_v36  ;;  %v3862_v5 = vmax.f32 %v3521_v38, %v3523_v39 }
 0x167   : > { %2723 = vst [vmem:[%s3676_s11] sm:$0xff] %v2722_v16   ;;  %v2133_v10 = vadd.f32 %v3655_v61, %v2094_v3  ;;  %v2095_v11 = vmax.f32 %v1741_v9, %v1982_v6  ;;  %v3863_v38 = vmax.f32 %v3527_v41, %v3529_v42 }
 0x168   : > { %v2136_v12 = vadd.f32 %v3655_v61, %v2097_v21  ;;  %v2167_v19 = vmax.f32 %v2135_v20, 0.0 }
 0x169   : > { %v2134_v23 = vadd.f32 %v3655_v61, %v2095_v11  ;;  %v2962_v24 = vpop.f32.mrb[40].mxu0  ;;  %v2996_v13 = vpop.f32.mrb[40].mxu1  ;;  %v2165_v15 = vmax.f32 %v2133_v10, 0.0 }
 0x16a   : > { %v2168_v25 = vmax.f32 %v2136_v12, 0.0  ;;  %v1746_v27 = vmax.f32 %v3859_v26, %v2962_v24  ;;  %v1641_v28 = vpop.f32.mrb[41].mxu0  ;;  %v1995_v14 = vpop.f32.mrb[41].mxu1  ;;  %v3864_v24 = vmax.f32 %v3533_v44, %v3535_v45 }
 0x16b   : > { %v2166_v31 = vmax.f32 %v2134_v23, 0.0  ;;  %v1744_v22 = vmax.f32 %v3860_v7, %v1641_v28  ;;  %v2963_v34 = vpop.f32.mrb[42].mxu0  ;;  %v2997_v37 = vpop.f32.mrb[42].mxu1  ;;  %v3865_v28 = vmax.f32 %v3539_v47, %v3541_v48  ;;  %v3866_v7 = vmax.f32 %v3545_v50, %v3547_v51 }
 0x16c   : > { %v2737_v40 = vpack.c.bf16 %v2168_v25, %v2167_v19  ;;  %v2100_v43 = vmax.f32 %v1746_v27, %v2996_v13  ;;  %v1747_v17 = vmax.f32 %v3861_v46, %v2963_v34  ;;  %v1644_v29 = vpop.f32.mrb[43].mxu0  ;;  %v1998_v30 = vpop.f32.mrb[43].mxu1  ;;  %v3867_v50 = vmax.f32 %v3551_v53, %v3553_v54 }
 0x16d   : > { %v2732_v18 = vpack.c.bf16 %v2166_v31, %v2165_v15  ;;  %v2098_v0 = vmax.f32 %v1744_v22, %v1995_v14  ;;  %v1745_v6 = vmax.f32 %v3862_v5, %v1644_v29  ;;  %v3868_v5 = vmax.f32 %v3557_v56, %v3559_v57 }
 0x16e   : > { %2801 = vst [vmem:[%s3676_s11 + $0x18] sm:$0xff] %v2737_v40   ;;  %v2139_v32 = vadd.f32 %v3655_v61, %v2100_v43  ;;  %v2101_v33 = vmax.f32 %v1747_v17, %v2997_v37 }
 0x16f   : > { %2800 = vst [vmem:[%s3676_s11 + $0x10] sm:$0xff] %v2732_v18   ;;  %v2137_v16 = vadd.f32 %v3655_v61, %v2098_v0  ;;  %v2099_v3 = vmax.f32 %v1745_v6, %v1998_v30 }
 0x170   : > { %v2140_v8 = vadd.f32 %v3655_v61, %v2101_v33  ;;  %v2171_v20 = vmax.f32 %v2139_v32, 0.0 }
 0x171   : > { %v2138_v35 = vadd.f32 %v3655_v61, %v2099_v3  ;;  %v2966_v36 = vpop.f32.mrb[44].mxu0  ;;  %v3000_v9 = vpop.f32.mrb[44].mxu1  ;;  %v2169_v12 = vmax.f32 %v2137_v16, 0.0 }
 0x172   : > { %v2172_v21 = vmax.f32 %v2140_v8, 0.0  ;;  %v1750_v39 = vmax.f32 %v3863_v38, %v2966_v36  ;;  %v1657_v10 = vpop.f32.mrb[45].mxu0  ;;  %v2011_v11 = vpop.f32.mrb[45].mxu1  ;;  %v3869_v8 = vmax.f32 %v3563_v59, %v3565_v60 }
 0x173   : > { %v2170_v23 = vmax.f32 %v2138_v35, 0.0  ;;  %v1748_v13 = vmax.f32 %v3864_v24, %v1657_v10  ;;  %v2967_v19 = vpop.f32.mrb[46].mxu0  ;;  %v3001_v25 = vpop.f32.mrb[46].mxu1 }
 0x174   : > { %v2747_v26 = vpack.c.bf16 %v2172_v21, %v2171_v20  ;;  %v2104_v27 = vmax.f32 %v1750_v39, %v3000_v9  ;;  %v1751_v14 = vmax.f32 %v3865_v28, %v2967_v19  ;;  %v1660_v41 = vpop.f32.mrb[47].mxu0  ;;  %v2014_v42 = vpop.f32.mrb[47].mxu1  ;;  %v3870_v20 = vmax.f32 %v3569_v62, %v3571_v63 }
 0x175   : > { %v2742_v15 = vpack.c.bf16 %v2170_v23, %v2169_v12  ;;  %v2102_v31 = vmax.f32 %v1748_v13, %v2011_v11  ;;  %v1749_v22 = vmax.f32 %v3866_v7, %v1660_v41  ;;  %v3871_v62 = vmax.f32 %v3575_v1, %v3577_v2 }
 0x176   : > { %2803 = vst [vmem:[%s3676_s11 + $0x28] sm:$0xff] %v2747_v26   ;;  %v2143_v44 = vadd.f32 %v3655_v61, %v2104_v27  ;;  %v2105_v45 = vmax.f32 %v1751_v14, %v3001_v25  ;;  %v3872_v26 = vmax.f32 %v3581_v4, %v3583_v58 }
 0x177   : > { %2802 = vst [vmem:[%s3676_s11 + $0x20] sm:$0xff] %v2742_v15   ;;  %v2141_v34 = vadd.f32 %v3655_v61, %v2102_v31  ;;  %v2103_v37 = vmax.f32 %v1749_v22, %v2014_v42  ;;  %v3873_v15 = vmax.f32 %v3587_v55, %v3589_v52 }
 0x178   : > { %v2144_v40 = vadd.f32 %v3655_v61, %v2105_v45  ;;  %v2175_v46 = vmax.f32 %v2143_v44, 0.0  ;;  %v3874_v44 = vld [vmem:[#allocation3_spill] sm:$0xff] }
 0x179   : > { %v2142_v47 = vadd.f32 %v3655_v61, %v2103_v37  ;;  %v2970_v48 = vpop.f32.mrb[48].mxu0  ;;  %v3004_v43 = vpop.f32.mrb[48].mxu1  ;;  %v2173_v18 = vmax.f32 %v2141_v34, 0.0  ;;  %v3875_v45 = vmax.f32 %v3593_v49, %v3874_v44 }
 0x17a   : > { %v2176_v17 = vmax.f32 %v2144_v40, 0.0  ;;  %v1754_v51 = vmax.f32 %v3867_v50, %v2970_v48  ;;  %v1673_v29 = vpop.f32.mrb[49].mxu0  ;;  %v2027_v30 = vpop.f32.mrb[49].mxu1  ;;  %v3877_v50 = vld [vmem:[#allocation5_spill] sm:$0xff] }
 0x17b   : > { %v2174_v0 = vmax.f32 %v2142_v47, 0.0  ;;  %v1752_v6 = vmax.f32 %v3868_v5, %v1673_v29  ;;  %v2971_v32 = vpop.f32.mrb[50].mxu0  ;;  %v3005_v33 = vpop.f32.mrb[50].mxu1  ;;  %v3879_v5 = vld [vmem:[#allocation6_spill] sm:$0xff] }
 0x17c   : > { %v2757_v16 = vpack.c.bf16 %v2176_v17, %v2175_v46  ;;  %v2108_v3 = vmax.f32 %v1754_v51, %v3004_v43  ;;  %v1755_v35 = vmax.f32 %v3869_v8, %v2971_v32  ;;  %v1676_v53 = vpop.f32.mrb[51].mxu0  ;;  %v2030_v54 = vpop.f32.mrb[51].mxu1  ;;  %v3876_v17 = vld [vmem:[#allocation4_spill] sm:$0xff] }
 0x17d   : > { %v2752_v36 = vpack.c.bf16 %v2174_v0, %v2173_v18  ;;  %v2106_v9 = vmax.f32 %v1752_v6, %v2027_v30  ;;  %v1753_v21 = vmax.f32 %v3870_v20, %v1676_v53  ;;  %v3878_v49 = vmax.f32 %v3876_v17, %v3877_v50  ;;  %v3880_v6 = vld [vmem:[#allocation7_spill] sm:$0xff]  ;;  %v3882_v53 = vld [vmem:[#allocation8_spill] sm:$0xff] }
 0x17e   : > { %2805 = vst [vmem:[%s3676_s11 + $0x38] sm:$0xff] %v2757_v16   ;;  %v2147_v56 = vadd.f32 %v3655_v61, %v2108_v3  ;;  %v2109_v57 = vmax.f32 %v1755_v35, %v3005_v33  ;;  %v3881_v32 = vmax.f32 %v3879_v5, %v3880_v6  ;;  %v3898_v17 = vld [vmem:[#allocation19_spill] sm:$0xff] }
 0x17f   : > { %2804 = vst [vmem:[%s3676_s11 + $0x30] sm:$0xff] %v2752_v36   ;;  %v2145_v38 = vadd.f32 %v3655_v61, %v2106_v9  ;;  %v2107_v39 = vmax.f32 %v1753_v21, %v2030_v54  ;;  %v3883_v54 = vld [vmem:[#allocation9_spill] sm:$0xff] }
 0x180   : > { %v2148_v10 = vadd.f32 %v3655_v61, %v2109_v57  ;;  %v2179_v12 = vmax.f32 %v2147_v56, 0.0  ;;  %v3884_v36 = vmax.f32 %v3882_v53, %v3883_v54 }
 0x181   : > { %v2146_v59 = vadd.f32 %v3655_v61, %v2107_v39  ;;  %v2974_v60 = vpop.f32.mrb[52].mxu0  ;;  %v3008_v11 = vpop.f32.mrb[52].mxu1  ;;  %v2177_v19 = vmax.f32 %v2145_v38, 0.0  ;;  %v3885_v38 = vld [vmem:[#allocation10_spill] sm:$0xff]  ;;  %v3886_v39 = vld [vmem:[#allocation11_spill] sm:$0xff] }
 0x182   : > { %v2180_v23 = vmax.f32 %v2148_v10, 0.0  ;;  %v1758_v63 = vmax.f32 %v3871_v62, %v2974_v60  ;;  %v1689_v24 = vpop.f32.mrb[53].mxu0  ;;  %v2043_v13 = vpop.f32.mrb[53].mxu1  ;;  %v3887_v10 = vmax.f32 %v3885_v38, %v3886_v39 }
 0x183   : > { %v2178_v25 = vmax.f32 %v2146_v59, 0.0  ;;  %v1756_v27 = vmax.f32 %v3872_v26, %v1689_v24  ;;  %v2975_v28 = vpop.f32.mrb[54].mxu0  ;;  %v3009_v14 = vpop.f32.mrb[54].mxu1  ;;  %v3888_v26 = vld [vmem:[#allocation12_spill] sm:$0xff] }
 0x184   : > { %v2767_v41 = vpack.c.bf16 %v2180_v23, %v2179_v12  ;;  %v2112_v42 = vmax.f32 %v1758_v63, %v3008_v11  ;;  %v1759_v31 = vmax.f32 %v3873_v15, %v2975_v28  ;;  %v1692_v1 = vpop.f32.mrb[55].mxu0  ;;  %v2046_v2 = vpop.f32.mrb[55].mxu1 }
 0x185   : > { %v2762_v7 = vpack.c.bf16 %v2178_v25, %v2177_v19  ;;  %v2110_v22 = vmax.f32 %v1756_v27, %v2043_v13  ;;  %v1757_v34 = vmax.f32 %v3875_v45, %v1692_v1  ;;  %v3889_v27 = vld [vmem:[#allocation13_spill] sm:$0xff]  ;;  %v3891_v1 = vld [vmem:[#allocation14_spill] sm:$0xff] }
 0x186   : > { %2807 = vst [vmem:[%s3676_s11 + $0x48] sm:$0xff] %v2767_v41   ;;  %v2151_v58 = vadd.f32 %v3655_v61, %v2112_v42  ;;  %v2113_v4 = vmax.f32 %v1759_v31, %v3009_v14  ;;  %v3890_v28 = vmax.f32 %v3888_v26, %v3889_v27 }
 0x187   : > { %2806 = vst [vmem:[%s3676_s11 + $0x40] sm:$0xff] %v2762_v7   ;;  %v2149_v37 = vadd.f32 %v3655_v61, %v2110_v22  ;;  %v2111_v40 = vmax.f32 %v1757_v34, %v2046_v2  ;;  %v3892_v2 = vld [vmem:[#allocation15_spill] sm:$0xff] }
 0x188   : > { %v2152_v47 = vadd.f32 %v3655_v61, %v2113_v4  ;;  %v2183_v43 = vmax.f32 %v2151_v58, 0.0  ;;  %v3893_v7 = vmax.f32 %v3891_v1, %v3892_v2  ;;  %v3894_v4 = vld [vmem:[#allocation16_spill] sm:$0xff] }
 0x189   : > { %v2150_v52 = vadd.f32 %v3655_v61, %v2111_v40  ;;  %v2978_v55 = vpop.f32.mrb[56].mxu0  ;;  %v3012_v48 = vpop.f32.mrb[56].mxu1  ;;  %v2181_v18 = vmax.f32 %v2149_v37, 0.0  ;;  %v3895_v37 = vld [vmem:[#allocation17_spill] sm:$0xff] }
 0x18a   : > { %v2184_v46 = vmax.f32 %v2152_v47, 0.0  ;;  %v1762_v51 = vmax.f32 %v3878_v49, %v2978_v55  ;;  %v1705_v29 = vpop.f32.mrb[57].mxu0  ;;  %v2059_v30 = vpop.f32.mrb[57].mxu1  ;;  %v3896_v40 = vmax.f32 %v3894_v4, %v3895_v37 }
 0x18b   : > { %v2182_v0 = vmax.f32 %v2150_v52, 0.0  ;;  %v1760_v33 = vmax.f32 %v3881_v32, %v1705_v29  ;;  %v2979_v16 = vpop.f32.mrb[58].mxu0  ;;  %v3013_v3 = vpop.f32.mrb[58].mxu1 }
 0x18c   : > { %v2777_v8 = vpack.c.bf16 %v2184_v46, %v2183_v43  ;;  %v2116_v35 = vmax.f32 %v1762_v51, %v3012_v48  ;;  %v1763_v9 = vmax.f32 %v3884_v36, %v2979_v16  ;;  %v1708_v20 = vpop.f32.mrb[59].mxu0  ;;  %v2062_v21 = vpop.f32.mrb[59].mxu1  ;;  %v3897_v46 = vld [vmem:[#allocation18_spill] sm:$0xff] }
 0x18d   : > { %v2772_v56 = vpack.c.bf16 %v2182_v0, %v2181_v18  ;;  %v2114_v57 = vmax.f32 %v1760_v33, %v2059_v30  ;;  %v1761_v59 = vmax.f32 %v3887_v10, %v1708_v20  ;;  %v3899_v50 = vmax.f32 %v3897_v46, %v3898_v17 }
 0x18e   : > { %2809 = vst [vmem:[%s3676_s11 + $0x58] sm:$0xff] %v2777_v8   ;;  %v2155_v60 = vadd.f32 %v3655_v61, %v2116_v35  ;;  %v2117_v11 = vmax.f32 %v1763_v9, %v3013_v3 }
 0x18f   : > { %2808 = vst [vmem:[%s3676_s11 + $0x50] sm:$0xff] %v2772_v56   ;;  %v2153_v12 = vadd.f32 %v3655_v61, %v2114_v57  ;;  %v2115_v23 = vmax.f32 %v1761_v59, %v2062_v21 }
 0x190   : > { %v2156_v62 = vadd.f32 %v3655_v61, %v2117_v11  ;;  %v2187_v19 = vmax.f32 %v2155_v60, 0.0 }
 0x191   : > { %v2154_v63 = vadd.f32 %v3655_v61, %v2115_v23  ;;  %v2982_v24 = vpop.f32.mrb[60].mxu0  ;;  %v3016_v13 = vpop.f32.mrb[60].mxu1  ;;  %v2185_v15 = vmax.f32 %v2153_v12, 0.0 }
 0x192   : > { %v2188_v25 = vmax.f32 %v2156_v62, 0.0  ;;  %v1766_v14 = vmax.f32 %v3890_v28, %v2982_v24  ;;  %v1721_v41 = vpop.f32.mrb[61].mxu0  ;;  %v2075_v42 = vpop.f32.mrb[61].mxu1 }
 0x193   : > { %v2186_v31 = vmax.f32 %v2154_v63, 0.0  ;;  %v1764_v22 = vmax.f32 %v3893_v7, %v1721_v41  ;;  %v2983_v44 = vpop.f32.mrb[62].mxu0  ;;  %v3017_v45 = vpop.f32.mrb[62].mxu1 }
 0x194   : > { %v2787_v34 = vpack.c.bf16 %v2188_v25, %v2187_v19  ;;  %v2120_v58 = vmax.f32 %v1766_v14, %v3016_v13  ;;  %v1767_v47 = vmax.f32 %v3896_v40, %v2983_v44  ;;  %v1724_v52 = vpop.f32.mrb[63].mxu0  ;;  %v2078_v55 = vpop.f32.mrb[63].mxu1 }
 0x195   : > { %v2782_v48 = vpack.c.bf16 %v2186_v31, %v2185_v15  ;;  %v2118_v43 = vmax.f32 %v1764_v22, %v2075_v42  ;;  %v1765_v49 = vmax.f32 %v3899_v50, %v1724_v52 }
 0x196   : > { %2811 = vst [vmem:[%s3676_s11 + $0x68] sm:$0xff] %v2787_v34   ;;  %v2159_v51 = vadd.f32 %v3655_v61, %v2120_v58  ;;  %v2121_v29 = vmax.f32 %v1767_v47, %v3017_v45 }
 0x197   : > { %2810 = vst [vmem:[%s3676_s11 + $0x60] sm:$0xff] %v2782_v48   ;;  %v2157_v30 = vadd.f32 %v3655_v61, %v2118_v43  ;;  %v2119_v18 = vmax.f32 %v1765_v49, %v2078_v55 }
 0x198   : > { %v2160_v0 = vadd.f32 %v3655_v61, %v2121_v29  ;;  %v2191_v6 = vmax.f32 %v2159_v51, 0.0 }
 0x199   : > { %v2158_v5 = vadd.f32 %v3655_v61, %v2119_v18  ;;  %v2189_v33 = vmax.f32 %v2157_v30, 0.0 }
 0x19a   : > { %v2192_v32 = vmax.f32 %v2160_v0, 0.0 }
 0x19b   : > { %v2190_v16 = vmax.f32 %v2158_v5, 0.0 }
 0x19c   : > { %v2797_v3 = vpack.c.bf16 %v2192_v32, %v2191_v6 }
 0x19d   : > { %v2792_v8 = vpack.c.bf16 %v2190_v16, %v2189_v33 }
 0x19e   : > { %2813 = vst [vmem:[%s3676_s11 + $0x78] sm:$0xff] %v2797_v3  }
 0x19f   : > { %2812 = vst [vmem:[%s3676_s11 + $0x70] sm:$0xff] %v2792_v8  }
 0x1a0 PF: > { %p10_p9 = scmp.ge.s32.totalorder %s3170_s16, 4   ;;  %s3900_s12 = smov %s3126_s13 }
 0x1a1   : > { %s3901_s13 = smov %s3179_s19  ;;  %s3902_s14 = smov %s3170_s16 }
 0x1a2   :  { %12 = sbr.rel (!%p10_p9) target bundleno = 2 (0x2), region = 111 }

// kernel: embedding_net_forward.5
= control target key start
LH: loop header
LB: loop body
LE: loop exit
PB: predicated region body
PF: predicated region fallthrough
CT: control target
= control target key end

     0   :  { %s5301_s12 = smov 0   ;;  %s6315_s0 = inlined_call_operand.vmem [shape: bf16[2,2,2,9,9,32], index: 0, kind: input, shape index: {}]   ;;  %s6316_s1 = inlined_call_operand.vmem [shape: bf16[9,32,128], index: 1, kind: input, shape index: {}]   ;;  %s6317_s2 = inlined_call_operand.vmem [shape: f32[1,128], index: 2, kind: input, shape index: {}]   ;;  %s6318_s3 = inlined_call_operand.vmem [shape: bf16[2,8,8,128], index: 3, kind: output, shape index: {}]  }
   0x1 LB: > { %s3953_s13 = sadd.s32 4294967295, %s5279_s12   ;;  %p3957_p0 = scmp.ge.s32.totalorder %s5279_s12, 1  ;;  %s5279_s12 = sphi %s5301_s12, %s13_s12  }
   0x2   : > { %p137_p1 = scmp.lt.s32.totalorder %s5279_s12, 3 }
   0x4   : > { %p138_p2 = pnand %p3957_p0, %p137_p1 }
   0x6   : > { %141 = sbr.rel (%p138_p2) target bundleno = 548 (0x224), region = 32 }
   0xd   : > { %v5213_v0 = vld [vmem:[%s6316_s1 + $0x10] sm:$0xff]   ;;  %p161_p3 = scmp.lt.s32.totalorder %s3953_s13, 1  ;;  %v5214_v1 = vld [vmem:[%s6316_s1 + $0x18] sm:$0xff]   ;;  %v5321_v2 = vld [vmem:[%s6316_s1] sm:$0xff]   ;;  %vm795_vm0 = vcmask 261120  }
   0xe   : > { %4516 = vmatprep.subr.bf16.mxu0 %v5213_v0  ;;  %4624 = vmatprep.subr.bf16.mxu1 %v5213_v0  ;;  %v5361_v11 = vld [vmem:[%s6316_s1 + $0x8] sm:$0xff]   ;;  %vm247_vm1 = vsmask.f32 3328  ;;  %vm248_vm2 = vsmask.f32 7440  ;;  %v5386_v19 = vld [vmem:[%s6316_s1 + $0x20] sm:$0xff]  }
   0xf   : > { %s6382_s13 = smov (!%p161_p3, %s3953_s13), 1  ;;  %4517 = vmatpush3.bf16.msra.mxu0 %v5213_v0  ;;  %4625 = vmatpush3.bf16.msra.mxu1 %v5213_v0  ;;  %vm5427_vm3 = vmor %vm247_vm1, %vm248_vm2 }
  0x10   : > { %4518 = vmatprep.subr.bf16.mxu0 %v5214_v1  ;;  %s5204_s18 = smul.u32 288, %s6382_s13  ;;  %4626 = vmatprep.subr.bf16.mxu1 %v5214_v1  ;;  %s4276_s20 = sshll.u32 %s6382_s13, 5 }
  0x11   : > { %s170_s24 = scalar_lea.vmem %s6318_s3, %s4276_s20 }
  0x12   : > { %s5326_s23 = scalar_lea.vmem %s6315_s0, %s5204_s18 }
  0x13   : > { %4519 = vmatpush3.bf16.msra.mxu0 %v5214_v1  ;;  %v5329_v3 = vld [vmem:[%s5326_s23 + $0x48] sm:$0xf]  ;;  %v5332_v4 = vld [vmem:[%s5326_s23 + $0x50] sm:$0xf]  ;;  %4627 = vmatpush3.bf16.msra.mxu1 %v5214_v1  ;;  %v5341_v6 = vld [vmem:[%s5326_s23 + $0x58] sm:$0xf] }
  0x14   : > { %4528 = vmatprep.subr.bf16.mxu0 %v5321_v2  ;;  %4636 = vmatprep.subr.bf16.mxu1 %v5321_v2  ;;  %v5338_v5 = vcombine.low %v5329_v3, %v5332_v4  ;;  %v5344_v7 = vld [vmem:[%s5326_s23 + $0x60] sm:$0xf]  ;;  %v5349_v8 = vld [vmem:[%s5326_s23 + $0x68] sm:$0xf]  ;;  %v5352_v9 = vld [vmem:[%s5326_s23 + $0x70] sm:$0xf]  ;;  %v5411_v32 = vcombine.low %v5332_v4, %v5341_v6 }
  0x15   : > { %v5356_v10 = vcombine.low %v5341_v6, %v5344_v7  ;;  %v5367_v12 = vcombine.low %v5349_v8, %v5352_v9  ;;  %v5370_v13 = vld [vmem:[%s5326_s23 + $0x78] sm:$0xf]  ;;  %v5373_v14 = vld [vmem:[%s5326_s23 + $0x80] sm:$0xf]  ;;  %v363_v16 = vshrl.u32 %v5329_v3, 16  ;;  %v5379_v17 = vcombine.low %v5344_v7, %v5349_v8 }
  0x16   : > { %4520 = vmatprep.mubr.msk.bf16.mxu0 %vm795_vm0, %v5338_v5  ;;  %v172_v15 = vld [vmem:[%s5326_s23] sm:$0xf]  ;;  %v173_v18 = vld [vmem:[%s5326_s23 + $0x4] sm:$0x1]  ;;  %v174_v20 = vld [vmem:[%s5326_s23 + $0x8] sm:$0xf]  ;;  %v5398_v23 = vcombine.low %v5370_v13, %v5373_v14 }
  0x17   : > { %4521 = vmatmul.mubr.msk.bf16.vlgmr.msra.gmra.mrb[0].mxu0 %vm795_vm0, %v5356_v10  ;;  %v175_v21 = vld [vmem:[%s5326_s23 + $0xc] sm:$0x1]  ;;  %v5393_v22 = vld [vmem:[%s5326_s23 + $0x10] sm:$0xf]  ;;  %v5401_v24 = vld [vmem:[%s5326_s23 + $0x18] sm:$0xf]  ;;  %v4029_v26 = vcombine.low %v172_v15, %v174_v20 }
  0x18   : > { %4529 = vmatpush3.bf16.msra.mxu0 %v5321_v2  ;;  %4524 = vmatprep.mubr.msk.bf16.mxu0 %vm795_vm0, %v5367_v12  ;;  %v251_v25 = vshrl.u32 %v172_v15, 16  ;;  %v5404_v27 = vcombine.low %v174_v20, %v5393_v22  ;;  %v177_v28 = vld [vmem:[%s5326_s23 + $0x14] sm:$0x1]  ;;  %v254_v29 = vshll.u32 %v172_v15, 16  ;;  %v260_v30 = vshll.u32 %v173_v18, 16 }
  0x19   : > { %4530 = vmatprep.subr.bf16.mxu0 %v5361_v11  ;;  %v4030_v31 = vcombine.low %v5393_v22, %v5401_v24  ;;  %v265_v34 = vshrl.u32 %v174_v20, 16  ;;  %v268_v35 = vshll.u32 %v174_v20, 16  ;;  %v274_v36 = vshll.u32 %v175_v21, 16  ;;  %v179_v37 = vld [vmem:[%s5326_s23 + $0x1c] sm:$0x1] }
  0x1a   : > { %v253_v33 = vrot.slane %v251_v25, 4  ;;  %v256_v38 = vrot.slane %v254_v29, 5  ;;  %v262_v39 = vrot.slane %v260_v30, 5  ;;  %v279_v40 = vshrl.u32 %v5393_v22, 16  ;;  %v5419_v42 = vld [vmem:[%s5326_s23 + $0x20] sm:$0xf] }
  0x1b   : > { %v282_v41 = vshll.u32 %v5393_v22, 16  ;;  %v267_v43 = vrot.slane %v265_v34, 4  ;;  %v270_v44 = vrot.slane %v268_v35, 5  ;;  %v276_v45 = vrot.slane %v274_v36, 5  ;;  %v181_v51 = vld [vmem:[%s5326_s23 + $0x24] sm:$0x1] }
  0x1c   : > { %4531 = vmatpush3.bf16.msra.mxu0 %v5361_v11  ;;  %v288_v46 = vshll.u32 %v177_v28, 16  ;;  %v257_v47 = vor.u32 %v256_v38, %v253_v33  ;;  %v281_v48 = vrot.slane %v279_v40, 4  ;;  %v293_v50 = vshrl.u32 %v5401_v24, 16  ;;  %v5435_v61 = vld [vmem:[%s5326_s23 + $0x28] sm:$0xf] }
  0x1d   : > { %4540 = vmatprep.subr.bf16.mxu0 %v5386_v19  ;;  %v284_v49 = vrot.slane %v282_v41, 5  ;;  %v271_v53 = vor.u32 %v270_v44, %v267_v43  ;;  %v296_v55 = vshll.u32 %v5401_v24, 16  ;;  %v302_v56 = vshll.u32 %v179_v37, 16  ;;  %v5443_v22 = vld [vmem:[%s6316_s1 + $0x28] sm:$0xff]   ;;  %v5450_v33 = vld [vmem:[%s5326_s23 + $0x30] sm:$0xf] }
  0x1e   : > { %v290_v54 = vrot.slane %v288_v46, 5  ;;  %v258_v57 = vrot.slane %v257_v47, 4  ;;  %v295_v59 = vrot.slane %v293_v50, 4  ;;  %v307_v60 = vshrl.u32 %v5419_v42, 16  ;;  %v183_v29 = vld [vmem:[%s5326_s23 + $0x2c] sm:$0x1] }
  0x1f   : > { %4525 = vmatmul.mubr.msk.bf16.gmra.mrb[4].mxu0 %vm795_vm0, %v5398_v23  ;;  %v285_v58 = vor.u32 %v284_v49, %v281_v48  ;;  %v272_v62 = vrot.slane %v271_v53, 4  ;;  %v298_v63 = vrot.slane %v296_v55, 5  ;;  %v304_v0 = vrot.slane %v302_v56, 5  ;;  %v185_v38 = vld [vmem:[%s5326_s23 + $0x34] sm:$0x1] }
  0x20   : > { %4532 = vmatprep.mubr.msk.bf16.mxu0 %vm795_vm0, %v4029_v26  ;;  %v310_v1 = vshll.u32 %v5419_v42, 16  ;;  %v263_v15 = vsel %vm5427_vm3, %v258_v57, %v262_v39  ;;  %v309_v20 = vrot.slane %v307_v60, 4  ;;  %v316_v21 = vshll.u32 %v181_v51, 16  ;;  %v5459_v39 = vld [vmem:[%s5326_s23 + $0x38] sm:$0xf] }
  0x21   : > { %v286_v18 = vrot.slane %v285_v58, 4  ;;  %v277_v25 = vsel %vm5427_vm3, %v272_v62, %v276_v45  ;;  %v299_v26 = vor.u32 %v298_v63, %v295_v59  ;;  %v321_v30 = vshrl.u32 %v5435_v61, 16  ;;  %v187_v51 = vld [vmem:[%s5326_s23 + $0x3c] sm:$0x1]  ;;  %v5479_v58 = vld [vmem:[%s6316_s1 + $0x30] sm:$0xff]  }
  0x22   : > { %v312_v28 = vrot.slane %v310_v1, 5  ;;  %v318_v35 = vrot.slane %v316_v21, 5  ;;  %v5454_v36 = vcombine.low %v263_v15, %v277_v25  ;;  %v324_v37 = vshll.u32 %v5435_v61, 16 }
  0x23   : > { %v291_v34 = vsel %vm5427_vm3, %v286_v18, %v290_v54  ;;  %v300_v40 = vrot.slane %v299_v26, 4  ;;  %v323_v44 = vrot.slane %v321_v30, 4  ;;  %v330_v46 = vshll.u32 %v183_v29, 16 }
  0x24   : > { %v313_v41 = vor.u32 %v312_v28, %v309_v20  ;;  %v5461_v43 = vcombine.low %v277_v25, %v291_v34  ;;  %4628 = vmatprep.mubr.msk.bf16.mxu1 %vm795_vm0, %v5454_v36  ;;  %v326_v45 = vrot.slane %v324_v37, 5  ;;  %v335_v47 = vshrl.u32 %v5450_v33, 16 }
  0x25   : > { %v338_v48 = vshll.u32 %v5450_v33, 16  ;;  %v305_v49 = vsel %vm5427_vm3, %v300_v40, %v304_v0  ;;  %v344_v53 = vshll.u32 %v185_v38, 16  ;;  %v349_v54 = vshrl.u32 %v5459_v39, 16 }
  0x26   : > { %v314_v50 = vrot.slane %v313_v41, 4  ;;  %v5473_v55 = vcombine.low %v291_v34, %v305_v49  ;;  %v327_v56 = vor.u32 %v326_v45, %v323_v44  ;;  %v337_v57 = vrot.slane %v335_v47, 4 }
  0x27   : > { %4533 = vmatmul.mubr.msk.bf16.vlgmr.msra.gmra.mrb[0].mxu0 %vm795_vm0, %v4030_v31  ;;  %v332_v31 = vrot.slane %v330_v46, 5  ;;  %v405_v59 = vshrl.u32 %v5344_v7, 16  ;;  %v340_v62 = vrot.slane %v338_v48, 5  ;;  %v351_v63 = vrot.slane %v349_v54, 4  ;;  %v3970_v54 = vld [vmem:[%s5326_s23 + $0x6c] sm:$0x1] }
  0x28   : > { %4541 = vmatpush3.bf16.msra.mxu0 %v5386_v19  ;;  %v319_v60 = vsel %vm5427_vm3, %v314_v50, %v318_v35  ;;  %4629 = vmatmul.mubr.msk.bf16.vlgmr.msra.gmra.mrb[0].mxu1 %vm795_vm0, %v5473_v55  ;;  %v328_v1 = vrot.slane %v327_v56, 4  ;;  %v352_v15 = vshll.u32 %v5459_v39, 16  ;;  %v358_v18 = vshll.u32 %v187_v51, 16  ;;  %v3962_v51 = vld [vmem:[%s5326_s23 + $0x4c] sm:$0x1] }
  0x29   : > { %4542 = vmatprep.subr.bf16.mxu0 %v5443_v22  ;;  %v5484_v0 = vcombine.low %v305_v49, %v319_v60  ;;  %v408_v20 = vshll.u32 %v5344_v7, 16  ;;  %4637 = vmatpush3.bf16.msra.mxu1 %v5321_v2  ;;  %v341_v21 = vor.u32 %v340_v62, %v337_v57  ;;  %v4031_v25 = vcombine.low %v5419_v42, %v5435_v61 }
  0x2a   : > { %v4032_v26 = vcombine.low %v5450_v33, %v5459_v39  ;;  %v366_v28 = vshll.u32 %v5329_v3, 16  ;;  %v5499_v29 = vsel %vm5427_vm3, %v328_v1, %v332_v31  ;;  %4638 = vmatprep.subr.bf16.mxu1 %v5361_v11  ;;  %v346_v7 = vrot.slane %v344_v53, 5  ;;  %v3968_v3 = vld [vmem:[%s5326_s23 + $0x64] sm:$0x1]  ;;  %v3964_v53 = vld [vmem:[%s5326_s23 + $0x54] sm:$0x1] }
  0x2b   : > { %v354_v30 = vrot.slane %v352_v15, 5  ;;  %v377_v2 = vshrl.u32 %v5332_v4, 16  ;;  %v380_v34 = vshll.u32 %v5332_v4, 16  ;;  %v4045_v35 = vcombine.low %v319_v60, %v5499_v29  ;;  %4536 = vmatprep.mubr.msk.bf16.mxu0 %vm795_vm0, %v4031_v25 }
  0x2c   : > { %4543 = vmatpush3.bf16.msra.mxu0 %v5443_v22  ;;  %v342_v37 = vrot.slane %v341_v21, 4  ;;  %v360_v40 = vrot.slane %v358_v18, 5  ;;  %v365_v41 = vrot.slane %v363_v16, 4  ;;  %v407_v44 = vrot.slane %v405_v59, 4 }
  0x2d   : > { %4552 = vmatprep.subr.bf16.mxu0 %v5479_v58  ;;  %v355_v38 = vor.u32 %v354_v30, %v351_v63  ;;  %v410_v45 = vrot.slane %v408_v20, 5  ;;  %4632 = vmatprep.mubr.msk.bf16.mxu1 %vm795_vm0, %v4045_v35  ;;  %v368_v4 = vrot.slane %v366_v28, 5  ;;  %v419_v46 = vshrl.u32 %v5349_v8, 16 }
  0x2e   : > { %4639 = vmatpush3.bf16.msra.mxu1 %v5361_v11  ;;  %v5515_v47 = vsel %vm5427_vm3, %v342_v37, %v346_v7  ;;  %v379_v16 = vrot.slane %v377_v2, 4  ;;  %v382_v49 = vrot.slane %v380_v34, 5  ;;  %v422_v50 = vshll.u32 %v5349_v8, 16  ;;  %v5536_v8 = vld [vmem:[%s6316_s1 + $0x38] sm:$0xff]   ;;  %v5554_v34 = vld [vmem:[%s5326_s23 + $0x90] sm:$0xf] }
  0x2f   : > { %4537 = vmatmul.mubr.msk.bf16.gmra.mrb[4].mxu0 %vm795_vm0, %v4032_v26  ;;  %v356_v48 = vrot.slane %v355_v38, 4  ;;  %4648 = vmatprep.subr.bf16.mxu1 %v5386_v19  ;;  %v411_v56 = vor.u32 %v410_v45, %v407_v44  ;;  %v414_v57 = vshll.u32 %v3968_v3, 16  ;;  %v369_v59 = vor.u32 %v368_v4, %v365_v41  ;;  %6340 = vst [vmem:[#allocation2_spill] sm:$0xff] %v5536_v8  ;;  %v3966_v41 = vld [vmem:[%s5326_s23 + $0x5c] sm:$0x1] }
  0x30   : > { %4544 = vmatprep.mubr.msk.bf16.mxu0 %vm795_vm0, %v5454_v36  ;;  %v391_v36 = vshrl.u32 %v5341_v6, 16  ;;  %v394_v60 = vshll.u32 %v5341_v6, 16  ;;  %v421_v62 = vrot.slane %v419_v46, 4  ;;  %v383_v63 = vor.u32 %v382_v49, %v379_v16  ;;  %v5568_v3 = vld [vmem:[%s5326_s23 + $0xa8] sm:$0xf] }
  0x31   : > { %v5524_v11 = vsel %vm5427_vm3, %v356_v48, %v360_v40  ;;  %v424_v1 = vrot.slane %v422_v50, 5  ;;  %v428_v15 = vshll.u32 %v3970_v54, 16  ;;  %v433_v18 = vshrl.u32 %v5352_v9, 16  ;;  %6342 = vst [vmem:[#allocation4_spill] sm:$0xff] %v5568_v3  ;;  %v3972_v16 = vld [vmem:[%s5326_s23 + $0x74] sm:$0x1] }
  0x32   : > { %v4046_v31 = vcombine.low %v5515_v47, %v5524_v11  ;;  %v436_v20 = vshll.u32 %v5352_v9, 16  ;;  %v372_v6 = vshll.u32 %v3962_v51, 16  ;;  %v386_v21 = vshll.u32 %v3964_v53, 16  ;;  %v5585_v53 = vld [vmem:[%s5326_s23 + $0xb0] sm:$0xf] }
  0x33   : > { %v412_v25 = vrot.slane %v411_v56, 4  ;;  %v416_v26 = vrot.slane %v414_v57, 5  ;;  %v425_v28 = vor.u32 %v424_v1, %v421_v62  ;;  %v430_v7 = vrot.slane %v428_v15, 5  ;;  %6345 = vst [vmem:[#allocation7_spill] sm:$0xff] %v5585_v53  ;;  %v5605_v62 = vld [vmem:[%s5326_s23 + $0xa0] sm:$0xf] }
  0x34   : > { %4633 = vmatmul.mubr.msk.bf16.gmra.mrb[4].mxu1 %vm795_vm0, %v4046_v31  ;;  %v370_v9 = vrot.slane %v369_v59, 4  ;;  %v393_v30 = vrot.slane %v391_v36, 4  ;;  %v396_v2 = vrot.slane %v394_v60, 5  ;;  %v374_v38 = vrot.slane %v372_v6, 5  ;;  %6346 = vst [vmem:[#allocation8_spill] sm:$0xff] %v5605_v62 }
  0x35   : > { %4640 = vmatprep.mubr.msk.bf16.mxu1 %vm795_vm0, %v5338_v5  ;;  %v5551_v5 = vld [vmem:[%s6316_s1 + $0x40] sm:$0xff]   ;;  %v426_v37 = vrot.slane %v425_v28, 4  ;;  %v388_v40 = vrot.slane %v386_v21, 5  ;;  %v435_v44 = vrot.slane %v433_v18, 4  ;;  %v438_v45 = vrot.slane %v436_v20, 5 }
  0x36   : > { %v447_v4 = vshrl.u32 %v5370_v13, 16  ;;  %v450_v46 = vshll.u32 %v5370_v13, 16  ;;  %v5564_v48 = vsel %vm5427_vm3, %v412_v25, %v416_v26  ;;  %v397_v50 = vor.u32 %v396_v2, %v393_v30  ;;  %v5613_v6 = vld [vmem:[%s5326_s23 + $0xb8] sm:$0xf]  ;;  %v5616_v21 = vld [vmem:[%s5326_s23 + $0xf0] sm:$0xf] }
  0x37   : > { %4545 = vmatmul.mubr.msk.bf16.vlgmr.msra.gmra.mrb[0].mxu0 %vm795_vm0, %v5473_v55  ;;  %v384_v55 = vrot.slane %v383_v63, 4  ;;  %v5573_v49 = vsel %vm5427_vm3, %v426_v37, %v430_v7  ;;  %v461_v54 = vshrl.u32 %v5373_v14, 16  ;;  %v464_v56 = vshll.u32 %v5373_v14, 16  ;;  %6347 = vst [vmem:[#allocation9_spill] sm:$0xff] %v5613_v6  ;;  %v5620_v7 = vld [vmem:[%s5326_s23 + $0xf8] sm:$0xf] }
  0x38   : > { %4548 = vmatprep.mubr.msk.bf16.mxu0 %vm795_vm0, %v4045_v35  ;;  %4553 = vmatpush3.bf16.msra.mxu0 %v5479_v58  ;;  %v5557_v35 = vld [vmem:[%s5326_s23 + $0x98] sm:$0xf]  ;;  %v5581_v13 = vcombine.low %v5564_v48, %v5573_v49  ;;  %v400_v57 = vshll.u32 %v3966_v41, 16  ;;  %v375_v36 = vsel %vm5427_vm3, %v370_v9, %v374_v38  ;;  %v439_v60 = vor.u32 %v438_v45, %v435_v44  ;;  %v5647_v45 = vld [vmem:[%s6316_s1 + $0x48] sm:$0xff]   ;;  %v5738_v59 = vld [vmem:[%s5326_s23 + $0x100] sm:$0xf] }
  0x39   : > { %4554 = vmatprep.subr.bf16.mxu0 %v5536_v8  ;;  %6341 = vst [vmem:[#allocation3_spill] sm:$0xff] %v5557_v35  ;;  %v5577_v51 = vcombine.low %v5554_v34, %v5557_v35  ;;  %v5600_v14 = vsel %vm5427_vm3, %v384_v55, %v388_v40  ;;  %v449_v63 = vrot.slane %v447_v4, 4  ;;  %v452_v1 = vrot.slane %v450_v46, 5 }
  0x3a   : > { %6344 = vst [vmem:[#allocation6_spill] sm:$0xff] %v5581_v13  ;;  %v398_v15 = vrot.slane %v397_v50, 4  ;;  %v4145_v18 = vcombine.low %v375_v36, %v5600_v14  ;;  %v402_v20 = vrot.slane %v400_v57, 5  ;;  %v463_v26 = vrot.slane %v461_v54, 4  ;;  %v3986_v50 = vld [vmem:[%s5326_s23 + $0xac] sm:$0x1] }
  0x3b   : > { %6343 = vst [vmem:[#allocation5_spill] sm:$0xff] %v5577_v51  ;;  %v466_v28 = vrot.slane %v464_v56, 5  ;;  %v517_v9 = vshrl.u32 %v5568_v3, 16  ;;  %v5626_v30 = vcombine.low %v5605_v62, %v5568_v3  ;;  %v5630_v2 = vcombine.low %v5616_v21, %v5620_v7  ;;  %v5661_v56 = vld [vmem:[%s5326_s23 + $0xc0] sm:$0xf] }
  0x3c   : > { %4555 = vmatpush3.bf16.msra.mxu0 %v5536_v8  ;;  %4641 = vmatmul.mubr.msk.bf16.vlgmr.msra.gmra.mrb[0].mxu1 %vm795_vm0, %v5356_v10  ;;  %v442_v10 = vshll.u32 %v3972_v16, 16  ;;  %v453_v55 = vor.u32 %v452_v1, %v449_v63  ;;  %v5635_v38 = vcombine.low %v5585_v53, %v5613_v6  ;;  %v5641_v40 = vsel %vm5427_vm3, %v398_v15, %v402_v20  ;;  %v3988_v36 = vld [vmem:[%s5326_s23 + $0xb4] sm:$0x1]  ;;  %v5675_v15 = vld [vmem:[%s5326_s23 + $0xd8] sm:$0xf] }
  0x3d   : > { %4564 = vmatprep.subr.bf16.mxu0 %v5551_v5  ;;  %4649 = vmatpush3.bf16.msra.mxu1 %v5386_v19  ;;  %v3974_v19 = vld [vmem:[%s5326_s23 + $0x7c] sm:$0x1]  ;;  %6348 = vst [vmem:[#allocation10_spill] sm:$0xff] %v5626_v30  ;;  %6349 = vst [vmem:[#allocation11_spill] sm:$0xff] %v5630_v2  ;;  %v531_v44 = vshrl.u32 %v5585_v53, 16  ;;  %v475_v4 = vshrl.u32 %v5554_v34, 16  ;;  %v467_v46 = vor.u32 %v466_v28, %v463_v26 }
  0x3e   : > { %4644 = vmatprep.mubr.msk.bf16.mxu1 %vm795_vm0, %v5367_v12  ;;  %4650 = vmatprep.subr.bf16.mxu1 %v5443_v22  ;;  %v3976_v12 = vld [vmem:[%s5326_s23 + $0x84] sm:$0x1]  ;;  %v444_v25 = vrot.slane %v442_v10, 5  ;;  %v456_v37 = vshll.u32 %v3974_v19, 16  ;;  %6350 = vst [vmem:[#allocation12_spill] sm:$0xff] %v5635_v38  ;;  %v534_v16 = vshll.u32 %v5585_v53, 16 }
  0x3f   : > { %4549 = vmatmul.mubr.msk.bf16.gmra.mrb[4].mxu0 %vm795_vm0, %v4046_v31  ;;  %v440_v31 = vrot.slane %v439_v60, 4  ;;  %v470_v41 = vshll.u32 %v3976_v12, 16  ;;  %v478_v54 = vshll.u32 %v5554_v34, 16  ;;  %v519_v57 = vrot.slane %v517_v9, 4  ;;  %v5670_v12 = vld [vmem:[%s5326_s23 + $0xc8] sm:$0xf] }
  0x40   : > { %4556 = vmatprep.mubr.msk.bf16.mxu0 %vm795_vm0, %v5577_v51  ;;  %v4146_v60 = vcombine.low %v5641_v40, %v5564_v48  ;;  %v454_v10 = vrot.slane %v453_v55, 4  ;;  %v458_v19 = vrot.slane %v456_v37, 5  ;;  %v5681_v48 = vld [vmem:[%s6316_s1 + $0x50] sm:$0xff]   ;;  %v533_v20 = vrot.slane %v531_v44, 4  ;;  %v5690_v55 = vld [vmem:[%s5326_s23 + $0xe0] sm:$0xf] }
  0x41   : > { %4651 = vmatpush3.bf16.msra.mxu1 %v5443_v22  ;;  %v520_v22 = vshll.u32 %v5568_v3, 16  ;;  %v472_v1 = vrot.slane %v470_v41, 5  ;;  %v536_v26 = vrot.slane %v534_v16, 5  ;;  %v540_v28 = vshll.u32 %v3988_v36, 16  ;;  %v5750_v53 = vld [vmem:[%s6316_s1 + $0x58] sm:$0xff]  }
  0x42   : > { %4660 = vmatprep.subr.bf16.mxu1 %v5479_v58  ;;  %v489_v9 = vshrl.u32 %v5557_v35, 16  ;;  %v477_v37 = vrot.slane %v475_v4, 4  ;;  %v480_v16 = vrot.slane %v478_v54, 5  ;;  %v5701_v4 = vsel %vm5427_vm3, %v454_v10, %v458_v19 }
  0x43   : > { %v522_v34 = vrot.slane %v520_v22, 5  ;;  %v5687_v22 = vcombine.low %v5661_v56, %v5670_v12  ;;  %v542_v36 = vrot.slane %v540_v28, 5  ;;  %v5709_v54 = vcombine.low %v5675_v15, %v5690_v55 }
  0x44   : > { %4645 = vmatmul.mubr.msk.bf16.gmra.mrb[4].mxu1 %vm795_vm0, %v5398_v23  ;;  %v5653_v23 = vsel %vm5427_vm3, %v440_v31, %v444_v25  ;;  %v468_v31 = vrot.slane %v467_v46, 4  ;;  %v537_v46 = vor.u32 %v536_v26, %v533_v20  ;;  %v491_v10 = vrot.slane %v489_v9, 4 }
  0x45   : > { %4652 = vmatprep.mubr.msk.bf16.mxu1 %vm795_vm0, %v4145_v18  ;;  %v4147_v63 = vcombine.low %v5573_v49, %v5653_v23  ;;  %v526_v18 = vshll.u32 %v3986_v50, 16  ;;  %v523_v25 = vor.u32 %v522_v34, %v519_v57  ;;  %v492_v49 = vshll.u32 %v5557_v35, 16  ;;  %6351 = vst [vmem:[#allocation13_spill] sm:$0xff] %v5687_v22  ;;  %v3980_v34 = vld [vmem:[%s5326_s23 + $0x94] sm:$0x1] }
  0x46   : > { %v503_v50 = vshrl.u32 %v5605_v62, 16  ;;  %v506_v57 = vshll.u32 %v5605_v62, 16  ;;  %v538_v20 = vrot.slane %v537_v46, 4  ;;  %v629_v46 = vshrl.u32 %v5616_v21, 16  ;;  %v4004_v35 = vld [vmem:[%s5326_s23 + $0xf4] sm:$0x1] }
  0x47   : > { %4557 = vmatmul.mubr.msk.bf16.vlgmr.msra.gmra.mrb[0].mxu0 %vm795_vm0, %v5626_v30  ;;  %v524_v41 = vrot.slane %v523_v25, 4  ;;  %v528_v44 = vrot.slane %v526_v18, 5  ;;  %v3982_v18 = vld [vmem:[%s5326_s23 + $0x9c] sm:$0x1]  ;;  %v494_v19 = vrot.slane %v492_v49, 5  ;;  %v638_v51 = vshll.u32 %v4004_v35, 16 }
  0x48   : > { %4560 = vmatprep.mubr.msk.bf16.mxu0 %vm795_vm0, %v5635_v38  ;;  %4565 = vmatpush3.bf16.msra.mxu0 %v5551_v5  ;;  %v5721_v25 = vld [vmem:[%s5326_s23 + $0xe8] sm:$0xf]  ;;  %v5731_v28 = vsel %vm5427_vm3, %v538_v20, %v542_v36  ;;  %v3984_v36 = vld [vmem:[%s5326_s23 + $0xa4] sm:$0x1]  ;;  %v505_v20 = vrot.slane %v503_v50, 4  ;;  %v498_v2 = vshll.u32 %v3982_v18, 16 }
  0x49   : > { %4566 = vmatprep.subr.bf16.mxu0 %v5647_v45  ;;  %v5727_v26 = vsel %vm5427_vm3, %v524_v41, %v528_v44  ;;  %v481_v41 = vor.u32 %v480_v16, %v477_v37  ;;  %v484_v44 = vshll.u32 %v3980_v34, 16  ;;  %v495_v49 = vor.u32 %v494_v19, %v491_v10  ;;  %v5757_v34 = vld [vmem:[%s5326_s23 + $0x108] sm:$0xf]  ;;  %v5760_v18 = vld [vmem:[%s5326_s23 + $0x110] sm:$0xf] }
  0x4a   : > { %v576_v37 = vshll.u32 %v5670_v12, 16  ;;  %v587_v16 = vshrl.u32 %v5675_v15, 16  ;;  %v632_v50 = vshll.u32 %v5616_v21, 16  ;;  %v5765_v10 = vcombine.low %v5721_v25, %v5616_v21  ;;  %v4006_v38 = vld [vmem:[%s5326_s23 + $0xfc] sm:$0x1] }
  0x4b   : > { %v512_v19 = vshll.u32 %v3984_v36, 16  ;;  %v482_v62 = vrot.slane %v481_v41, 4  ;;  %v590_v21 = vshll.u32 %v5675_v15, 16  ;;  %v496_v30 = vrot.slane %v495_v49, 4 }
  0x4c   : > { %4567 = vmatpush3.bf16.msra.mxu0 %v5647_v45  ;;  %4653 = vmatmul.mubr.msk.bf16.vlgmr.msra.gmra.mrb[0].mxu1 %vm795_vm0, %v4146_v60  ;;  %v5705_v60 = vsel %vm5427_vm3, %v468_v31, %v472_v1  ;;  %v5742_v31 = vcombine.low %v5727_v26, %v5731_v28  ;;  %v508_v1 = vrot.slane %v506_v57, 5  ;;  %v643_v57 = vshrl.u32 %v5620_v7, 16 }
  0x4d   : > { %4576 = vmatprep.subr.bf16.mxu0 %v5681_v48  ;;  %4661 = vmatpush3.bf16.msra.mxu1 %v5479_v58  ;;  %6352 = vst [vmem:[#allocation14_spill] sm:$0xff] %v5705_v60  ;;  %v545_v58 = vshrl.u32 %v5613_v6, 16  ;;  %v4148_v9 = vcombine.low %v5701_v4, %v5705_v60  ;;  %v500_v60 = vrot.slane %v498_v2, 5  ;;  %v634_v36 = vrot.slane %v632_v50, 5 }
  0x4e   : > { %4656 = vmatprep.mubr.msk.bf16.mxu1 %vm795_vm0, %v4147_v63  ;;  %4662 = vmatprep.subr.bf16.mxu1 %v5536_v8  ;;  %v548_v63 = vshll.u32 %v5613_v6, 16  ;;  %6353 = vst [vmem:[#allocation15_spill] sm:$0xff] %v5742_v31  ;;  %v3990_v6 = vld [vmem:[%s5326_s23 + $0xbc] sm:$0x1]  ;;  %v5789_v15 = vcombine.low %v5757_v34, %v5760_v18  ;;  %v652_v49 = vshll.u32 %v4006_v38, 16  ;;  %v514_v35 = vrot.slane %v512_v19, 5 }
  0x4f   : > { %4561 = vmatmul.mubr.msk.bf16.gmra.mrb[4].mxu0 %vm795_vm0, %v5687_v22  ;;  %v547_v31 = vrot.slane %v545_v58, 4  ;;  %v646_v58 = vshll.u32 %v5620_v7, 16  ;;  %v509_v22 = vor.u32 %v508_v1, %v505_v20  ;;  %v5785_v1 = vcombine.low %v5401_v24, %v5419_v42 }
  0x50   : > { %4568 = vmatprep.mubr.msk.bf16.mxu0 %vm795_vm0, %v5709_v54  ;;  %v550_v3 = vrot.slane %v548_v63, 5  ;;  %v5770_v63 = vcombine.low %v5620_v7, %v5738_v59  ;;  %v554_v2 = vshll.u32 %v3990_v6, 16  ;;  %v640_v20 = vrot.slane %v638_v51, 5 }
  0x51   : > { %4663 = vmatpush3.bf16.msra.mxu1 %v5536_v8  ;;  %v486_v8 = vrot.slane %v484_v44, 5  ;;  %v510_v42 = vrot.slane %v509_v22, 4  ;;  %v5801_v44 = vsel %vm5427_vm3, %v496_v30, %v500_v60  ;;  %v654_v50 = vrot.slane %v652_v49, 5  ;;  %v3992_v30 = vld [vmem:[%s5326_s23 + $0xc4] sm:$0x1] }
  0x52   : > { %4672 = vmatprep.subr.bf16.mxu1 %v5551_v5  ;;  %v551_v7 = vor.u32 %v550_v3, %v547_v31  ;;  %v5795_v3 = vld [vmem:[%s6316_s1 + $0x60] sm:$0xff]   ;;  %v648_v31 = vrot.slane %v646_v58, 5  ;;  %v6354_v58 = vshrl.u32 %v5661_v56, 16  ;;  %v6355_v13 = vshll.u32 %v5661_v56, 16 }
  0x53   : > { %v487_v24 = vsel %vm5427_vm3, %v482_v62, %v486_v8  ;;  %v556_v22 = vrot.slane %v554_v2, 5  ;;  %v6356_v51 = vshrl.u32 %v5670_v12, 16  ;;  %v578_v19 = vrot.slane %v576_v37, 5 }
  0x54   : > { %4657 = vmatmul.mubr.msk.bf16.gmra.mrb[4].mxu1 %vm795_vm0, %v4148_v9  ;;  %v631_v9 = vrot.slane %v629_v46, 4  ;;  %v645_v46 = vrot.slane %v643_v57, 4  ;;  %v552_v57 = vrot.slane %v551_v7, 4  ;;  %v561_v38 = vrot.slane %v6354_v58, 4 }
  0x55   : > { %4664 = vmatprep.mubr.msk.bf16.mxu1 %vm795_vm0, %v5709_v54  ;;  %v564_v8 = vrot.slane %v6355_v13, 5  ;;  %v575_v60 = vrot.slane %v6356_v51, 4  ;;  %v601_v7 = vshrl.u32 %v5690_v55, 16  ;;  %v5820_v13 = vcombine.low %v487_v24, %v5801_v44 }
  0x56   : > { %v635_v41 = vor.u32 %v634_v36, %v631_v9  ;;  %v649_v6 = vor.u32 %v648_v31, %v645_v46  ;;  %v604_v36 = vshll.u32 %v5690_v55, 16  ;;  %v3994_v46 = vld [vmem:[%s5326_s23 + $0xcc] sm:$0x1]  ;;  %v589_v2 = vrot.slane %v587_v16, 4 }
  0x57   : > { %4569 = vmatmul.mubr.msk.bf16.vlgmr.msra.gmra.mrb[0].mxu0 %vm795_vm0, %v5765_v10  ;;  %v592_v31 = vrot.slane %v590_v21, 5  ;;  %v5836_v24 = vsel %vm5427_vm3, %v510_v42, %v514_v35  ;;  %v565_v16 = vor.u32 %v564_v8, %v561_v38  ;;  %v568_v21 = vshll.u32 %v3992_v30, 16  ;;  %v3998_v42 = vld [vmem:[%s5326_s23 + $0xdc] sm:$0x1] }
  0x58   : > { %4572 = vmatprep.mubr.msk.bf16.mxu0 %vm795_vm0, %v5770_v63  ;;  %4577 = vmatpush3.bf16.msra.mxu0 %v5681_v48  ;;  %v636_v62 = vrot.slane %v635_v41, 4  ;;  %v650_v9 = vrot.slane %v649_v6, 4  ;;  %v579_v6 = vor.u32 %v578_v19, %v575_v60  ;;  %v5848_v58 = vcombine.low %v5435_v61, %v5450_v33 }
  0x59   : > { %4578 = vmatprep.subr.bf16.mxu0 %v5750_v53  ;;  %v603_v35 = vrot.slane %v601_v7, 4  ;;  %v615_v38 = vshrl.u32 %v5721_v25, 16  ;;  %v618_v8 = vshll.u32 %v5721_v25, 16  ;;  %v566_v33 = vrot.slane %v565_v16, 4  ;;  %v5869_v7 = vld [vmem:[%s6316_s1 + $0x68] sm:$0xff]  }
  0x5a   : > { %v5828_v37 = vsel %vm5427_vm3, %v636_v62, %v640_v20  ;;  %v5832_v49 = vsel %vm5427_vm3, %v650_v9, %v654_v50  ;;  %v5844_v20 = vsel %vm5427_vm3, %v552_v57, %v556_v22  ;;  %v582_v50 = vshll.u32 %v3994_v46, 16  ;;  %v4000_v22 = vld [vmem:[%s5326_s23 + $0xe4] sm:$0x1] }
  0x5b   : > { %6357 = vst [vmem:[#allocation16_spill] sm:$0xff] %v5828_v37  ;;  %6358 = vst [vmem:[#allocation17_spill] sm:$0xff] %v5832_v49  ;;  %v606_v62 = vrot.slane %v604_v36, 5  ;;  %v5857_v57 = vcombine.low %v5836_v24, %v5727_v26  ;;  %v5862_v61 = vcombine.low %v5731_v28, %v5844_v20  ;;  %v570_v30 = vrot.slane %v568_v21, 5 }
  0x5c   : > { %4579 = vmatpush3.bf16.msra.mxu0 %v5750_v53  ;;  %4665 = vmatmul.mubr.msk.bf16.vlgmr.msra.gmra.mrb[0].mxu1 %vm795_vm0, %v5765_v10  ;;  %v593_v51 = vor.u32 %v592_v31, %v589_v2  ;;  %v580_v60 = vrot.slane %v579_v6, 4  ;;  %v584_v19 = vrot.slane %v582_v50, 5  ;;  %v596_v9 = vshll.u32 %v3998_v42, 16  ;;  %v4002_v42 = vld [vmem:[%s5326_s23 + $0xec] sm:$0x1] }
  0x5d   : > { %4588 = vmatprep.subr.bf16.mxu0 %v5795_v3  ;;  %4673 = vmatpush3.bf16.msra.mxu1 %v5551_v5  ;;  %v5873_v26 = vcombine.low %v5499_v29, %v5515_v47  ;;  %v607_v28 = vor.u32 %v606_v62, %v603_v35  ;;  %v610_v36 = vshll.u32 %v4000_v22, 16  ;;  %v5879_v46 = vcombine.low %v5600_v14, %v5641_v40 }
  0x5e   : > { %4668 = vmatprep.mubr.msk.bf16.mxu1 %vm795_vm0, %v5770_v63  ;;  %4674 = vmatprep.subr.bf16.mxu1 %v5647_v45  ;;  %v5883_v2 = vcombine.low %v5653_v23, %v5701_v4  ;;  %v657_v31 = vshrl.u32 %v5738_v59, 16  ;;  %v660_v16 = vshll.u32 %v5738_v59, 16  ;;  %v5894_v29 = vsel %vm5427_vm3, %v566_v33, %v570_v30  ;;  %v5900_v23 = vld [vmem:[%s6316_s1 + $0x70] sm:$0xff]  }
  0x5f   : > { %4573 = vmatmul.mubr.msk.bf16.gmra.mrb[4].mxu0 %vm795_vm0, %v5789_v15  ;;  %v594_v47 = vrot.slane %v593_v51, 4  ;;  %v617_v14 = vrot.slane %v615_v38, 4  ;;  %v620_v40 = vrot.slane %v618_v8, 5  ;;  %v5904_v4 = vsel %vm5427_vm3, %v580_v60, %v584_v19  ;;  %v4008_v8 = vld [vmem:[%s5326_s23 + $0x104] sm:$0x1] }
  0x60   : > { %4580 = vmatprep.mubr.msk.bf16.mxu0 %vm795_vm0, %v5820_v13  ;;  %v598_v21 = vrot.slane %v596_v9, 5  ;;  %v608_v6 = vrot.slane %v607_v28, 4  ;;  %v612_v50 = vrot.slane %v610_v36, 5  ;;  %v659_v35 = vrot.slane %v657_v31, 4 }
  0x61   : > { %4675 = vmatpush3.bf16.msra.mxu1 %v5647_v45  ;;  %v662_v62 = vrot.slane %v660_v16, 5  ;;  %v671_v38 = vshrl.u32 %v5757_v34, 16  ;;  %v674_v22 = vshll.u32 %v5757_v34, 16  ;;  %v5915_v33 = vcombine.low %v5894_v29, %v5904_v4 }
  0x62   : > { %4684 = vmatprep.subr.bf16.mxu1 %v5681_v48  ;;  %v621_v30 = vor.u32 %v620_v40, %v617_v14  ;;  %v624_v51 = vshll.u32 %v4002_v42, 16  ;;  %v685_v60 = vshrl.u32 %v5760_v18, 16  ;;  %v688_v19 = vshll.u32 %v5760_v18, 16  ;;  %v4010_v40 = vld [vmem:[%s5326_s23 + $0x10c] sm:$0x1] }
  0x63   : > { %v599_v9 = vsel %vm5427_vm3, %v594_v47, %v598_v21  ;;  %v5927_v28 = vsel %vm5427_vm3, %v608_v6, %v612_v50  ;;  %v663_v36 = vor.u32 %v662_v62, %v659_v35  ;;  %v666_v31 = vshll.u32 %v4008_v8, 16  ;;  %v4012_v8 = vld [vmem:[%s5326_s23 + $0x114] sm:$0x1] }
  0x64   : > { %4669 = vmatmul.mubr.msk.bf16.gmra.mrb[4].mxu1 %vm795_vm0, %v5789_v15  ;;  %v5935_v16 = vcombine.low %v599_v9, %v5927_v28  ;;  %v622_v14 = vrot.slane %v621_v30, 4  ;;  %v626_v47 = vrot.slane %v624_v51, 5  ;;  %v673_v21 = vrot.slane %v671_v38, 4  ;;  %v5946_v30 = vld [vmem:[%s6316_s1 + $0x78] sm:$0xff]  }
  0x65   : > { %4676 = vmatprep.mubr.msk.bf16.mxu1 %vm795_vm0, %v5820_v13  ;;  %v676_v6 = vrot.slane %v674_v22, 5  ;;  %v687_v50 = vrot.slane %v685_v60, 4  ;;  %v690_v42 = vrot.slane %v688_v19, 5  ;;  %v664_v35 = vrot.slane %v663_v36, 4  ;;  %v188_v36 = vld [vmem:[%s5326_s23 + $0x40] sm:$0xf] }
  0x66   : > { %v668_v62 = vrot.slane %v666_v31, 5  ;;  %v680_v9 = vshll.u32 %v4010_v40, 16  ;;  %v5952_v38 = vsel %vm5427_vm3, %v622_v14, %v626_v47  ;;  %v694_v60 = vshll.u32 %v4012_v8, 16  ;;  %v5972_v47 = vld [vmem:[%s6316_s1 + $0x80] sm:$0xff]   ;;  %v6012_v8 = vld [vmem:[%s6316_s1 + $0x88] sm:$0xff]  }
  0x67   : > { %4581 = vmatmul.mubr.msk.bf16.vlgmr.msra.gmra.mrb[0].mxu0 %vm795_vm0, %v5857_v57  ;;  %v677_v22 = vor.u32 %v676_v6, %v673_v21  ;;  %v691_v51 = vor.u32 %v690_v42, %v687_v50  ;;  %v5966_v31 = vcombine.low %v5952_v38, %v5828_v37  ;;  %v5979_v42 = vcombine.low %v5459_v39, %v188_v36 }
  0x68   : > { %4584 = vmatprep.mubr.msk.bf16.mxu0 %vm795_vm0, %v5862_v61  ;;  %4589 = vmatpush3.bf16.msra.mxu0 %v5795_v3  ;;  %v5958_v19 = vsel %vm5427_vm3, %v664_v35, %v668_v62  ;;  %v682_v14 = vrot.slane %v680_v9, 5  ;;  %v696_v50 = vrot.slane %v694_v60, 5  ;;  %v5263_v9 = vld [vmem:[%s5326_s23 + $0x70] sm:$0xf]  ;;  %v699_v60 = vshrl.u32 %v188_v36, 16 }
  0x69   : > { %4590 = vmatprep.subr.bf16.mxu0 %v5869_v7  ;;  %6359 = vst [vmem:[#allocation18_spill] sm:$0xff] %v5958_v19  ;;  %v5976_v40 = vcombine.low %v5832_v49, %v5958_v19  ;;  %v678_v21 = vrot.slane %v677_v22, 4  ;;  %v692_v6 = vrot.slane %v691_v51, 4  ;;  %v5264_v22 = vld [vmem:[%s5326_s23 + $0x78] sm:$0xf]  ;;  %v6361_v19 = vld [vmem:[#allocation6_spill] sm:$0xff] }
  0x6a   : > { %v6018_v51 = vcombine.low %v5263_v9, %v5264_v22  ;;  %v5266_v9 = vld [vmem:[%s6316_s1 + $0x10] sm:$0xff]   ;;  %v701_v22 = vrot.slane %v699_v60, 4 }
  0x6b   : > { %v5990_v35 = vsel %vm5427_vm3, %v678_v21, %v682_v14  ;;  %v5994_v39 = vsel %vm5427_vm3, %v692_v6, %v696_v50  ;;  %v702_v14 = vshll.u32 %v188_v36, 16  ;;  %v3977_v21 = vld [vmem:[%s5326_s23 + $0x88] sm:$0xf]  ;;  %v5265_v6 = vld [vmem:[%s5326_s23 + $0x80] sm:$0xf] }
  0x6c   : > { %4591 = vmatpush3.bf16.msra.mxu0 %v5869_v7  ;;  %4677 = vmatmul.mubr.msk.bf16.vlgmr.msra.gmra.mrb[0].mxu1 %vm795_vm0, %v5857_v57  ;;  %6360 = vst [vmem:[#allocation19_spill] sm:$0xff] %v5994_v39  ;;  %v6003_v62 = vcombine.low %v5990_v35, %v5994_v39  ;;  %v6031_v50 = vcombine.low %v5265_v6, %v3977_v21  ;;  %v189_v36 = vld [vmem:[%s5326_s23 + $0x44] sm:$0x1]  ;;  %v716_v49 = vshll.u32 %v3977_v21, 16 }
  0x6d   : > { %4600 = vmatprep.subr.bf16.mxu0 %v5900_v23  ;;  %4685 = vmatpush3.bf16.msra.mxu1 %v5681_v48  ;;  %v704_v41 = vrot.slane %v702_v14, 5  ;;  %v708_v39 = vshll.u32 %v189_v36, 16  ;;  %v5268_v36 = vld [vmem:[%s6316_s1] sm:$0xff]  }
  0x6e   : > { %4680 = vmatprep.mubr.msk.bf16.mxu1 %vm795_vm0, %v5862_v61  ;;  %4686 = vmatprep.subr.bf16.mxu1 %v5750_v53 }
  0x6f   : > { %4585 = vmatmul.mubr.msk.bf16.gmra.mrb[4].mxu0 %vm795_vm0, %v5915_v33  ;;  %v705_v6 = vor.u32 %v704_v41, %v701_v22  ;;  %v710_v14 = vrot.slane %v708_v39, 5  ;;  %v5267_v41 = vld [vmem:[%s6316_s1 + $0x18] sm:$0xff]  }
  0x70   : > { %4592 = vmatprep.mubr.msk.bf16.mxu0 %vm795_vm0, %v5404_v27 }
  0x71   : > { %4687 = vmatpush3.bf16.msra.mxu1 %v5750_v53  ;;  %v706_v60 = vrot.slane %v705_v6, 4  ;;  %v713_v6 = vshrl.u32 %v3977_v21, 16 }
  0x72   : > { %4696 = vmatprep.subr.bf16.mxu1 %v5795_v3 }
  0x73   : > { %v711_v22 = vsel %vm5427_vm3, %v706_v60, %v710_v14  ;;  %v718_v60 = vrot.slane %v716_v49, 5  ;;  %v3978_v14 = vld [vmem:[%s5326_s23 + $0x8c] sm:$0x1] }
  0x74   : > { %4681 = vmatmul.mubr.msk.bf16.gmra.mrb[4].mxu1 %vm795_vm0, %v5915_v33  ;;  %v6063_v39 = vcombine.low %v5524_v11, %v711_v22  ;;  %v715_v11 = vrot.slane %v713_v6, 4  ;;  %v722_v22 = vshll.u32 %v3978_v14, 16  ;;  %v5269_v49 = vld [vmem:[%s6316_s1 + $0x8] sm:$0xff]   ;;  %v6362_v14 = vld [vmem:[#allocation5_spill] sm:$0xff] }
  0x75   : > { %4688 = vmatprep.mubr.msk.bf16.mxu1 %vm795_vm0, %v5935_v16 }
  0x76   : > { %v719_v21 = vor.u32 %v718_v60, %v715_v11  ;;  %v724_v37 = vrot.slane %v722_v22, 5  ;;  %v5270_v11 = vld [vmem:[%s6316_s1 + $0x20] sm:$0xff]  }
  0x77   : > { %4593 = vmatmul.mubr.msk.bf16.vlgmr.msra.gmra.mrb[0].mxu0 %vm795_vm0, %v5785_v1 }
  0x78   : > { %4596 = vmatprep.mubr.msk.bf16.mxu0 %vm795_vm0, %v5848_v58  ;;  %4601 = vmatpush3.bf16.msra.mxu0 %v5900_v23  ;;  %v720_v6 = vrot.slane %v719_v21, 4  ;;  %v6363_v21 = vld [vmem:[#allocation14_spill] sm:$0xff] }
  0x79   : > { %4602 = vmatprep.subr.bf16.mxu0 %v5946_v30 }
  0x7a   : > { %v725_v60 = vsel %vm5427_vm3, %v720_v6, %v724_v37  ;;  %v6365_v37 = vld [vmem:[#allocation12_spill] sm:$0xff]  ;;  %v5271_v6 = vld [vmem:[%s6316_s1 + $0x28] sm:$0xff]  }
  0x7b   : > { %v6103_v22 = vcombine.low %v6363_v21, %v725_v60  ;;  %v6366_v60 = vld [vmem:[#allocation13_spill] sm:$0xff] }
  0x7c   : > { %4603 = vmatpush3.bf16.msra.mxu0 %v5946_v30  ;;  %4689 = vmatmul.mubr.msk.bf16.vlgmr.msra.gmra.mrb[0].mxu1 %vm795_vm0, %v5966_v31 }
  0x7d   : > { %4612 = vmatprep.subr.bf16.mxu0 %v5972_v47  ;;  %4697 = vmatpush3.bf16.msra.mxu1 %v5795_v3 }
  0x7e   : > { %4692 = vmatprep.mubr.msk.bf16.mxu1 %vm795_vm0, %v5976_v40  ;;  %4698 = vmatprep.subr.bf16.mxu1 %v5869_v7 }
  0x7f   : > { %4597 = vmatmul.mubr.msk.bf16.gmra.mrb[4].mxu0 %vm795_vm0, %v5979_v42 }
  0x80   : > { %4604 = vmatprep.mubr.msk.bf16.mxu0 %vm795_vm0, %v5411_v32 }
  0x81   : > { %4699 = vmatpush3.bf16.msra.mxu1 %v5869_v7 }
  0x82   : > { %4708 = vmatprep.subr.bf16.mxu1 %v5900_v23 }
  0x84   : > { %4693 = vmatmul.mubr.msk.bf16.gmra.mrb[4].mxu1 %vm795_vm0, %v6003_v62 }
  0x85   : > { %4700 = vmatprep.mubr.msk.bf16.mxu1 %vm795_vm0, %v5411_v32 }
  0x87   : > { %4605 = vmatmul.mubr.msk.bf16.vlgmr.msra.gmra.mrb[0].mxu0 %vm795_vm0, %v5379_v17 }
  0x88   : > { %4608 = vmatprep.mubr.msk.bf16.mxu0 %vm795_vm0, %v6018_v51  ;;  %4613 = vmatpush3.bf16.msra.mxu0 %v5972_v47 }
  0x89   : > { %4614 = vmatprep.subr.bf16.mxu0 %v6012_v8 }
  0x8c   : > { %4615 = vmatpush3.bf16.msra.mxu0 %v6012_v8  ;;  %4701 = vmatmul.mubr.msk.bf16.vlgmr.msra.gmra.mrb[0].mxu1 %vm795_vm0, %v5379_v17 }
  0x8d   : > { %4732 = vmatprep.subr.bf16.mxu0 %v5266_v9  ;;  %4709 = vmatpush3.bf16.msra.mxu1 %v5900_v23 }
  0x8e   : > { %4704 = vmatprep.mubr.msk.bf16.mxu1 %vm795_vm0, %v6018_v51  ;;  %4710 = vmatprep.subr.bf16.mxu1 %v5946_v30 }
  0x8f   : > { %4609 = vmatmul.mubr.msk.bf16.gmra.mrb[4].mxu0 %vm795_vm0, %v6031_v50 }
  0x90   : > { %4616 = vmatprep.mubr.msk.bf16.mxu0 %vm795_vm0, %v5461_v43 }
  0x91   : > { %4711 = vmatpush3.bf16.msra.mxu1 %v5946_v30 }
  0x92   : > { %4720 = vmatprep.subr.bf16.mxu1 %v5972_v47 }
  0x94   : > { %4705 = vmatmul.mubr.msk.bf16.gmra.mrb[4].mxu1 %vm795_vm0, %v6031_v50 }
  0x95   : > { %4712 = vmatprep.mubr.msk.bf16.mxu1 %vm795_vm0, %v5461_v43 }
  0x97   : > { %4617 = vmatmul.mubr.msk.bf16.vlgmr.msra.gmra.mrb[0].mxu0 %vm795_vm0, %v5484_v0 }
  0x98   : > { %4620 = vmatprep.mubr.msk.bf16.mxu0 %vm795_vm0, %v5873_v26  ;;  %4733 = vmatpush3.bf16.msra.mxu0 %v5266_v9 }
  0x99   : > { %4734 = vmatprep.subr.bf16.mxu0 %v5267_v41 }
  0x9c   : > { %4735 = vmatpush3.bf16.msra.mxu0 %v5267_v41  ;;  %4713 = vmatmul.mubr.msk.bf16.vlgmr.msra.gmra.mrb[0].mxu1 %vm795_vm0, %v5484_v0 }
  0x9d   : > { %4744 = vmatprep.subr.bf16.mxu0 %v5268_v36  ;;  %4721 = vmatpush3.bf16.msra.mxu1 %v5972_v47 }
  0x9e   : > { %4716 = vmatprep.mubr.msk.bf16.mxu1 %vm795_vm0, %v5873_v26  ;;  %4722 = vmatprep.subr.bf16.mxu1 %v6012_v8 }
  0x9f   : > { %4621 = vmatmul.mubr.msk.bf16.gmra.mrb[4].mxu0 %vm795_vm0, %v6063_v39 }
  0xa0   : > { %4736 = vmatprep.mubr.msk.bf16.mxu0 %vm795_vm0, %v5709_v54 }
  0xa1   : > { %4723 = vmatpush3.bf16.msra.mxu1 %v6012_v8 }
  0xa2   : > { %4840 = vmatprep.subr.bf16.mxu1 %v5266_v9 }
  0xa4   : > { %4717 = vmatmul.mubr.msk.bf16.gmra.mrb[4].mxu1 %vm795_vm0, %v6063_v39 }
  0xa5   : > { %4724 = vmatprep.mubr.msk.bf16.mxu1 %vm795_vm0, %v5879_v46 }
  0xa7   : > { %4737 = vmatmul.mubr.msk.bf16.vlgmr.msra.gmra.mrb[8].mxu0 %vm795_vm0, %v5765_v10 }
  0xa8   : > { %4740 = vmatprep.mubr.msk.bf16.mxu0 %vm795_vm0, %v5770_v63  ;;  %4745 = vmatpush3.bf16.msra.mxu0 %v5268_v36 }
  0xa9   : > { %4746 = vmatprep.subr.bf16.mxu0 %v5269_v49 }
  0xac   : > { %4747 = vmatpush3.bf16.msra.mxu0 %v5269_v49  ;;  %4725 = vmatmul.mubr.msk.bf16.vlgmr.msra.gmra.mrb[0].mxu1 %vm795_vm0, %v6361_v19 }
  0xad   : > { %4756 = vmatprep.subr.bf16.mxu0 %v5270_v11  ;;  %4841 = vmatpush3.bf16.msra.mxu1 %v5266_v9  ;;  %v6364_v9 = vld [vmem:[#allocation10_spill] sm:$0xff] }
  0xae   : > { %4728 = vmatprep.mubr.msk.bf16.mxu1 %vm795_vm0, %v5883_v2  ;;  %4842 = vmatprep.subr.bf16.mxu1 %v5267_v41 }
  0xaf   : > { %4741 = vmatmul.mubr.msk.bf16.gmra.mrb[12].mxu0 %vm795_vm0, %v5789_v15 }
  0xb0   : > { %4748 = vmatprep.mubr.msk.bf16.mxu0 %vm795_vm0, %v6362_v14 }
  0xb1   : > { %4843 = vmatpush3.bf16.msra.mxu1 %v5267_v41  ;;  %v5272_v41 = vld [vmem:[%s6316_s1 + $0x30] sm:$0xff]  }
  0xb2   : > { %4852 = vmatprep.subr.bf16.mxu1 %v5268_v36 }
  0xb4   : > { %4729 = vmatmul.mubr.msk.bf16.gmra.mrb[4].mxu1 %vm795_vm0, %v6103_v22 }
  0xb5   : > { %4844 = vmatprep.mubr.msk.bf16.mxu1 %vm795_vm0, %v5820_v13 }
  0xb7   : > { %4749 = vmatmul.mubr.msk.bf16.vlgmr.msra.gmra.mrb[8].mxu0 %vm795_vm0, %v6364_v9 }
  0xb8   : > { %4752 = vmatprep.mubr.msk.bf16.mxu0 %vm795_vm0, %v6365_v37  ;;  %4757 = vmatpush3.bf16.msra.mxu0 %v5270_v11 }
  0xb9   : > { %4758 = vmatprep.subr.bf16.mxu0 %v5271_v6 }
  0xbc   : > { %4759 = vmatpush3.bf16.msra.mxu0 %v5271_v6  ;;  %4845 = vmatmul.mubr.msk.bf16.vlgmr.msra.gmra.mrb[8].mxu1 %vm795_vm0, %v5857_v57 }
  0xbd   : > { %4768 = vmatprep.subr.bf16.mxu0 %v5272_v41  ;;  %4853 = vmatpush3.bf16.msra.mxu1 %v5268_v36  ;;  %v6367_v36 = vld [vmem:[#allocation2_spill] sm:$0xff] }
  0xbe   : > { %4848 = vmatprep.mubr.msk.bf16.mxu1 %vm795_vm0, %v5862_v61  ;;  %4854 = vmatprep.subr.bf16.mxu1 %v5269_v49 }
  0xbf   : > { %4753 = vmatmul.mubr.msk.bf16.gmra.mrb[12].mxu0 %vm795_vm0, %v6366_v60 }
  0xc0   : > { %4760 = vmatprep.mubr.msk.bf16.mxu0 %vm795_vm0, %v5820_v13 }
  0xc1   : > { %4855 = vmatpush3.bf16.msra.mxu1 %v5269_v49 }
  0xc2   : > { %4864 = vmatprep.subr.bf16.mxu1 %v5270_v11 }
  0xc4   : > { %4849 = vmatmul.mubr.msk.bf16.gmra.mrb[12].mxu1 %vm795_vm0, %v5915_v33 }
  0xc5   : > { %4856 = vmatprep.mubr.msk.bf16.mxu1 %vm795_vm0, %v5709_v54  ;;  %v4217_v54 = vcombine.low %v5690_v55, %v5721_v25 }
  0xc7   : > { %4761 = vmatmul.mubr.msk.bf16.vlgmr.msra.gmra.mrb[8].mxu0 %vm795_vm0, %v5857_v57  ;;  %v6375_v57 = vld [vmem:[#allocation15_spill] sm:$0xff] }
  0xc8   : > { %4764 = vmatprep.mubr.msk.bf16.mxu0 %vm795_vm0, %v5862_v61  ;;  %4769 = vmatpush3.bf16.msra.mxu0 %v5272_v41 }
  0xc9   : > { %4770 = vmatprep.subr.bf16.mxu0 %v6367_v36 }
  0xcc   : > { %4771 = vmatpush3.bf16.msra.mxu0 %v6367_v36  ;;  %4857 = vmatmul.mubr.msk.bf16.vlgmr.msra.gmra.mrb[8].mxu1 %vm795_vm0, %v5765_v10  ;;  %v6374_v10 = vld [vmem:[#allocation11_spill] sm:$0xff] }
  0xcd   : > { %4780 = vmatprep.subr.bf16.mxu0 %v5551_v5  ;;  %4865 = vmatpush3.bf16.msra.mxu1 %v5270_v11 }
  0xce   : > { %4860 = vmatprep.mubr.msk.bf16.mxu1 %vm795_vm0, %v5770_v63  ;;  %4866 = vmatprep.subr.bf16.mxu1 %v5271_v6  ;;  %v4013_v63 = vld [vmem:[%s5326_s23 + $0x118] sm:$0xf] }
  0xcf   : > { %4765 = vmatmul.mubr.msk.bf16.gmra.mrb[12].mxu0 %vm795_vm0, %v5915_v33 }
  0xd0   : > { %4772 = vmatprep.mubr.msk.bf16.mxu0 %vm795_vm0, %v5404_v27  ;;  %v6369_v27 = vld [vmem:[#allocation3_spill] sm:$0xff] }
  0xd1   : > { %4867 = vmatpush3.bf16.msra.mxu1 %v5271_v6 }
  0xd2   : > { %4876 = vmatprep.subr.bf16.mxu1 %v5272_v41 }
  0xd4   : > { %4861 = vmatmul.mubr.msk.bf16.gmra.mrb[12].mxu1 %vm795_vm0, %v5789_v15  ;;  %v4225_v15 = vcombine.low %v5801_v44, %v5836_v24  ;;  %v4227_v44 = vcombine.low %v5844_v20, %v5894_v29  ;;  %v4265_v29 = vcombine.low %v5927_v28, %v5952_v38  ;;  %v6380_v38 = vld [vmem:[#allocation19_spill] sm:$0xff] }
  0xd5   : > { %4868 = vmatprep.mubr.msk.bf16.mxu1 %vm795_vm0, %v5935_v16  ;;  %v6376_v16 = vld [vmem:[#allocation18_spill] sm:$0xff] }
  0xd7   : > { %4773 = vmatmul.mubr.msk.bf16.vlgmr.msra.gmra.mrb[8].mxu0 %vm795_vm0, %v5785_v1 }
  0xd8   : > { %4776 = vmatprep.mubr.msk.bf16.mxu0 %vm795_vm0, %v5848_v58  ;;  %4781 = vmatpush3.bf16.msra.mxu0 %v5551_v5 }
  0xd9   : > { %4782 = vmatprep.subr.bf16.mxu0 %v5647_v45 }
  0xdc   : > { %4783 = vmatpush3.bf16.msra.mxu0 %v5647_v45  ;;  %4869 = vmatmul.mubr.msk.bf16.vlgmr.msra.gmra.mrb[8].mxu1 %vm795_vm0, %v5966_v31 }
  0xdd   : > { %4792 = vmatprep.subr.bf16.mxu0 %v5681_v48  ;;  %4877 = vmatpush3.bf16.msra.mxu1 %v5272_v41 }
  0xde   : > { %4872 = vmatprep.mubr.msk.bf16.mxu1 %vm795_vm0, %v5976_v40  ;;  %4878 = vmatprep.subr.bf16.mxu1 %v6367_v36  ;;  %v6378_v40 = vld [vmem:[#allocation17_spill] sm:$0xff] }
  0xdf   : > { %4777 = vmatmul.mubr.msk.bf16.gmra.mrb[12].mxu0 %vm795_vm0, %v5979_v42 }
  0xe0   : > { %4784 = vmatprep.mubr.msk.bf16.mxu0 %vm795_vm0, %v5411_v32 }
  0xe1   : > { %4879 = vmatpush3.bf16.msra.mxu1 %v6367_v36 }
  0xe2   : > { %4888 = vmatprep.subr.bf16.mxu1 %v5551_v5 }
  0xe4   : > { %4873 = vmatmul.mubr.msk.bf16.gmra.mrb[12].mxu1 %vm795_vm0, %v6003_v62 }
  0xe5   : > { %4880 = vmatprep.mubr.msk.bf16.mxu1 %vm795_vm0, %v5411_v32 }
  0xe7   : > { %4785 = vmatmul.mubr.msk.bf16.vlgmr.msra.gmra.mrb[8].mxu0 %vm795_vm0, %v5379_v17 }
  0xe8   : > { %4788 = vmatprep.mubr.msk.bf16.mxu0 %vm795_vm0, %v6018_v51  ;;  %4793 = vmatpush3.bf16.msra.mxu0 %v5681_v48 }
  0xe9   : > { %4794 = vmatprep.subr.bf16.mxu0 %v5750_v53 }
  0xec   : > { %4795 = vmatpush3.bf16.msra.mxu0 %v5750_v53  ;;  %4881 = vmatmul.mubr.msk.bf16.vlgmr.msra.gmra.mrb[8].mxu1 %vm795_vm0, %v5379_v17  ;;  %v6368_v17 = vld [vmem:[#allocation8_spill] sm:$0xff] }
  0xed   : > { %4804 = vmatprep.subr.bf16.mxu0 %v5795_v3  ;;  %4889 = vmatpush3.bf16.msra.mxu1 %v5551_v5  ;;  %v4209_v32 = vcombine.low %v6369_v27, %v6368_v17  ;;  %v6371_v5 = vld [vmem:[#allocation4_spill] sm:$0xff] }
  0xee   : > { %4884 = vmatprep.mubr.msk.bf16.mxu1 %vm795_vm0, %v6018_v51  ;;  %4890 = vmatprep.subr.bf16.mxu1 %v5647_v45 }
  0xef   : > { %4789 = vmatmul.mubr.msk.bf16.gmra.mrb[12].mxu0 %vm795_vm0, %v6031_v50 }
  0xf0   : > { %4796 = vmatprep.mubr.msk.bf16.mxu0 %vm795_vm0, %v5461_v43 }
  0xf1   : > { %4891 = vmatpush3.bf16.msra.mxu1 %v5647_v45  ;;  %v6372_v45 = vld [vmem:[#allocation7_spill] sm:$0xff] }
  0xf2   : > { %4900 = vmatprep.subr.bf16.mxu1 %v5681_v48 }
  0xf4   : > { %4885 = vmatmul.mubr.msk.bf16.gmra.mrb[12].mxu1 %vm795_vm0, %v6031_v50 }
  0xf5   : > { %4892 = vmatprep.mubr.msk.bf16.mxu1 %vm795_vm0, %v5461_v43  ;;  %v6370_v43 = vld [vmem:[#allocation9_spill] sm:$0xff] }
  0xf7   : > { %4797 = vmatmul.mubr.msk.bf16.vlgmr.msra.gmra.mrb[8].mxu0 %vm795_vm0, %v5484_v0 }
  0xf8   : > { %4800 = vmatprep.mubr.msk.bf16.mxu0 %vm795_vm0, %v5873_v26  ;;  %4805 = vmatpush3.bf16.msra.mxu0 %v5795_v3 }
  0xf9   : > { %4806 = vmatprep.subr.bf16.mxu0 %v5869_v7 }
  0xfc   : > { %4807 = vmatpush3.bf16.msra.mxu0 %v5869_v7  ;;  %4893 = vmatmul.mubr.msk.bf16.vlgmr.msra.gmra.mrb[8].mxu1 %vm795_vm0, %v5484_v0  ;;  %v4211_v0 = vcombine.low %v6370_v43, %v5661_v56 }
  0xfd   : > { %4816 = vmatprep.subr.bf16.mxu0 %v5900_v23  ;;  %4901 = vmatpush3.bf16.msra.mxu1 %v5681_v48  ;;  %v6373_v48 = vcombine.low %v6371_v5, %v6372_v45 }
  0xfe   : > { %4896 = vmatprep.mubr.msk.bf16.mxu1 %vm795_vm0, %v5873_v26  ;;  %4902 = vmatprep.subr.bf16.mxu1 %v5750_v53  ;;  %v741_v26 = vshrl.u32 %v4013_v63, 16 }
  0xff   : > { %4801 = vmatmul.mubr.msk.bf16.gmra.mrb[12].mxu0 %vm795_vm0, %v6063_v39 }
 0x100   : > { %4808 = vmatprep.mubr.msk.bf16.mxu0 %vm795_vm0, %v4209_v32  ;;  %v743_v20 = vrot.slane %v741_v26, 4 }
 0x101   : > { %4903 = vmatpush3.bf16.msra.mxu1 %v5750_v53  ;;  %v3995_v53 = vld [vmem:[%s5326_s23 + $0xd0] sm:$0xf] }
 0x102   : > { %4912 = vmatprep.subr.bf16.mxu1 %v5795_v3  ;;  %v4212_v56 = vcombine.low %v5670_v12, %v3995_v53  ;;  %v4219_v12 = vcombine.low %v5738_v59, %v5757_v34  ;;  %v727_v55 = vshrl.u32 %v3995_v53, 16  ;;  %v730_v25 = vshll.u32 %v3995_v53, 16 }
 0x103   : > { %v4220_v59 = vcombine.low %v5760_v18, %v4013_v63 }
 0x104   : > { %4897 = vmatmul.mubr.msk.bf16.gmra.mrb[12].mxu1 %vm795_vm0, %v6063_v39  ;;  %v729_v34 = vrot.slane %v727_v55, 4  ;;  %v732_v1 = vrot.slane %v730_v25, 5 }
 0x105   : > { %4904 = vmatprep.mubr.msk.bf16.mxu1 %vm795_vm0, %v5879_v46  ;;  %v744_v46 = vshll.u32 %v4013_v63, 16 }
 0x106   : > { %v733_v13 = vor.u32 %v732_v1, %v729_v34 }
 0x107   : > { %4809 = vmatmul.mubr.msk.bf16.vlgmr.msra.gmra.mrb[8].mxu0 %vm795_vm0, %v6373_v48 }
 0x108   : > { %4812 = vmatprep.mubr.msk.bf16.mxu0 %vm795_vm0, %v4211_v0  ;;  %4817 = vmatpush3.bf16.msra.mxu0 %v5900_v23  ;;  %v734_v24 = vrot.slane %v733_v13, 4 }
 0x109   : > { %4818 = vmatprep.subr.bf16.mxu0 %v5946_v30 }
 0x10c   : > { %4819 = vmatpush3.bf16.msra.mxu0 %v5946_v30  ;;  %4905 = vmatmul.mubr.msk.bf16.vlgmr.msra.gmra.mrb[8].mxu1 %vm795_vm0, %v6361_v19 }
 0x10d   : > { %4828 = vmatprep.subr.bf16.mxu0 %v5972_v47  ;;  %4913 = vmatpush3.bf16.msra.mxu1 %v5795_v3  ;;  %v3996_v3 = vld [vmem:[%s5326_s23 + $0xd4] sm:$0x1] }
 0x10e   : > { %4908 = vmatprep.mubr.msk.bf16.mxu1 %vm795_vm0, %v5883_v2  ;;  %4914 = vmatprep.subr.bf16.mxu1 %v5869_v7  ;;  %v736_v18 = vshll.u32 %v3996_v3, 16  ;;  %v746_v2 = vrot.slane %v744_v46, 5 }
 0x10f   : > { %4813 = vmatmul.mubr.msk.bf16.gmra.mrb[12].mxu0 %vm795_vm0, %v4212_v56 }
 0x110   : > { %4820 = vmatprep.mubr.msk.bf16.mxu0 %vm795_vm0, %v4217_v54  ;;  %v738_v58 = vrot.slane %v736_v18, 5 }
 0x111   : > { %4915 = vmatpush3.bf16.msra.mxu1 %v5869_v7 }
 0x112   : > { %4924 = vmatprep.subr.bf16.mxu1 %v5900_v23  ;;  %v739_v61 = vsel %vm5427_vm3, %v734_v24, %v738_v58  ;;  %v4273_v24 = vld [vmem:[%s6317_s2] ss:$0 sm:$0xff] }
 0x113   : > { %v4228_v7 = vcombine.low %v5904_v4, %v739_v61  ;;  %v747_v4 = vor.u32 %v746_v2, %v743_v20 }
 0x114   : > { %4909 = vmatmul.mubr.msk.bf16.gmra.mrb[12].mxu1 %vm795_vm0, %v6103_v22 }
 0x115   : > { %4916 = vmatprep.mubr.msk.bf16.mxu1 %vm795_vm0, %v4217_v54  ;;  %v748_v19 = vrot.slane %v747_v4, 4 }
 0x117   : > { %4821 = vmatmul.mubr.msk.bf16.vlgmr.msra.gmra.mrb[8].mxu0 %vm795_vm0, %v6374_v10 }
 0x118   : > { %4824 = vmatprep.mubr.msk.bf16.mxu0 %vm795_vm0, %v4219_v12  ;;  %4829 = vmatpush3.bf16.msra.mxu0 %v5972_v47 }
 0x119   : > { %4830 = vmatprep.subr.bf16.mxu0 %v6012_v8 }
 0x11c   : > { %4831 = vmatpush3.bf16.msra.mxu0 %v6012_v8  ;;  %4917 = vmatmul.mubr.msk.bf16.vlgmr.msra.gmra.mrb[8].mxu1 %vm795_vm0, %v6374_v10 }
 0x11d   : > { %4925 = vmatpush3.bf16.msra.mxu1 %v5900_v23  ;;  %4920 = vmatprep.mubr.msk.bf16.mxu1 %vm795_vm0, %v4219_v12  ;;  %v4014_v23 = vld [vmem:[%s5326_s23 + $0x11c] sm:$0x1] }
 0x11e   : > { %4926 = vmatprep.subr.bf16.mxu1 %v5946_v30  ;;  %v750_v33 = vshll.u32 %v4014_v23, 16 }
 0x11f   : > { %4825 = vmatmul.mubr.msk.bf16.gmra.mrb[12].mxu0 %vm795_vm0, %v4220_v59 }
 0x120   : > { %4832 = vmatprep.mubr.msk.bf16.mxu0 %vm795_vm0, %v4225_v15  ;;  %v752_v31 = vrot.slane %v750_v33, 5 }
 0x121   : > { %4927 = vmatpush3.bf16.msra.mxu1 %v5946_v30  ;;  %v4267_v30 = vcombine.low %v6376_v16, %v5990_v35 }
 0x122   : > { %4936 = vmatprep.subr.bf16.mxu1 %v5972_v47  ;;  %v753_v28 = vsel %vm5427_vm3, %v748_v19, %v752_v31 }
 0x123   : > { %v4268_v62 = vcombine.low %v6380_v38, %v753_v28 }
 0x124   : > { %4921 = vmatmul.mubr.msk.bf16.gmra.mrb[12].mxu1 %vm795_vm0, %v4220_v59 }
 0x125   : > { %4928 = vmatprep.mubr.msk.bf16.mxu1 %vm795_vm0, %v4225_v15 }
 0x127   : > { %4833 = vmatmul.mubr.msk.bf16.vlgmr.msra.gmra.mrb[8].mxu0 %vm795_vm0, %v6375_v57 }
 0x128   : > { %4836 = vmatprep.mubr.msk.bf16.mxu0 %vm795_vm0, %v4227_v44 }
 0x12c   : > { %4929 = vmatmul.mubr.msk.bf16.vlgmr.msra.gmra.mrb[8].mxu1 %vm795_vm0, %v6375_v57 }
 0x12d   : > { %4937 = vmatpush3.bf16.msra.mxu1 %v5972_v47  ;;  %4932 = vmatprep.mubr.msk.bf16.mxu1 %vm795_vm0, %v4227_v44  ;;  %v6377_v47 = vld [vmem:[#allocation16_spill] sm:$0xff] }
 0x12e   : > { %4938 = vmatprep.subr.bf16.mxu1 %v6012_v8  ;;  %v6379_v42 = vcombine.low %v6377_v47, %v6378_v40 }
 0x12f   : > { %4837 = vmatmul.mubr.msk.bf16.gmra.mrb[12].mxu0 %vm795_vm0, %v4228_v7 }
 0x131   : > { %4939 = vmatpush3.bf16.msra.mxu1 %v6012_v8 }
 0x134   : > { %4933 = vmatmul.mubr.msk.bf16.gmra.mrb[12].mxu1 %vm795_vm0, %v4228_v7 }
 0x135   : > { %4940 = vmatprep.mubr.msk.bf16.mxu1 %vm795_vm0, %v4265_v29 }
 0x13c   : > { %4941 = vmatmul.mubr.msk.bf16.vlgmr.msra.gmra.mrb[8].mxu1 %vm795_vm0, %v6379_v42 }
 0x13d   : > { %4944 = vmatprep.mubr.msk.bf16.mxu1 %vm795_vm0, %v4267_v30 }
 0x144   : > { %4945 = vmatmul.mubr.msk.bf16.gmra.mrb[12].mxu1 %vm795_vm0, %v4268_v62 }
 0x16a   : > { %v4618_v8 = vpop.f32.mrb[0].mxu0 }
 0x16b   : > { %v1738_v51 = vpop.f32.mrb[1].mxu0 }
 0x16c   : > { %v4619_v50 = vpop.f32.mrb[2].mxu0 }
 0x16d   : > { %v1741_v35 = vpop.f32.mrb[3].mxu0 }
 0x172   : > { %v4622_v39 = vpop.f32.mrb[4].mxu0 }
 0x173   : > { %v1754_v49 = vpop.f32.mrb[5].mxu0 }
 0x174   : > { %v4623_v11 = vpop.f32.mrb[6].mxu0 }
 0x175   : > { %v1757_v14 = vpop.f32.mrb[7].mxu0 }
 0x17f   : > { %v4726_v21 = vpop.f32.mrb[0].mxu1 }
 0x180   : > { %v2485_v22 = vmax.f32 %v4618_v8, %v4726_v21  ;;  %v2444_v9 = vpop.f32.mrb[1].mxu1 }
 0x181   : > { %v2483_v37 = vmax.f32 %v1738_v51, %v2444_v9  ;;  %v4727_v6 = vpop.f32.mrb[2].mxu1 }
 0x182   : > { %v2486_v41 = vmax.f32 %v4619_v50, %v4727_v6  ;;  %v2447_v52 = vpop.f32.mrb[3].mxu1 }
 0x183   : > { %v2484_v60 = vmax.f32 %v1741_v35, %v2447_v52 }
 0x187   : > { %v4730_v36 = vpop.f32.mrb[4].mxu1 }
 0x188   : > { %v2489_v17 = vmax.f32 %v4622_v39, %v4730_v36  ;;  %v2460_v27 = vpop.f32.mrb[5].mxu1 }
 0x189   : > { %v2487_v32 = vmax.f32 %v1754_v49, %v2460_v27  ;;  %v4731_v43 = vpop.f32.mrb[6].mxu1 }
 0x18a   : > { %v2490_v0 = vmax.f32 %v4623_v11, %v4731_v43  ;;  %v2463_v5 = vpop.f32.mrb[7].mxu1 }
 0x18b   : > { %v2488_v45 = vmax.f32 %v1757_v14, %v2463_v5 }
 0x1fa   : > { %v4834_v48 = vpop.f32.mrb[8].mxu0 }
 0x1fb   : > { %v3187_v53 = vmax.f32 %v2485_v22, %v4834_v48  ;;  %v3146_v56 = vpop.f32.mrb[9].mxu0 }
 0x1fc   : > { %v3185_v54 = vmax.f32 %v2483_v37, %v3146_v56  ;;  %v4835_v12 = vpop.f32.mrb[10].mxu0 }
 0x1fd   : > { %v3188_v10 = vmax.f32 %v2486_v41, %v4835_v12  ;;  %v3149_v55 = vpop.f32.mrb[11].mxu0 }
 0x1fe   : > { %v3186_v25 = vmax.f32 %v2484_v60, %v3149_v55 }
 0x202   : > { %v4838_v63 = vpop.f32.mrb[12].mxu0 }
 0x203   : > { %v3191_v59 = vmax.f32 %v2489_v17, %v4838_v63  ;;  %v3162_v34 = vpop.f32.mrb[13].mxu0 }
 0x204   : > { %v3189_v1 = vmax.f32 %v2487_v32, %v3162_v34  ;;  %v4839_v15 = vpop.f32.mrb[14].mxu0 }
 0x205   : > { %v3192_v3 = vmax.f32 %v2490_v0, %v4839_v15  ;;  %v3165_v13 = vpop.f32.mrb[15].mxu0 }
 0x206   : > { %v3190_v18 = vmax.f32 %v2488_v45, %v3165_v13 }
 0x20f   : > { %v4942_v44 = vpop.f32.mrb[8].mxu1 }
 0x210   : > { %v3853_v58 = vmax.f32 %v3187_v53, %v4942_v44  ;;  %v3812_v57 = vpop.f32.mrb[9].mxu1 }
 0x211   : > { %v3851_v61 = vmax.f32 %v3185_v54, %v3812_v57  ;;  %v4943_v7 = vpop.f32.mrb[10].mxu1 }
 0x212   : > { %v3868_v26 = vadd.f32 %v4273_v24, %v3853_v58  ;;  %v3854_v46 = vmax.f32 %v3188_v10, %v4943_v7  ;;  %v3815_v20 = vpop.f32.mrb[11].mxu1 }
 0x213   : > { %v3866_v2 = vadd.f32 %v4273_v24, %v3851_v61  ;;  %v3852_v29 = vmax.f32 %v3186_v25, %v3815_v20 }
 0x214   : > { %v3869_v23 = vadd.f32 %v4273_v24, %v3854_v46  ;;  %v3876_v33 = vmax.f32 %v3868_v26, 0.0 }
 0x215   : > { %v3867_v4 = vadd.f32 %v4273_v24, %v3852_v29  ;;  %v3874_v30 = vmax.f32 %v3866_v2, 0.0 }
 0x216   : > { %v3877_v16 = vmax.f32 %v3869_v23, 0.0 }
 0x217   : > { %v3875_v19 = vmax.f32 %v3867_v4, 0.0  ;;  %v4946_v31 = vpop.f32.mrb[12].mxu1 }
 0x218   : > { %v4285_v47 = vpack.c.bf16 %v3877_v16, %v3876_v33  ;;  %v3857_v40 = vmax.f32 %v3191_v59, %v4946_v31  ;;  %v3828_v42 = vpop.f32.mrb[13].mxu1 }
 0x219   : > { %v4280_v28 = vpack.c.bf16 %v3875_v19, %v3874_v30  ;;  %v3855_v38 = vmax.f32 %v3189_v1, %v3828_v42  ;;  %v4947_v62 = vpop.f32.mrb[14].mxu1 }
 0x21a   : > { %4297 = vst [vmem:[%s170_s24 + $0x8] sm:$0xff] %v4285_v47   ;;  %v3872_v8 = vadd.f32 %v4273_v24, %v3857_v40  ;;  %v3858_v51 = vmax.f32 %v3192_v3, %v4947_v62  ;;  %v3831_v50 = vpop.f32.mrb[15].mxu1 }
 0x21b   : > { %4281 = vst [vmem:[%s170_s24] sm:$0xff] %v4280_v28   ;;  %v3870_v35 = vadd.f32 %v4273_v24, %v3855_v38  ;;  %v3856_v39 = vmax.f32 %v3190_v18, %v3831_v50 }
 0x21c   : > { %v3873_v49 = vadd.f32 %v4273_v24, %v3858_v51  ;;  %v3880_v14 = vmax.f32 %v3872_v8, 0.0 }
 0x21d   : > { %v3871_v11 = vadd.f32 %v4273_v24, %v3856_v39  ;;  %v3878_v22 = vmax.f32 %v3870_v35, 0.0 }
 0x21e   : > { %v3881_v21 = vmax.f32 %v3873_v49, 0.0 }
 0x21f   : > { %v3879_v9 = vmax.f32 %v3871_v11, 0.0 }
 0x220   : > { %v4295_v37 = vpack.c.bf16 %v3881_v21, %v3880_v14 }
 0x221   : > { %v4290_v6 = vpack.c.bf16 %v3879_v9, %v3878_v22 }
 0x222   : > { %4299 = vst [vmem:[%s170_s24 + $0x18] sm:$0xff] %v4295_v37  }
 0x223   : > { %4298 = vst [vmem:[%s170_s24 + $0x10] sm:$0xff] %v4290_v6  }
 0x224 PF: > { %s13_s12 = sadd.s32 1, %s5279_s12  }
 0x225   : > { %p10_p4 = scmp.ge.s32.totalorder %s13_s12, 4  }
 0x227   :  { %12 = sbr.rel (!%p10_p4) target bundleno = 1 (0x1), region = 73 }

// kernel: embedding_net_forward.6
= control target key start
LH: loop header
LB: loop body
LE: loop exit
PB: predicated region body
PF: predicated region fallthrough
CT: control target
= control target key end

     0   :  { %s3901_s12 = smov 0   ;;  %s4830_s0 = inlined_call_operand.vmem [shape: bf16[2,2,2,5,5,64], index: 0, kind: input, shape index: {}]   ;;  %s4831_s1 = inlined_call_operand.vmem [shape: bf16[9,64,128], index: 1, kind: input, shape index: {}]   ;;  %s4832_s2 = inlined_call_operand.vmem [shape: f32[1,128], index: 2, kind: input, shape index: {}]   ;;  %s4833_s3 = inlined_call_operand.vmem [shape: bf16[2,4,4,128], index: 3, kind: output, shape index: {}]  }
   0x1 LB: > { %s2897_s13 = sadd.s32 4294967295, %s3876_s12   ;;  %p2901_p0 = scmp.ge.s32.totalorder %s3876_s12, 1  ;;  %s3876_s12 = sphi %s3901_s12, %s13_s12  }
   0x2   : > { %p137_p1 = scmp.lt.s32.totalorder %s3876_s12, 3 }
   0x4   : > { %p138_p2 = pnand %p2901_p0, %p137_p1 }
   0x5   : > { %v3812_v0 = vld [vmem:[%s4831_s1 + $0x20] sm:$0xff] (!%p138_p2)   ;;  %v3878_v1 = vmov (!%p138_p2), 0.0   ;;  %v3813_v2 = vld [vmem:[%s4831_s1 + $0x28] sm:$0xff] (!%p138_p2)   ;;  %p161_p3 = scmp.lt.s32.totalorder (!%p138_p2), %s2897_s13, 1  ;;  %vm3879_vm0 = vmmov (!%p138_p2), 0   ;;  %v202_v5 = vlaneseq (!%p138_p2)  ;;  %v3814_v6 = vld [vmem:[%s4831_s1 + $0x30] sm:$0xff] (!%p138_p2)  }
   0x6   : > { %141 = sbr.rel (%p138_p2) target bundleno = 540 (0x21c), region = 32  ;;  %3240 = vmatprep.subr.bf16.mxu0 (!%p138_p2), %v3878_v1  ;;  %3348 = vmatprep.subr.bf16.mxu1 (!%p138_p2), %v3878_v1  ;;  %v3880_v3 = vmov (!%p138_p2), 1983009808   ;;  %v3815_v11 = vld [vmem:[%s4831_s1 + $0x38] sm:$0xff] (!%p138_p2)   ;;  %vm231_vm1 = vsmask.f32 (!%p138_p2), 1280 }
   0x7   : > { %3241 = vmatpush3.bf16.msra.mxu0 (!%p138_p2), %v3812_v0  ;;  %3349 = vmatpush3.bf16.msra.mxu1 (!%p138_p2), %v3812_v0  ;;  %v200_v4 = vunpack.c.l.s4 (!%p138_p2), %v3880_v3  ;;  %v203_v10 = vshrl.u32 (!%p138_p2), %v202_v5, 7  ;;  %vm232_vm2 = vsmask.f32 (!%p138_p2), 3336  ;;  %vm720_vm3 = vcmask (!%p138_p2), 523264   ;;  %v3983_v25 = vld [vmem:[%s4831_s1] sm:$0xff] (!%p138_p2)   ;;  %v4002_v44 = vld [vmem:[%s4831_s1 + $0x8] sm:$0xff] (!%p138_p2)  }
   0x8   : > { %3242 = vmatprep.subr.bf16.mxu0 (!%p138_p2), %v3878_v1  ;;  %3350 = vmatprep.subr.bf16.mxu1 (!%p138_p2), %v3878_v1  ;;  %vm233_vm4 = vmor (!%p138_p2), %vm231_vm1, %vm232_vm2  ;;  %vm234_vm5 = vsmask.f32 (!%p138_p2), 5392  ;;  %vm236_vm6 = vsmask.f32 (!%p138_p2), 7448 }
   0x9   : > { %3248 = vmatprep.mubr.msk.bf16.mxu0 (!%p138_p2), %vm3879_vm0, %v3878_v1  ;;  %3356 = vmatprep.mubr.msk.bf16.mxu1 (!%p138_p2), %vm3879_vm0, %v3878_v1  ;;  %v201_v9 = vunpack.c.0.s8 (!%p138_p2), %v200_v4  ;;  %vm3994_vm7 = vmor (!%p138_p2), %vm233_vm4, %vm234_vm5 }
   0xa   : > { %vm4010_vm8 = vmor (!%p138_p2), %vm3994_vm7, %vm236_vm6 }
   0xb   : > { %3243 = vmatpush3.bf16.msra.mxu0 (!%p138_p2), %v3813_v2  ;;  %3351 = vmatpush3.bf16.msra.mxu1 (!%p138_p2), %v3813_v2  ;;  %v3955_v15 = vsub.s32 (!%p138_p2), %v201_v9, %v203_v10  ;;  %v4018_v2 = vld [vmem:[%s4831_s1 + $0x10] sm:$0xff] (!%p138_p2)  }
   0xc   : > { %3244 = vmatprep.subr.bf16.mxu0 (!%p138_p2), %v3878_v1  ;;  %3352 = vmatprep.subr.bf16.mxu1 (!%p138_p2), %v3878_v1 }
   0xd   : > { %s4839_s13 = smov (!%p161_p3, %s2897_s13), 1 }
   0xe   : > { %s3800_s20 = smul.u32 80, %s4839_s13  ;;  %s3059_s4 = sshll.u32 %s4839_s13, 3 }
   0xf   : > { %3245 = vmatpush3.bf16.msra.mxu0 %v3814_v6  ;;  %3353 = vmatpush3.bf16.msra.mxu1 %v3814_v6  ;;  %s170_s7 = scalar_lea.vmem %s4833_s3, %s3059_s4 }
  0x10   : > { %s3934_s23 = scalar_lea.vmem %s4830_s0, %s3800_s20  ;;  %3246 = vmatprep.subr.bf16.mxu0 %v3878_v1  ;;  %3354 = vmatprep.subr.bf16.mxu1 %v3878_v1 }
  0x11   : > { %v3937_v7 = vld [vmem:[%s3934_s23 + $0x18] sm:$0x7]  ;;  %v3940_v8 = vld [vmem:[%s3934_s23 + $0x1c] sm:$0x7]  ;;  %v3946_v12 = vld [vmem:[%s3934_s23 + $0x14] sm:$0x7] }
  0x12   : > { %v1339_v13 = vcombine.low %v3937_v7, %v3940_v8  ;;  %v3952_v14 = vld [vmem:[%s3934_s23 + $0x20] sm:$0x7]  ;;  %v679_v16 = vcombine.low %v3946_v12, %v3937_v7  ;;  %v3963_v18 = vld [vmem:[%s3934_s23 + $0x4] sm:$0x7]  ;;  %v3970_v20 = vld [vmem:[%s3934_s23 + $0x8] sm:$0x7] }
  0x13   : > { %3247 = vmatpush3.bf16.msra.mxu0 %v3815_v11  ;;  %3355 = vmatpush3.bf16.msra.mxu1 %v3815_v11  ;;  %v3960_v17 = vld [vmem:[%s3934_s23] sm:$0x7]  ;;  %v680_v19 = vcombine.low %v3940_v8, %v3952_v14  ;;  %v3974_v22 = vld [vmem:[%s3934_s23 + $0xc] sm:$0x7]  ;;  %v213_v24 = vrot.slane %v3963_v18, %v3955_v15  ;;  %v221_v29 = vrot.slane %v3970_v20, %v3955_v15 }
  0x14   : > { %3252 = vmatprep.subr.bf16.mxu0 %v3878_v1  ;;  %3360 = vmatprep.subr.bf16.mxu1 %v3878_v1  ;;  %v687_v21 = vrot.slane %v679_v16, %v3955_v15  ;;  %v205_v23 = vrot.slane %v3960_v17, %v3955_v15  ;;  %v229_v30 = vrot.slane %v3974_v22, %v3955_v15 }
  0x15   : > { %v694_v26 = vrot.slane %v680_v19, %v3955_v15  ;;  %v214_v28 = vcombine.high %v213_v24, %v213_v24  ;;  %v222_v32 = vcombine.high %v221_v29, %v221_v29  ;;  %v253_v37 = vshrl.u32 %v213_v24, 16 }
  0x16   : > { %v206_v27 = vcombine.high %v205_v23, %v205_v23  ;;  %v239_v33 = vshrl.u32 %v205_v23, 16  ;;  %v242_v34 = vshll.u32 %v205_v23, 16  ;;  %v230_v35 = vcombine.high %v229_v30, %v229_v30  ;;  %v4040_v23 = vld [vmem:[%s4831_s1 + $0x18] sm:$0xff]  }
  0x17   : > { %v3990_v31 = vcombine.low %v687_v21, %v694_v26  ;;  %v256_v38 = vshll.u32 %v213_v24, 16  ;;  %v262_v42 = vshll.u32 %v214_v28, 16  ;;  %v267_v43 = vshrl.u32 %v221_v29, 16 }
  0x18   : > { %v248_v36 = vshll.u32 %v206_v27, 16  ;;  %v241_v40 = vrot.slane %v239_v33, 6  ;;  %v244_v41 = vrot.slane %v242_v34, 7  ;;  %v255_v46 = vrot.slane %v253_v37, 6 }
  0x19   : > { %3249 = vmatmul.mubr.msk.bf16.vlgmr.msra.gmra.mrb[0].mxu0 %vm720_vm3, %v3990_v31  ;;  %v258_v47 = vrot.slane %v256_v38, 7  ;;  %v270_v48 = vshll.u32 %v221_v29, 16  ;;  %v264_v50 = vrot.slane %v262_v42, 7  ;;  %v269_v51 = vrot.slane %v267_v43, 6  ;;  %v4071_v43 = vld [vmem:[%s3934_s23 + $0x10] sm:$0x7] }
  0x1a   : > { %3253 = vmatpush3.bf16.msra.mxu0 %v3983_v25  ;;  %v250_v45 = vrot.slane %v248_v36, 7  ;;  %3260 = vmatprep.mubr.msk.bf16.mxu0 %vm3879_vm0, %v3878_v1  ;;  %v245_v49 = vor.u32 %v244_v41, %v241_v40  ;;  %v276_v52 = vshll.u32 %v222_v32, 16  ;;  %v281_v56 = vshrl.u32 %v229_v30, 16  ;;  %v4066_v36 = vld [vmem:[%s4831_s1 + $0x40] sm:$0xff]  }
  0x1b   : > { %3254 = vmatprep.subr.bf16.mxu0 %v3878_v1  ;;  %v259_v54 = vor.u32 %v258_v47, %v255_v46  ;;  %v272_v55 = vrot.slane %v270_v48, 7  ;;  %v284_v57 = vshll.u32 %v229_v30, 16  ;;  %v290_v60 = vshll.u32 %v230_v35, 16  ;;  %v4080_v47 = vld [vmem:[%s4831_s1 + $0x48] sm:$0xff]  }
  0x1c   : > { %v246_v58 = vrot.slane %v245_v49, 2  ;;  %v278_v59 = vrot.slane %v276_v52, 7  ;;  %v283_v63 = vrot.slane %v281_v56, 6  ;;  %v765_v11 = vcombine.low %v3960_v17, %v3963_v18 }
  0x1d   : > { %v260_v61 = vrot.slane %v259_v54, 2  ;;  %v273_v62 = vor.u32 %v272_v55, %v269_v51  ;;  %v286_v0 = vrot.slane %v284_v57, 7  ;;  %v292_v9 = vrot.slane %v290_v60, 7  ;;  %v4097_v60 = vld [vmem:[%s4831_s1 + $0x50] sm:$0xff]  }
  0x1e   : > { %3255 = vmatpush3.bf16.msra.mxu0 %v4002_v44  ;;  %v251_v3 = vsel %vm4010_vm8, %v246_v58, %v250_v45  ;;  %v304_v16 = vrot.slane %v3946_v12, %v3955_v15  ;;  %v766_v24 = vcombine.low %v3970_v20, %v3974_v22  ;;  %v312_v17 = vrot.slane %v3937_v7, %v3955_v15 }
  0x1f   : > { %3256 = vmatprep.subr.bf16.mxu0 %v3878_v1  ;;  %v4025_v4 = vsel %vm4010_vm8, %v260_v61, %v264_v50  ;;  %v274_v5 = vrot.slane %v273_v62, 2  ;;  %v287_v6 = vor.u32 %v286_v0, %v283_v63  ;;  %v773_v26 = vrot.slane %v765_v11, %v3955_v15 }
  0x20   : > { %v859_v10 = vcombine.low %v251_v3, %v4025_v4  ;;  %v320_v27 = vrot.slane %v3940_v8, %v3955_v15  ;;  %v780_v29 = vrot.slane %v766_v24, %v3955_v15  ;;  %v328_v33 = vrot.slane %v3952_v14, %v3955_v15  ;;  %v4236_v8 = vld [vmem:[%s3934_s23 + $0x3c] sm:$0x7] }
  0x21   : > { %v4034_v19 = vsel %vm4010_vm8, %v274_v5, %v278_v59  ;;  %v288_v21 = vrot.slane %v287_v6, 2  ;;  %v331_v34 = vshrl.u32 %v304_v16, 16  ;;  %v334_v37 = vshll.u32 %v304_v16, 16 }
  0x22   : > { %3257 = vmatpush3.bf16.msra.mxu0 %v4018_v2  ;;  %v1435_v12 = vcombine.low %v4025_v4, %v4034_v19  ;;  %v867_v32 = vrot.slane %v859_v10, %v3955_v15  ;;  %v781_v35 = vcombine.low %v773_v26, %v780_v29  ;;  %v345_v38 = vshrl.u32 %v312_v17, 16  ;;  %v4106_v10 = vld [vmem:[%s4831_s1 + $0x58] sm:$0xff]  }
  0x23   : > { %3258 = vmatprep.subr.bf16.mxu0 %v3878_v1  ;;  %v4054_v28 = vsel %vm4010_vm8, %v288_v21, %v292_v9  ;;  %v348_v39 = vshll.u32 %v312_v17, 16  ;;  %v359_v41 = vshrl.u32 %v320_v27, 16  ;;  %v362_v42 = vshll.u32 %v320_v27, 16 }
  0x24   : > { %v860_v30 = vcombine.low %v4034_v19, %v4054_v28  ;;  %v333_v46 = vrot.slane %v331_v34, 6  ;;  %v373_v48 = vshrl.u32 %v328_v33, 16  ;;  %v376_v49 = vshll.u32 %v328_v33, 16 }
  0x25   : > { %v336_v50 = vrot.slane %v334_v37, 7  ;;  %v347_v51 = vrot.slane %v345_v38, 6  ;;  %v577_v52 = vrot.slane %v4071_v43, %v3955_v15  ;;  %v305_v54 = vcombine.high %v304_v16, %v304_v16 }
  0x26   : > { %3259 = vmatpush3.bf16.msra.mxu0 %v4040_v23  ;;  %v874_v40 = vrot.slane %v860_v30, %v3955_v15  ;;  %v313_v55 = vcombine.high %v312_v17, %v312_v17  ;;  %v350_v56 = vrot.slane %v348_v39, 7  ;;  %v361_v57 = vrot.slane %v359_v41, 6  ;;  %v4120_v41 = vld [vmem:[%s3934_s23 + $0x2c] sm:$0x7] }
  0x27   : > { %3264 = vmatprep.subr.bf16.mxu0 %v3878_v1  ;;  %v321_v58 = vcombine.high %v320_v27, %v320_v27  ;;  %v364_v59 = vrot.slane %v362_v42, 7  ;;  %v329_v61 = vcombine.high %v328_v33, %v328_v33  ;;  %v378_v62 = vrot.slane %v376_v49, 7  ;;  %v4130_v49 = vld [vmem:[%s3934_s23 + $0x34] sm:$0x7] }
  0x28   : > { %v4073_v45 = vcombine.low %v867_v32, %v874_v40  ;;  %v580_v63 = vshrl.u32 %v577_v52, 16  ;;  %v583_v0 = vshll.u32 %v577_v52, 16  ;;  %v337_v3 = vor.u32 %v336_v50, %v333_v46  ;;  %v4114_v32 = vld [vmem:[%s4831_s1 + $0x60] sm:$0xff]   ;;  %v2910_v40 = vld [vmem:[%s3934_s23 + $0x28] sm:$0x7] }
  0x29   : > { %3261 = vmatmul.mubr.msk.bf16.vlgmr.msra.gmra.mrb[0].mxu0 %vm720_vm3, %v781_v35  ;;  %v340_v5 = vshll.u32 %v305_v54, 16  ;;  %v354_v6 = vshll.u32 %v313_v55, 16  ;;  %v368_v9 = vshll.u32 %v321_v58, 16  ;;  %v351_v11 = vor.u32 %v350_v56, %v347_v51  ;;  %v4136_v50 = vld [vmem:[%s4831_s1 + $0x68] sm:$0xff]  }
  0x2a   : > { %3265 = vmatpush3.bf16.msra.mxu0 %v4066_v36  ;;  %3272 = vmatprep.mubr.msk.bf16.mxu0 %vm3879_vm0, %v3878_v1  ;;  %v365_v16 = vor.u32 %v364_v59, %v361_v57  ;;  %v382_v21 = vshll.u32 %v329_v61, 16  ;;  %v578_v17 = vcombine.high %v577_v52, %v577_v52  ;;  %v582_v26 = vrot.slane %v580_v63, 6  ;;  %v4171_v61 = vld [vmem:[%s4831_s1 + $0x70] sm:$0xff]  }
  0x2b   : > { %3357 = vmatmul.mubr.msk.bf16.vlgmr.msra.gmra.mrb[0].mxu1 %vm720_vm3, %v4073_v45  ;;  %3266 = vmatprep.subr.bf16.mxu0 %v3878_v1  ;;  %v585_v27 = vrot.slane %v583_v0, 7  ;;  %v338_v29 = vrot.slane %v337_v3, 2  ;;  %v342_v30 = vrot.slane %v340_v5, 7  ;;  %v352_v33 = vrot.slane %v351_v11, 2  ;;  %v2909_v11 = vld [vmem:[%s3934_s23 + $0x24] sm:$0x7] }
  0x2c   : > { %3361 = vmatpush3.bf16.msra.mxu1 %v3983_v25  ;;  %3368 = vmatprep.mubr.msk.bf16.mxu1 %vm3879_vm0, %v3878_v1  ;;  %v375_v25 = vrot.slane %v373_v48, 6  ;;  %v356_v34 = vrot.slane %v354_v6, 7  ;;  %v366_v35 = vrot.slane %v365_v16, 2  ;;  %v370_v37 = vrot.slane %v368_v9, 7  ;;  %v4127_v48 = vld [vmem:[%s3934_s23 + $0x30] sm:$0x7] }
  0x2d   : > { %3362 = vmatprep.subr.bf16.mxu1 %v3878_v1  ;;  %v384_v39 = vrot.slane %v382_v21, 7  ;;  %v586_v42 = vor.u32 %v585_v27, %v582_v26  ;;  %v589_v46 = vshll.u32 %v578_v17, 16  ;;  %v343_v51 = vsel %vm4010_vm8, %v338_v29, %v342_v30  ;;  %v4189_v6 = vld [vmem:[%s4831_s1 + $0x78] sm:$0xff]  }
  0x2e   : > { %3267 = vmatpush3.bf16.msra.mxu0 %v4080_v47  ;;  %v379_v24 = vor.u32 %v378_v62, %v375_v25  ;;  %v4151_v52 = vsel %vm4010_vm8, %v366_v35, %v370_v37  ;;  %v956_v57 = vcombine.low %v4127_v48, %v4130_v49  ;;  %v4178_v62 = vrot.slane %v2910_v40, %v3955_v15 }
  0x2f   : > { %3268 = vmatprep.subr.bf16.mxu0 %v3878_v1  ;;  %v587_v55 = vrot.slane %v586_v42, 2  ;;  %v591_v56 = vrot.slane %v589_v46, 7  ;;  %v1243_v9 = vcombine.low %v3963_v18, %v3970_v20  ;;  %v4198_v21 = vrot.slane %v4120_v41, %v3955_v15  ;;  %v4257_v42 = vld [vmem:[%s3934_s23 + $0x48] sm:$0x7] }
  0x30   : > { %3363 = vmatpush3.bf16.msra.mxu1 %v4002_v44  ;;  %v380_v38 = vrot.slane %v379_v24, 2  ;;  %v970_v0 = vrot.slane %v956_v57, %v3955_v15  ;;  %v1244_v24 = vcombine.low %v3974_v22, %v4071_v43  ;;  %v4205_v17 = vrot.slane %v4127_v48, %v3955_v15 }
  0x31   : > { %3364 = vmatprep.subr.bf16.mxu1 %v3878_v1  ;;  %v592_v25 = vsel %vm4010_vm8, %v587_v55, %v591_v56  ;;  %v423_v18 = vshrl.u32 %v4178_v62, 16  ;;  %v600_v27 = vrot.slane %v2909_v11, %v3955_v15  ;;  %v1340_v22 = vcombine.low %v3952_v14, %v2909_v11  ;;  %v4228_v14 = vld [vmem:[%s4831_s1 + $0x80] sm:$0xff]  }
  0x32   : > { %3269 = vmatpush3.bf16.msra.mxu0 %v4097_v60  ;;  %v4155_v54 = vsel %vm4010_vm8, %v380_v38, %v384_v39  ;;  %v1436_v16 = vcombine.low %v4054_v28, %v592_v25  ;;  %v1251_v28 = vrot.slane %v1243_v9, %v3955_v15  ;;  %v1258_v26 = vrot.slane %v1244_v24, %v3955_v15  ;;  %v4245_v39 = vld [vmem:[%s3934_s23 + $0x40] sm:$0x7] }
  0x33   : > { %3270 = vmatprep.subr.bf16.mxu0 %v3878_v1  ;;  %v1605_v59 = vcombine.low %v4151_v52, %v4155_v54  ;;  %v1347_v43 = vrot.slane %v1339_v13, %v3955_v15  ;;  %v4222_v30 = vrot.slane %v4130_v49, %v3955_v15  ;;  %v1443_v7 = vrot.slane %v1435_v12, %v3955_v15 }
  0x34   : > { %3365 = vmatpush3.bf16.msra.mxu1 %v4018_v2  ;;  %v4238_v13 = vcombine.low %v1251_v28, %v1258_v26  ;;  %v606_v35 = vshll.u32 %v600_v27, 16  ;;  %v1354_v37 = vrot.slane %v1340_v22, %v3955_v15  ;;  %v4242_v38 = vrot.slane %v423_v18, 6  ;;  %v4297_v26 = vld [vmem:[%s4831_s1 + $0x90] sm:$0xff]  }
  0x35   : > { %3366 = vmatprep.subr.bf16.mxu1 %v3878_v1  ;;  %v1619_v5 = vrot.slane %v1605_v59, %v3955_v15  ;;  %v1450_v4 = vrot.slane %v1436_v16, %v3955_v15  ;;  %v601_v19 = vcombine.high %v600_v27, %v600_v27  ;;  %v437_v46 = vshrl.u32 %v4198_v21, 16 }
  0x36   : > { %3271 = vmatpush3.bf16.msra.mxu0 %v4106_v10  ;;  %v608_v55 = vrot.slane %v606_v35, 7  ;;  %v4260_v56 = vcombine.low %v1347_v43, %v1354_v37  ;;  %v454_v59 = vshll.u32 %v4205_v17, 16  ;;  %v465_v25 = vshrl.u32 %v4222_v30, 16 }
  0x37   : > { %3276 = vmatprep.subr.bf16.mxu0 %v3878_v1  ;;  %v4272_v57 = vcombine.low %v1443_v7, %v1450_v4  ;;  %v397_v16 = vcombine.high %v4178_v62, %v4178_v62  ;;  %v405_v24 = vcombine.high %v4198_v21, %v4198_v21  ;;  %v413_v18 = vcombine.high %v4205_v17, %v4205_v17  ;;  %v4315_v4 = vld [vmem:[%s4831_s1 + $0x98] sm:$0xff]  }
  0x38   : > { %3367 = vmatpush3.bf16.msra.mxu1 %v4040_v23  ;;  %v439_v22 = vrot.slane %v437_v46, 6 }
  0x39   : > { %3372 = vmatprep.subr.bf16.mxu1 %v3878_v1  ;;  %3273 = vmatmul.mubr.msk.bf16.vlgmr.msra.gmra.mrb[0].mxu0 %vm720_vm3, %v4073_v45  ;;  %v4147_v45 = vsel %vm4010_vm8, %v352_v33, %v356_v34  ;;  %v426_v33 = vshll.u32 %v4178_v62, 16  ;;  %v603_v34 = vshrl.u32 %v600_v27, 16  ;;  %v421_v27 = vcombine.high %v4222_v30, %v4222_v30 }
  0x3a   : > { %3277 = vmatpush3.bf16.msra.mxu0 %v4114_v32  ;;  %3284 = vmatprep.mubr.msk.bf16.mxu0 %vm3879_vm0, %v3878_v1  ;;  %v1604_v58 = vcombine.low %v343_v51, %v4147_v45  ;;  %v1902_v12 = vcombine.low %v4147_v45, %v4151_v52  ;;  %v440_v45 = vshll.u32 %v4198_v21, 16  ;;  %v451_v52 = vshrl.u32 %v4205_v17, 16 }
  0x3b   : > { %3369 = vmatmul.mubr.msk.bf16.vlgmr.msra.gmra.mrb[0].mxu1 %vm720_vm3, %v3990_v31  ;;  %3278 = vmatprep.subr.bf16.mxu0 %v3878_v1  ;;  %v955_v31 = vcombine.low %v2910_v40, %v4120_v41  ;;  %v4248_v40 = vld [vmem:[%s3934_s23 + $0x44] sm:$0x7]  ;;  %v605_v51 = vrot.slane %v603_v34, 6  ;;  %v456_v21 = vrot.slane %v454_v59, 7  ;;  %v4327_v59 = vrot.slane %v4245_v39, %v3955_v15 }
  0x3c   : > { %3373 = vmatpush3.bf16.msra.mxu1 %v4066_v36  ;;  %3380 = vmatprep.mubr.msk.bf16.mxu1 %vm3879_vm0, %v3878_v1  ;;  %v1612_v3 = vrot.slane %v1604_v58, %v3955_v15  ;;  %v612_v58 = vshll.u32 %v601_v19, 16  ;;  %v1052_v9 = vcombine.low %v4248_v40, %v4257_v42  ;;  %v442_v43 = vrot.slane %v440_v45, 7 }
  0x3d   : > { %3374 = vmatprep.subr.bf16.mxu1 %v3878_v1  ;;  %v963_v63 = vrot.slane %v955_v31, %v3955_v15  ;;  %v4266_v31 = vld [vmem:[%s4831_s1 + $0x88] sm:$0xff]   ;;  %v453_v62 = vrot.slane %v451_v52, 6  ;;  %v1910_v34 = vrot.slane %v1902_v12, %v3955_v15  ;;  %v432_v19 = vshll.u32 %v397_v16, 16 }
  0x3e   : > { %3279 = vmatpush3.bf16.msra.mxu0 %v4136_v50  ;;  %v1620_v29 = vcombine.low %v1612_v3, %v1619_v5  ;;  %v428_v3 = vrot.slane %v426_v33, 7  ;;  %v1051_v5 = vcombine.low %v4236_v8, %v4245_v39  ;;  %v614_v11 = vrot.slane %v612_v58, 7 }
  0x3f   : > { %3280 = vmatprep.subr.bf16.mxu0 %v3878_v1  ;;  %v4208_v20 = vcombine.low %v963_v63, %v970_v0  ;;  %v468_v63 = vshll.u32 %v4222_v30, 16  ;;  %v609_v0 = vor.u32 %v608_v55, %v605_v51  ;;  %v1066_v35 = vrot.slane %v1052_v9, %v3955_v15 }
  0x40   : > { %3375 = vmatpush3.bf16.msra.mxu1 %v4080_v47  ;;  %v1059_v30 = vrot.slane %v1051_v5, %v3955_v15  ;;  %v429_v37 = vor.u32 %v428_v3, %v4242_v38  ;;  %v443_v46 = vor.u32 %v442_v43, %v439_v22  ;;  %v457_v51 = vor.u32 %v456_v21, %v453_v62  ;;  %v4350_v43 = vld [vmem:[%s4831_s1 + $0xa8] sm:$0xff]  }
  0x41   : > { %3376 = vmatprep.subr.bf16.mxu1 %v3878_v1  ;;  %v610_v28 = vrot.slane %v609_v0, 2  ;;  %v470_v33 = vrot.slane %v468_v63, 7  ;;  %v460_v55 = vshll.u32 %v413_v18, 16  ;;  %v474_v52 = vshll.u32 %v421_v27, 16  ;;  %v4335_v63 = vld [vmem:[%s4831_s1 + $0xa0] sm:$0xff]  }
  0x42   : > { %3281 = vmatpush3.bf16.msra.mxu0 %v4171_v61  ;;  %v488_v58 = vrot.slane %v4236_v8, %v3955_v15  ;;  %v430_v0 = vrot.slane %v429_v37, 2  ;;  %v434_v3 = vrot.slane %v432_v19, 7  ;;  %v444_v5 = vrot.slane %v443_v46, 2 }
  0x43   : > { %3282 = vmatprep.subr.bf16.mxu0 %v3878_v1  ;;  %v615_v17 = vsel %vm4010_vm8, %v610_v28, %v614_v11  ;;  %v458_v8 = vrot.slane %v457_v51, 2  ;;  %v462_v11 = vrot.slane %v460_v55, 7  ;;  %v504_v18 = vrot.slane %v4248_v40, %v3955_v15 }
  0x44   : > { %3377 = vmatpush3.bf16.msra.mxu1 %v4097_v60  ;;  %v1903_v7 = vcombine.low %v4155_v54, %v615_v17  ;;  %v446_v54 = vshll.u32 %v405_v24, 16  ;;  %v476_v24 = vrot.slane %v474_v52, 7  ;;  %v512_v28 = vrot.slane %v4257_v42, %v3955_v15 }
  0x45   : > { %3378 = vmatprep.subr.bf16.mxu1 %v3878_v1  ;;  %v515_v27 = vshrl.u32 %v488_v58, 16  ;;  %v518_v22 = vshll.u32 %v488_v58, 16  ;;  %v435_v62 = vsel %vm4010_vm8, %v430_v0, %v434_v3  ;;  %v529_v17 = vshrl.u32 %v4327_v59, 16 }
  0x46   : > { %3283 = vmatpush3.bf16.msra.mxu0 %v4189_v6  ;;  %v1917_v12 = vrot.slane %v1903_v7, %v3955_v15  ;;  %v448_v9 = vrot.slane %v446_v54, 7  ;;  %v532_v7 = vshll.u32 %v4327_v59, 16  ;;  %v560_v37 = vshll.u32 %v512_v28, 16  ;;  %v4381_v54 = vld [vmem:[%s4831_s1 + $0xb0] sm:$0xff]  }
  0x47   : > { %3288 = vmatprep.subr.bf16.mxu0 %v3878_v1  ;;  %v517_v19 = vrot.slane %v515_v27, 6  ;;  %v520_v46 = vrot.slane %v518_v22, 7  ;;  %v497_v51 = vcombine.high %v4327_v59, %v4327_v59  ;;  %v505_v55 = vcombine.high %v504_v18, %v504_v18  ;;  %v4395_v59 = vld [vmem:[%s4831_s1 + $0xb8] sm:$0xff]  }
  0x48   : > { %3379 = vmatpush3.bf16.msra.mxu1 %v4106_v10  ;;  %v4320_v38 = vcombine.low %v1910_v34, %v1917_v12  ;;  %v4356_v21 = vsel %vm4010_vm8, %v444_v5, %v448_v9  ;;  %v543_v34 = vshrl.u32 %v504_v18, 16  ;;  %v489_v12 = vcombine.high %v488_v58, %v488_v58 }
  0x49   : > { %3384 = vmatprep.subr.bf16.mxu1 %v3878_v1  ;;  %3285 = vmatmul.mubr.msk.bf16.vlgmr.msra.gmra.mrb[0].mxu0 %vm720_vm3, %v4208_v20  ;;  %v1147_v52 = vcombine.low %v435_v62, %v4356_v21  ;;  %v531_v3 = vrot.slane %v529_v17, 6  ;;  %v534_v5 = vrot.slane %v532_v7, 7  ;;  %v562_v58 = vrot.slane %v560_v37, 7 }
  0x4a   : > { %3289 = vmatpush3.bf16.msra.mxu0 %v4228_v14  ;;  %3296 = vmatprep.mubr.msk.bf16.mxu0 %vm3879_vm0, %v3878_v1  ;;  %v545_v9 = vrot.slane %v543_v34, 6  ;;  %v538_v22 = vshll.u32 %v497_v51, 16  ;;  %v552_v17 = vshll.u32 %v505_v55, 16 }
  0x4b   : > { %3381 = vmatmul.mubr.msk.bf16.vlgmr.msra.gmra.mrb[0].mxu1 %vm720_vm3, %v1620_v29  ;;  %3290 = vmatprep.subr.bf16.mxu0 %v3878_v1  ;;  %v467_v29 = vrot.slane %v465_v25, 6  ;;  %v4329_v25 = vcombine.low %v1059_v30, %v1066_v35  ;;  %v546_v30 = vshll.u32 %v504_v18, 16  ;;  %v557_v35 = vshrl.u32 %v512_v28, 16 }
  0x4c   : > { %3385 = vmatpush3.bf16.msra.mxu1 %v4114_v32  ;;  %3392 = vmatprep.mubr.msk.bf16.mxu1 %vm3879_vm0, %v3878_v1  ;;  %v1155_v18 = vrot.slane %v1147_v52, %v3955_v15  ;;  %v535_v27 = vor.u32 %v534_v5, %v531_v3  ;;  %v554_v55 = vrot.slane %v552_v17, 7  ;;  %v4499_v17 = vld [vmem:[%s4831_s1 + $0xf0] sm:$0xff]  }
  0x4d   : > { %3386 = vmatprep.subr.bf16.mxu1 %v3878_v1  ;;  %v471_v45 = vor.u32 %v470_v33, %v467_v29  ;;  %v4365_v29 = vsel %vm4010_vm8, %v458_v8, %v462_v11  ;;  %v548_v8 = vrot.slane %v546_v30, 7  ;;  %v559_v11 = vrot.slane %v557_v35, 6  ;;  %v4406_v30 = vld [vmem:[%s4831_s1 + $0xc0] sm:$0xff]  }
  0x4e   : > { %3291 = vmatpush3.bf16.msra.mxu0 %v4266_v31 }
  0x4f   : > { %3292 = vmatprep.subr.bf16.mxu0 %v3878_v1  ;;  %v472_v16 = vrot.slane %v471_v45, 2  ;;  %v513_v45 = vcombine.high %v512_v28, %v512_v28  ;;  %v549_v62 = vor.u32 %v548_v8, %v545_v9  ;;  %v563_v7 = vor.u32 %v562_v58, %v559_v11  ;;  %v4448_v11 = vld [vmem:[%s4831_s1 + $0xd0] sm:$0xff]  }
  0x50   : > { %3387 = vmatpush3.bf16.msra.mxu1 %v4136_v50 }
  0x51   : > { %3388 = vmatprep.subr.bf16.mxu1 %v3878_v1  ;;  %v4369_v33 = vsel %vm4010_vm8, %v472_v16, %v476_v24  ;;  %v521_v16 = vor.u32 %v520_v46, %v517_v19  ;;  %v524_v24 = vshll.u32 %v489_v12, 16  ;;  %v566_v34 = vshll.u32 %v513_v45, 16 }
  0x52   : > { %3293 = vmatpush3.bf16.msra.mxu0 %v4297_v26  ;;  %v1148_v0 = vcombine.low %v4365_v29, %v4369_v33  ;;  %v536_v46 = vrot.slane %v535_v27, 2  ;;  %v540_v12 = vrot.slane %v538_v22, 7  ;;  %v550_v51 = vrot.slane %v549_v62, 2  ;;  %v4471_v27 = vld [vmem:[%s4831_s1 + $0xe0] sm:$0xff]   ;;  %v4484_v62 = vld [vmem:[%s4831_s1 + $0xe8] sm:$0xff]  }
  0x53   : > { %3294 = vmatprep.subr.bf16.mxu0 %v3878_v1  ;;  %v522_v35 = vrot.slane %v521_v16, 2  ;;  %v526_v19 = vrot.slane %v524_v24, 7  ;;  %v564_v45 = vrot.slane %v563_v7, 2  ;;  %v568_v52 = vrot.slane %v566_v34, 7  ;;  %v4460_v24 = vld [vmem:[%s4831_s1 + $0xd8] sm:$0xff]   ;;  %v4517_v34 = vld [vmem:[%s4831_s1 + $0x100] sm:$0xff]  }
  0x54   : > { %3389 = vmatpush3.bf16.msra.mxu1 %v4171_v61  ;;  %v1162_v28 = vrot.slane %v1148_v0, %v3955_v15  ;;  %v4419_v0 = vld [vmem:[%s4831_s1 + $0xc8] sm:$0xff]   ;;  %v4433_v5 = vsel %vm4010_vm8, %v536_v46, %v540_v12  ;;  %v4437_v9 = vsel %vm4010_vm8, %v550_v51, %v554_v55  ;;  %v4508_v7 = vld [vmem:[%s4831_s1 + $0xf8] sm:$0xff]   ;;  %v3864_v12 = vld [vmem:[%s4831_s1 + $0x20] sm:$0xff]  }
  0x55   : > { %3390 = vmatprep.subr.bf16.mxu1 %v3878_v1  ;;  %v527_v3 = vsel %vm4010_vm8, %v522_v35, %v526_v19  ;;  %v4441_v8 = vsel %vm4010_vm8, %v564_v45, %v568_v52  ;;  %v4528_v35 = vld [vmem:[%s4831_s1 + $0x108] sm:$0xff]   ;;  %v4543_v19 = vld [vmem:[%s4831_s1 + $0x110] sm:$0xff]   ;;  %v4552_v46 = vld [vmem:[%s4831_s1 + $0x118] sm:$0xff]  }
  0x56   : > { %3295 = vmatpush3.bf16.msra.mxu0 %v4315_v4  ;;  %v4408_v37 = vcombine.low %v1155_v18, %v1162_v28  ;;  %v1753_v58 = vcombine.low %v527_v3, %v4433_v5  ;;  %v1754_v16 = vcombine.low %v4437_v9, %v4441_v8  ;;  %v3865_v51 = vld [vmem:[%s4831_s1 + $0x28] sm:$0xff]   ;;  %v3866_v55 = vld [vmem:[%s4831_s1 + $0x30] sm:$0xff]   ;;  %v3867_v45 = vld [vmem:[%s4831_s1 + $0x38] sm:$0xff]  }
  0x57   : > { %3300 = vmatprep.subr.bf16.mxu0 %v3878_v1  ;;  %v3868_v52 = vld [vmem:[%s4831_s1] sm:$0xff]  }
  0x58   : > { %3391 = vmatpush3.bf16.msra.mxu1 %v4189_v6  ;;  %v1761_v18 = vrot.slane %v1753_v58, %v3955_v15  ;;  %v1768_v28 = vrot.slane %v1754_v16, %v3955_v15  ;;  %v2752_v16 = vcombine.low %v4433_v5, %v4437_v9 }
  0x59   : > { %3396 = vmatprep.subr.bf16.mxu1 %v3878_v1  ;;  %3297 = vmatmul.mubr.msk.bf16.vlgmr.msra.gmra.mrb[0].mxu0 %vm720_vm3, %v4329_v25 }
  0x5a   : > { %3301 = vmatpush3.bf16.msra.mxu0 %v4335_v63  ;;  %3308 = vmatprep.mubr.msk.bf16.mxu0 %vm3879_vm0, %v3878_v1  ;;  %v4473_v22 = vcombine.low %v1761_v18, %v1768_v28  ;;  %v2760_v18 = vrot.slane %v2752_v16, %v3955_v15 }
  0x5b   : > { %3393 = vmatmul.mubr.msk.bf16.vlgmr.msra.gmra.mrb[0].mxu1 %vm720_vm3, %v4329_v25  ;;  %3302 = vmatprep.subr.bf16.mxu0 %v3878_v1 }
  0x5c   : > { %3397 = vmatpush3.bf16.msra.mxu1 %v4228_v14  ;;  %3404 = vmatprep.mubr.msk.bf16.mxu1 %vm3879_vm0, %v3878_v1 }
  0x5d   : > { %3398 = vmatprep.subr.bf16.mxu1 %v3878_v1 }
  0x5e   : > { %3303 = vmatpush3.bf16.msra.mxu0 %v4350_v43 }
  0x5f   : > { %3304 = vmatprep.subr.bf16.mxu0 %v3878_v1 }
  0x60   : > { %3399 = vmatpush3.bf16.msra.mxu1 %v4266_v31 }
  0x61   : > { %3400 = vmatprep.subr.bf16.mxu1 %v3878_v1 }
  0x62   : > { %3305 = vmatpush3.bf16.msra.mxu0 %v4381_v54 }
  0x63   : > { %3306 = vmatprep.subr.bf16.mxu0 %v3878_v1 }
  0x64   : > { %3401 = vmatpush3.bf16.msra.mxu1 %v4297_v26 }
  0x65   : > { %3402 = vmatprep.subr.bf16.mxu1 %v3878_v1 }
  0x66   : > { %3307 = vmatpush3.bf16.msra.mxu0 %v4395_v59 }
  0x67   : > { %3312 = vmatprep.subr.bf16.mxu0 %v3878_v1 }
  0x68   : > { %3403 = vmatpush3.bf16.msra.mxu1 %v4315_v4 }
  0x69   : > { %3408 = vmatprep.subr.bf16.mxu1 %v3878_v1  ;;  %3309 = vmatmul.mubr.msk.bf16.vlgmr.msra.gmra.mrb[0].mxu0 %vm720_vm3, %v4408_v37 }
  0x6a   : > { %3313 = vmatpush3.bf16.msra.mxu0 %v4406_v30  ;;  %3320 = vmatprep.mubr.msk.bf16.mxu0 %vm3879_vm0, %v3878_v1 }
  0x6b   : > { %3405 = vmatmul.mubr.msk.bf16.vlgmr.msra.gmra.mrb[0].mxu1 %vm720_vm3, %v4408_v37  ;;  %3314 = vmatprep.subr.bf16.mxu0 %v3878_v1 }
  0x6c   : > { %3409 = vmatpush3.bf16.msra.mxu1 %v4335_v63  ;;  %3416 = vmatprep.mubr.msk.bf16.mxu1 %vm3879_vm0, %v3878_v1 }
  0x6d   : > { %3410 = vmatprep.subr.bf16.mxu1 %v3878_v1 }
  0x6e   : > { %3315 = vmatpush3.bf16.msra.mxu0 %v4419_v0 }
  0x6f   : > { %3316 = vmatprep.subr.bf16.mxu0 %v3878_v1 }
  0x70   : > { %3411 = vmatpush3.bf16.msra.mxu1 %v4350_v43 }
  0x71   : > { %3412 = vmatprep.subr.bf16.mxu1 %v3878_v1 }
  0x72   : > { %3317 = vmatpush3.bf16.msra.mxu0 %v4448_v11 }
  0x73   : > { %3318 = vmatprep.subr.bf16.mxu0 %v3878_v1 }
  0x74   : > { %3413 = vmatpush3.bf16.msra.mxu1 %v4381_v54 }
  0x75   : > { %3414 = vmatprep.subr.bf16.mxu1 %v3878_v1 }
  0x76   : > { %3319 = vmatpush3.bf16.msra.mxu0 %v4460_v24 }
  0x77   : > { %3324 = vmatprep.subr.bf16.mxu0 %v3878_v1 }
  0x78   : > { %3415 = vmatpush3.bf16.msra.mxu1 %v4395_v59 }
  0x79   : > { %3420 = vmatprep.subr.bf16.mxu1 %v3878_v1  ;;  %3321 = vmatmul.mubr.msk.bf16.vlgmr.msra.gmra.mrb[0].mxu0 %vm720_vm3, %v4238_v13 }
  0x7a   : > { %3325 = vmatpush3.bf16.msra.mxu0 %v4471_v27  ;;  %3332 = vmatprep.mubr.msk.bf16.mxu0 %vm3879_vm0, %v3878_v1 }
  0x7b   : > { %3417 = vmatmul.mubr.msk.bf16.vlgmr.msra.gmra.mrb[0].mxu1 %vm720_vm3, %v4473_v22  ;;  %3326 = vmatprep.subr.bf16.mxu0 %v3878_v1 }
  0x7c   : > { %3421 = vmatpush3.bf16.msra.mxu1 %v4406_v30  ;;  %3428 = vmatprep.mubr.msk.bf16.mxu1 %vm3879_vm0, %v3878_v1 }
  0x7d   : > { %3422 = vmatprep.subr.bf16.mxu1 %v3878_v1 }
  0x7e   : > { %3327 = vmatpush3.bf16.msra.mxu0 %v4484_v62 }
  0x7f   : > { %3328 = vmatprep.subr.bf16.mxu0 %v3878_v1 }
  0x80   : > { %3423 = vmatpush3.bf16.msra.mxu1 %v4419_v0 }
  0x81   : > { %3424 = vmatprep.subr.bf16.mxu1 %v3878_v1 }
  0x82   : > { %3329 = vmatpush3.bf16.msra.mxu0 %v4499_v17 }
  0x83   : > { %3330 = vmatprep.subr.bf16.mxu0 %v3878_v1 }
  0x84   : > { %3425 = vmatpush3.bf16.msra.mxu1 %v4448_v11 }
  0x85   : > { %3426 = vmatprep.subr.bf16.mxu1 %v3878_v1 }
  0x86   : > { %3331 = vmatpush3.bf16.msra.mxu0 %v4508_v7 }
  0x87   : > { %3336 = vmatprep.subr.bf16.mxu0 %v3878_v1 }
  0x88   : > { %3427 = vmatpush3.bf16.msra.mxu1 %v4460_v24 }
  0x89   : > { %3432 = vmatprep.subr.bf16.mxu1 %v3878_v1  ;;  %3333 = vmatmul.mubr.msk.bf16.vlgmr.msra.gmra.mrb[0].mxu0 %vm720_vm3, %v4260_v56 }
  0x8a   : > { %3337 = vmatpush3.bf16.msra.mxu0 %v4517_v34  ;;  %3344 = vmatprep.mubr.msk.bf16.mxu0 %vm3879_vm0, %v3878_v1 }
  0x8b   : > { %3429 = vmatmul.mubr.msk.bf16.vlgmr.msra.gmra.mrb[0].mxu1 %vm720_vm3, %v4260_v56  ;;  %3338 = vmatprep.subr.bf16.mxu0 %v3878_v1 }
  0x8c   : > { %3433 = vmatpush3.bf16.msra.mxu1 %v4471_v27  ;;  %3440 = vmatprep.mubr.msk.bf16.mxu1 %vm3879_vm0, %v3878_v1 }
  0x8d   : > { %3434 = vmatprep.subr.bf16.mxu1 %v3878_v1 }
  0x8e   : > { %3339 = vmatpush3.bf16.msra.mxu0 %v4528_v35 }
  0x8f   : > { %3340 = vmatprep.subr.bf16.mxu0 %v3878_v1 }
  0x90   : > { %3435 = vmatpush3.bf16.msra.mxu1 %v4484_v62 }
  0x91   : > { %3436 = vmatprep.subr.bf16.mxu1 %v3878_v1 }
  0x92   : > { %3341 = vmatpush3.bf16.msra.mxu0 %v4543_v19 }
  0x93   : > { %3342 = vmatprep.subr.bf16.mxu0 %v3878_v1 }
  0x94   : > { %3437 = vmatpush3.bf16.msra.mxu1 %v4499_v17 }
  0x95   : > { %3438 = vmatprep.subr.bf16.mxu1 %v3878_v1 }
  0x96   : > { %3343 = vmatpush3.bf16.msra.mxu0 %v4552_v46 }
  0x97   : > { %3456 = vmatprep.subr.bf16.mxu0 %v3878_v1 }
  0x98   : > { %3439 = vmatpush3.bf16.msra.mxu1 %v4508_v7 }
  0x99   : > { %3444 = vmatprep.subr.bf16.mxu1 %v3878_v1  ;;  %3345 = vmatmul.mubr.msk.bf16.vlgmr.msra.gmra.mrb[0].mxu0 %vm720_vm3, %v4272_v57 }
  0x9a   : > { %3457 = vmatpush3.bf16.msra.mxu0 %v3864_v12  ;;  %3464 = vmatprep.mubr.msk.bf16.mxu0 %vm3879_vm0, %v3878_v1 }
  0x9b   : > { %3441 = vmatmul.mubr.msk.bf16.vlgmr.msra.gmra.mrb[0].mxu1 %vm720_vm3, %v4272_v57  ;;  %3458 = vmatprep.subr.bf16.mxu0 %v3878_v1 }
  0x9c   : > { %3445 = vmatpush3.bf16.msra.mxu1 %v4517_v34  ;;  %3452 = vmatprep.mubr.msk.bf16.mxu1 %vm3879_vm0, %v3878_v1 }
  0x9d   : > { %3446 = vmatprep.subr.bf16.mxu1 %v3878_v1 }
  0x9e   : > { %3459 = vmatpush3.bf16.msra.mxu0 %v3865_v51 }
  0x9f   : > { %3460 = vmatprep.subr.bf16.mxu0 %v3878_v1 }
  0xa0   : > { %3447 = vmatpush3.bf16.msra.mxu1 %v4528_v35 }
  0xa1   : > { %3448 = vmatprep.subr.bf16.mxu1 %v3878_v1 }
  0xa2   : > { %3461 = vmatpush3.bf16.msra.mxu0 %v3866_v55 }
  0xa3   : > { %3462 = vmatprep.subr.bf16.mxu0 %v3878_v1 }
  0xa4   : > { %3449 = vmatpush3.bf16.msra.mxu1 %v4543_v19 }
  0xa5   : > { %3450 = vmatprep.subr.bf16.mxu1 %v3878_v1 }
  0xa6   : > { %3463 = vmatpush3.bf16.msra.mxu0 %v3867_v45 }
  0xa7   : > { %3468 = vmatprep.subr.bf16.mxu0 %v3878_v1 }
  0xa8   : > { %3451 = vmatpush3.bf16.msra.mxu1 %v4552_v46 }
  0xa9   : > { %3564 = vmatprep.subr.bf16.mxu1 %v3878_v1  ;;  %3465 = vmatmul.mubr.msk.bf16.vlgmr.msra.gmra.mrb[4].mxu0 %vm720_vm3, %v4329_v25 }
  0xaa   : > { %3469 = vmatpush3.bf16.msra.mxu0 %v3868_v52  ;;  %3476 = vmatprep.mubr.msk.bf16.mxu0 %vm3879_vm0, %v3878_v1 }
  0xab   : > { %3453 = vmatmul.mubr.msk.bf16.vlgmr.msra.gmra.mrb[0].mxu1 %vm720_vm3, %v4320_v38  ;;  %3470 = vmatprep.subr.bf16.mxu0 %v3878_v1 }
  0xac   : > { %3565 = vmatpush3.bf16.msra.mxu1 %v3864_v12  ;;  %3572 = vmatprep.mubr.msk.bf16.mxu1 %vm3879_vm0, %v3878_v1 }
  0xad   : > { %3566 = vmatprep.subr.bf16.mxu1 %v3878_v1 }
  0xae   : > { %3471 = vmatpush3.bf16.msra.mxu0 %v4002_v44  ;;  %v3869_v44 = vld [vmem:[%s4831_s1 + $0x8] sm:$0xff]  }
  0xaf   : > { %3472 = vmatprep.subr.bf16.mxu0 %v3878_v1 }
  0xb0   : > { %3567 = vmatpush3.bf16.msra.mxu1 %v3865_v51 }
  0xb1   : > { %3568 = vmatprep.subr.bf16.mxu1 %v3878_v1 }
  0xb2   : > { %3473 = vmatpush3.bf16.msra.mxu0 %v4018_v2 }
  0xb3   : > { %3474 = vmatprep.subr.bf16.mxu0 %v3878_v1 }
  0xb4   : > { %3569 = vmatpush3.bf16.msra.mxu1 %v3866_v55 }
  0xb5   : > { %3570 = vmatprep.subr.bf16.mxu1 %v3878_v1 }
  0xb6   : > { %3475 = vmatpush3.bf16.msra.mxu0 %v4040_v23 }
  0xb7   : > { %3480 = vmatprep.subr.bf16.mxu0 %v3878_v1 }
  0xb8   : > { %3571 = vmatpush3.bf16.msra.mxu1 %v3867_v45  ;;  %v3056_v45 = vld [vmem:[%s4832_s2] ss:$0 sm:$0xff] }
  0xb9   : > { %3576 = vmatprep.subr.bf16.mxu1 %v3878_v1  ;;  %3477 = vmatmul.mubr.msk.bf16.vlgmr.msra.gmra.mrb[4].mxu0 %vm720_vm3, %v4208_v20 }
  0xba   : > { %3481 = vmatpush3.bf16.msra.mxu0 %v4066_v36  ;;  %3488 = vmatprep.mubr.msk.bf16.mxu0 %vm3879_vm0, %v3878_v1 }
  0xbb   : > { %3573 = vmatmul.mubr.msk.bf16.vlgmr.msra.gmra.mrb[4].mxu1 %vm720_vm3, %v4408_v37  ;;  %3482 = vmatprep.subr.bf16.mxu0 %v3878_v1 }
  0xbc   : > { %3577 = vmatpush3.bf16.msra.mxu1 %v3868_v52  ;;  %3584 = vmatprep.mubr.msk.bf16.mxu1 %vm3879_vm0, %v3878_v1 }
  0xbd   : > { %3578 = vmatprep.subr.bf16.mxu1 %v3878_v1 }
  0xbe   : > { %3483 = vmatpush3.bf16.msra.mxu0 %v4080_v47 }
  0xbf   : > { %3484 = vmatprep.subr.bf16.mxu0 %v3878_v1 }
  0xc0   : > { %3579 = vmatpush3.bf16.msra.mxu1 %v3869_v44 }
  0xc1   : > { %3580 = vmatprep.subr.bf16.mxu1 %v3878_v1 }
  0xc2   : > { %3485 = vmatpush3.bf16.msra.mxu0 %v4097_v60 }
  0xc3   : > { %3486 = vmatprep.subr.bf16.mxu0 %v3878_v1 }
  0xc4   : > { %3581 = vmatpush3.bf16.msra.mxu1 %v4018_v2  ;;  %v2914_v2 = vld [vmem:[%s3934_s23 + $0x38] sm:$0x7] }
  0xc5   : > { %3582 = vmatprep.subr.bf16.mxu1 %v3878_v1 }
  0xc6   : > { %3487 = vmatpush3.bf16.msra.mxu0 %v4106_v10 }
  0xc7   : > { %3492 = vmatprep.subr.bf16.mxu0 %v3878_v1 }
  0xc8   : > { %3583 = vmatpush3.bf16.msra.mxu1 %v4040_v23  ;;  %v2221_v23 = vcombine.low %v4120_v41, %v4127_v48 }
  0xc9   : > { %3588 = vmatprep.subr.bf16.mxu1 %v3878_v1  ;;  %3489 = vmatmul.mubr.msk.bf16.vlgmr.msra.gmra.mrb[4].mxu0 %vm720_vm3, %v4408_v37 }
  0xca   : > { %3493 = vmatpush3.bf16.msra.mxu0 %v4114_v32  ;;  %3500 = vmatprep.mubr.msk.bf16.mxu0 %vm3879_vm0, %v3878_v1 }
  0xcb   : > { %3585 = vmatmul.mubr.msk.bf16.vlgmr.msra.gmra.mrb[4].mxu1 %vm720_vm3, %v4329_v25  ;;  %3494 = vmatprep.subr.bf16.mxu0 %v3878_v1 }
  0xcc   : > { %3589 = vmatpush3.bf16.msra.mxu1 %v4066_v36  ;;  %3596 = vmatprep.mubr.msk.bf16.mxu1 %vm3879_vm0, %v3878_v1  ;;  %v2222_v36 = vcombine.low %v4130_v49, %v2914_v2  ;;  %v2919_v49 = vld [vmem:[%s3934_s23 + $0x4c] sm:$0x7] }
  0xcd   : > { %3590 = vmatprep.subr.bf16.mxu1 %v3878_v1 }
  0xce   : > { %3495 = vmatpush3.bf16.msra.mxu0 %v4136_v50 }
  0xcf   : > { %3496 = vmatprep.subr.bf16.mxu0 %v3878_v1 }
  0xd0   : > { %3591 = vmatpush3.bf16.msra.mxu1 %v4080_v47  ;;  %v2229_v47 = vrot.slane %v2221_v23, %v3955_v15 }
  0xd1   : > { %3592 = vmatprep.subr.bf16.mxu1 %v3878_v1 }
  0xd2   : > { %3497 = vmatpush3.bf16.msra.mxu0 %v4171_v61 }
  0xd3   : > { %3498 = vmatprep.subr.bf16.mxu0 %v3878_v1 }
  0xd4   : > { %3593 = vmatpush3.bf16.msra.mxu1 %v4097_v60  ;;  %v2236_v60 = vrot.slane %v2222_v36, %v3955_v15 }
  0xd5   : > { %3594 = vmatprep.subr.bf16.mxu1 %v3878_v1 }
  0xd6   : > { %3499 = vmatpush3.bf16.msra.mxu0 %v4189_v6 }
  0xd7   : > { %3504 = vmatprep.subr.bf16.mxu0 %v3878_v1 }
  0xd8   : > { %3595 = vmatpush3.bf16.msra.mxu1 %v4106_v10  ;;  %v2237_v10 = vcombine.low %v2229_v47, %v2236_v60 }
  0xd9   : > { %3600 = vmatprep.subr.bf16.mxu1 %v3878_v1  ;;  %3501 = vmatmul.mubr.msk.bf16.vlgmr.msra.gmra.mrb[4].mxu0 %vm720_vm3, %v4238_v13 }
  0xda   : > { %3505 = vmatpush3.bf16.msra.mxu0 %v4228_v14  ;;  %3512 = vmatprep.mubr.msk.bf16.mxu0 %vm3879_vm0, %v3878_v1 }
  0xdb   : > { %3597 = vmatmul.mubr.msk.bf16.vlgmr.msra.gmra.mrb[4].mxu1 %vm720_vm3, %v4473_v22  ;;  %3506 = vmatprep.subr.bf16.mxu0 %v3878_v1 }
  0xdc   : > { %3601 = vmatpush3.bf16.msra.mxu1 %v4114_v32  ;;  %3608 = vmatprep.mubr.msk.bf16.mxu1 %vm3879_vm0, %v3878_v1  ;;  %v623_v32 = vrot.slane %v2914_v2, %v3955_v15 }
  0xdd   : > { %3602 = vmatprep.subr.bf16.mxu1 %v3878_v1 }
  0xde   : > { %3507 = vmatpush3.bf16.msra.mxu0 %v4266_v31  ;;  %v626_v41 = vshrl.u32 %v623_v32, 16  ;;  %v629_v48 = vshll.u32 %v623_v32, 16 }
  0xdf   : > { %3508 = vmatprep.subr.bf16.mxu0 %v3878_v1 }
  0xe0   : > { %3603 = vmatpush3.bf16.msra.mxu1 %v4136_v50  ;;  %v2284_v50 = vcombine.low %v4245_v39, %v4248_v40  ;;  %v631_v20 = vrot.slane %v629_v48, 7 }
  0xe1   : > { %3604 = vmatprep.subr.bf16.mxu1 %v3878_v1 }
  0xe2   : > { %3509 = vmatpush3.bf16.msra.mxu0 %v4297_v26  ;;  %v2292_v13 = vrot.slane %v2284_v50, %v3955_v15 }
  0xe3   : > { %3510 = vmatprep.subr.bf16.mxu0 %v3878_v1 }
  0xe4   : > { %3605 = vmatpush3.bf16.msra.mxu1 %v4171_v61  ;;  %v2285_v61 = vcombine.low %v4257_v42, %v2919_v49 }
  0xe5   : > { %3606 = vmatprep.subr.bf16.mxu1 %v3878_v1 }
  0xe6   : > { %3511 = vmatpush3.bf16.msra.mxu0 %v4315_v4 }
  0xe7   : > { %3516 = vmatprep.subr.bf16.mxu0 %v3878_v1 }
  0xe8   : > { %3607 = vmatpush3.bf16.msra.mxu1 %v4189_v6  ;;  %v628_v6 = vrot.slane %v626_v41, 6 }
  0xe9   : > { %3612 = vmatprep.subr.bf16.mxu1 %v3878_v1  ;;  %3513 = vmatmul.mubr.msk.bf16.vlgmr.msra.gmra.mrb[4].mxu0 %vm720_vm3, %v4260_v56 }
  0xea   : > { %3517 = vmatpush3.bf16.msra.mxu0 %v4335_v63  ;;  %3524 = vmatprep.mubr.msk.bf16.mxu0 %vm3879_vm0, %v3878_v1  ;;  %v632_v39 = vor.u32 %v631_v20, %v628_v6 }
  0xeb   : > { %3609 = vmatmul.mubr.msk.bf16.vlgmr.msra.gmra.mrb[4].mxu1 %vm720_vm3, %v4260_v56  ;;  %3518 = vmatprep.subr.bf16.mxu0 %v3878_v1  ;;  %v2299_v56 = vrot.slane %v2285_v61, %v3955_v15 }
  0xec   : > { %3613 = vmatpush3.bf16.msra.mxu1 %v4228_v14  ;;  %3620 = vmatprep.mubr.msk.bf16.mxu1 %vm3879_vm0, %v3878_v1  ;;  %v624_v14 = vcombine.high %v623_v32, %v623_v32 }
  0xed   : > { %3614 = vmatprep.subr.bf16.mxu1 %v3878_v1  ;;  %v2300_v42 = vcombine.low %v2292_v13, %v2299_v56 }
  0xee   : > { %3519 = vmatpush3.bf16.msra.mxu0 %v4350_v43  ;;  %v635_v40 = vshll.u32 %v624_v14, 16 }
  0xef   : > { %3520 = vmatprep.subr.bf16.mxu0 %v3878_v1 }
  0xf0   : > { %3615 = vmatpush3.bf16.msra.mxu1 %v4266_v31  ;;  %v646_v31 = vrot.slane %v2919_v49, %v3955_v15 }
  0xf1   : > { %3616 = vmatprep.subr.bf16.mxu1 %v3878_v1 }
  0xf2   : > { %3521 = vmatpush3.bf16.msra.mxu0 %v4381_v54 }
  0xf3   : > { %3522 = vmatprep.subr.bf16.mxu0 %v3878_v1 }
  0xf4   : > { %3617 = vmatpush3.bf16.msra.mxu1 %v4297_v26  ;;  %v637_v26 = vrot.slane %v635_v40, 7 }
  0xf5   : > { %3618 = vmatprep.subr.bf16.mxu1 %v3878_v1 }
  0xf6   : > { %3523 = vmatpush3.bf16.msra.mxu0 %v4395_v59 }
  0xf7   : > { %3528 = vmatprep.subr.bf16.mxu0 %v3878_v1 }
  0xf8   : > { %3619 = vmatpush3.bf16.msra.mxu1 %v4315_v4  ;;  %v649_v4 = vshrl.u32 %v646_v31, 16 }
  0xf9   : > { %3624 = vmatprep.subr.bf16.mxu1 %v3878_v1  ;;  %3525 = vmatmul.mubr.msk.bf16.vlgmr.msra.gmra.mrb[4].mxu0 %vm720_vm3, %v4272_v57 }
  0xfa   : > { %3529 = vmatpush3.bf16.msra.mxu0 %v4406_v30  ;;  %3536 = vmatprep.mubr.msk.bf16.mxu0 %vm3879_vm0, %v3878_v1 }
  0xfb   : > { %3621 = vmatmul.mubr.msk.bf16.vlgmr.msra.gmra.mrb[4].mxu1 %vm720_vm3, %v4272_v57  ;;  %3530 = vmatprep.subr.bf16.mxu0 %v3878_v1  ;;  %v633_v57 = vrot.slane %v632_v39, 2 }
  0xfc   : > { %3625 = vmatpush3.bf16.msra.mxu1 %v4335_v63  ;;  %3632 = vmatprep.mubr.msk.bf16.mxu1 %vm3879_vm0, %v3878_v1  ;;  %v2347_v63 = vcombine.low %v4356_v21, %v4365_v29 }
  0xfd   : > { %3626 = vmatprep.subr.bf16.mxu1 %v3878_v1  ;;  %v638_v25 = vsel %vm4010_vm8, %v633_v57, %v637_v26 }
  0xfe   : > { %3531 = vmatpush3.bf16.msra.mxu0 %v4419_v0  ;;  %v2355_v37 = vrot.slane %v2347_v63, %v3955_v15 }
  0xff   : > { %3532 = vmatprep.subr.bf16.mxu0 %v3878_v1 }
 0x100   : > { %3627 = vmatpush3.bf16.msra.mxu1 %v4350_v43  ;;  %v2348_v43 = vcombine.low %v4369_v33, %v638_v25 }
 0x101   : > { %3628 = vmatprep.subr.bf16.mxu1 %v3878_v1 }
 0x102   : > { %3533 = vmatpush3.bf16.msra.mxu0 %v4448_v11 }
 0x103   : > { %3534 = vmatprep.subr.bf16.mxu0 %v3878_v1 }
 0x104   : > { %3629 = vmatpush3.bf16.msra.mxu1 %v4381_v54  ;;  %v651_v54 = vrot.slane %v649_v4, 6 }
 0x105   : > { %3630 = vmatprep.subr.bf16.mxu1 %v3878_v1 }
 0x106   : > { %3535 = vmatpush3.bf16.msra.mxu0 %v4460_v24 }
 0x107   : > { %3540 = vmatprep.subr.bf16.mxu0 %v3878_v1 }
 0x108   : > { %3631 = vmatpush3.bf16.msra.mxu1 %v4395_v59 }
 0x109   : > { %3636 = vmatprep.subr.bf16.mxu1 %v3878_v1  ;;  %3537 = vmatmul.mubr.msk.bf16.vlgmr.msra.gmra.mrb[4].mxu0 %vm720_vm3, %v2237_v10 }
 0x10a   : > { %3541 = vmatpush3.bf16.msra.mxu0 %v4471_v27  ;;  %3548 = vmatprep.mubr.msk.bf16.mxu0 %vm3879_vm0, %v3878_v1 }
 0x10b   : > { %3633 = vmatmul.mubr.msk.bf16.vlgmr.msra.gmra.mrb[4].mxu1 %vm720_vm3, %v4320_v38  ;;  %3542 = vmatprep.subr.bf16.mxu0 %v3878_v1  ;;  %v652_v38 = vshll.u32 %v646_v31, 16 }
 0x10c   : > { %3637 = vmatpush3.bf16.msra.mxu1 %v4406_v30  ;;  %3644 = vmatprep.mubr.msk.bf16.mxu1 %vm3879_vm0, %v3878_v1  ;;  %v647_v30 = vcombine.high %v646_v31, %v646_v31 }
 0x10d   : > { %3638 = vmatprep.subr.bf16.mxu1 %v3878_v1  ;;  %v654_v59 = vrot.slane %v652_v38, 7 }
 0x10e   : > { %3543 = vmatpush3.bf16.msra.mxu0 %v4484_v62  ;;  %v658_v29 = vshll.u32 %v647_v30, 16 }
 0x10f   : > { %3544 = vmatprep.subr.bf16.mxu0 %v3878_v1  ;;  %v655_v21 = vor.u32 %v654_v59, %v651_v54 }
 0x110   : > { %3639 = vmatpush3.bf16.msra.mxu1 %v4419_v0  ;;  %v2362_v0 = vrot.slane %v2348_v43, %v3955_v15 }
 0x111   : > { %3640 = vmatprep.subr.bf16.mxu1 %v3878_v1  ;;  %v656_v3 = vrot.slane %v655_v21, 2 }
 0x112   : > { %3545 = vmatpush3.bf16.msra.mxu0 %v4499_v17  ;;  %v2363_v33 = vcombine.low %v2355_v37, %v2362_v0 }
 0x113   : > { %3546 = vmatprep.subr.bf16.mxu0 %v3878_v1 }
 0x114   : > { %3641 = vmatpush3.bf16.msra.mxu1 %v4448_v11  ;;  %v660_v11 = vrot.slane %v658_v29, 7 }
 0x115   : > { %3642 = vmatprep.subr.bf16.mxu1 %v3878_v1 }
 0x116   : > { %3547 = vmatpush3.bf16.msra.mxu0 %v4508_v7  ;;  %v661_v58 = vsel %vm4010_vm8, %v656_v3, %v660_v11 }
 0x117   : > { %3552 = vmatprep.subr.bf16.mxu0 %v3878_v1 }
 0x118   : > { %3643 = vmatpush3.bf16.msra.mxu1 %v4460_v24  ;;  %v2753_v24 = vcombine.low %v4441_v8, %v661_v58 }
 0x119   : > { %3648 = vmatprep.subr.bf16.mxu1 %v3878_v1  ;;  %3549 = vmatmul.mubr.msk.bf16.vlgmr.msra.gmra.mrb[4].mxu0 %vm720_vm3, %v2300_v42 }
 0x11a   : > { %3553 = vmatpush3.bf16.msra.mxu0 %v4517_v34  ;;  %3560 = vmatprep.mubr.msk.bf16.mxu0 %vm3879_vm0, %v3878_v1  ;;  %v2767_v28 = vrot.slane %v2753_v24, %v3955_v15 }
 0x11b   : > { %3645 = vmatmul.mubr.msk.bf16.vlgmr.msra.gmra.mrb[4].mxu1 %vm720_vm3, %v2300_v42  ;;  %3554 = vmatprep.subr.bf16.mxu0 %v3878_v1 }
 0x11c   : > { %3649 = vmatpush3.bf16.msra.mxu1 %v4471_v27  ;;  %3656 = vmatprep.mubr.msk.bf16.mxu1 %vm3879_vm0, %v3878_v1  ;;  %v2768_v53 = vcombine.low %v2760_v18, %v2767_v28 }
 0x11d   : > { %3650 = vmatprep.subr.bf16.mxu1 %v3878_v1 }
 0x11e   : > { %3555 = vmatpush3.bf16.msra.mxu0 %v4528_v35 }
 0x11f   : > { %3556 = vmatprep.subr.bf16.mxu0 %v3878_v1 }
 0x120   : > { %3651 = vmatpush3.bf16.msra.mxu1 %v4484_v62 }
 0x121   : > { %3652 = vmatprep.subr.bf16.mxu1 %v3878_v1 }
 0x122   : > { %3557 = vmatpush3.bf16.msra.mxu0 %v4543_v19 }
 0x123   : > { %3558 = vmatprep.subr.bf16.mxu0 %v3878_v1 }
 0x124   : > { %3653 = vmatpush3.bf16.msra.mxu1 %v4499_v17 }
 0x125   : > { %3654 = vmatprep.subr.bf16.mxu1 %v3878_v1 }
 0x126   : > { %3559 = vmatpush3.bf16.msra.mxu0 %v4552_v46 }
 0x128   : > { %3655 = vmatpush3.bf16.msra.mxu1 %v4508_v7 }
 0x129   : > { %3660 = vmatprep.subr.bf16.mxu1 %v3878_v1  ;;  %3561 = vmatmul.mubr.msk.bf16.vlgmr.msra.gmra.mrb[4].mxu0 %vm720_vm3, %v2363_v33 }
 0x12b   : > { %3657 = vmatmul.mubr.msk.bf16.vlgmr.msra.gmra.mrb[4].mxu1 %vm720_vm3, %v2363_v33 }
 0x12c   : > { %3661 = vmatpush3.bf16.msra.mxu1 %v4517_v34  ;;  %3668 = vmatprep.mubr.msk.bf16.mxu1 %vm3879_vm0, %v3878_v1 }
 0x12d   : > { %3662 = vmatprep.subr.bf16.mxu1 %v3878_v1 }
 0x130   : > { %3663 = vmatpush3.bf16.msra.mxu1 %v4528_v35 }
 0x131   : > { %3664 = vmatprep.subr.bf16.mxu1 %v3878_v1 }
 0x134   : > { %3665 = vmatpush3.bf16.msra.mxu1 %v4543_v19 }
 0x135   : > { %3666 = vmatprep.subr.bf16.mxu1 %v3878_v1 }
 0x138   : > { %3667 = vmatpush3.bf16.msra.mxu1 %v4552_v46 }
 0x13b   : > { %3669 = vmatmul.mubr.msk.bf16.vlgmr.msra.gmra.mrb[4].mxu1 %vm720_vm3, %v2768_v53 }
 0x16c   : > { %v1513_v5 = vpop.f32.mrb[0].mxu0 }
 0x16d   : > { %v3346_v9 = vpop.f32.mrb[1].mxu0 }
 0x16e   : > { %v1516_v8 = vpop.f32.mrb[2].mxu0 }
 0x16f   : > { %v3347_v27 = vpop.f32.mrb[3].mxu0 }
 0x17e   : > { %v1956_v22 = vpop.f32.mrb[0].mxu1 }
 0x17f   : > { %v1965_v62 = vmax.f32 %v1513_v5, %v1956_v22  ;;  %v3454_v17 = vpop.f32.mrb[1].mxu1 }
 0x180   : > { %v1959_v7 = vpop.f32.mrb[2].mxu1 }
 0x181   : > { %v1966_v34 = vmax.f32 %v1516_v8, %v1959_v7  ;;  %v3455_v15 = vpop.f32.mrb[3].mxu1 }
 0x1fc   : > { %v2401_v35 = vpop.f32.mrb[4].mxu0 }
 0x1fd   : > { %v2410_v19 = vmax.f32 %v1965_v62, %v2401_v35  ;;  %v3562_v12 = vpop.f32.mrb[5].mxu0 }
 0x1fe   : > { %v2404_v1 = vpop.f32.mrb[6].mxu0 }
 0x1ff   : > { %v2411_v51 = vmax.f32 %v1966_v34, %v2404_v1  ;;  %v3563_v55 = vpop.f32.mrb[7].mxu0 }
 0x20e   : > { %v2806_v46 = vpop.f32.mrb[4].mxu1 }
 0x20f   : > { %v2815_v52 = vmax.f32 %v2410_v19, %v2806_v46  ;;  %v3670_v44 = vpop.f32.mrb[5].mxu1 }
 0x210   : > { %v2809_v2 = vpop.f32.mrb[6].mxu1 }
 0x211   : > { %v2824_v23 = vadd.f32 %v3056_v45, %v2815_v52  ;;  %v2816_v36 = vmax.f32 %v2411_v51, %v2809_v2  ;;  %v3671_v47 = vpop.f32.mrb[7].mxu1 }
 0x213   : > { %v2826_v60 = vmax.f32 %v2824_v23, 0.0  ;;  %v2825_v10 = vadd.f32 %v3056_v45, %v2816_v36 }
 0x215   : > { %v2830_v32 = vcombine.high %v2826_v60, %v2826_v60  ;;  %v2834_v41 = vpack.c.bf16 %v2826_v60, %v2826_v60  ;;  %v2827_v48 = vmax.f32 %v2825_v10, 0.0 }
 0x217   : > { %v2835_v49 = vpack.c.bf16 %v2830_v32, %v2830_v32  ;;  %2838 = vst [vmem:[%s170_s7] sm:$0x3] %v2834_v41  ;;  %v2831_v50 = vcombine.high %v2827_v48, %v2827_v48  ;;  %v2836_v61 = vpack.c.bf16 %v2827_v48, %v2827_v48 }
 0x219   : > { %2839 = vst [vmem:[%s170_s7 + $0x2] sm:$0x3] %v2835_v49  ;;  %v2837_v6 = vpack.c.bf16 %v2831_v50, %v2831_v50  ;;  %2840 = vst [vmem:[%s170_s7 + $0x4] sm:$0x3] %v2836_v61 }
 0x21b   : > { %2841 = vst [vmem:[%s170_s7 + $0x6] sm:$0x3] %v2837_v6 }
 0x21c PF: > { %s13_s12 = sadd.s32 1, %s3876_s12  }
 0x21d   : > { %p10_p4 = scmp.ge.s32.totalorder %s13_s12, 4  }
 0x21f   :  { %12 = sbr.rel (!%p10_p4) target bundleno = 1 (0x1), region = 73 }

// kernel: embedding_net_forward.7
= control target key start
LH: loop header
LB: loop body
LE: loop exit
PB: predicated region body
PF: predicated region fallthrough
CT: control target
= control target key end

     0   :  { %s3963_s12 = smov 0   ;;  %s5404_s0 = inlined_call_operand.vmem [shape: bf16[2,2,2,3,3,128], index: 0, kind: input, shape index: {}]   ;;  %s5405_s1 = inlined_call_operand.vmem [shape: bf16[9,128,256], index: 1, kind: input, shape index: {}]   ;;  %s5406_s2 = inlined_call_operand.vmem [shape: f32[1,256], index: 2, kind: input, shape index: {}]   ;;  %s5407_s3 = inlined_call_operand.vmem [shape: bf16[2,2,2,256], index: 3, kind: output, shape index: {}]  }
   0x1 LB: > { %s3224_s13 = sadd.s32 4294967295, %s3938_s12   ;;  %p3228_p0 = scmp.ge.s32.totalorder %s3938_s12, 1  ;;  %s3938_s12 = sphi %s3963_s12, %s13_s12  }
   0x2   : > { %p137_p1 = scmp.lt.s32.totalorder %s3938_s12, 3 }
   0x4   : > { %p138_p2 = pnand %p3228_p0, %p137_p1 }
   0x6   : > { %141 = sbr.rel (%p138_p2) target bundleno = 827 (0x33b), region = 32 }
   0xd   : > { %v3670_v0 = vld [vmem:[%s5405_s1 + $0x84] ss:$8 sps:$4 sm:$0xff]   ;;  %p160_p3 = scmp.lt.s32.totalorder %s3224_s13, 1  ;;  %v3672_v1 = vld [vmem:[%s5405_s1 + $0x80] ss:$8 sps:$4 sm:$0xff]   ;;  %v5408_v2 = vmov 0   ;;  %v190_v3 = vlaneseq }
   0xe   : > { %577 = vmatprep.mubr.bf16.mxu0 %v5408_v2  ;;  %1847 = vmatprep.mubr.bf16.mxu1 %v5408_v2  ;;  %v3673_v4 = vld [vmem:[%s5405_s1 + $0x94] ss:$8 sps:$4 sm:$0xff]   ;;  %v3941_v5 = vmov 1966171168   ;;  %v3675_v7 = vld [vmem:[%s5405_s1 + $0x90] ss:$8 sps:$4 sm:$0xff]  }
   0xf   : > { %545 = vmatprep.subr.bf16.mxu0 %v3670_v0  ;;  %1815 = vmatprep.subr.bf16.mxu1 %v3670_v0  ;;  %s5632_s13 = smov (!%p160_p3, %s3224_s13), 1  ;;  %v188_v6 = vunpack.c.l.s4 %v3941_v5  ;;  %v3676_v8 = vld [vmem:[%s5405_s1 + $0xa4] ss:$8 sps:$4 sm:$0xff]   ;;  %v3991_v10 = vshrl.u32 %v190_v3, 7  ;;  %v3678_v11 = vld [vmem:[%s5405_s1 + $0xa0] ss:$8 sps:$4 sm:$0xff]  }
  0x10   : > { %546 = vmatpush1.bf16.msra.mxu0 %v3672_v1  ;;  %1816 = vmatpush1.bf16.msra.mxu1 %v3672_v1  ;;  %s3658_s24 = smul.u32 24, %s5632_s13  ;;  %v3679_v12 = vld [vmem:[%s5405_s1 + $0xb4] ss:$8 sps:$4 sm:$0xff]   ;;  %vm203_vm0 = vsmask.f32 256  ;;  %s3230_s6 = sshll.u32 %s5632_s13, 2 }
  0x11   : > { %547 = vmatprep.subr.bf16.mxu0 %v3673_v4  ;;  %1817 = vmatprep.subr.bf16.mxu1 %v3673_v4  ;;  %v189_v9 = vunpack.c.0.s8 %v188_v6  ;;  %5518 = vst [vmem:[#allocation2_spill] sm:$0xff] %v3991_v10  ;;  %vm204_vm1 = vsmask.f32 1284  ;;  %v3681_v14 = vld [vmem:[%s5405_s1 + $0xb0] ss:$8 sps:$4 sm:$0xff]   ;;  %s168_s9 = scalar_lea.vmem %s5407_s3, %s3230_s6 }
  0x12   : > { %s4002_s4 = scalar_lea.vmem %s5404_s0, %s3658_s24  ;;  %vm206_vm2 = vsmask.f32 2312  ;;  %v3682_v15 = vld [vmem:[%s5405_s1 + $0xc4] ss:$8 sps:$4 sm:$0xff]   ;;  %vm205_vm3 = vmor %vm203_vm0, %vm204_vm1  ;;  %vm208_vm4 = vsmask.f32 3340 }
  0x13   : > { %v4005_v13 = vsub.s32 %v189_v9, %v3991_v10  ;;  %v4014_v16 = vld [vmem:[%s4002_s4] sm:$0x3]  ;;  %v4017_v17 = vld [vmem:[%s4002_s4 + $0x2] sm:$0x3]  ;;  %vm207_vm5 = vmor %vm205_vm3, %vm206_vm2  ;;  %vm210_vm6 = vsmask.f32 4368 }
  0x14   : > { %548 = vmatpush1.bf16.msra.mxu0 %v3675_v7  ;;  %1818 = vmatpush1.bf16.msra.mxu1 %v3675_v7  ;;  %v3684_v20 = vld [vmem:[%s5405_s1 + $0xc0] ss:$8 sps:$4 sm:$0xff]   ;;  %v3685_v21 = vld [vmem:[%s5405_s1 + $0xd4] ss:$8 sps:$4 sm:$0xff]   ;;  %vm209_vm7 = vmor %vm207_vm5, %vm208_vm4  ;;  %vm212_vm9 = vsmask.f32 5396  ;;  %v586_v57 = vcombine.low %v4014_v16, %v4017_v17 }
  0x15   : > { %549 = vmatprep.subr.bf16.mxu0 %v3676_v8  ;;  %1819 = vmatprep.subr.bf16.mxu1 %v3676_v8  ;;  %v193_v18 = vrot.slane %v4014_v16, %v4005_v13  ;;  %v201_v19 = vrot.slane %v4017_v17, %v4005_v13  ;;  %vm211_vm8 = vmor %vm209_vm7, %vm210_vm6  ;;  %vm214_vm10 = vsmask.f32 6424  ;;  %vm216_vm12 = vsmask.f32 7452  ;;  %v3687_v25 = vld [vmem:[%s5405_s1 + $0xd0] ss:$8 sps:$4 sm:$0xff]  }
  0x16   : > { %vm213_vm11 = vmor %vm211_vm8, %vm212_vm9  ;;  %v4033_v29 = vld [vmem:[%s4002_s4 + $0x6] sm:$0x3]  ;;  %v4036_v30 = vld [vmem:[%s4002_s4 + $0x8] sm:$0x3]  ;;  %v593_v60 = vrot.slane %v586_v57, %v4005_v13 }
  0x17   : > { %v194_v22 = vcombine.high %v193_v18, %v193_v18  ;;  %v202_v23 = vcombine.high %v201_v19, %v201_v19  ;;  %v219_v24 = vshrl.u32 %v193_v18, 16  ;;  %vm215_vm13 = vmor %vm213_vm11, %vm214_vm10  ;;  %v228_v27 = vshrl.u32 %v201_v19, 16  ;;  %v3688_v32 = vld [vmem:[%s5405_s1 + $0xe4] ss:$8 sps:$4 sm:$0xff]   ;;  %v3690_v37 = vld [vmem:[%s5405_s1 + $0xe0] ss:$8 sps:$4 sm:$0xff]  }
  0x18   : > { %550 = vmatpush1.bf16.msra.mxu0 %v3678_v11  ;;  %1820 = vmatpush1.bf16.msra.mxu1 %v3678_v11  ;;  %vm4038_vm14 = vmor %vm215_vm13, %vm216_vm12  ;;  %v449_v35 = vcombine.low %v4033_v29, %v4036_v30  ;;  %v3691_v38 = vld [vmem:[%s5405_s1 + $0xf4] ss:$8 sps:$4 sm:$0xff]   ;;  %v3693_v41 = vld [vmem:[%s5405_s1 + $0xf0] ss:$8 sps:$4 sm:$0xff]   ;;  %v600_v63 = vrot.slane %v593_v60, %v4005_v13  ;;  %v244_v5 = vrot.slane %v4033_v29, %v4005_v13 }
  0x19   : > { %551 = vmatprep.subr.bf16.mxu0 %v3679_v12  ;;  %1821 = vmatprep.subr.bf16.mxu1 %v3679_v12  ;;  %v224_v26 = vshll.u32 %v194_v22, 16  ;;  %v233_v28 = vshll.u32 %v202_v23, 16  ;;  %v3694_v42 = vld [vmem:[%s5405_s1 + $0x4] ss:$8 sps:$4 sm:$0xff]   ;;  %v3696_v45 = vld [vmem:[%s5405_s1] ss:$8 sps:$4 sm:$0xff]   ;;  %v252_v6 = vrot.slane %v4036_v30, %v4005_v13 }
  0x1a   : > { %v456_v39 = vrot.slane %v449_v35, %v4005_v13  ;;  %v3697_v46 = vld [vmem:[%s5405_s1 + $0x14] ss:$8 sps:$4 sm:$0xff]   ;;  %v3699_v47 = vld [vmem:[%s5405_s1 + $0x10] ss:$8 sps:$4 sm:$0xff]   ;;  %v3700_v48 = vld [vmem:[%s5405_s1 + $0x24] ss:$8 sps:$4 sm:$0xff]   ;;  %v245_v9 = vcombine.high %v244_v5, %v244_v5 }
  0x1b   : > { %v226_v33 = vsel %vm4038_vm14, %v219_v24, %v224_v26  ;;  %v4049_v34 = vsel %vm4038_vm14, %v228_v27, %v233_v28  ;;  %v3702_v49 = vld [vmem:[%s5405_s1 + $0x20] ss:$8 sps:$4 sm:$0xff]   ;;  %v3703_v50 = vld [vmem:[%s5405_s1 + $0x34] ss:$8 sps:$4 sm:$0xff]   ;;  %v3705_v51 = vld [vmem:[%s5405_s1 + $0x30] ss:$8 sps:$4 sm:$0xff]   ;;  %v253_v11 = vcombine.high %v252_v6, %v252_v6 }
  0x1c   : > { %552 = vmatpush1.bf16.msra.mxu0 %v3681_v14  ;;  %1822 = vmatpush1.bf16.msra.mxu1 %v3681_v14  ;;  %v740_v36 = vcombine.low %v226_v33, %v4049_v34  ;;  %v4069_v43 = vrot.slane %v456_v39, %v4005_v13  ;;  %v3706_v52 = vld [vmem:[%s5405_s1 + $0x44] ss:$8 sps:$4 sm:$0xff]   ;;  %v3708_v53 = vld [vmem:[%s5405_s1 + $0x40] ss:$8 sps:$4 sm:$0xff]   ;;  %v3709_v54 = vld [vmem:[%s5405_s1 + $0x54] ss:$8 sps:$4 sm:$0xff]  }
  0x1d   : > { %553 = vmatprep.subr.bf16.mxu0 %v3682_v15  ;;  %1823 = vmatprep.subr.bf16.mxu1 %v3682_v15  ;;  %v3711_v55 = vld [vmem:[%s5405_s1 + $0x50] ss:$8 sps:$4 sm:$0xff]   ;;  %v3712_v56 = vld [vmem:[%s5405_s1 + $0x64] ss:$8 sps:$4 sm:$0xff]   ;;  %v3714_v58 = vld [vmem:[%s5405_s1 + $0x60] ss:$8 sps:$4 sm:$0xff]  }
  0x1e   : > { %v747_v40 = vrot.slane %v740_v36, %v4005_v13  ;;  %v3715_v59 = vld [vmem:[%s5405_s1 + $0x74] ss:$8 sps:$4 sm:$0xff]   ;;  %v3717_v61 = vld [vmem:[%s5405_s1 + $0x70] ss:$8 sps:$4 sm:$0xff]   ;;  %v3718_v62 = vld [vmem:[%s5405_s1 + $0x104] ss:$8 sps:$4 sm:$0xff]  }
  0x1f   : > { %v3720_v0 = vld [vmem:[%s5405_s1 + $0x100] ss:$8 sps:$4 sm:$0xff]   ;;  %v3721_v1 = vld [vmem:[%s5405_s1 + $0x114] ss:$8 sps:$4 sm:$0xff]   ;;  %v3723_v3 = vld [vmem:[%s5405_s1 + $0x110] ss:$8 sps:$4 sm:$0xff]  }
  0x20   : > { %554 = vmatpush1.bf16.msra.mxu0 %v3684_v20  ;;  %1824 = vmatpush1.bf16.msra.mxu1 %v3684_v20  ;;  %v4072_v44 = vrot.slane %v747_v40, %v4005_v13  ;;  %v3724_v4 = vld [vmem:[%s5405_s1 + $0x124] ss:$8 sps:$4 sm:$0xff]   ;;  %v3726_v7 = vld [vmem:[%s5405_s1 + $0x120] ss:$8 sps:$4 sm:$0xff]   ;;  %v3727_v8 = vld [vmem:[%s5405_s1 + $0x134] ss:$8 sps:$4 sm:$0xff]  }
  0x21   : > { %555 = vmatprep.subr.bf16.mxu0 %v3685_v21  ;;  %1825 = vmatprep.subr.bf16.mxu1 %v3685_v21  ;;  %v3729_v12 = vld [vmem:[%s5405_s1 + $0x130] ss:$8 sps:$4 sm:$0xff]   ;;  %v3730_v14 = vld [vmem:[%s5405_s1 + $0x144] ss:$8 sps:$4 sm:$0xff]   ;;  %v255_v15 = vshrl.u32 %v244_v5, 16  ;;  %v264_v16 = vshrl.u32 %v252_v6, 16 }
  0x22   : > { %v260_v17 = vshll.u32 %v245_v9, 16  ;;  %v269_v18 = vshll.u32 %v253_v11, 16  ;;  %v3732_v19 = vld [vmem:[%s5405_s1 + $0x140] ss:$8 sps:$4 sm:$0xff]   ;;  %v3733_v20 = vld [vmem:[%s5405_s1 + $0x154] ss:$8 sps:$4 sm:$0xff]  }
  0x23   : > { %v4170_v21 = vld [vmem:[%s5405_s1 + $0x150] ss:$8 sps:$4 sm:$0xff]   ;;  %v4181_v24 = vld [vmem:[%s5405_s1 + $0x164] ss:$8 sps:$4 sm:$0xff]   ;;  %v4189_v26 = vld [vmem:[%s5405_s1 + $0x160] ss:$8 sps:$4 sm:$0xff]  }
  0x24   : > { %556 = vmatpush1.bf16.msra.mxu0 %v3687_v25  ;;  %1826 = vmatpush1.bf16.msra.mxu1 %v3687_v25  ;;  %v262_v22 = vsel %vm4038_vm14, %v255_v15, %v260_v17  ;;  %v4176_v23 = vsel %vm4038_vm14, %v264_v16, %v269_v18  ;;  %v4196_v27 = vld [vmem:[%s5405_s1 + $0x174] ss:$8 sps:$4 sm:$0xff]   ;;  %v4204_v29 = vld [vmem:[%s5405_s1 + $0x170] ss:$8 sps:$4 sm:$0xff]   ;;  %v4219_v35 = vld [vmem:[%s5405_s1 + $0x180] ss:$8 sps:$4 sm:$0xff]  }
  0x25   : > { %557 = vmatprep.subr.bf16.mxu0 %v3688_v32  ;;  %1827 = vmatprep.subr.bf16.mxu1 %v3688_v32  ;;  %v1897_v25 = vcombine.low %v262_v22, %v4176_v23  ;;  %v4211_v32 = vld [vmem:[%s5405_s1 + $0x184] ss:$8 sps:$4 sm:$0xff]   ;;  %v4226_v36 = vld [vmem:[%s5405_s1 + $0x194] ss:$8 sps:$4 sm:$0xff]   ;;  %v4250_v39 = vld [vmem:[%s5405_s1 + $0x1a0] ss:$8 sps:$4 sm:$0xff]  }
  0x26   : > { %v4257_v40 = vld [vmem:[%s5405_s1 + $0x1b4] ss:$8 sps:$4 sm:$0xff]   ;;  %v4332_v57 = vld [vmem:[%s5405_s1 + $0x1f0] ss:$8 sps:$4 sm:$0xff]   ;;  %v4407_v9 = vld [vmem:[%s5405_s1 + $0x244] ss:$8 sps:$4 sm:$0xff]  }
  0x27   : > { %v1904_v28 = vrot.slane %v1897_v25, %v4005_v13  ;;  %v4393_v5 = vld [vmem:[%s5405_s1 + $0x234] ss:$8 sps:$4 sm:$0xff]   ;;  %v4428_v18 = vld [vmem:[%s5405_s1 + $0x250] ss:$8 sps:$4 sm:$0xff]   ;;  %v4441_v22 = vld [vmem:[%s5405_s1 + $0x264] ss:$8 sps:$4 sm:$0xff]  }
  0x28   : > { %558 = vmatpush1.bf16.msra.mxu0 %v3690_v37  ;;  %1828 = vmatpush1.bf16.msra.mxu1 %v3690_v37  ;;  %v4234_v37 = vld [vmem:[%s5405_s1 + $0x190] ss:$8 sps:$4 sm:$0xff]   ;;  %v4421_v17 = vld [vmem:[%s5405_s1 + $0x254] ss:$8 sps:$4 sm:$0xff]  }
  0x29   : > { %559 = vmatprep.subr.bf16.mxu0 %v3691_v38  ;;  %1829 = vmatprep.subr.bf16.mxu1 %v3691_v38  ;;  %v1911_v33 = vrot.slane %v1904_v28, %v4005_v13  ;;  %v4241_v38 = vld [vmem:[%s5405_s1 + $0x1a4] ss:$8 sps:$4 sm:$0xff]   ;;  %v4449_v28 = vld [vmem:[%s5405_s1 + $0x260] ss:$8 sps:$4 sm:$0xff]  }
  0x2c   : > { %560 = vmatpush1.bf16.msra.mxu0 %v3693_v41  ;;  %1830 = vmatpush1.bf16.msra.mxu1 %v3693_v41  ;;  %v4264_v41 = vld [vmem:[%s5405_s1 + $0x1b0] ss:$8 sps:$4 sm:$0xff]  }
  0x2d   : > { %682 = vmatprep.subr.bf16.mxu0 %v3694_v42  ;;  %1856 = vmatprep.subr.bf16.mxu1 %v3694_v42  ;;  %v4271_v42 = vld [vmem:[%s5405_s1 + $0x1c4] ss:$8 sps:$4 sm:$0xff]  }
  0x2f   : > { %578 = vmatmul.mubr.bf16.vlgmr.msra.gmra.mrb[0].mxu0 %v4069_v43  ;;  %1848 = vmatmul.mubr.bf16.vlgmr.msra.gmra.mrb[0].mxu1 %v4072_v44 }
  0x30   : > { %683 = vmatpush1.bf16.msra.mxu0 %v3696_v45  ;;  %1857 = vmatpush1.bf16.msra.mxu1 %v3696_v45  ;;  %v4290_v45 = vld [vmem:[%s5405_s1 + $0x1d0] ss:$8 sps:$4 sm:$0xff]  }
  0x31   : > { %684 = vmatprep.subr.bf16.mxu0 %v3697_v46  ;;  %1858 = vmatprep.subr.bf16.mxu1 %v3697_v46  ;;  %v3234_v46 = vld [vmem:[%s4002_s4 + $0xc] sm:$0x3] }
  0x32   : > { %714 = vmatprep.mubr.bf16.mxu0 %v5408_v2  ;;  %1888 = vmatprep.mubr.bf16.mxu1 %v5408_v2 }
  0x34   : > { %685 = vmatpush1.bf16.msra.mxu0 %v3699_v47  ;;  %1859 = vmatpush1.bf16.msra.mxu1 %v3699_v47  ;;  %v3235_v47 = vld [vmem:[%s4002_s4 + $0xe] sm:$0x3] }
  0x35   : > { %686 = vmatprep.subr.bf16.mxu0 %v3700_v48  ;;  %1860 = vmatprep.subr.bf16.mxu1 %v3700_v48  ;;  %v4297_v48 = vld [vmem:[%s4002_s4 + $0x12] sm:$0x3] }
  0x38   : > { %687 = vmatpush1.bf16.msra.mxu0 %v3702_v49  ;;  %1861 = vmatpush1.bf16.msra.mxu1 %v3702_v49  ;;  %v4300_v49 = vld [vmem:[%s4002_s4 + $0x14] sm:$0x3] }
  0x39   : > { %688 = vmatprep.subr.bf16.mxu0 %v3703_v50  ;;  %1862 = vmatprep.subr.bf16.mxu1 %v3703_v50  ;;  %v4307_v50 = vld [vmem:[%s5405_s1 + $0x1e4] ss:$8 sps:$4 sm:$0xff]  }
  0x3c   : > { %689 = vmatpush1.bf16.msra.mxu0 %v3705_v51  ;;  %1863 = vmatpush1.bf16.msra.mxu1 %v3705_v51  ;;  %v896_v51 = vcombine.low %v3234_v46, %v3235_v47 }
  0x3d   : > { %690 = vmatprep.subr.bf16.mxu0 %v3706_v52  ;;  %1864 = vmatprep.subr.bf16.mxu1 %v3706_v52  ;;  %v1052_v52 = vcombine.low %v4297_v48, %v4300_v49 }
  0x40   : > { %691 = vmatpush1.bf16.msra.mxu0 %v3708_v53  ;;  %1865 = vmatpush1.bf16.msra.mxu1 %v3708_v53  ;;  %v4316_v53 = vld [vmem:[%s5405_s1 + $0x1e0] ss:$8 sps:$4 sm:$0xff]  }
  0x41   : > { %692 = vmatprep.subr.bf16.mxu0 %v3709_v54  ;;  %1866 = vmatprep.subr.bf16.mxu1 %v3709_v54  ;;  %v4323_v54 = vld [vmem:[%s5405_s1 + $0x1f4] ss:$8 sps:$4 sm:$0xff]  }
  0x44   : > { %693 = vmatpush1.bf16.msra.mxu0 %v3711_v55  ;;  %1867 = vmatpush1.bf16.msra.mxu1 %v3711_v55  ;;  %v903_v55 = vrot.slane %v896_v51, %v4005_v13  ;;  %v4471_v51 = vld [vmem:[%s5405_s1 + $0x284] ss:$8 sps:$4 sm:$0xff]  }
  0x45   : > { %694 = vmatprep.subr.bf16.mxu0 %v3712_v56  ;;  %1868 = vmatprep.subr.bf16.mxu1 %v3712_v56  ;;  %v1059_v56 = vrot.slane %v1052_v52, %v4005_v13 }
  0x47   : > { %v4345_v60 = vrot.slane %v1059_v56, %v4005_v13  ;;  %v4488_v56 = vld [vmem:[%s5405_s1 + $0x294] ss:$8 sps:$4 sm:$0xff]  }
  0x48   : > { %695 = vmatpush1.bf16.msra.mxu0 %v3714_v58  ;;  %1869 = vmatpush1.bf16.msra.mxu1 %v3714_v58  ;;  %v4339_v58 = vld [vmem:[%s5405_s1 + $0x204] ss:$8 sps:$4 sm:$0xff]  }
  0x49   : > { %696 = vmatprep.subr.bf16.mxu0 %v3715_v59  ;;  %1870 = vmatprep.subr.bf16.mxu1 %v3715_v59  ;;  %v4342_v59 = vrot.slane %v903_v55, %v4005_v13  ;;  %v4481_v55 = vld [vmem:[%s5405_s1 + $0x280] ss:$8 sps:$4 sm:$0xff]  }
  0x4c   : > { %697 = vmatpush1.bf16.msra.mxu0 %v3717_v61  ;;  %1871 = vmatpush1.bf16.msra.mxu1 %v3717_v61  ;;  %v4352_v61 = vld [vmem:[%s5405_s1 + $0x200] ss:$8 sps:$4 sm:$0xff]  }
  0x4d   : > { %836 = vmatprep.subr.bf16.mxu0 %v3718_v62  ;;  %1913 = vmatprep.subr.bf16.mxu1 %v3718_v62  ;;  %v4359_v62 = vld [vmem:[%s5405_s1 + $0x214] ss:$8 sps:$4 sm:$0xff]  }
  0x4f   : > { %715 = vmatmul.mubr.bf16.vlgmr.msra.gmra.mrb[0].mxu0 %v600_v63  ;;  %1889 = vmatmul.mubr.bf16.vlgmr.msra.gmra.mrb[0].mxu1 %v4069_v43  ;;  %v4278_v43 = vld [vmem:[%s5405_s1 + $0x1c0] ss:$8 sps:$4 sm:$0xff]   ;;  %v4368_v63 = vld [vmem:[%s5405_s1 + $0x210] ss:$8 sps:$4 sm:$0xff]  }
  0x50   : > { %837 = vmatpush1.bf16.msra.mxu0 %v3720_v0  ;;  %1914 = vmatpush1.bf16.msra.mxu1 %v3720_v0  ;;  %v4375_v0 = vld [vmem:[%s5405_s1 + $0x224] ss:$8 sps:$4 sm:$0xff]  }
  0x51   : > { %838 = vmatprep.subr.bf16.mxu0 %v3721_v1  ;;  %1915 = vmatprep.subr.bf16.mxu1 %v3721_v1  ;;  %v280_v1 = vrot.slane %v3234_v46, %v4005_v13 }
  0x52   : > { %868 = vmatprep.mubr.bf16.mxu0 %v5408_v2  ;;  %1945 = vmatprep.mubr.bf16.mxu1 %v5408_v2 }
  0x53   : > { %v281_v6 = vcombine.high %v280_v1, %v280_v1  ;;  %v291_v11 = vshrl.u32 %v280_v1, 16  ;;  %v4497_v1 = vld [vmem:[%s5405_s1 + $0x290] ss:$8 sps:$4 sm:$0xff]  }
  0x54   : > { %839 = vmatpush1.bf16.msra.mxu0 %v3723_v3  ;;  %1916 = vmatpush1.bf16.msra.mxu1 %v3723_v3  ;;  %v288_v3 = vrot.slane %v3235_v47, %v4005_v13  ;;  %v4464_v47 = vld [vmem:[%s5405_s1 + $0x270] ss:$8 sps:$4 sm:$0xff]  }
  0x55   : > { %840 = vmatprep.subr.bf16.mxu0 %v3724_v4  ;;  %1917 = vmatprep.subr.bf16.mxu1 %v3724_v4  ;;  %v4386_v4 = vld [vmem:[%s5405_s1 + $0x220] ss:$8 sps:$4 sm:$0xff]  }
  0x56   : > { %v300_v15 = vshrl.u32 %v288_v3, 16 }
  0x58   : > { %841 = vmatpush1.bf16.msra.mxu0 %v3726_v7  ;;  %1918 = vmatpush1.bf16.msra.mxu1 %v3726_v7  ;;  %v4400_v7 = vld [vmem:[%s5405_s1 + $0x230] ss:$8 sps:$4 sm:$0xff]  }
  0x59   : > { %842 = vmatprep.subr.bf16.mxu0 %v3727_v8  ;;  %1919 = vmatprep.subr.bf16.mxu1 %v3727_v8  ;;  %v289_v8 = vcombine.high %v288_v3, %v288_v3  ;;  %v4504_v3 = vld [vmem:[%s5405_s1 + $0x2a4] ss:$8 sps:$4 sm:$0xff]  }
  0x5b   : > { %v305_v16 = vshll.u32 %v289_v8, 16  ;;  %v324_v8 = vrot.slane %v4300_v49, %v4005_v13  ;;  %v4531_v49 = vld [vmem:[%s5405_s1 + $0x2b0] ss:$8 sps:$4 sm:$0xff]  }
  0x5c   : > { %843 = vmatpush1.bf16.msra.mxu0 %v3729_v12  ;;  %1920 = vmatpush1.bf16.msra.mxu1 %v3729_v12  ;;  %v296_v12 = vshll.u32 %v281_v6, 16  ;;  %v316_v6 = vrot.slane %v4297_v48, %v4005_v13  ;;  %v4524_v48 = vld [vmem:[%s5405_s1 + $0x2b4] ss:$8 sps:$4 sm:$0xff]   ;;  %5522 = vst [vmem:[#allocation4_spill] sm:$0xff] %v4531_v49 }
  0x5d   : > { %844 = vmatprep.subr.bf16.mxu0 %v3730_v14  ;;  %1921 = vmatprep.subr.bf16.mxu1 %v3730_v14  ;;  %v4414_v14 = vld [vmem:[%s5405_s1 + $0x240] ss:$8 sps:$4 sm:$0xff]  }
  0x60   : > { %845 = vmatpush1.bf16.msra.mxu0 %v3732_v19  ;;  %1922 = vmatpush1.bf16.msra.mxu1 %v3732_v19  ;;  %v298_v19 = vsel %vm4038_vm14, %v291_v11, %v296_v12  ;;  %v4517_v11 = vld [vmem:[%s5405_s1 + $0x2a0] ss:$8 sps:$4 sm:$0xff]   ;;  %v317_v12 = vcombine.high %v316_v6, %v316_v6 }
  0x61   : > { %846 = vmatprep.subr.bf16.mxu0 %v3733_v20  ;;  %1923 = vmatprep.subr.bf16.mxu1 %v3733_v20  ;;  %v4434_v20 = vsel %vm4038_vm14, %v300_v15, %v305_v16  ;;  %v325_v15 = vcombine.high %v324_v8, %v324_v8  ;;  %v4538_v16 = vld [vmem:[%s5405_s1 + $0x2c4] ss:$8 sps:$4 sm:$0xff]  }
  0x62   : > { %5521 = vst [vmem:[#allocation3_spill] sm:$0xff] %v4434_v20  ;;  %v1208_v25 = vcombine.low %v298_v19, %v4434_v20  ;;  %5523 = vst [vmem:[#allocation5_spill] sm:$0xff] %v4538_v16  ;;  %v327_v19 = vshrl.u32 %v316_v6, 16  ;;  %v4552_v6 = vld [vmem:[%s5405_s1 + $0x2d4] ss:$8 sps:$4 sm:$0xff]  }
  0x63   : > { %v341_v10 = vshll.u32 %v325_v15, 16  ;;  %5525 = vst [vmem:[#allocation7_spill] sm:$0xff] %v4552_v6  ;;  %v4572_v20 = vld [vmem:[%s5405_s1 + $0x2e4] ss:$8 sps:$4 sm:$0xff]  }
  0x64   : > { %847 = vmatpush1.bf16.msra.mxu0 %v4170_v21  ;;  %1924 = vmatpush1.bf16.msra.mxu1 %v4170_v21  ;;  %v1215_v46 = vrot.slane %v1208_v25, %v4005_v13  ;;  %v332_v25 = vshll.u32 %v317_v12, 16  ;;  %v4559_v12 = vld [vmem:[%s5405_s1 + $0x2d0] ss:$8 sps:$4 sm:$0xff]   ;;  %5528 = vst [vmem:[#allocation10_spill] sm:$0xff] %v4572_v20 }
  0x65   : > { %848 = vmatprep.subr.bf16.mxu0 %v4181_v24  ;;  %1925 = vmatprep.subr.bf16.mxu1 %v4181_v24  ;;  %5526 = vst [vmem:[#allocation8_spill] sm:$0xff] %v4559_v12 }
  0x66   : > { %v4474_v52 = vrot.slane %v1215_v46, %v4005_v13  ;;  %v4545_v46 = vld [vmem:[%s5405_s1 + $0x2c0] ss:$8 sps:$4 sm:$0xff]  }
  0x67   : > { %5524 = vst [vmem:[#allocation6_spill] sm:$0xff] %v4545_v46 }
  0x68   : > { %849 = vmatpush1.bf16.msra.mxu0 %v4189_v26  ;;  %1926 = vmatpush1.bf16.msra.mxu1 %v4189_v26 }
  0x69   : > { %850 = vmatprep.subr.bf16.mxu0 %v4196_v27  ;;  %1927 = vmatprep.subr.bf16.mxu1 %v4196_v27 }
  0x6c   : > { %851 = vmatpush1.bf16.msra.mxu0 %v4204_v29  ;;  %1928 = vmatpush1.bf16.msra.mxu1 %v4204_v29 }
  0x6d   : > { %992 = vmatprep.subr.bf16.mxu0 %v4211_v32  ;;  %1956 = vmatprep.subr.bf16.mxu1 %v4211_v32 }
  0x6f   : > { %869 = vmatmul.mubr.bf16.vlgmr.msra.gmra.mrb[0].mxu0 %v4072_v44  ;;  %1946 = vmatmul.mubr.bf16.vlgmr.msra.gmra.mrb[0].mxu1 %v1911_v33  ;;  %v4285_v44 = vld [vmem:[%s5405_s1 + $0x1d4] ss:$8 sps:$4 sm:$0xff]  }
  0x70   : > { %993 = vmatpush1.bf16.msra.mxu0 %v4219_v35  ;;  %1957 = vmatpush1.bf16.msra.mxu1 %v4219_v35  ;;  %v4456_v33 = vld [vmem:[%s5405_s1 + $0x274] ss:$8 sps:$4 sm:$0xff]  }
  0x71   : > { %994 = vmatprep.subr.bf16.mxu0 %v4226_v36  ;;  %1958 = vmatprep.subr.bf16.mxu1 %v4226_v36 }
  0x72   : > { %1024 = vmatprep.mubr.bf16.mxu0 %v5408_v2  ;;  %1988 = vmatprep.mubr.bf16.mxu1 %v5408_v2 }
  0x74   : > { %995 = vmatpush1.bf16.msra.mxu0 %v4234_v37  ;;  %1959 = vmatpush1.bf16.msra.mxu1 %v4234_v37 }
  0x75   : > { %996 = vmatprep.subr.bf16.mxu0 %v4241_v38  ;;  %1960 = vmatprep.subr.bf16.mxu1 %v4241_v38 }
  0x78   : > { %997 = vmatpush1.bf16.msra.mxu0 %v4250_v39  ;;  %1961 = vmatpush1.bf16.msra.mxu1 %v4250_v39 }
  0x79   : > { %998 = vmatprep.subr.bf16.mxu0 %v4257_v40  ;;  %1962 = vmatprep.subr.bf16.mxu1 %v4257_v40 }
  0x7c   : > { %999 = vmatpush1.bf16.msra.mxu0 %v4264_v41  ;;  %1963 = vmatpush1.bf16.msra.mxu1 %v4264_v41 }
  0x7d   : > { %1000 = vmatprep.subr.bf16.mxu0 %v4271_v42  ;;  %1964 = vmatprep.subr.bf16.mxu1 %v4271_v42 }
  0x80   : > { %1001 = vmatpush1.bf16.msra.mxu0 %v4278_v43  ;;  %1965 = vmatpush1.bf16.msra.mxu1 %v4278_v43 }
  0x81   : > { %1002 = vmatprep.subr.bf16.mxu0 %v4285_v44  ;;  %1966 = vmatprep.subr.bf16.mxu1 %v4285_v44 }
  0x84   : > { %1003 = vmatpush1.bf16.msra.mxu0 %v4290_v45  ;;  %1967 = vmatpush1.bf16.msra.mxu1 %v4290_v45 }
  0x85   : > { %1004 = vmatprep.subr.bf16.mxu0 %v4307_v50  ;;  %1968 = vmatprep.subr.bf16.mxu1 %v4307_v50 }
  0x88   : > { %1005 = vmatpush1.bf16.msra.mxu0 %v4316_v53  ;;  %1969 = vmatpush1.bf16.msra.mxu1 %v4316_v53 }
  0x89   : > { %1006 = vmatprep.subr.bf16.mxu0 %v4323_v54  ;;  %1970 = vmatprep.subr.bf16.mxu1 %v4323_v54 }
  0x8c   : > { %1007 = vmatpush1.bf16.msra.mxu0 %v4332_v57  ;;  %1971 = vmatpush1.bf16.msra.mxu1 %v4332_v57 }
  0x8d   : > { %1148 = vmatprep.subr.bf16.mxu0 %v4339_v58  ;;  %1999 = vmatprep.subr.bf16.mxu1 %v4339_v58 }
  0x8f   : > { %1025 = vmatmul.mubr.bf16.vlgmr.msra.gmra.mrb[0].mxu0 %v4342_v59  ;;  %1989 = vmatmul.mubr.bf16.vlgmr.msra.gmra.mrb[0].mxu1 %v4345_v60 }
  0x90   : > { %1149 = vmatpush1.bf16.msra.mxu0 %v4352_v61  ;;  %2000 = vmatpush1.bf16.msra.mxu1 %v4352_v61 }
  0x91   : > { %1150 = vmatprep.subr.bf16.mxu0 %v4359_v62  ;;  %2001 = vmatprep.subr.bf16.mxu1 %v4359_v62 }
  0x92   : > { %1180 = vmatprep.mubr.bf16.mxu0 %v5408_v2  ;;  %2031 = vmatprep.mubr.bf16.mxu1 %v5408_v2 }
  0x94   : > { %1151 = vmatpush1.bf16.msra.mxu0 %v4368_v63  ;;  %2002 = vmatpush1.bf16.msra.mxu1 %v4368_v63 }
  0x95   : > { %1152 = vmatprep.subr.bf16.mxu0 %v4375_v0  ;;  %2003 = vmatprep.subr.bf16.mxu1 %v4375_v0 }
  0x98   : > { %1153 = vmatpush1.bf16.msra.mxu0 %v4386_v4  ;;  %2004 = vmatpush1.bf16.msra.mxu1 %v4386_v4 }
  0x99   : > { %1154 = vmatprep.subr.bf16.mxu0 %v4393_v5  ;;  %2005 = vmatprep.subr.bf16.mxu1 %v4393_v5 }
  0x9c   : > { %1155 = vmatpush1.bf16.msra.mxu0 %v4400_v7  ;;  %2006 = vmatpush1.bf16.msra.mxu1 %v4400_v7 }
  0x9d   : > { %1156 = vmatprep.subr.bf16.mxu0 %v4407_v9  ;;  %2007 = vmatprep.subr.bf16.mxu1 %v4407_v9 }
  0xa0   : > { %1157 = vmatpush1.bf16.msra.mxu0 %v4414_v14  ;;  %2008 = vmatpush1.bf16.msra.mxu1 %v4414_v14 }
  0xa1   : > { %1158 = vmatprep.subr.bf16.mxu0 %v4421_v17  ;;  %2009 = vmatprep.subr.bf16.mxu1 %v4421_v17 }
  0xa4   : > { %1159 = vmatpush1.bf16.msra.mxu0 %v4428_v18  ;;  %2010 = vmatpush1.bf16.msra.mxu1 %v4428_v18 }
  0xa5   : > { %1160 = vmatprep.subr.bf16.mxu0 %v4441_v22  ;;  %2011 = vmatprep.subr.bf16.mxu1 %v4441_v22 }
  0xa8   : > { %1161 = vmatpush1.bf16.msra.mxu0 %v4449_v28  ;;  %2012 = vmatpush1.bf16.msra.mxu1 %v4449_v28 }
  0xa9   : > { %1162 = vmatprep.subr.bf16.mxu0 %v4456_v33  ;;  %2013 = vmatprep.subr.bf16.mxu1 %v4456_v33 }
  0xac   : > { %1163 = vmatpush1.bf16.msra.mxu0 %v4464_v47  ;;  %2014 = vmatpush1.bf16.msra.mxu1 %v4464_v47 }
  0xad   : > { %1304 = vmatprep.subr.bf16.mxu0 %v4471_v51  ;;  %2058 = vmatprep.subr.bf16.mxu1 %v4471_v51 }
  0xaf   : > { %1181 = vmatmul.mubr.bf16.vlgmr.msra.gmra.mrb[0].mxu0 %v4345_v60  ;;  %2032 = vmatmul.mubr.bf16.vlgmr.msra.gmra.mrb[0].mxu1 %v4474_v52 }
  0xb0   : > { %1305 = vmatpush1.bf16.msra.mxu0 %v4481_v55  ;;  %2059 = vmatpush1.bf16.msra.mxu1 %v4481_v55 }
  0xb1   : > { %1306 = vmatprep.subr.bf16.mxu0 %v4488_v56  ;;  %2060 = vmatprep.subr.bf16.mxu1 %v4488_v56 }
  0xb2   : > { %1336 = vmatprep.mubr.bf16.mxu0 %v5408_v2  ;;  %2090 = vmatprep.mubr.bf16.mxu1 %v5408_v2  ;;  %v336_v2 = vshrl.u32 %v324_v8, 16  ;;  %v334_v8 = vsel %vm4038_vm14, %v327_v19, %v332_v25  ;;  %v4595_v25 = vld [vmem:[%s5405_s1 + $0x2f0] ss:$8 sps:$4 sm:$0xff]  }
  0xb3   : > { %5531 = vst [vmem:[#allocation13_spill] sm:$0xff] %v4595_v25 }
  0xb4   : > { %1307 = vmatpush1.bf16.msra.mxu0 %v4497_v1  ;;  %2061 = vmatpush1.bf16.msra.mxu1 %v4497_v1  ;;  %v4565_v15 = vsel %vm4038_vm14, %v336_v2, %v341_v10  ;;  %v4580_v2 = vld [vmem:[%s5405_s1 + $0x2e0] ss:$8 sps:$4 sm:$0xff]   ;;  %v4587_v10 = vld [vmem:[%s5405_s1 + $0x2f4] ss:$8 sps:$4 sm:$0xff]  }
  0xb5   : > { %1308 = vmatprep.subr.bf16.mxu0 %v4504_v3  ;;  %2062 = vmatprep.subr.bf16.mxu1 %v4504_v3  ;;  %5527 = vst [vmem:[#allocation9_spill] sm:$0xff] %v4565_v15  ;;  %5529 = vst [vmem:[#allocation11_spill] sm:$0xff] %v4580_v2 }
  0xb6   : > { %5530 = vst [vmem:[#allocation12_spill] sm:$0xff] %v4587_v10 }
  0xb8   : > { %1309 = vmatpush1.bf16.msra.mxu0 %v4517_v11  ;;  %2063 = vmatpush1.bf16.msra.mxu1 %v4517_v11 }
  0xb9   : > { %1310 = vmatprep.subr.bf16.mxu0 %v4524_v48  ;;  %2064 = vmatprep.subr.bf16.mxu1 %v4524_v48 }
  0xbc   : > { %1311 = vmatpush1.bf16.msra.mxu0 %v4531_v49  ;;  %2065 = vmatpush1.bf16.msra.mxu1 %v4531_v49 }
  0xbd   : > { %1312 = vmatprep.subr.bf16.mxu0 %v4538_v16  ;;  %2066 = vmatprep.subr.bf16.mxu1 %v4538_v16  ;;  %v4707_v16 = vld [vmem:[%s5405_s1 + $0x360] ss:$8 sps:$4 sm:$0xff]  }
  0xbe   : > { %5546 = vst [vmem:[#allocation27_spill] sm:$0xff] %v4707_v16 }
  0xc0   : > { %1313 = vmatpush1.bf16.msra.mxu0 %v4545_v46  ;;  %2067 = vmatpush1.bf16.msra.mxu1 %v4545_v46  ;;  %v2042_v46 = vcombine.low %v334_v8, %v4565_v15  ;;  %v4602_v8 = vld [vmem:[%s5405_s1 + $0x304] ss:$8 sps:$4 sm:$0xff]   ;;  %v4612_v15 = vld [vmem:[%s5405_s1 + $0x300] ss:$8 sps:$4 sm:$0xff]  }
  0xc1   : > { %1314 = vmatprep.subr.bf16.mxu0 %v4552_v6  ;;  %2068 = vmatprep.subr.bf16.mxu1 %v4552_v6  ;;  %5532 = vst [vmem:[#allocation14_spill] sm:$0xff] %v4602_v8  ;;  %5533 = vst [vmem:[#allocation15_spill] sm:$0xff] %v4612_v15 }
  0xc2   : > { %v2049_v19 = vrot.slane %v2042_v46, %v4005_v13 }
  0xc4   : > { %1315 = vmatpush1.bf16.msra.mxu0 %v4559_v12  ;;  %2069 = vmatpush1.bf16.msra.mxu1 %v4559_v12  ;;  %v4605_v46 = vrot.slane %v2049_v19, %v4005_v13  ;;  %v4628_v19 = vld [vmem:[%s5405_s1 + $0x310] ss:$8 sps:$4 sm:$0xff]   ;;  %v3886_v12 = vld [vmem:[%s4002_s4 + $0x2] sm:$0x3] }
  0xc5   : > { %1316 = vmatprep.subr.bf16.mxu0 %v4572_v20  ;;  %2070 = vmatprep.subr.bf16.mxu1 %v4572_v20  ;;  %5535 = vst [vmem:[#allocation17_spill] sm:$0xff] %v4628_v19  ;;  %v4690_v20 = vld [vmem:[%s4002_s4 + $0xa] sm:$0x3] }
  0xc8   : > { %1317 = vmatpush1.bf16.msra.mxu0 %v4580_v2  ;;  %2071 = vmatpush1.bf16.msra.mxu1 %v4580_v2  ;;  %v172_v2 = vld [vmem:[%s4002_s4 + $0x4] sm:$0x3] }
  0xc9   : > { %1318 = vmatprep.subr.bf16.mxu0 %v4587_v10  ;;  %2072 = vmatprep.subr.bf16.mxu1 %v4587_v10  ;;  %v4619_v10 = vld [vmem:[%s5405_s1 + $0x314] ss:$8 sps:$4 sm:$0xff]   ;;  %v1364_v6 = vcombine.low %v3886_v12, %v172_v2 }
  0xca   : > { %5534 = vst [vmem:[#allocation16_spill] sm:$0xff] %v4619_v10  ;;  %v4714_v12 = vld [vmem:[%s5405_s1 + $0x374] ss:$8 sps:$4 sm:$0xff]  }
  0xcb   : > { %5547 = vst [vmem:[#allocation28_spill] sm:$0xff] %v4714_v12 }
  0xcc   : > { %1319 = vmatpush1.bf16.msra.mxu0 %v4595_v25  ;;  %2073 = vmatpush1.bf16.msra.mxu1 %v4595_v25  ;;  %v5537_v25 = vmov 0  }
  0xcd   : > { %1460 = vmatprep.subr.bf16.mxu0 %v4602_v8  ;;  %2101 = vmatprep.subr.bf16.mxu1 %v4602_v8  ;;  %v4635_v8 = vld [vmem:[%s5405_s1 + $0x324] ss:$8 sps:$4 sm:$0xff]  }
  0xce   : > { %5536 = vst [vmem:[#allocation18_spill] sm:$0xff] %v4635_v8 }
  0xcf   : > { %1337 = vmatmul.mubr.bf16.vlgmr.msra.gmra.mrb[0].mxu0 %v4474_v52  ;;  %2091 = vmatmul.mubr.bf16.vlgmr.msra.gmra.mrb[0].mxu1 %v4605_v46 }
  0xd0   : > { %1461 = vmatpush1.bf16.msra.mxu0 %v4612_v15  ;;  %2102 = vmatpush1.bf16.msra.mxu1 %v4612_v15  ;;  %v4644_v15 = vld [vmem:[%s5405_s1 + $0x320] ss:$8 sps:$4 sm:$0xff]  }
  0xd1   : > { %1462 = vmatprep.subr.bf16.mxu0 %v4619_v10  ;;  %2103 = vmatprep.subr.bf16.mxu1 %v4619_v10  ;;  %5538 = vst [vmem:[#allocation19_spill] sm:$0xff] %v4644_v15  ;;  %v4651_v10 = vld [vmem:[%s5405_s1 + $0x334] ss:$8 sps:$4 sm:$0xff]  }
  0xd2   : > { %1492 = vmatprep.mubr.bf16.mxu0 %v5537_v25  ;;  %2133 = vmatprep.mubr.bf16.mxu1 %v5537_v25  ;;  %5539 = vst [vmem:[#allocation20_spill] sm:$0xff] %v4651_v10 }
  0xd4   : > { %1463 = vmatpush1.bf16.msra.mxu0 %v4628_v19  ;;  %2104 = vmatpush1.bf16.msra.mxu1 %v4628_v19  ;;  %v4658_v19 = vld [vmem:[%s5405_s1 + $0x330] ss:$8 sps:$4 sm:$0xff]  }
  0xd5   : > { %1464 = vmatprep.subr.bf16.mxu0 %v4635_v8  ;;  %2105 = vmatprep.subr.bf16.mxu1 %v4635_v8  ;;  %5540 = vst [vmem:[#allocation21_spill] sm:$0xff] %v4658_v19  ;;  %v4665_v8 = vld [vmem:[%s5405_s1 + $0x344] ss:$8 sps:$4 sm:$0xff]  }
  0xd6   : > { %5541 = vst [vmem:[#allocation22_spill] sm:$0xff] %v4665_v8 }
  0xd8   : > { %1465 = vmatpush1.bf16.msra.mxu0 %v4644_v15  ;;  %2106 = vmatpush1.bf16.msra.mxu1 %v4644_v15  ;;  %v4672_v15 = vld [vmem:[%s5405_s1 + $0x340] ss:$8 sps:$4 sm:$0xff]  }
  0xd9   : > { %1466 = vmatprep.subr.bf16.mxu0 %v4651_v10  ;;  %2107 = vmatprep.subr.bf16.mxu1 %v4651_v10  ;;  %5542 = vst [vmem:[#allocation23_spill] sm:$0xff] %v4672_v15  ;;  %v4679_v10 = vld [vmem:[%s5405_s1 + $0x354] ss:$8 sps:$4 sm:$0xff]  }
  0xda   : > { %5543 = vst [vmem:[#allocation24_spill] sm:$0xff] %v4679_v10 }
  0xdc   : > { %1467 = vmatpush1.bf16.msra.mxu0 %v4658_v19  ;;  %2108 = vmatpush1.bf16.msra.mxu1 %v4658_v19  ;;  %v4687_v19 = vld [vmem:[%s5405_s1 + $0x350] ss:$8 sps:$4 sm:$0xff]  }
  0xdd   : > { %1468 = vmatprep.subr.bf16.mxu0 %v4665_v8  ;;  %2109 = vmatprep.subr.bf16.mxu1 %v4665_v8  ;;  %5544 = vst [vmem:[#allocation25_spill] sm:$0xff] %v4687_v19  ;;  %v4697_v8 = vld [vmem:[%s5405_s1 + $0x364] ss:$8 sps:$4 sm:$0xff]  }
  0xde   : > { %5545 = vst [vmem:[#allocation26_spill] sm:$0xff] %v4697_v8 }
  0xe0   : > { %1469 = vmatpush1.bf16.msra.mxu0 %v4672_v15  ;;  %2110 = vmatpush1.bf16.msra.mxu1 %v4672_v15  ;;  %v1520_v15 = vcombine.low %v4036_v30, %v4690_v20  ;;  %v1371_v30 = vrot.slane %v1364_v6, %v4005_v13 }
  0xe1   : > { %1470 = vmatprep.subr.bf16.mxu0 %v4679_v10  ;;  %2111 = vmatprep.subr.bf16.mxu1 %v4679_v10 }
  0xe2   : > { %v1527_v10 = vrot.slane %v1520_v15, %v4005_v13  ;;  %v4733_v6 = vrot.slane %v1371_v30, %v4005_v13  ;;  %v4750_v30 = vld [vmem:[%s5405_s1 + $0x394] ss:$8 sps:$4 sm:$0xff]  }
  0xe3   : > { %5551 = vst [vmem:[#allocation32_spill] sm:$0xff] %v4750_v30 }
  0xe4   : > { %1471 = vmatpush1.bf16.msra.mxu0 %v4687_v19  ;;  %2112 = vmatpush1.bf16.msra.mxu1 %v4687_v19  ;;  %v4723_v19 = vld [vmem:[%s5405_s1 + $0x370] ss:$8 sps:$4 sm:$0xff]   ;;  %v4736_v15 = vrot.slane %v1527_v10, %v4005_v13 }
  0xe5   : > { %1472 = vmatprep.subr.bf16.mxu0 %v4697_v8  ;;  %2113 = vmatprep.subr.bf16.mxu1 %v4697_v8  ;;  %5548 = vst [vmem:[#allocation29_spill] sm:$0xff] %v4723_v19  ;;  %v4730_v8 = vld [vmem:[%s5405_s1 + $0x384] ss:$8 sps:$4 sm:$0xff]   ;;  %v4759_v10 = vld [vmem:[%s5405_s1 + $0x390] ss:$8 sps:$4 sm:$0xff]  }
  0xe6   : > { %5549 = vst [vmem:[#allocation30_spill] sm:$0xff] %v4730_v8  ;;  %5552 = vst [vmem:[#allocation33_spill] sm:$0xff] %v4759_v10 }
  0xe8   : > { %1473 = vmatpush1.bf16.msra.mxu0 %v4707_v16  ;;  %2114 = vmatpush1.bf16.msra.mxu1 %v4707_v16  ;;  %v4743_v16 = vld [vmem:[%s5405_s1 + $0x380] ss:$8 sps:$4 sm:$0xff]  }
  0xe9   : > { %1474 = vmatprep.subr.bf16.mxu0 %v4714_v12  ;;  %2115 = vmatprep.subr.bf16.mxu1 %v4714_v12  ;;  %5550 = vst [vmem:[#allocation31_spill] sm:$0xff] %v4743_v16 }
  0xec   : > { %1475 = vmatpush1.bf16.msra.mxu0 %v4723_v19  ;;  %2116 = vmatpush1.bf16.msra.mxu1 %v4723_v19  ;;  %v4776_v19 = vld [vmem:[%s5405_s1 + $0x3a0] ss:$8 sps:$4 sm:$0xff]  }
  0xed   : > { %1616 = vmatprep.subr.bf16.mxu0 %v4730_v8  ;;  %2144 = vmatprep.subr.bf16.mxu1 %v4730_v8  ;;  %v4766_v8 = vld [vmem:[%s5405_s1 + $0x3a4] ss:$8 sps:$4 sm:$0xff]   ;;  %5554 = vst [vmem:[#allocation35_spill] sm:$0xff] %v4776_v19 }
  0xee   : > { %5553 = vst [vmem:[#allocation34_spill] sm:$0xff] %v4766_v8 }
  0xef   : > { %1493 = vmatmul.mubr.bf16.vlgmr.msra.gmra.mrb[0].mxu0 %v4733_v6  ;;  %2134 = vmatmul.mubr.bf16.vlgmr.msra.gmra.mrb[0].mxu1 %v4736_v15 }
  0xf0   : > { %1617 = vmatpush1.bf16.msra.mxu0 %v4743_v16  ;;  %2145 = vmatpush1.bf16.msra.mxu1 %v4743_v16  ;;  %v351_v16 = vrot.slane %v172_v2, %v4005_v13  ;;  %v4790_v2 = vld [vmem:[%s5405_s1 + $0x3b0] ss:$8 sps:$4 sm:$0xff]  }
  0xf1   : > { %1618 = vmatprep.subr.bf16.mxu0 %v4750_v30  ;;  %2146 = vmatprep.subr.bf16.mxu1 %v4750_v30  ;;  %v4783_v30 = vld [vmem:[%s5405_s1 + $0x3b4] ss:$8 sps:$4 sm:$0xff]  }
  0xf2   : > { %1648 = vmatprep.mubr.bf16.mxu0 %v5537_v25  ;;  %2176 = vmatprep.mubr.bf16.mxu1 %v5537_v25  ;;  %5555 = vst [vmem:[#allocation36_spill] sm:$0xff] %v4783_v30  ;;  %v352_v12 = vcombine.high %v351_v16, %v351_v16 }
  0xf4   : > { %1619 = vmatpush1.bf16.msra.mxu0 %v4759_v10  ;;  %2147 = vmatpush1.bf16.msra.mxu1 %v4759_v10  ;;  %v354_v10 = vshrl.u32 %v351_v16, 16  ;;  %v359_v49 = vshll.u32 %v352_v12, 16  ;;  %v4820_v12 = vld [vmem:[%s5405_s1 + $0x3d0] ss:$8 sps:$4 sm:$0xff]  }
  0xf5   : > { %1620 = vmatprep.subr.bf16.mxu0 %v4766_v8  ;;  %2148 = vmatprep.subr.bf16.mxu1 %v4766_v8  ;;  %v4797_v8 = vld [vmem:[%s5405_s1 + $0x3c4] ss:$8 sps:$4 sm:$0xff]   ;;  %5559 = vst [vmem:[#allocation40_spill] sm:$0xff] %v4820_v12 }
  0xf6   : > { %5556 = vst [vmem:[#allocation37_spill] sm:$0xff] %v4797_v8  ;;  %v361_v16 = vsel %vm4038_vm14, %v354_v10, %v359_v49  ;;  %v4835_v10 = vld [vmem:[%s5405_s1 + $0x3e0] ss:$8 sps:$4 sm:$0xff]  }
  0xf7   : > { %v1676_v49 = vcombine.low %v4049_v34, %v361_v16  ;;  %5561 = vst [vmem:[#allocation42_spill] sm:$0xff] %v4835_v10  ;;  %v4850_v16 = vld [vmem:[%s5405_s1 + $0x3f0] ss:$8 sps:$4 sm:$0xff]  }
  0xf8   : > { %1621 = vmatpush1.bf16.msra.mxu0 %v4776_v19  ;;  %2149 = vmatpush1.bf16.msra.mxu1 %v4776_v19  ;;  %v4804_v19 = vld [vmem:[%s5405_s1 + $0x3c0] ss:$8 sps:$4 sm:$0xff]   ;;  %5563 = vst [vmem:[#allocation44_spill] sm:$0xff] %v4850_v16 }
  0xf9   : > { %1622 = vmatprep.subr.bf16.mxu0 %v4783_v30  ;;  %2150 = vmatprep.subr.bf16.mxu1 %v4783_v30  ;;  %5557 = vst [vmem:[#allocation38_spill] sm:$0xff] %v4804_v19  ;;  %v4811_v30 = vld [vmem:[%s5405_s1 + $0x3d4] ss:$8 sps:$4 sm:$0xff]   ;;  %v1683_v34 = vrot.slane %v1676_v49, %v4005_v13 }
  0xfa   : > { %5558 = vst [vmem:[#allocation39_spill] sm:$0xff] %v4811_v30 }
  0xfb   : > { %v4860_v49 = vrot.slane %v1683_v34, %v4005_v13  ;;  %v4883_v34 = vld [vmem:[%s5405_s1 + $0x410] ss:$8 sps:$4 sm:$0xff]  }
  0xfc   : > { %1623 = vmatpush1.bf16.msra.mxu0 %v4790_v2  ;;  %2151 = vmatpush1.bf16.msra.mxu1 %v4790_v2  ;;  %5567 = vst [vmem:[#allocation48_spill] sm:$0xff] %v4883_v34 }
  0xfd   : > { %1624 = vmatprep.subr.bf16.mxu0 %v4797_v8  ;;  %2152 = vmatprep.subr.bf16.mxu1 %v4797_v8  ;;  %v4827_v8 = vld [vmem:[%s5405_s1 + $0x3e4] ss:$8 sps:$4 sm:$0xff]  }
  0xfe   : > { %5560 = vst [vmem:[#allocation41_spill] sm:$0xff] %v4827_v8 }
 0x100   : > { %1625 = vmatpush1.bf16.msra.mxu0 %v4804_v19  ;;  %2153 = vmatpush1.bf16.msra.mxu1 %v4804_v19 }
 0x101   : > { %1626 = vmatprep.subr.bf16.mxu0 %v4811_v30  ;;  %2154 = vmatprep.subr.bf16.mxu1 %v4811_v30  ;;  %v4842_v30 = vld [vmem:[%s5405_s1 + $0x3f4] ss:$8 sps:$4 sm:$0xff]  }
 0x102   : > { %5562 = vst [vmem:[#allocation43_spill] sm:$0xff] %v4842_v30 }
 0x104   : > { %1627 = vmatpush1.bf16.msra.mxu0 %v4820_v12  ;;  %2155 = vmatpush1.bf16.msra.mxu1 %v4820_v12 }
 0x105   : > { %1628 = vmatprep.subr.bf16.mxu0 %v4827_v8  ;;  %2156 = vmatprep.subr.bf16.mxu1 %v4827_v8  ;;  %v4857_v8 = vld [vmem:[%s5405_s1 + $0x404] ss:$8 sps:$4 sm:$0xff]  }
 0x106   : > { %5564 = vst [vmem:[#allocation45_spill] sm:$0xff] %v4857_v8 }
 0x108   : > { %1629 = vmatpush1.bf16.msra.mxu0 %v4835_v10  ;;  %2157 = vmatpush1.bf16.msra.mxu1 %v4835_v10  ;;  %v4867_v10 = vld [vmem:[%s5405_s1 + $0x400] ss:$8 sps:$4 sm:$0xff]  }
 0x109   : > { %1630 = vmatprep.subr.bf16.mxu0 %v4842_v30  ;;  %2158 = vmatprep.subr.bf16.mxu1 %v4842_v30  ;;  %5565 = vst [vmem:[#allocation46_spill] sm:$0xff] %v4867_v10  ;;  %v4874_v30 = vld [vmem:[%s5405_s1 + $0x414] ss:$8 sps:$4 sm:$0xff]  }
 0x10a   : > { %5566 = vst [vmem:[#allocation47_spill] sm:$0xff] %v4874_v30 }
 0x10c   : > { %1631 = vmatpush1.bf16.msra.mxu0 %v4850_v16  ;;  %2159 = vmatpush1.bf16.msra.mxu1 %v4850_v16  ;;  %v4908_v16 = vld [vmem:[%s5405_s1 + $0x434] ss:$8 sps:$4 sm:$0xff]  }
 0x10d   : > { %1772 = vmatprep.subr.bf16.mxu0 %v4857_v8  ;;  %2203 = vmatprep.subr.bf16.mxu1 %v4857_v8  ;;  %v4890_v8 = vld [vmem:[%s5405_s1 + $0x424] ss:$8 sps:$4 sm:$0xff]   ;;  %5570 = vst [vmem:[#allocation51_spill] sm:$0xff] %v4908_v16 }
 0x10e   : > { %5568 = vst [vmem:[#allocation49_spill] sm:$0xff] %v4890_v8 }
 0x10f   : > { %1649 = vmatmul.mubr.bf16.vlgmr.msra.gmra.mrb[0].mxu0 %v4736_v15  ;;  %2177 = vmatmul.mubr.bf16.vlgmr.msra.gmra.mrb[0].mxu1 %v4860_v49 }
 0x110   : > { %1773 = vmatpush1.bf16.msra.mxu0 %v4867_v10  ;;  %2204 = vmatpush1.bf16.msra.mxu1 %v4867_v10  ;;  %v369_v10 = vrot.slane %v4690_v20, %v4005_v13  ;;  %v4915_v20 = vld [vmem:[%s5405_s1 + $0x430] ss:$8 sps:$4 sm:$0xff]  }
 0x111   : > { %1774 = vmatprep.subr.bf16.mxu0 %v4874_v30  ;;  %2205 = vmatprep.subr.bf16.mxu1 %v4874_v30  ;;  %v4901_v30 = vld [vmem:[%s5405_s1 + $0x420] ss:$8 sps:$4 sm:$0xff]   ;;  %5571 = vst [vmem:[#allocation52_spill] sm:$0xff] %v4915_v20 }
 0x112   : > { %1804 = vmatprep.mubr.bf16.mxu0 %v5537_v25  ;;  %2235 = vmatprep.mubr.bf16.mxu1 %v5537_v25  ;;  %5569 = vst [vmem:[#allocation50_spill] sm:$0xff] %v4901_v30  ;;  %v370_v12 = vcombine.high %v369_v10, %v369_v10 }
 0x114   : > { %1775 = vmatpush1.bf16.msra.mxu0 %v4883_v34  ;;  %2206 = vmatpush1.bf16.msra.mxu1 %v4883_v34  ;;  %v372_v34 = vshrl.u32 %v369_v10, 16  ;;  %v377_v19 = vshll.u32 %v370_v12, 16  ;;  %v4943_v12 = vld [vmem:[%s5405_s1 + $0x450] ss:$8 sps:$4 sm:$0xff]  }
 0x115   : > { %1776 = vmatprep.subr.bf16.mxu0 %v4890_v8  ;;  %2207 = vmatprep.subr.bf16.mxu1 %v4890_v8  ;;  %v4922_v8 = vld [vmem:[%s5405_s1 + $0x444] ss:$8 sps:$4 sm:$0xff]  }
 0x116   : > { %5572 = vst [vmem:[#allocation53_spill] sm:$0xff] %v4922_v8  ;;  %v379_v10 = vsel %vm4038_vm14, %v372_v34, %v377_v19  ;;  %v4967_v19 = vld [vmem:[%s5405_s1 + $0x474] ss:$8 sps:$4 sm:$0xff]   ;;  %v4975_v34 = vld [vmem:[%s5405_s1 + $0x470] ss:$8 sps:$4 sm:$0xff]  }
 0x117   : > { %5574 = vst [vmem:[#allocation55_spill] sm:$0xff] %v4967_v19  ;;  %5575 = vst [vmem:[#allocation56_spill] sm:$0xff] %v4975_v34 }
 0x118   : > { %1777 = vmatpush1.bf16.msra.mxu0 %v4901_v30  ;;  %2208 = vmatpush1.bf16.msra.mxu1 %v4901_v30  ;;  %v4929_v30 = vld [vmem:[%s5405_s1 + $0x440] ss:$8 sps:$4 sm:$0xff]  }
 0x119   : > { %1778 = vmatprep.subr.bf16.mxu0 %v4908_v16  ;;  %2209 = vmatprep.subr.bf16.mxu1 %v4908_v16  ;;  %5573 = vst [vmem:[#allocation54_spill] sm:$0xff] %v4929_v30  ;;  %v4936_v16 = vld [vmem:[%s5405_s1 + $0x454] ss:$8 sps:$4 sm:$0xff]  }
 0x11c   : > { %1779 = vmatpush1.bf16.msra.mxu0 %v4915_v20  ;;  %2210 = vmatpush1.bf16.msra.mxu1 %v4915_v20  ;;  %v2187_v20 = vcombine.low %v4176_v23, %v379_v10 }
 0x11d   : > { %1780 = vmatprep.subr.bf16.mxu0 %v4922_v8  ;;  %2211 = vmatprep.subr.bf16.mxu1 %v4922_v8  ;;  %v4952_v8 = vld [vmem:[%s5405_s1 + $0x464] ss:$8 sps:$4 sm:$0xff]  }
 0x11e   : > { %v2194_v23 = vrot.slane %v2187_v20, %v4005_v13  ;;  %v3887_v20 = vld [vmem:[%s5405_s1 + $0x84] ss:$8 sps:$4 sm:$0xff]  }
 0x11f   : > { %v5628_v31 = vld [vmem:[#allocation55_spill] sm:$0xff] }
 0x120   : > { %1781 = vmatpush1.bf16.msra.mxu0 %v4929_v30  ;;  %2212 = vmatpush1.bf16.msra.mxu1 %v4929_v30  ;;  %v4960_v30 = vld [vmem:[%s5405_s1 + $0x460] ss:$8 sps:$4 sm:$0xff]   ;;  %v4980_v10 = vrot.slane %v2194_v23, %v4005_v13  ;;  %v3889_v23 = vld [vmem:[%s5405_s1 + $0x94] ss:$8 sps:$4 sm:$0xff]  }
 0x121   : > { %1782 = vmatprep.subr.bf16.mxu0 %v4936_v16  ;;  %2213 = vmatprep.subr.bf16.mxu1 %v4936_v16 }
 0x124   : > { %1783 = vmatpush1.bf16.msra.mxu0 %v4943_v12  ;;  %2214 = vmatpush1.bf16.msra.mxu1 %v4943_v12 }
 0x125   : > { %1784 = vmatprep.subr.bf16.mxu0 %v4952_v8  ;;  %2215 = vmatprep.subr.bf16.mxu1 %v4952_v8 }
 0x128   : > { %1785 = vmatpush1.bf16.msra.mxu0 %v4960_v30  ;;  %2216 = vmatpush1.bf16.msra.mxu1 %v4960_v30 }
 0x129   : > { %1786 = vmatprep.subr.bf16.mxu0 %v4967_v19  ;;  %2217 = vmatprep.subr.bf16.mxu1 %v4967_v19  ;;  %v3888_v19 = vld [vmem:[%s5405_s1 + $0x80] ss:$8 sps:$4 sm:$0xff]  }
 0x12c   : > { %1787 = vmatpush1.bf16.msra.mxu0 %v4975_v34  ;;  %2218 = vmatpush1.bf16.msra.mxu1 %v4975_v34  ;;  %v3893_v34 = vld [vmem:[%s5405_s1 + $0xb4] ss:$8 sps:$4 sm:$0xff]  }
 0x12d   : > { %2248 = vmatprep.subr.bf16.mxu0 %v3887_v20  ;;  %2681 = vmatprep.subr.bf16.mxu1 %v3887_v20  ;;  %v3890_v20 = vld [vmem:[%s5405_s1 + $0x90] ss:$8 sps:$4 sm:$0xff]  }
 0x12f   : > { %1805 = vmatmul.mubr.bf16.vlgmr.msra.gmra.mrb[0].mxu0 %v4860_v49  ;;  %2236 = vmatmul.mubr.bf16.vlgmr.msra.gmra.mrb[0].mxu1 %v4980_v10 }
 0x130   : > { %2249 = vmatpush1.bf16.msra.mxu0 %v3888_v19  ;;  %2682 = vmatpush1.bf16.msra.mxu1 %v3888_v19  ;;  %v3891_v19 = vld [vmem:[%s5405_s1 + $0xa4] ss:$8 sps:$4 sm:$0xff]  }
 0x131   : > { %2250 = vmatprep.subr.bf16.mxu0 %v3889_v23  ;;  %2683 = vmatprep.subr.bf16.mxu1 %v3889_v23  ;;  %v3892_v23 = vld [vmem:[%s5405_s1 + $0xa0] ss:$8 sps:$4 sm:$0xff]  }
 0x132   : > { %2280 = vmatprep.mubr.bf16.mxu0 %v5537_v25  ;;  %2713 = vmatprep.mubr.bf16.mxu1 %v5537_v25 }
 0x134   : > { %2251 = vmatpush1.bf16.msra.mxu0 %v3890_v20  ;;  %2684 = vmatpush1.bf16.msra.mxu1 %v3890_v20  ;;  %v3894_v20 = vld [vmem:[%s5405_s1 + $0xb0] ss:$8 sps:$4 sm:$0xff]  }
 0x135   : > { %2252 = vmatprep.subr.bf16.mxu0 %v3891_v19  ;;  %2685 = vmatprep.subr.bf16.mxu1 %v3891_v19  ;;  %v3895_v19 = vld [vmem:[%s5405_s1 + $0xc4] ss:$8 sps:$4 sm:$0xff]  }
 0x138   : > { %2253 = vmatpush1.bf16.msra.mxu0 %v3892_v23  ;;  %2686 = vmatpush1.bf16.msra.mxu1 %v3892_v23  ;;  %v3896_v23 = vld [vmem:[%s5405_s1 + $0xc0] ss:$8 sps:$4 sm:$0xff]  }
 0x139   : > { %2254 = vmatprep.subr.bf16.mxu0 %v3893_v34  ;;  %2687 = vmatprep.subr.bf16.mxu1 %v3893_v34  ;;  %v3897_v34 = vld [vmem:[%s5405_s1 + $0xd4] ss:$8 sps:$4 sm:$0xff]  }
 0x13c   : > { %2255 = vmatpush1.bf16.msra.mxu0 %v3894_v20  ;;  %2688 = vmatpush1.bf16.msra.mxu1 %v3894_v20  ;;  %v3898_v20 = vld [vmem:[%s5405_s1 + $0xd0] ss:$8 sps:$4 sm:$0xff]  }
 0x13d   : > { %2256 = vmatprep.subr.bf16.mxu0 %v3895_v19  ;;  %2689 = vmatprep.subr.bf16.mxu1 %v3895_v19  ;;  %v3899_v19 = vld [vmem:[%s5405_s1 + $0xe4] ss:$8 sps:$4 sm:$0xff]  }
 0x140   : > { %2257 = vmatpush1.bf16.msra.mxu0 %v3896_v23  ;;  %2690 = vmatpush1.bf16.msra.mxu1 %v3896_v23  ;;  %v3900_v23 = vld [vmem:[%s5405_s1 + $0xe0] ss:$8 sps:$4 sm:$0xff]  }
 0x141   : > { %2258 = vmatprep.subr.bf16.mxu0 %v3897_v34  ;;  %2691 = vmatprep.subr.bf16.mxu1 %v3897_v34  ;;  %v3901_v34 = vld [vmem:[%s5405_s1 + $0xf4] ss:$8 sps:$4 sm:$0xff]  }
 0x144   : > { %2259 = vmatpush1.bf16.msra.mxu0 %v3898_v20  ;;  %2692 = vmatpush1.bf16.msra.mxu1 %v3898_v20  ;;  %v3902_v20 = vld [vmem:[%s5405_s1 + $0xf0] ss:$8 sps:$4 sm:$0xff]  }
 0x145   : > { %2260 = vmatprep.subr.bf16.mxu0 %v3899_v19  ;;  %2693 = vmatprep.subr.bf16.mxu1 %v3899_v19  ;;  %v3903_v19 = vld [vmem:[%s5405_s1 + $0x4] ss:$8 sps:$4 sm:$0xff]  }
 0x148   : > { %2261 = vmatpush1.bf16.msra.mxu0 %v3900_v23  ;;  %2694 = vmatpush1.bf16.msra.mxu1 %v3900_v23  ;;  %v3904_v23 = vld [vmem:[%s5405_s1] ss:$8 sps:$4 sm:$0xff]  }
 0x149   : > { %2262 = vmatprep.subr.bf16.mxu0 %v3901_v34  ;;  %2695 = vmatprep.subr.bf16.mxu1 %v3901_v34  ;;  %v3905_v34 = vld [vmem:[%s5405_s1 + $0x14] ss:$8 sps:$4 sm:$0xff]  }
 0x14c   : > { %2263 = vmatpush1.bf16.msra.mxu0 %v3902_v20  ;;  %2696 = vmatpush1.bf16.msra.mxu1 %v3902_v20  ;;  %v3906_v20 = vld [vmem:[%s5405_s1 + $0x10] ss:$8 sps:$4 sm:$0xff]  }
 0x14d   : > { %2289 = vmatprep.subr.bf16.mxu0 %v3903_v19  ;;  %2722 = vmatprep.subr.bf16.mxu1 %v3903_v19  ;;  %v3907_v19 = vld [vmem:[%s5405_s1 + $0x24] ss:$8 sps:$4 sm:$0xff]  }
 0x14f   : > { %2281 = vmatmul.mubr.bf16.vlgmr.msra.gmra.mrb[4].mxu0 %v4345_v60  ;;  %2714 = vmatmul.mubr.bf16.vlgmr.msra.gmra.mrb[4].mxu1 %v4474_v52 }
 0x150   : > { %2290 = vmatpush1.bf16.msra.mxu0 %v3904_v23  ;;  %2723 = vmatpush1.bf16.msra.mxu1 %v3904_v23  ;;  %v3908_v23 = vld [vmem:[%s5405_s1 + $0x20] ss:$8 sps:$4 sm:$0xff]  }
 0x151   : > { %2291 = vmatprep.subr.bf16.mxu0 %v3905_v34  ;;  %2724 = vmatprep.subr.bf16.mxu1 %v3905_v34  ;;  %v3909_v34 = vld [vmem:[%s5405_s1 + $0x34] ss:$8 sps:$4 sm:$0xff]  }
 0x152   : > { %2321 = vmatprep.mubr.bf16.mxu0 %v5537_v25  ;;  %2754 = vmatprep.mubr.bf16.mxu1 %v5537_v25 }
 0x154   : > { %2292 = vmatpush1.bf16.msra.mxu0 %v3906_v20  ;;  %2725 = vmatpush1.bf16.msra.mxu1 %v3906_v20  ;;  %v3910_v20 = vld [vmem:[%s5405_s1 + $0x30] ss:$8 sps:$4 sm:$0xff]  }
 0x155   : > { %2293 = vmatprep.subr.bf16.mxu0 %v3907_v19  ;;  %2726 = vmatprep.subr.bf16.mxu1 %v3907_v19  ;;  %v3911_v19 = vld [vmem:[%s5405_s1 + $0x44] ss:$8 sps:$4 sm:$0xff]  }
 0x158   : > { %2294 = vmatpush1.bf16.msra.mxu0 %v3908_v23  ;;  %2727 = vmatpush1.bf16.msra.mxu1 %v3908_v23  ;;  %v3912_v23 = vld [vmem:[%s5405_s1 + $0x40] ss:$8 sps:$4 sm:$0xff]  }
 0x159   : > { %2295 = vmatprep.subr.bf16.mxu0 %v3909_v34  ;;  %2728 = vmatprep.subr.bf16.mxu1 %v3909_v34  ;;  %v3913_v34 = vld [vmem:[%s5405_s1 + $0x54] ss:$8 sps:$4 sm:$0xff]  }
 0x15c   : > { %2296 = vmatpush1.bf16.msra.mxu0 %v3910_v20  ;;  %2729 = vmatpush1.bf16.msra.mxu1 %v3910_v20  ;;  %v3914_v20 = vld [vmem:[%s5405_s1 + $0x50] ss:$8 sps:$4 sm:$0xff]  }
 0x15d   : > { %2297 = vmatprep.subr.bf16.mxu0 %v3911_v19  ;;  %2730 = vmatprep.subr.bf16.mxu1 %v3911_v19  ;;  %v3915_v19 = vld [vmem:[%s5405_s1 + $0x64] ss:$8 sps:$4 sm:$0xff]  }
 0x160   : > { %2298 = vmatpush1.bf16.msra.mxu0 %v3912_v23  ;;  %2731 = vmatpush1.bf16.msra.mxu1 %v3912_v23  ;;  %v3916_v23 = vld [vmem:[%s5405_s1 + $0x60] ss:$8 sps:$4 sm:$0xff]  }
 0x161   : > { %2299 = vmatprep.subr.bf16.mxu0 %v3913_v34  ;;  %2732 = vmatprep.subr.bf16.mxu1 %v3913_v34  ;;  %v3917_v34 = vld [vmem:[%s5405_s1 + $0x74] ss:$8 sps:$4 sm:$0xff]  }
 0x164   : > { %2300 = vmatpush1.bf16.msra.mxu0 %v3914_v20  ;;  %2733 = vmatpush1.bf16.msra.mxu1 %v3914_v20  ;;  %v3918_v20 = vld [vmem:[%s5405_s1 + $0x70] ss:$8 sps:$4 sm:$0xff]  }
 0x165   : > { %2301 = vmatprep.subr.bf16.mxu0 %v3915_v19  ;;  %2734 = vmatprep.subr.bf16.mxu1 %v3915_v19  ;;  %v3919_v19 = vld [vmem:[%s5405_s1 + $0x104] ss:$8 sps:$4 sm:$0xff]  }
 0x168   : > { %2302 = vmatpush1.bf16.msra.mxu0 %v3916_v23  ;;  %2735 = vmatpush1.bf16.msra.mxu1 %v3916_v23  ;;  %v3920_v23 = vld [vmem:[%s5405_s1 + $0x100] ss:$8 sps:$4 sm:$0xff]  }
 0x169   : > { %2303 = vmatprep.subr.bf16.mxu0 %v3917_v34  ;;  %2736 = vmatprep.subr.bf16.mxu1 %v3917_v34  ;;  %v3921_v34 = vld [vmem:[%s5405_s1 + $0x114] ss:$8 sps:$4 sm:$0xff]  }
 0x16c   : > { %2304 = vmatpush1.bf16.msra.mxu0 %v3918_v20  ;;  %2737 = vmatpush1.bf16.msra.mxu1 %v3918_v20  ;;  %v3924_v20 = vld [vmem:[%s5405_s1 + $0x120] ss:$8 sps:$4 sm:$0xff]  }
 0x16d   : > { %2330 = vmatprep.subr.bf16.mxu0 %v3919_v19  ;;  %2763 = vmatprep.subr.bf16.mxu1 %v3919_v19  ;;  %v3925_v19 = vld [vmem:[%s5405_s1 + $0x134] ss:$8 sps:$4 sm:$0xff]  }
 0x16f   : > { %2322 = vmatmul.mubr.bf16.vlgmr.msra.gmra.mrb[4].mxu0 %v4342_v59  ;;  %2755 = vmatmul.mubr.bf16.vlgmr.msra.gmra.mrb[4].mxu1 %v4345_v60  ;;  %v3922_v59 = vld [vmem:[%s5405_s1 + $0x110] ss:$8 sps:$4 sm:$0xff]   ;;  %v3923_v60 = vld [vmem:[%s5405_s1 + $0x124] ss:$8 sps:$4 sm:$0xff]  }
 0x170   : > { %2331 = vmatpush1.bf16.msra.mxu0 %v3920_v23  ;;  %2764 = vmatpush1.bf16.msra.mxu1 %v3920_v23  ;;  %v3926_v23 = vld [vmem:[%s5405_s1 + $0x130] ss:$8 sps:$4 sm:$0xff]  }
 0x171   : > { %2332 = vmatprep.subr.bf16.mxu0 %v3921_v34  ;;  %2765 = vmatprep.subr.bf16.mxu1 %v3921_v34  ;;  %v3927_v34 = vld [vmem:[%s5405_s1 + $0x144] ss:$8 sps:$4 sm:$0xff]  }
 0x172   : > { %2362 = vmatprep.mubr.bf16.mxu0 %v5537_v25  ;;  %2795 = vmatprep.mubr.bf16.mxu1 %v5537_v25 }
 0x174   : > { %2333 = vmatpush1.bf16.msra.mxu0 %v3922_v59  ;;  %2766 = vmatpush1.bf16.msra.mxu1 %v3922_v59  ;;  %v3928_v59 = vld [vmem:[%s5405_s1 + $0x140] ss:$8 sps:$4 sm:$0xff]  }
 0x175   : > { %2334 = vmatprep.subr.bf16.mxu0 %v3923_v60  ;;  %2767 = vmatprep.subr.bf16.mxu1 %v3923_v60  ;;  %v3929_v60 = vld [vmem:[%s5405_s1 + $0x154] ss:$8 sps:$4 sm:$0xff]  }
 0x178   : > { %2335 = vmatpush1.bf16.msra.mxu0 %v3924_v20  ;;  %2768 = vmatpush1.bf16.msra.mxu1 %v3924_v20  ;;  %v5605_v20 = vld [vmem:[#allocation34_spill] sm:$0xff] }
 0x179   : > { %2336 = vmatprep.subr.bf16.mxu0 %v3925_v19  ;;  %2769 = vmatprep.subr.bf16.mxu1 %v3925_v19 }
 0x17c   : > { %2337 = vmatpush1.bf16.msra.mxu0 %v3926_v23  ;;  %2770 = vmatpush1.bf16.msra.mxu1 %v3926_v23  ;;  %v5606_v23 = vld [vmem:[#allocation35_spill] sm:$0xff] }
 0x17d   : > { %2338 = vmatprep.subr.bf16.mxu0 %v3927_v34  ;;  %2771 = vmatprep.subr.bf16.mxu1 %v3927_v34  ;;  %v5607_v34 = vld [vmem:[#allocation36_spill] sm:$0xff] }
 0x180   : > { %2339 = vmatpush1.bf16.msra.mxu0 %v3928_v59  ;;  %2772 = vmatpush1.bf16.msra.mxu1 %v3928_v59 }
 0x181   : > { %2340 = vmatprep.subr.bf16.mxu0 %v3929_v60  ;;  %2773 = vmatprep.subr.bf16.mxu1 %v3929_v60 }
 0x184   : > { %2341 = vmatpush1.bf16.msra.mxu0 %v4170_v21  ;;  %2774 = vmatpush1.bf16.msra.mxu1 %v4170_v21  ;;  %v5576_v21 = vld [vmem:[#allocation4_spill] sm:$0xff] }
 0x185   : > { %2342 = vmatprep.subr.bf16.mxu0 %v4181_v24  ;;  %2775 = vmatprep.subr.bf16.mxu1 %v4181_v24  ;;  %v5577_v24 = vld [vmem:[#allocation5_spill] sm:$0xff] }
 0x188   : > { %2343 = vmatpush1.bf16.msra.mxu0 %v4189_v26  ;;  %2776 = vmatpush1.bf16.msra.mxu1 %v4189_v26  ;;  %v5578_v26 = vld [vmem:[#allocation6_spill] sm:$0xff] }
 0x189   : > { %2344 = vmatprep.subr.bf16.mxu0 %v4196_v27  ;;  %2777 = vmatprep.subr.bf16.mxu1 %v4196_v27  ;;  %v5579_v27 = vld [vmem:[#allocation7_spill] sm:$0xff] }
 0x18c   : > { %2345 = vmatpush1.bf16.msra.mxu0 %v4204_v29  ;;  %2778 = vmatpush1.bf16.msra.mxu1 %v4204_v29  ;;  %v5580_v29 = vld [vmem:[#allocation8_spill] sm:$0xff] }
 0x18d   : > { %2373 = vmatprep.subr.bf16.mxu0 %v4211_v32  ;;  %2806 = vmatprep.subr.bf16.mxu1 %v4211_v32  ;;  %v5581_v32 = vld [vmem:[#allocation10_spill] sm:$0xff] }
 0x18f   : > { %2363 = vmatmul.mubr.bf16.vlgmr.msra.gmra.mrb[4].mxu0 %v4474_v52  ;;  %2796 = vmatmul.mubr.bf16.vlgmr.msra.gmra.mrb[4].mxu1 %v4605_v46  ;;  %v5601_v46 = vld [vmem:[#allocation30_spill] sm:$0xff] }
 0x190   : > { %2374 = vmatpush1.bf16.msra.mxu0 %v4219_v35  ;;  %2807 = vmatpush1.bf16.msra.mxu1 %v4219_v35  ;;  %v5582_v35 = vld [vmem:[#allocation11_spill] sm:$0xff] }
 0x191   : > { %2375 = vmatprep.subr.bf16.mxu0 %v4226_v36  ;;  %2808 = vmatprep.subr.bf16.mxu1 %v4226_v36  ;;  %v5583_v36 = vld [vmem:[#allocation12_spill] sm:$0xff] }
 0x192   : > { %2405 = vmatprep.mubr.bf16.mxu0 %v5537_v25  ;;  %2838 = vmatprep.mubr.bf16.mxu1 %v5537_v25 }
 0x194   : > { %2376 = vmatpush1.bf16.msra.mxu0 %v4234_v37  ;;  %2809 = vmatpush1.bf16.msra.mxu1 %v4234_v37  ;;  %v5584_v37 = vld [vmem:[#allocation13_spill] sm:$0xff] }
 0x195   : > { %2377 = vmatprep.subr.bf16.mxu0 %v4241_v38  ;;  %2810 = vmatprep.subr.bf16.mxu1 %v4241_v38  ;;  %v5585_v38 = vld [vmem:[#allocation14_spill] sm:$0xff] }
 0x198   : > { %2378 = vmatpush1.bf16.msra.mxu0 %v4250_v39  ;;  %2811 = vmatpush1.bf16.msra.mxu1 %v4250_v39  ;;  %v5586_v39 = vld [vmem:[#allocation15_spill] sm:$0xff] }
 0x199   : > { %2379 = vmatprep.subr.bf16.mxu0 %v4257_v40  ;;  %2812 = vmatprep.subr.bf16.mxu1 %v4257_v40  ;;  %v5587_v40 = vld [vmem:[#allocation16_spill] sm:$0xff] }
 0x19c   : > { %2380 = vmatpush1.bf16.msra.mxu0 %v4264_v41  ;;  %2813 = vmatpush1.bf16.msra.mxu1 %v4264_v41  ;;  %v5588_v41 = vld [vmem:[#allocation17_spill] sm:$0xff] }
 0x19d   : > { %2381 = vmatprep.subr.bf16.mxu0 %v4271_v42  ;;  %2814 = vmatprep.subr.bf16.mxu1 %v4271_v42  ;;  %v5589_v42 = vld [vmem:[#allocation18_spill] sm:$0xff] }
 0x1a0   : > { %2382 = vmatpush1.bf16.msra.mxu0 %v4278_v43  ;;  %2815 = vmatpush1.bf16.msra.mxu1 %v4278_v43  ;;  %v5590_v43 = vld [vmem:[#allocation19_spill] sm:$0xff] }
 0x1a1   : > { %2383 = vmatprep.subr.bf16.mxu0 %v4285_v44  ;;  %2816 = vmatprep.subr.bf16.mxu1 %v4285_v44  ;;  %v5591_v44 = vld [vmem:[#allocation20_spill] sm:$0xff] }
 0x1a4   : > { %2384 = vmatpush1.bf16.msra.mxu0 %v4290_v45  ;;  %2817 = vmatpush1.bf16.msra.mxu1 %v4290_v45  ;;  %v5592_v45 = vld [vmem:[#allocation21_spill] sm:$0xff] }
 0x1a5   : > { %2385 = vmatprep.subr.bf16.mxu0 %v4307_v50  ;;  %2818 = vmatprep.subr.bf16.mxu1 %v4307_v50  ;;  %v5593_v50 = vld [vmem:[#allocation22_spill] sm:$0xff] }
 0x1a8   : > { %2386 = vmatpush1.bf16.msra.mxu0 %v4316_v53  ;;  %2819 = vmatpush1.bf16.msra.mxu1 %v4316_v53  ;;  %v5594_v53 = vld [vmem:[#allocation23_spill] sm:$0xff] }
 0x1a9   : > { %2387 = vmatprep.subr.bf16.mxu0 %v4323_v54  ;;  %2820 = vmatprep.subr.bf16.mxu1 %v4323_v54  ;;  %v3236_v54 = vld [vmem:[%s4002_s4 + $0x10] sm:$0x3] }
 0x1ac   : > { %2388 = vmatpush1.bf16.msra.mxu0 %v4332_v57  ;;  %2821 = vmatpush1.bf16.msra.mxu1 %v4332_v57  ;;  %v5269_v57 = vld [vmem:[%s4002_s4 + $0x16] sm:$0x3] }
 0x1ad   : > { %2416 = vmatprep.subr.bf16.mxu0 %v4339_v58  ;;  %2849 = vmatprep.subr.bf16.mxu1 %v4339_v58  ;;  %v5595_v58 = vld [vmem:[#allocation24_spill] sm:$0xff] }
 0x1af   : > { %2406 = vmatmul.mubr.bf16.vlgmr.msra.gmra.mrb[4].mxu0 %v4733_v6  ;;  %2839 = vmatmul.mubr.bf16.vlgmr.msra.gmra.mrb[4].mxu1 %v4736_v15  ;;  %v5602_v6 = vld [vmem:[#allocation31_spill] sm:$0xff] }
 0x1b0   : > { %2417 = vmatpush1.bf16.msra.mxu0 %v4352_v61  ;;  %2850 = vmatpush1.bf16.msra.mxu1 %v4352_v61 }
 0x1b1   : > { %2418 = vmatprep.subr.bf16.mxu0 %v4359_v62  ;;  %2851 = vmatprep.subr.bf16.mxu1 %v4359_v62 }
 0x1b2   : > { %2448 = vmatprep.mubr.bf16.mxu0 %v5537_v25  ;;  %2881 = vmatprep.mubr.bf16.mxu1 %v5537_v25 }
 0x1b4   : > { %2419 = vmatpush1.bf16.msra.mxu0 %v4368_v63  ;;  %2852 = vmatpush1.bf16.msra.mxu1 %v4368_v63 }
 0x1b5   : > { %2420 = vmatprep.subr.bf16.mxu0 %v4375_v0  ;;  %2853 = vmatprep.subr.bf16.mxu1 %v4375_v0 }
 0x1b8   : > { %2421 = vmatpush1.bf16.msra.mxu0 %v4386_v4  ;;  %2854 = vmatpush1.bf16.msra.mxu1 %v4386_v4 }
 0x1b9   : > { %2422 = vmatprep.subr.bf16.mxu0 %v4393_v5  ;;  %2855 = vmatprep.subr.bf16.mxu1 %v4393_v5  ;;  %v3930_v5 = vld [vmem:[%s4002_s4 + $0xe] sm:$0x3] }
 0x1bc   : > { %2423 = vmatpush1.bf16.msra.mxu0 %v4400_v7  ;;  %2856 = vmatpush1.bf16.msra.mxu1 %v4400_v7  ;;  %v2502_v7 = vcombine.low %v3930_v5, %v3236_v54 }
 0x1bd   : > { %2424 = vmatprep.subr.bf16.mxu0 %v4407_v9  ;;  %2857 = vmatprep.subr.bf16.mxu1 %v4407_v9  ;;  %v3931_v9 = vld [vmem:[%s4002_s4 + $0x14] sm:$0x3] }
 0x1be   : > { %v2509_v52 = vrot.slane %v2502_v7, %v4005_v13  ;;  %v5625_v7 = vld [vmem:[#allocation53_spill] sm:$0xff] }
 0x1c0   : > { %2425 = vmatpush1.bf16.msra.mxu0 %v4414_v14  ;;  %2858 = vmatpush1.bf16.msra.mxu1 %v4414_v14  ;;  %v2561_v14 = vcombine.low %v3931_v9, %v5269_v57  ;;  %v5626_v9 = vld [vmem:[#allocation54_spill] sm:$0xff] }
 0x1c1   : > { %2426 = vmatprep.subr.bf16.mxu0 %v4421_v17  ;;  %2859 = vmatprep.subr.bf16.mxu1 %v4421_v17 }
 0x1c4   : > { %2427 = vmatpush1.bf16.msra.mxu0 %v4428_v18  ;;  %2860 = vmatpush1.bf16.msra.mxu1 %v4428_v18 }
 0x1c5   : > { %2428 = vmatprep.subr.bf16.mxu0 %v4441_v22  ;;  %2861 = vmatprep.subr.bf16.mxu1 %v4441_v22 }
 0x1c8   : > { %2429 = vmatpush1.bf16.msra.mxu0 %v4449_v28  ;;  %2862 = vmatpush1.bf16.msra.mxu1 %v4449_v28  ;;  %v5596_v28 = vld [vmem:[#allocation25_spill] sm:$0xff] }
 0x1c9   : > { %2430 = vmatprep.subr.bf16.mxu0 %v4456_v33  ;;  %2863 = vmatprep.subr.bf16.mxu1 %v4456_v33 }
 0x1cc   : > { %2431 = vmatpush1.bf16.msra.mxu0 %v4464_v47  ;;  %2864 = vmatpush1.bf16.msra.mxu1 %v4464_v47 }
 0x1cd   : > { %2459 = vmatprep.subr.bf16.mxu0 %v4471_v51  ;;  %2892 = vmatprep.subr.bf16.mxu1 %v4471_v51  ;;  %v5597_v51 = vld [vmem:[#allocation26_spill] sm:$0xff] }
 0x1cf   : > { %2449 = vmatmul.mubr.bf16.vlgmr.msra.gmra.mrb[4].mxu0 %v4736_v15  ;;  %2882 = vmatmul.mubr.bf16.vlgmr.msra.gmra.mrb[4].mxu1 %v4860_v49  ;;  %v5603_v15 = vld [vmem:[#allocation32_spill] sm:$0xff] }
 0x1d0   : > { %2460 = vmatpush1.bf16.msra.mxu0 %v4481_v55  ;;  %2893 = vmatpush1.bf16.msra.mxu1 %v4481_v55  ;;  %v2568_v55 = vrot.slane %v2561_v14, %v4005_v13 }
 0x1d1   : > { %2461 = vmatprep.subr.bf16.mxu0 %v4488_v56  ;;  %2894 = vmatprep.subr.bf16.mxu1 %v4488_v56  ;;  %v5598_v56 = vld [vmem:[#allocation27_spill] sm:$0xff] }
 0x1d2   : > { %2491 = vmatprep.mubr.bf16.mxu0 %v5537_v25  ;;  %2924 = vmatprep.mubr.bf16.mxu1 %v5537_v25 }
 0x1d4   : > { %2462 = vmatpush1.bf16.msra.mxu0 %v4497_v1  ;;  %2895 = vmatpush1.bf16.msra.mxu1 %v4497_v1  ;;  %v5599_v1 = vld [vmem:[#allocation28_spill] sm:$0xff] }
 0x1d5   : > { %2463 = vmatprep.subr.bf16.mxu0 %v4504_v3  ;;  %2896 = vmatprep.subr.bf16.mxu1 %v4504_v3  ;;  %v2516_v3 = vrot.slane %v2509_v52, %v4005_v13 }
 0x1d8   : > { %2464 = vmatpush1.bf16.msra.mxu0 %v4517_v11  ;;  %2897 = vmatpush1.bf16.msra.mxu1 %v4517_v11  ;;  %v2575_v11 = vrot.slane %v2568_v55, %v4005_v13  ;;  %v3942_v55 = vmov 1983009808  }
 0x1d9   : > { %2465 = vmatprep.subr.bf16.mxu0 %v4524_v48  ;;  %2898 = vmatprep.subr.bf16.mxu1 %v4524_v48  ;;  %v5600_v48 = vld [vmem:[#allocation29_spill] sm:$0xff] }
 0x1dc   : > { %2466 = vmatpush1.bf16.msra.mxu0 %v5576_v21  ;;  %2899 = vmatpush1.bf16.msra.mxu1 %v5576_v21  ;;  %v5608_v21 = vld [vmem:[#allocation37_spill] sm:$0xff] }
 0x1dd   : > { %2467 = vmatprep.subr.bf16.mxu0 %v5577_v24  ;;  %2900 = vmatprep.subr.bf16.mxu1 %v5577_v24  ;;  %v5609_v24 = vld [vmem:[#allocation38_spill] sm:$0xff] }
 0x1e0   : > { %2468 = vmatpush1.bf16.msra.mxu0 %v5578_v26  ;;  %2901 = vmatpush1.bf16.msra.mxu1 %v5578_v26 }
 0x1e1   : > { %2469 = vmatprep.subr.bf16.mxu0 %v5579_v27  ;;  %2902 = vmatprep.subr.bf16.mxu1 %v5579_v27  ;;  %v5610_v27 = vld [vmem:[#allocation39_spill] sm:$0xff] }
 0x1e4   : > { %2470 = vmatpush1.bf16.msra.mxu0 %v5580_v29  ;;  %2903 = vmatpush1.bf16.msra.mxu1 %v5580_v29  ;;  %v5611_v29 = vld [vmem:[#allocation3_spill] sm:$0xff] }
 0x1e5   : > { %2471 = vmatprep.subr.bf16.mxu0 %v5581_v32  ;;  %2904 = vmatprep.subr.bf16.mxu1 %v5581_v32 }
 0x1e8   : > { %2472 = vmatpush1.bf16.msra.mxu0 %v5582_v35  ;;  %2905 = vmatpush1.bf16.msra.mxu1 %v5582_v35  ;;  %v5612_v35 = vld [vmem:[#allocation40_spill] sm:$0xff] }
 0x1e9   : > { %2473 = vmatprep.subr.bf16.mxu0 %v5583_v36  ;;  %2906 = vmatprep.subr.bf16.mxu1 %v5583_v36 }
 0x1ec   : > { %2474 = vmatpush1.bf16.msra.mxu0 %v5584_v37  ;;  %2907 = vmatpush1.bf16.msra.mxu1 %v5584_v37  ;;  %v5614_v37 = vld [vmem:[#allocation42_spill] sm:$0xff] }
 0x1ed   : > { %2518 = vmatprep.subr.bf16.mxu0 %v5585_v38  ;;  %2935 = vmatprep.subr.bf16.mxu1 %v5585_v38  ;;  %v5615_v38 = vld [vmem:[#allocation43_spill] sm:$0xff] }
 0x1ef   : > { %2492 = vmatmul.mubr.bf16.vlgmr.msra.gmra.mrb[4].mxu0 %v4860_v49  ;;  %2925 = vmatmul.mubr.bf16.vlgmr.msra.gmra.mrb[4].mxu1 %v4980_v10  ;;  %v387_v49 = vrot.slane %v3236_v54, %v4005_v13  ;;  %v5604_v10 = vld [vmem:[#allocation33_spill] sm:$0xff]  ;;  %v5622_v54 = vld [vmem:[#allocation50_spill] sm:$0xff] }
 0x1f0   : > { %2519 = vmatpush1.bf16.msra.mxu0 %v5586_v39  ;;  %2936 = vmatpush1.bf16.msra.mxu1 %v5586_v39 }
 0x1f1   : > { %2520 = vmatprep.subr.bf16.mxu0 %v5587_v40  ;;  %2937 = vmatprep.subr.bf16.mxu1 %v5587_v40  ;;  %v388_v19 = vcombine.high %v387_v49, %v387_v49  ;;  %v390_v59 = vshrl.u32 %v387_v49, 16  ;;  %v5616_v40 = vld [vmem:[#allocation44_spill] sm:$0xff] }
 0x1f2   : > { %2550 = vmatprep.mubr.bf16.mxu0 %v5537_v25  ;;  %2967 = vmatprep.mubr.bf16.mxu1 %v5537_v25 }
 0x1f3   : > { %v395_v60 = vshll.u32 %v388_v19, 16 }
 0x1f4   : > { %2521 = vmatpush1.bf16.msra.mxu0 %v5588_v41  ;;  %2938 = vmatpush1.bf16.msra.mxu1 %v5588_v41  ;;  %v5617_v41 = vld [vmem:[#allocation45_spill] sm:$0xff] }
 0x1f5   : > { %2522 = vmatprep.subr.bf16.mxu0 %v5589_v42  ;;  %2939 = vmatprep.subr.bf16.mxu1 %v5589_v42  ;;  %v397_v26 = vsel %vm4038_vm14, %v390_v59, %v395_v60  ;;  %v5618_v42 = vld [vmem:[#allocation46_spill] sm:$0xff] }
 0x1f6   : > { %v2620_v32 = vcombine.low %v5611_v29, %v397_v26 }
 0x1f8   : > { %2523 = vmatpush1.bf16.msra.mxu0 %v5590_v43  ;;  %2940 = vmatpush1.bf16.msra.mxu1 %v5590_v43  ;;  %v2627_v36 = vrot.slane %v2620_v32, %v4005_v13  ;;  %v5619_v43 = vld [vmem:[#allocation47_spill] sm:$0xff] }
 0x1f9   : > { %2524 = vmatprep.subr.bf16.mxu0 %v5591_v44  ;;  %2941 = vmatprep.subr.bf16.mxu1 %v5591_v44  ;;  %v405_v44 = vrot.slane %v5269_v57, %v4005_v13  ;;  %v5624_v57 = vld [vmem:[#allocation52_spill] sm:$0xff] }
 0x1fa   : > { %v2634_v39 = vrot.slane %v2627_v36, %v4005_v13 }
 0x1fc   : > { %2525 = vmatpush1.bf16.msra.mxu0 %v5592_v45  ;;  %2942 = vmatpush1.bf16.msra.mxu1 %v5592_v45  ;;  %v5620_v45 = vld [vmem:[#allocation48_spill] sm:$0xff] }
 0x1fd   : > { %2526 = vmatprep.subr.bf16.mxu0 %v5593_v50  ;;  %2943 = vmatprep.subr.bf16.mxu1 %v5593_v50  ;;  %v5621_v50 = vld [vmem:[#allocation49_spill] sm:$0xff] }
 0x200   : > { %2527 = vmatpush1.bf16.msra.mxu0 %v5594_v53  ;;  %2944 = vmatpush1.bf16.msra.mxu1 %v5594_v53  ;;  %v406_v53 = vcombine.high %v405_v44, %v405_v44 }
 0x201   : > { %2528 = vmatprep.subr.bf16.mxu0 %v5595_v58  ;;  %2945 = vmatprep.subr.bf16.mxu1 %v5595_v58  ;;  %v5623_v58 = vld [vmem:[#allocation51_spill] sm:$0xff] }
 0x202   : > { %v5273_v61 = vpop.f32.mrb[0].mxu0  ;;  %v5275_v62 = vpop.f32.mrb[0].mxu1  ;;  %v413_v5 = vshll.u32 %v406_v53, 16 }
 0x203   : > { %v2246_v63 = vmax.f32 %v5273_v61, %v5275_v62  ;;  %v5279_v0 = vpop.f32.mrb[1].mxu0  ;;  %v5281_v4 = vpop.f32.mrb[1].mxu1 }
 0x204   : > { %v2247_v17 = vmax.f32 %v5279_v0, %v5281_v4  ;;  %v1810_v18 = vpop.f32.mrb[2].mxu0  ;;  %v2241_v22 = vpop.f32.mrb[2].mxu1  ;;  %2529 = vmatpush1.bf16.msra.mxu0 %v5596_v28  ;;  %2946 = vmatpush1.bf16.msra.mxu1 %v5596_v28 }
 0x205   : > { %v1811_v33 = vpop.f32.mrb[3].mxu0  ;;  %v2242_v47 = vpop.f32.mrb[3].mxu1  ;;  %2530 = vmatprep.subr.bf16.mxu0 %v5597_v51  ;;  %2947 = vmatprep.subr.bf16.mxu1 %v5597_v51  ;;  %v5627_v18 = vld [vmem:[#allocation9_spill] sm:$0xff] }
 0x206   : > { %v5629_v33 = vld [vmem:[#allocation56_spill] sm:$0xff]  ;;  %v3082_v47 = vld [vmem:[%s5406_s2] sm:$0x3] }
 0x208   : > { %2531 = vmatpush1.bf16.msra.mxu0 %v5598_v56  ;;  %2948 = vmatpush1.bf16.msra.mxu1 %v5598_v56  ;;  %v3102_v56 = vunpack.c.l.s4 %v3942_v55 }
 0x209   : > { %2532 = vmatprep.subr.bf16.mxu0 %v5599_v1  ;;  %2949 = vmatprep.subr.bf16.mxu1 %v5599_v1 }
 0x20c   : > { %2533 = vmatpush1.bf16.msra.mxu0 %v5600_v48  ;;  %2950 = vmatpush1.bf16.msra.mxu1 %v5600_v48 }
 0x20d   : > { %2577 = vmatprep.subr.bf16.mxu0 %v5601_v46  ;;  %2978 = vmatprep.subr.bf16.mxu1 %v5601_v46 }
 0x20f   : > { %2551 = vmatmul.mubr.bf16.vlgmr.msra.gmra.mrb[4].mxu0 %v2516_v3  ;;  %2968 = vmatmul.mubr.bf16.vlgmr.msra.gmra.mrb[4].mxu1 %v2575_v11 }
 0x210   : > { %2578 = vmatpush1.bf16.msra.mxu0 %v5602_v6  ;;  %2979 = vmatpush1.bf16.msra.mxu1 %v5602_v6 }
 0x211   : > { %2579 = vmatprep.subr.bf16.mxu0 %v5603_v15  ;;  %2980 = vmatprep.subr.bf16.mxu1 %v5603_v15 }
 0x212   : > { %2609 = vmatprep.mubr.bf16.mxu0 %v5537_v25  ;;  %3010 = vmatprep.mubr.bf16.mxu1 %v5537_v25 }
 0x214   : > { %2580 = vmatpush1.bf16.msra.mxu0 %v5604_v10  ;;  %2981 = vmatpush1.bf16.msra.mxu1 %v5604_v10 }
 0x215   : > { %2581 = vmatprep.subr.bf16.mxu0 %v5605_v20  ;;  %2982 = vmatprep.subr.bf16.mxu1 %v5605_v20 }
 0x218   : > { %2582 = vmatpush1.bf16.msra.mxu0 %v5606_v23  ;;  %2983 = vmatpush1.bf16.msra.mxu1 %v5606_v23 }
 0x219   : > { %2583 = vmatprep.subr.bf16.mxu0 %v5607_v34  ;;  %2984 = vmatprep.subr.bf16.mxu1 %v5607_v34  ;;  %v3103_v34 = vunpack.c.0.s8 %v3102_v56 }
 0x21c   : > { %2584 = vmatpush1.bf16.msra.mxu0 %v4790_v2  ;;  %2985 = vmatpush1.bf16.msra.mxu1 %v4790_v2  ;;  %v5613_v2 = vld [vmem:[#allocation41_spill] sm:$0xff] }
 0x21d   : > { %2585 = vmatprep.subr.bf16.mxu0 %v5608_v21  ;;  %2986 = vmatprep.subr.bf16.mxu1 %v5608_v21 }
 0x220   : > { %2586 = vmatpush1.bf16.msra.mxu0 %v5609_v24  ;;  %2987 = vmatpush1.bf16.msra.mxu1 %v5609_v24 }
 0x221   : > { %2587 = vmatprep.subr.bf16.mxu0 %v5610_v27  ;;  %2988 = vmatprep.subr.bf16.mxu1 %v5610_v27 }
 0x224   : > { %2588 = vmatpush1.bf16.msra.mxu0 %v5612_v35  ;;  %2989 = vmatpush1.bf16.msra.mxu1 %v5612_v35 }
 0x225   : > { %2589 = vmatprep.subr.bf16.mxu0 %v5613_v2  ;;  %2990 = vmatprep.subr.bf16.mxu1 %v5613_v2 }
 0x228   : > { %2590 = vmatpush1.bf16.msra.mxu0 %v5614_v37  ;;  %2991 = vmatpush1.bf16.msra.mxu1 %v5614_v37 }
 0x229   : > { %2591 = vmatprep.subr.bf16.mxu0 %v5615_v38  ;;  %2992 = vmatprep.subr.bf16.mxu1 %v5615_v38 }
 0x22c   : > { %2592 = vmatpush1.bf16.msra.mxu0 %v5616_v40  ;;  %2993 = vmatpush1.bf16.msra.mxu1 %v5616_v40 }
 0x22d   : > { %2636 = vmatprep.subr.bf16.mxu0 %v5617_v41  ;;  %3037 = vmatprep.subr.bf16.mxu1 %v5617_v41 }
 0x22f   : > { %2610 = vmatmul.mubr.bf16.vlgmr.msra.gmra.mrb[4].mxu0 %v2575_v11  ;;  %3011 = vmatmul.mubr.bf16.vlgmr.msra.gmra.mrb[4].mxu1 %v2634_v39 }
 0x230   : > { %2637 = vmatpush1.bf16.msra.mxu0 %v5618_v42  ;;  %3038 = vmatpush1.bf16.msra.mxu1 %v5618_v42 }
 0x231   : > { %2638 = vmatprep.subr.bf16.mxu0 %v5619_v43  ;;  %3039 = vmatprep.subr.bf16.mxu1 %v5619_v43 }
 0x232   : > { %2668 = vmatprep.mubr.bf16.mxu0 %v5537_v25  ;;  %3069 = vmatprep.mubr.bf16.mxu1 %v5537_v25  ;;  %v408_v25 = vshrl.u32 %v405_v44, 16 }
 0x234   : > { %2639 = vmatpush1.bf16.msra.mxu0 %v5620_v45  ;;  %3040 = vmatpush1.bf16.msra.mxu1 %v5620_v45  ;;  %v415_v14 = vsel %vm4038_vm14, %v408_v25, %v413_v5 }
 0x235   : > { %2640 = vmatprep.subr.bf16.mxu0 %v5621_v50  ;;  %3041 = vmatprep.subr.bf16.mxu1 %v5621_v50  ;;  %v3021_v22 = vcombine.low %v5627_v18, %v415_v14 }
 0x237   : > { %v3028_v28 = vrot.slane %v3021_v22, %v4005_v13 }
 0x238   : > { %2641 = vmatpush1.bf16.msra.mxu0 %v5622_v54  ;;  %3042 = vmatpush1.bf16.msra.mxu1 %v5622_v54 }
 0x239   : > { %2642 = vmatprep.subr.bf16.mxu0 %v5623_v58  ;;  %3043 = vmatprep.subr.bf16.mxu1 %v5623_v58 }
 0x23c   : > { %2643 = vmatpush1.bf16.msra.mxu0 %v5624_v57  ;;  %3044 = vmatpush1.bf16.msra.mxu1 %v5624_v57 }
 0x23d   : > { %2644 = vmatprep.subr.bf16.mxu0 %v5625_v7  ;;  %3045 = vmatprep.subr.bf16.mxu1 %v5625_v7 }
 0x240   : > { %2645 = vmatpush1.bf16.msra.mxu0 %v5626_v9  ;;  %3046 = vmatpush1.bf16.msra.mxu1 %v5626_v9 }
 0x241   : > { %2646 = vmatprep.subr.bf16.mxu0 %v4936_v16  ;;  %3047 = vmatprep.subr.bf16.mxu1 %v4936_v16  ;;  %v3035_v16 = vrot.slane %v3028_v28, %v4005_v13 }
 0x244   : > { %2647 = vmatpush1.bf16.msra.mxu0 %v4943_v12  ;;  %3048 = vmatpush1.bf16.msra.mxu1 %v4943_v12  ;;  %v5630_v12 = vld [vmem:[#allocation2_spill] sm:$0xff] }
 0x245   : > { %2648 = vmatprep.subr.bf16.mxu0 %v4952_v8  ;;  %3049 = vmatprep.subr.bf16.mxu1 %v4952_v8  ;;  %v3086_v8 = vsub.s32 0, %v5630_v12 }
 0x247   : > { %v3087_v3 = vrot.slane %v3082_v47, %v3086_v8 }
 0x248   : > { %2649 = vmatpush1.bf16.msra.mxu0 %v4960_v30  ;;  %3050 = vmatpush1.bf16.msra.mxu1 %v4960_v30  ;;  %v3090_v30 = vsub.s32 1, %v5630_v12 }
 0x249   : > { %2650 = vmatprep.subr.bf16.mxu0 %v5628_v31  ;;  %3051 = vmatprep.subr.bf16.mxu1 %v5628_v31 }
 0x24a   : > { %v3091_v6 = vrot.slane %v3082_v47, %v3090_v30 }
 0x24c   : > { %2651 = vmatpush1.bf16.msra.mxu0 %v5629_v33  ;;  %3052 = vmatpush1.bf16.msra.mxu1 %v5629_v33 }
 0x24f   : > { %2669 = vmatmul.mubr.bf16.vlgmr.msra.gmra.mrb[4].mxu0 %v2634_v39  ;;  %3070 = vmatmul.mubr.bf16.vlgmr.msra.gmra.mrb[4].mxu1 %v3035_v16 }
 0x322   : > { %v2670_v51 = vpop.f32.mrb[4].mxu0  ;;  %v3071_v52 = vpop.f32.mrb[4].mxu1 }
 0x323   : > { %v2679_v1 = vmax.f32 %v2246_v63, %v2670_v51  ;;  %v2672_v11 = vpop.f32.mrb[5].mxu0  ;;  %v3073_v48 = vpop.f32.mrb[5].mxu1  ;;  %v3106_v63 = vsub.s32 %v3103_v34, %v5630_v12 }
 0x324   : > { %v2680_v46 = vmax.f32 %v2247_v17, %v2672_v11  ;;  %v2674_v15 = vpop.f32.mrb[6].mxu0  ;;  %v3075_v49 = vpop.f32.mrb[6].mxu1 }
 0x325   : > { %v3080_v10 = vmax.f32 %v2679_v1, %v3071_v52  ;;  %v2675_v20 = vpop.f32.mrb[7].mxu0  ;;  %v3076_v19 = vpop.f32.mrb[7].mxu1 }
 0x326   : > { %v3081_v23 = vmax.f32 %v2680_v46, %v3073_v48 }
 0x327   : > { %v3094_v59 = vadd.f32 %v3087_v3, %v3080_v10 }
 0x328   : > { %v3095_v60 = vadd.f32 %v3091_v6, %v3081_v23 }
 0x329   : > { %v3096_v61 = vmax.f32 %v3094_v59, 0.0 }
 0x32a   : > { %v3097_v62 = vmax.f32 %v3095_v60, 0.0 }
 0x32c   : > { %v3100_v21 = vcombine.low %v3096_v61, %v3097_v62 }
 0x32e   : > { %v3107_v24 = vrot.slane %v3100_v21, %v3106_v63 }
 0x330   : > { %v3108_v26 = vcombine.high %v3107_v24, %v3107_v24  ;;  %v3115_v0 = vrot.slane %v3107_v24, %v3106_v63 }
 0x332   : > { %v3116_v4 = vcombine.high %v3115_v0, %v3115_v0  ;;  %v3123_v17 = vrot.slane %v3108_v26, %v3106_v63 }
 0x334   : > { %v3124_v27 = vcombine.high %v3123_v17, %v3123_v17  ;;  %v3524_v29 = vpack.c.bf16 %v3116_v4, %v3115_v0 }
 0x336   : > { %v3144_v32 = vrot.slane %v3524_v29, %v4005_v13  ;;  %v3525_v35 = vpack.c.bf16 %v3124_v27, %v3123_v17 }
 0x338   : > { %v3159_v2 = vrot.slane %v3525_v35, %v4005_v13  ;;  %3526 = vst.sshfl [vmem:[%s168_s9] sm:$0x5 pattern:$0x73625140] %v3144_v32 }
 0x33a   : > { %3527 = vst.sshfl [vmem:[%s168_s9 + $0x2] sm:$0x5 pattern:$0x73625140] %v3159_v2 }
 0x33b PF: > { %s13_s12 = sadd.s32 1, %s3938_s12  }
 0x33c   : > { %p10_p4 = scmp.ge.s32.totalorder %s13_s12, 4  }
 0x33e   :  { %12 = sbr.rel (!%p10_p4) target bundleno = 1 (0x1), region = 73 }

</bundles_post_ra>
